<compile_context>
chip_gen: v5e
topology: v5e:2x2
jax: 0.10.0
libtpu: 0.0.40
codegen_flags: <defaults>
</compile_context>

<pallas_src>
import functools

import jax
import jax.numpy as jnp
import numpy as np
from jax import lax
from jax.experimental import pallas as pl
from jax.experimental.pallas import tpu as pltpu


def _basic_block_kernel(x_ref, w1_ref, b1_ref, w2_ref, b2_ref,
                        out_ref, pad_scr, *, H, W, Cp, bb):
    """Fused conv3x3 -> bn -> relu -> conv3x3 -> bn -> +identity -> relu.

    x_ref   : (bb, H+2, W+2, Cp)  bf16, spatially pre-padded, channel-padded
    w*_ref  : (3, 3*Cp, Cp)       bf16, [dy, dx*Cp + ci, co], BN scale folded in
    b*_ref  : (1, Cp)             f32 folded BN bias
    out_ref : (bb, H, W, Cp)      output block (lane-dense, Cp = 128k)
    pad_scr : (bb, H+2, W+2, Cp)  bf16 scratch holding padded conv1 output
    """
    M = bb * H * W
    K3 = 3 * Cp

    def dx_stack(a):
        # a: (bb, R, W+2, Cp) -> (bb, R, W, 3*Cp) with
        # result[b, r, w, dx*Cp + c] == a[b, r, w + dx, c]
        return jnp.concatenate(
            [a[:, :, 0:W, :], a[:, :, 1:W + 1, :], a[:, :, 2:W + 2, :]],
            axis=-1)

    def conv3x3(cat, w_ref):
        # cat: (bb, H+2, W, 3*Cp) bf16 ; one matmul per dy, f32 accumulation.
        acc = jnp.dot(cat[:, 0:H].reshape(M, K3), w_ref[0],
                      preferred_element_type=jnp.float32)
        for dy in (1, 2):
            acc = acc + jnp.dot(cat[:, dy:dy + H].reshape(M, K3), w_ref[dy],
                                preferred_element_type=jnp.float32)
        return acc                                      # (M, Cp) f32

    x = x_ref[...]                                      # (bb, H+2, W+2, Cp) bf16
    xcat = dx_stack(x)                                  # (bb, H+2, W, 3*Cp)

    # ---- conv1 (BN scale pre-folded into w1) + bias + relu, all f32 ----
    out1 = jnp.maximum(conv3x3(xcat, w1_ref) + b1_ref[...], 0.0)

    # ---- stash conv1 output (bf16) into padded scratch; interior is fully
    #      overwritten, so only the 1-pixel border needs (re)zeroing. ----
    zrow = jnp.zeros((bb, 1, W + 2, Cp), pad_scr.dtype)
    zcol = jnp.zeros((bb, H, 1, Cp), pad_scr.dtype)
    pad_scr[:, 0:1, :, :] = zrow
    pad_scr[:, H + 1:H + 2, :, :] = zrow
    pad_scr[:, 1:H + 1, 0:1, :] = zcol
    pad_scr[:, 1:H + 1, W + 1:W + 2, :] = zcol
    pad_scr[:, 1:H + 1, 1:W + 1, :] = (
        out1.reshape(bb, H, W, Cp).astype(pad_scr.dtype))

    ycat = dx_stack(pad_scr[...])                       # (bb, H+2, W, 3*Cp)

    # ---- conv2 (BN scale pre-folded into w2) + bias ----
    out2 = conv3x3(ycat, w2_ref) + b2_ref[...]

    # ---- residual add (identity = original x = center dx-tap of xcat) + relu
    identity = xcat[:, 1:H + 1, :, Cp:2 * Cp].reshape(M, Cp).astype(jnp.float32)
    out = jnp.maximum(out2 + identity, 0.0)

    out_ref[...] = out.reshape(bb, H, W, Cp).astype(out_ref.dtype)


def basic_block_pallas(x_nchw, w1_oihw, gamma1, beta1, w2_oihw, gamma2, beta2,
                       eps=1e-5, block_batch=None):
    """BasicBlock forward (stride=1, downsample=None) with a Pallas TPU kernel."""
    N, Cin, H, W = x_nchw.shape
    Cout = w1_oihw.shape[0]
    assert Cin == Cout, "stride=1 / downsample=None requires inplanes == planes"
    assert w2_oihw.shape == (Cout, Cout, 3, 3)

    # Round channels up to a full 128-lane vreg width -> lane-dense everything.
    Cp = max(128, ((Cout + 127) // 128) * 128)

    # Batch block: amortize per-grid-step overhead, keep VMEM modest.
    if block_batch is None:
        budget = 8 * 1024 * 1024                   # rough per-step VMEM budget
        per_img = 10 * (H + 2) * (W + 2) * Cp * 4  # crude all-buffers estimate
        bb = 1
        for cand in (8, 4, 2, 1):
            if N % cand == 0 and cand * per_img <= budget:
                bb = cand
                break
    else:
        bb = block_batch
    assert N % bb == 0

    # ---- input: NCHW -> NHWC, pad channels to Cp, spatial zero-pad 1, bf16 ----
    x_nhwc = jnp.transpose(x_nchw, (0, 2, 3, 1))
    x_pad = jnp.pad(x_nhwc, ((0, 0), (1, 1), (1, 1), (0, Cp - Cin)))
    x_pad = x_pad.astype(jnp.bfloat16)

    # ---- weights: fold BN scale (per output channel) into the conv weights,
    #      OIHW -> HWIO, pad I/O to Cp, stack dx taps: (3, 3*Cp, Cp) ----
    def prep_w(w, gamma):
        s = (gamma / jnp.sqrt(1.0 + eps)).astype(jnp.float32)       # (Cout,)
        w = w.astype(jnp.float32) * s[:, None, None, None]          # scale O axis
        w = jnp.transpose(w, (2, 3, 1, 0))                          # (3, 3, Ci, Co)
        w = jnp.pad(w, ((0, 0), (0, 0), (0, Cp - Cin), (0, Cp - Cout)))
        return w.reshape(3, 3 * Cp, Cp).astype(jnp.bfloat16)        # [dy, dx*Cp+ci, co]

    w1 = prep_w(w1_oihw, gamma1)
    w2 = prep_w(w2_oihw, gamma2)

    # ---- BN bias (inference: running_mean=0 -> bias is just beta) ----
    def prep_b(beta):
        return jnp.pad(beta.astype(jnp.float32), (0, Cp - Cout)).reshape(1, Cp)

    b1 = prep_b(beta1)
    b2 = prep_b(beta2)

    kernel = functools.partial(_basic_block_kernel, H=H, W=W, Cp=Cp, bb=bb)

    out = pl.pallas_call(
        kernel,
        out_shape=jax.ShapeDtypeStruct((N, H, W, Cp), x_nchw.dtype),
        grid_spec=pltpu.PrefetchScalarGridSpec(
            num_scalar_prefetch=0,
            grid=(N // bb,),
            in_specs=[
                pl.BlockSpec((bb, H + 2, W + 2, Cp), lambda n: (n, 0, 0, 0)),
                pl.BlockSpec((3, 3 * Cp, Cp), lambda n: (0, 0, 0)),
                pl.BlockSpec((1, Cp), lambda n: (0, 0)),
                pl.BlockSpec((3, 3 * Cp, Cp), lambda n: (0, 0, 0)),
                pl.BlockSpec((1, Cp), lambda n: (0, 0)),
            ],
            out_specs=pl.BlockSpec((bb, H, W, Cp), lambda n: (n, 0, 0, 0)),
            scratch_shapes=[pltpu.VMEM((bb, H + 2, W + 2, Cp), jnp.bfloat16)],
        ),
        compiler_params=pltpu.CompilerParams(
            dimension_semantics=("parallel",)),
    )(x_pad, w1, b1, w2, b2)

    # drop channel padding, NHWC -> NCHW
    return jnp.transpose(out[..., :Cout], (0, 3, 1, 2))


def basic_block_reference(x, w1, gamma1, beta1, w2, gamma2, beta2,
                          eps=1e-5, mxu_dtype=None):
    """Pure-JAX reference mirroring the PyTorch BasicBlock (eval-mode BN).

    With mxu_dtype=jnp.bfloat16 it mirrors the kernel's precision policy
    exactly: BN scale folded into the weights before the bf16 cast, bf16 conv
    operands, f32 accumulation / bias / relu / residual math.
    """
    dn = ("NCHW", "OIHW", "NCHW")
    s1 = gamma1 / jnp.sqrt(1.0 + eps)
    s2 = gamma2 / jnp.sqrt(1.0 + eps)

    def conv_bn(a, w, s):
        if mxu_dtype is None:
            o = lax.conv_general_dilated(a, w, (1, 1), ((1, 1), (1, 1)),
                                         dimension_numbers=dn,
                                         preferred_element_type=jnp.float32)
            return o * s[None, :, None, None]
        wf = (w * s[:, None, None, None]).astype(mxu_dtype)
        return lax.conv_general_dilated(a.astype(mxu_dtype), wf, (1, 1),
                                        ((1, 1), (1, 1)),
                                        dimension_numbers=dn,
                                        preferred_element_type=jnp.float32)

    if mxu_dtype is None:
        xin = x
    else:
        xin = x.astype(mxu_dtype).astype(jnp.float32)   # kernel sees bf16 x

    out = conv_bn(xin, w1, s1) + beta1[None, :, None, None]
    out = jnp.maximum(out, 0.0)
    out = conv_bn(out, w2, s2) + beta2[None, :, None, None]
    out = jnp.maximum(out + xin, 0.0)
    return out


if __name__ == "__main__":
    # Shapes consistent with BasicBlock(inplanes=8, planes=8, stride=1).
    N, C, H, W = 2, 8, 16, 16

    key = jax.random.PRNGKey(0)
    kx, kw1, kw2, kg1, kb1, kg2, kb2 = jax.random.split(key, 7)

    x = jax.random.normal(kx, (N, C, H, W), dtype=jnp.float32)
    w1 = jax.random.normal(kw1, (C, C, 3, 3), dtype=jnp.float32) * 0.1   # OIHW
    w2 = jax.random.normal(kw2, (C, C, 3, 3), dtype=jnp.float32) * 0.1   # OIHW
    gamma1 = 1.0 + 0.1 * jax.random.normal(kg1, (C,), dtype=jnp.float32)
    beta1 = 0.1 * jax.random.normal(kb1, (C,), dtype=jnp.float32)
    gamma2 = 1.0 + 0.1 * jax.random.normal(kg2, (C,), dtype=jnp.float32)
    beta2 = 0.1 * jax.random.normal(kb2, (C,), dtype=jnp.float32)

    out = jax.block_until_ready(
        basic_block_pallas(x, w1, gamma1, beta1, w2, gamma2, beta2))
    out_np = np.asarray(out)

    # 1) precision-matched reference (folded-scale bf16 weights, f32 accum).
    ref_mixed = jax.block_until_ready(
        basic_block_reference(x, w1, gamma1, beta1, w2, gamma2, beta2,
                              mxu_dtype=jnp.bfloat16))
    np.testing.assert_allclose(out_np, np.asarray(ref_mixed),
                               rtol=5e-3, atol=5e-3)

    # 2) full-f32 reference; tolerance reflects bf16 MXU operands in the kernel.
    ref_f32 = jax.block_until_ready(
        basic_block_reference(x, w1, gamma1, beta1, w2, gamma2, beta2))
    np.testing.assert_allclose(out_np, np.asarray(ref_f32),
                               rtol=5e-2, atol=5e-2)

    print("KERNEL_OK")
</pallas_src>

<mosaic_0001>
module attributes {stable_mosaic.version = 11 : i64} {
  func.func @_basic_block_kernel(%arg0: i32, %arg1: memref<2x18x18x128xbf16, #tpu.memory_space<vmem>>, %arg2: memref<3x384x128xbf16, #tpu.memory_space<vmem>>, %arg3: memref<1x128xf32, #tpu.memory_space<vmem>>, %arg4: memref<3x384x128xbf16, #tpu.memory_space<vmem>>, %arg5: memref<1x128xf32, #tpu.memory_space<vmem>>, %arg6: memref<2x16x16x128xf32, #tpu.memory_space<vmem>>, %arg7: memref<2x18x18x128xbf16, #tpu.memory_space<vmem>>) attributes {dimension_semantics = [#tpu.dimension_semantics<parallel>], iteration_bounds = array<i64: 1>, scalar_prefetch = 0 : i64, scratch_operands = 1 : i64, tpu.core_type = #tpu.core_type<tc>, window_params = [{transform_indices = @transform_0, window_bounds = array<i64: 2, 18, 18, 128>}, {pipeline_mode = #tpu.pipeline_mode<synchronous>, transform_indices = @transform_1, window_bounds = array<i64: 3, 384, 128>}, {pipeline_mode = #tpu.pipeline_mode<synchronous>, transform_indices = @transform_2, window_bounds = array<i64: 1, 128>}, {pipeline_mode = #tpu.pipeline_mode<synchronous>, transform_indices = @transform_3, window_bounds = array<i64: 3, 384, 128>}, {pipeline_mode = #tpu.pipeline_mode<synchronous>, transform_indices = @transform_4, window_bounds = array<i64: 1, 128>}, {transform_indices = @transform_5, window_bounds = array<i64: 2, 16, 16, 128>}]} {
    %c0 = arith.constant 0 : index
    %c0_0 = arith.constant 0 : index
    %c0_1 = arith.constant 0 : index
    %c0_2 = arith.constant 0 : index
    %0 = vector.load %arg1[%c0, %c0_0, %c0_1, %c0_2] : memref<2x18x18x128xbf16, #tpu.memory_space<vmem>>, vector<2x18x18x128xbf16>
    %1 = vector.extract_strided_slice %0 {offsets = [0, 0, 0, 0], sizes = [2, 18, 16, 128], strides = [1, 1, 1, 1]} : vector<2x18x18x128xbf16> to vector<2x18x16x128xbf16>
    %2 = vector.extract_strided_slice %0 {offsets = [0, 0, 1, 0], sizes = [2, 18, 16, 128], strides = [1, 1, 1, 1]} : vector<2x18x18x128xbf16> to vector<2x18x16x128xbf16>
    %3 = vector.extract_strided_slice %0 {offsets = [0, 0, 2, 0], sizes = [2, 18, 16, 128], strides = [1, 1, 1, 1]} : vector<2x18x18x128xbf16> to vector<2x18x16x128xbf16>
    %4 = tpu.concatenate %1, %2, %3 in 3 : vector<2x18x16x128xbf16>, vector<2x18x16x128xbf16>, vector<2x18x16x128xbf16> -> vector<2x18x16x384xbf16>
    %5 = vector.extract_strided_slice %4 {offsets = [0, 0, 0, 0], sizes = [2, 16, 16, 384], strides = [1, 1, 1, 1]} : vector<2x18x16x384xbf16> to vector<2x16x16x384xbf16>
    %6 = vector.shape_cast %5 : vector<2x16x16x384xbf16> to vector<512x384xbf16>
    %c0_3 = arith.constant 0 : index
    %c0_4 = arith.constant 0 : index
    %c0_5 = arith.constant 0 : index
    %7 = vector.load %arg2[%c0_3, %c0_4, %c0_5] : memref<3x384x128xbf16, #tpu.memory_space<vmem>>, vector<1x384x128xbf16>
    %8 = vector.shape_cast %7 : vector<1x384x128xbf16> to vector<384x128xbf16>
    %cst = arith.constant dense<0.000000e+00> : vector<512x128xf32>
    %9 = tpu.matmul %6, %8, %cst {dimension_numbers = #tpu.dot_dimension_numbers<[1], [0], [0], [1], [0, 0, 1, 1], [], []>} : vector<512x384xbf16>, vector<384x128xbf16>, vector<512x128xf32> -> vector<512x128xf32>
    %10 = vector.extract_strided_slice %4 {offsets = [0, 1, 0, 0], sizes = [2, 16, 16, 384], strides = [1, 1, 1, 1]} : vector<2x18x16x384xbf16> to vector<2x16x16x384xbf16>
    %11 = vector.shape_cast %10 : vector<2x16x16x384xbf16> to vector<512x384xbf16>
    %c1 = arith.constant 1 : index
    %c0_6 = arith.constant 0 : index
    %c0_7 = arith.constant 0 : index
    %12 = vector.load %arg2[%c1, %c0_6, %c0_7] : memref<3x384x128xbf16, #tpu.memory_space<vmem>>, vector<1x384x128xbf16>
    %13 = vector.shape_cast %12 : vector<1x384x128xbf16> to vector<384x128xbf16>
    %cst_8 = arith.constant dense<0.000000e+00> : vector<512x128xf32>
    %14 = tpu.matmul %11, %13, %cst_8 {dimension_numbers = #tpu.dot_dimension_numbers<[1], [0], [0], [1], [0, 0, 1, 1], [], []>} : vector<512x384xbf16>, vector<384x128xbf16>, vector<512x128xf32> -> vector<512x128xf32>
    %15 = arith.addf %9, %14 : vector<512x128xf32>
    %16 = vector.extract_strided_slice %4 {offsets = [0, 2, 0, 0], sizes = [2, 16, 16, 384], strides = [1, 1, 1, 1]} : vector<2x18x16x384xbf16> to vector<2x16x16x384xbf16>
    %17 = vector.shape_cast %16 : vector<2x16x16x384xbf16> to vector<512x384xbf16>
    %c2 = arith.constant 2 : index
    %c0_9 = arith.constant 0 : index
    %c0_10 = arith.constant 0 : index
    %18 = vector.load %arg2[%c2, %c0_9, %c0_10] : memref<3x384x128xbf16, #tpu.memory_space<vmem>>, vector<1x384x128xbf16>
    %19 = vector.shape_cast %18 : vector<1x384x128xbf16> to vector<384x128xbf16>
    %cst_11 = arith.constant dense<0.000000e+00> : vector<512x128xf32>
    %20 = tpu.matmul %17, %19, %cst_11 {dimension_numbers = #tpu.dot_dimension_numbers<[1], [0], [0], [1], [0, 0, 1, 1], [], []>} : vector<512x384xbf16>, vector<384x128xbf16>, vector<512x128xf32> -> vector<512x128xf32>
    %21 = arith.addf %15, %20 : vector<512x128xf32>
    %c0_12 = arith.constant 0 : index
    %c0_13 = arith.constant 0 : index
    %22 = vector.load %arg3[%c0_12, %c0_13] : memref<1x128xf32, #tpu.memory_space<vmem>>, vector<1x128xf32>
    %23 = vector.broadcast %22 : vector<1x128xf32> to vector<512x128xf32>
    %24 = arith.addf %21, %23 : vector<512x128xf32>
    %cst_14 = arith.constant 0.000000e+00 : f32
    %25 = vector.broadcast %cst_14 : f32 to vector<512x128xf32>
    %26 = arith.maximumf %24, %25 : vector<512x128xf32>
    %cst_15 = arith.constant 0.000000e+00 : bf16
    %27 = vector.broadcast %cst_15 : bf16 to vector<2x1x18x128xbf16>
    %cst_16 = arith.constant 0.000000e+00 : bf16
    %28 = vector.broadcast %cst_16 : bf16 to vector<2x16x1x128xbf16>
    %c0_17 = arith.constant 0 : index
    %c0_18 = arith.constant 0 : index
    %c0_19 = arith.constant 0 : index
    %c0_20 = arith.constant 0 : index
    %29 = vector.load %arg7[%c0_17, %c0_18, %c0_19, %c0_20] : memref<2x18x18x128xbf16, #tpu.memory_space<vmem>>, vector<2x1x18x128xbf16>
    tpu.vector_store %arg7[%c0_17, %c0_18, %c0_19, %c0_20], %27 {strides = array<i32>} : memref<2x18x18x128xbf16, #tpu.memory_space<vmem>>, vector<2x1x18x128xbf16>,
    %c0_21 = arith.constant 0 : index
    %c17 = arith.constant 17 : index
    %c0_22 = arith.constant 0 : index
    %c0_23 = arith.constant 0 : index
    %30 = vector.load %arg7[%c0_21, %c17, %c0_22, %c0_23] : memref<2x18x18x128xbf16, #tpu.memory_space<vmem>>, vector<2x1x18x128xbf16>
    tpu.vector_store %arg7[%c0_21, %c17, %c0_22, %c0_23], %27 {strides = array<i32>} : memref<2x18x18x128xbf16, #tpu.memory_space<vmem>>, vector<2x1x18x128xbf16>,
    %c0_24 = arith.constant 0 : index
    %c1_25 = arith.constant 1 : index
    %c0_26 = arith.constant 0 : index
    %c0_27 = arith.constant 0 : index
    %31 = vector.load %arg7[%c0_24, %c1_25, %c0_26, %c0_27] : memref<2x18x18x128xbf16, #tpu.memory_space<vmem>>, vector<2x16x1x128xbf16>
    tpu.vector_store %arg7[%c0_24, %c1_25, %c0_26, %c0_27], %28 {strides = array<i32>} : memref<2x18x18x128xbf16, #tpu.memory_space<vmem>>, vector<2x16x1x128xbf16>,
    %c0_28 = arith.constant 0 : index
    %c1_29 = arith.constant 1 : index
    %c17_30 = arith.constant 17 : index
    %c0_31 = arith.constant 0 : index
    %32 = vector.load %arg7[%c0_28, %c1_29, %c17_30, %c0_31] : memref<2x18x18x128xbf16, #tpu.memory_space<vmem>>, vector<2x16x1x128xbf16>
    tpu.vector_store %arg7[%c0_28, %c1_29, %c17_30, %c0_31], %28 {strides = array<i32>} : memref<2x18x18x128xbf16, #tpu.memory_space<vmem>>, vector<2x16x1x128xbf16>,
    %33 = vector.shape_cast %26 : vector<512x128xf32> to vector<2x16x16x128xf32>
    %34 = arith.truncf %33 : vector<2x16x16x128xf32> to vector<2x16x16x128xbf16>
    %c0_32 = arith.constant 0 : index
    %c1_33 = arith.constant 1 : index
    %c1_34 = arith.constant 1 : index
    %c0_35 = arith.constant 0 : index
    %35 = vector.load %arg7[%c0_32, %c1_33, %c1_34, %c0_35] : memref<2x18x18x128xbf16, #tpu.memory_space<vmem>>, vector<2x16x16x128xbf16>
    tpu.vector_store %arg7[%c0_32, %c1_33, %c1_34, %c0_35], %34 {strides = array<i32>} : memref<2x18x18x128xbf16, #tpu.memory_space<vmem>>, vector<2x16x16x128xbf16>,
    %c0_36 = arith.constant 0 : index
    %c0_37 = arith.constant 0 : index
    %c0_38 = arith.constant 0 : index
    %c0_39 = arith.constant 0 : index
    %36 = vector.load %arg7[%c0_36, %c0_37, %c0_38, %c0_39] : memref<2x18x18x128xbf16, #tpu.memory_space<vmem>>, vector<2x18x18x128xbf16>
    %37 = vector.extract_strided_slice %36 {offsets = [0, 0, 0, 0], sizes = [2, 18, 16, 128], strides = [1, 1, 1, 1]} : vector<2x18x18x128xbf16> to vector<2x18x16x128xbf16>
    %38 = vector.extract_strided_slice %36 {offsets = [0, 0, 1, 0], sizes = [2, 18, 16, 128], strides = [1, 1, 1, 1]} : vector<2x18x18x128xbf16> to vector<2x18x16x128xbf16>
    %39 = vector.extract_strided_slice %36 {offsets = [0, 0, 2, 0], sizes = [2, 18, 16, 128], strides = [1, 1, 1, 1]} : vector<2x18x18x128xbf16> to vector<2x18x16x128xbf16>
    %40 = tpu.concatenate %37, %38, %39 in 3 : vector<2x18x16x128xbf16>, vector<2x18x16x128xbf16>, vector<2x18x16x128xbf16> -> vector<2x18x16x384xbf16>
    %41 = vector.extract_strided_slice %40 {offsets = [0, 0, 0, 0], sizes = [2, 16, 16, 384], strides = [1, 1, 1, 1]} : vector<2x18x16x384xbf16> to vector<2x16x16x384xbf16>
    %42 = vector.shape_cast %41 : vector<2x16x16x384xbf16> to vector<512x384xbf16>
    %c0_40 = arith.constant 0 : index
    %c0_41 = arith.constant 0 : index
    %c0_42 = arith.constant 0 : index
    %43 = vector.load %arg4[%c0_40, %c0_41, %c0_42] : memref<3x384x128xbf16, #tpu.memory_space<vmem>>, vector<1x384x128xbf16>
    %44 = vector.shape_cast %43 : vector<1x384x128xbf16> to vector<384x128xbf16>
    %cst_43 = arith.constant dense<0.000000e+00> : vector<512x128xf32>
    %45 = tpu.matmul %42, %44, %cst_43 {dimension_numbers = #tpu.dot_dimension_numbers<[1], [0], [0], [1], [0, 0, 1, 1], [], []>} : vector<512x384xbf16>, vector<384x128xbf16>, vector<512x128xf32> -> vector<512x128xf32>
    %46 = vector.extract_strided_slice %40 {offsets = [0, 1, 0, 0], sizes = [2, 16, 16, 384], strides = [1, 1, 1, 1]} : vector<2x18x16x384xbf16> to vector<2x16x16x384xbf16>
    %47 = vector.shape_cast %46 : vector<2x16x16x384xbf16> to vector<512x384xbf16>
    %c1_44 = arith.constant 1 : index
    %c0_45 = arith.constant 0 : index
    %c0_46 = arith.constant 0 : index
    %48 = vector.load %arg4[%c1_44, %c0_45, %c0_46] : memref<3x384x128xbf16, #tpu.memory_space<vmem>>, vector<1x384x128xbf16>
    %49 = vector.shape_cast %48 : vector<1x384x128xbf16> to vector<384x128xbf16>
    %cst_47 = arith.constant dense<0.000000e+00> : vector<512x128xf32>
    %50 = tpu.matmul %47, %49, %cst_47 {dimension_numbers = #tpu.dot_dimension_numbers<[1], [0], [0], [1], [0, 0, 1, 1], [], []>} : vector<512x384xbf16>, vector<384x128xbf16>, vector<512x128xf32> -> vector<512x128xf32>
    %51 = arith.addf %45, %50 : vector<512x128xf32>
    %52 = vector.extract_strided_slice %40 {offsets = [0, 2, 0, 0], sizes = [2, 16, 16, 384], strides = [1, 1, 1, 1]} : vector<2x18x16x384xbf16> to vector<2x16x16x384xbf16>
    %53 = vector.shape_cast %52 : vector<2x16x16x384xbf16> to vector<512x384xbf16>
    %c2_48 = arith.constant 2 : index
    %c0_49 = arith.constant 0 : index
    %c0_50 = arith.constant 0 : index
    %54 = vector.load %arg4[%c2_48, %c0_49, %c0_50] : memref<3x384x128xbf16, #tpu.memory_space<vmem>>, vector<1x384x128xbf16>
    %55 = vector.shape_cast %54 : vector<1x384x128xbf16> to vector<384x128xbf16>
    %cst_51 = arith.constant dense<0.000000e+00> : vector<512x128xf32>
    %56 = tpu.matmul %53, %55, %cst_51 {dimension_numbers = #tpu.dot_dimension_numbers<[1], [0], [0], [1], [0, 0, 1, 1], [], []>} : vector<512x384xbf16>, vector<384x128xbf16>, vector<512x128xf32> -> vector<512x128xf32>
    %57 = arith.addf %51, %56 : vector<512x128xf32>
    %c0_52 = arith.constant 0 : index
    %c0_53 = arith.constant 0 : index
    %58 = vector.load %arg5[%c0_52, %c0_53] : memref<1x128xf32, #tpu.memory_space<vmem>>, vector<1x128xf32>
    %59 = vector.broadcast %58 : vector<1x128xf32> to vector<512x128xf32>
    %60 = arith.addf %57, %59 : vector<512x128xf32>
    %61 = vector.extract_strided_slice %4 {offsets = [0, 1, 0, 128], sizes = [2, 16, 16, 128], strides = [1, 1, 1, 1]} : vector<2x18x16x384xbf16> to vector<2x16x16x128xbf16>
    %62 = vector.shape_cast %61 : vector<2x16x16x128xbf16> to vector<512x128xbf16>
    %63 = arith.extf %62 : vector<512x128xbf16> to vector<512x128xf32>
    %64 = arith.addf %60, %63 : vector<512x128xf32>
    %cst_54 = arith.constant 0.000000e+00 : f32
    %65 = vector.broadcast %cst_54 : f32 to vector<512x128xf32>
    %66 = arith.maximumf %64, %65 : vector<512x128xf32>
    %67 = vector.shape_cast %66 : vector<512x128xf32> to vector<2x16x16x128xf32>
    %c0_55 = arith.constant 0 : index
    %c0_56 = arith.constant 0 : index
    %c0_57 = arith.constant 0 : index
    %c0_58 = arith.constant 0 : index
    %68 = vector.load %arg6[%c0_55, %c0_56, %c0_57, %c0_58] : memref<2x16x16x128xf32, #tpu.memory_space<vmem>>, vector<2x16x16x128xf32>
    tpu.vector_store %arg6[%c0_55, %c0_56, %c0_57, %c0_58], %67 {strides = array<i32>} : memref<2x16x16x128xf32, #tpu.memory_space<vmem>>, vector<2x16x16x128xf32>,
    return
  }
  func.func @transform_0(%arg0: i32) -> (i32, i32, i32, i32) {
    %c0_i32 = arith.constant 0 : i32
    %c0_i32_0 = arith.constant 0 : i32
    %c0_i32_1 = arith.constant 0 : i32
    %c0_i32_2 = arith.constant 0 : i32
    return %arg0, %c0_i32, %c0_i32_0, %c0_i32_1 : i32, i32, i32, i32
  }
  func.func @transform_1(%arg0: i32) -> (i32, i32, i32) {
    %c0_i32 = arith.constant 0 : i32
    %c0_i32_0 = arith.constant 0 : i32
    %c0_i32_1 = arith.constant 0 : i32
    %c0_i32_2 = arith.constant 0 : i32
    return %c0_i32, %c0_i32_0, %c0_i32_1 : i32, i32, i32
  }
  func.func @transform_2(%arg0: i32) -> (i32, i32) {
    %c0_i32 = arith.constant 0 : i32
    %c0_i32_0 = arith.constant 0 : i32
    %c0_i32_1 = arith.constant 0 : i32
    return %c0_i32, %c0_i32_0 : i32, i32
  }
  func.func @transform_3(%arg0: i32) -> (i32, i32, i32) {
    %c0_i32 = arith.constant 0 : i32
    %c0_i32_0 = arith.constant 0 : i32
    %c0_i32_1 = arith.constant 0 : i32
    %c0_i32_2 = arith.constant 0 : i32
    return %c0_i32, %c0_i32_0, %c0_i32_1 : i32, i32, i32
  }
  func.func @transform_4(%arg0: i32) -> (i32, i32) {
    %c0_i32 = arith.constant 0 : i32
    %c0_i32_0 = arith.constant 0 : i32
    %c0_i32_1 = arith.constant 0 : i32
    return %c0_i32, %c0_i32_0 : i32, i32
  }
  func.func @transform_5(%arg0: i32) -> (i32, i32, i32, i32) {
    %c0_i32 = arith.constant 0 : i32
    %c0_i32_0 = arith.constant 0 : i32
    %c0_i32_1 = arith.constant 0 : i32
    %c0_i32_2 = arith.constant 0 : i32
    return %arg0, %c0_i32, %c0_i32_0, %c0_i32_1 : i32, i32, i32, i32
  }
}

</mosaic_0001>

<bundles_post_ra>
// kernel: tpu_custom_call.1
= control target key start
LH: loop header
LB: loop body
LE: loop exit
PB: predicated region body
PF: predicated region fallthrough
CT: control target
= control target key end

     0   :  { %10 = vsyncpa [#allocation4], 0  ;;  %s13121_s0 = inlined_call_operand.vmem [shape: bf16[2,18,18,128], index: 0, kind: input, shape index: {}]   ;;  %s13122_s1 = inlined_call_operand.vmem [shape: bf16[3,384,128], index: 1, kind: input, shape index: {}]   ;;  %s13123_s2 = inlined_call_operand.vmem [shape: f32[1,128], index: 2, kind: input, shape index: {}]   ;;  %s13124_s3 = inlined_call_operand.hbm [shape: bf16[3,384,128], index: 3, kind: input, shape index: {}]   ;;  %s13125_s4 = inlined_call_operand.vmem [shape: f32[1,128], index: 4, kind: input, shape index: {}]   ;;  %s13126_s5 = inlined_call_operand.hbm [shape: f32[2,16,16,128], index: 5, kind: output, shape index: {}]  }
   0x1   :  { %11 = vsyncpa [#allocation5], 0  ;;  %s22_s20 = sshll.u32 %s13124_s3, 4  ;;  %s9452_s21 = smov [#allocation3]   ;;  %s23_s20 = int_to_ptr.hbm [resolvable:$true] %s22_s20 }
   0x2   :  { %s24_s22 = sshll.u32 %s9452_s21, 4  ;;  %s9453_s23 = smov 64   ;;  %s25_s22 = int_to_ptr.vmem [resolvable:$true] %s24_s22 }
   0x3   :  { %s9454_s24 = smov 4  }
   0x4   :  { %30 = dma.hbm_to_vmem [thread:$0]  %s23_s20, 9216, %s25_s22, [#allocation4], %s9453_s23, %s9453_s23, %s9454_s24  }
   0x5   :  { %9448 = dma.done.wait [#allocation4], 9216  }
   0x6   :  { %9449 = vsyncadd [#allocation4], 4294958080  ;;  %v9099_v0 = vld [vmem:[%s13122_s1 + $0xf8] sm:$0xff]  ;;  %v9098_v2 = vld [vmem:[%s13122_s1 + $0xf0] sm:$0xff]  ;;  %vm470_vm0 = vsmask.f32 7424 }
   0x7   :  { %v9107_v1 = vld [vmem:[%s13122_s1 + $0x138] sm:$0xff]  ;;  %1325 = vmatpush.bf16.msra.mxu0 %v9099_v0  ;;  %9248 = vmatpush.bf16.msra.mxu2 %v9099_v0  ;;  %v9106_v3 = vld [vmem:[%s13122_s1 + $0x130] sm:$0xff]  ;;  %v9097_v4 = vld [vmem:[%s13122_s1 + $0xe8] sm:$0xff]  ;;  %vm939_vm1 = vcmask 1046528   ;;  %vm3393_vm2 = vcmask 1040384   ;;  %vm4296_vm7 = vcmask 1043456  }
   0x8   :  { %1494 = vmatpush.bf16.msra.mxu1 %v9107_v1  ;;  %9256 = vmatpush.bf16.msra.mxu3 %v9107_v1  ;;  %v9105_v5 = vld [vmem:[%s13122_s1 + $0x128] sm:$0xff]  ;;  %v9096_v6 = vld [vmem:[%s13122_s1 + $0xe0] sm:$0xff]  ;;  %v43_v8 = vld [vmem:[%s13121_s0 + $0x14] sm:$0x1]  ;;  %vm3394_vm3 = vsmask.f32 256 }
   0x9   :  { %v9104_v7 = vld [vmem:[%s13122_s1 + $0x120] sm:$0xff]  ;;  %v97_v9 = vld [vmem:[%s13121_s0 + $0xec] sm:$0x1]  ;;  %v9095_v10 = vld [vmem:[%s13122_s1 + $0xd8] sm:$0xff]  ;;  %v399_v14 = vunpack.c.l.b16 %v43_v8  ;;  %vm3492_vm5 = vsmask.f32 7938 }
   0xa   :  { %v9103_v11 = vld [vmem:[%s13122_s1 + $0x118] sm:$0xff]  ;;  %v9033_v12 = vld [vmem:[%s13121_s0 + $0xc] sm:$0xff]  ;;  %v9051_v13 = vld [vmem:[%s13121_s0 + $0xe4] sm:$0xff]  ;;  %v417_v15 = vunpack.c.l.b16 %v97_v9  ;;  %vm3654_vm9 = vsmask.f32 4368  ;;  %s8059_s22 = sshll.u32 %s13126_s5, 4  ;;  %s8060_s22 = int_to_ptr.hbm [resolvable:$true] %s8059_s22 }
   0xb   :  { %1326 = vmatpush.bf16.msra.mxu0 %v9098_v2  ;;  %9249 = vmatpush.bf16.msra.mxu2 %v9098_v2  ;;  %v9094_v16 = vld [vmem:[%s13122_s1 + $0xd0] sm:$0xff]  ;;  %v9540_v18 = vpack.c.b16 %v399_v14, %v399_v14  ;;  %v486_v19 = vshll.u32 %v9033_v12, 16  ;;  %v702_v21 = vshll.u32 %v9051_v13, 16  ;;  %v9093_v22 = vld [vmem:[%s13122_s1 + $0xc8] sm:$0xff]  ;;  %v484_v23 = vshrl.u32 %v9033_v12, 16  ;;  %v9092_v30 = vld [vmem:[%s13122_s1 + $0xc0] sm:$0xff] }
   0xc   :  { %1495 = vmatpush.bf16.msra.mxu1 %v9106_v3  ;;  %9257 = vmatpush.bf16.msra.mxu3 %v9106_v3  ;;  %v9102_v17 = vld [vmem:[%s13122_s1 + $0x110] sm:$0xff]  ;;  %v9542_v20 = vpack.c.b16 %v417_v15, %v417_v15  ;;  %v700_v24 = vshrl.u32 %v9051_v13, 16  ;;  %v9101_v25 = vld [vmem:[%s13122_s1 + $0x108] sm:$0xff]  ;;  %v9100_v31 = vld [vmem:[%s13122_s1 + $0x100] sm:$0xff]  ;;  %s9457_s23 = smov 128   ;;  %s9458_s24 = smov 8  }
   0xd   :  { %v488_v26 = vrot.slane %v486_v19, 1  ;;  %v491_v27 = vshll.u32 %v9540_v18, 16  ;;  %v704_v28 = vrot.slane %v702_v21, 1  ;;  %v46_v36 = vld [vmem:[%s13121_s0 + $0x20] sm:$0x1]  ;;  %v9115_v37 = vld [vmem:[%s13122_s1 + $0x178] sm:$0xff]  ;;  %vm10846_vm4 = vmand %vm3393_vm2, %vm3394_vm3 }
   0xe   :  { %13322 = vst [vmem:[#allocation9_spill] sm:$0xff] %v9542_v20  ;;  %v707_v29 = vshll.u32 %v9542_v20, 16  ;;  %v9075_v38 = vld [vmem:[%s13122_s1 + $0x38] sm:$0xff]  ;;  %v400_v40 = vunpack.c.l.b16 %v46_v36  ;;  %v9052_v45 = vld [vmem:[%s13121_s0 + $0xf0] sm:$0xff]  ;;  %v49_v0 = vld [vmem:[%s13121_s0 + $0x2c] sm:$0x1] }
   0xf   :  { %1327 = vmatpush.bf16.msra.mxu0 %v9097_v4  ;;  %9250 = vmatpush.bf16.msra.mxu2 %v9097_v4  ;;  %v489_v32 = vor.u32 %v488_v26, %v484_v23  ;;  %v493_v33 = vrot.slane %v491_v27, 1  ;;  %v705_v34 = vor.u32 %v704_v28, %v700_v24  ;;  %v100_v39 = vld [vmem:[%s13121_s0 + $0xf8] sm:$0x1]  ;;  %v9114_v48 = vld [vmem:[%s13122_s1 + $0x170] sm:$0xff]  ;;  %v714_v52 = vshll.u32 %v9052_v45, 16  ;;  %v9035_v2 = vld [vmem:[%s13121_s0 + $0x24] sm:$0xff] }
  0x10   :  { %1496 = vmatpush.bf16.msra.mxu1 %v9105_v5  ;;  %9258 = vmatpush.bf16.msra.mxu3 %v9105_v5  ;;  %v709_v35 = vrot.slane %v707_v29, 1  ;;  %v9083_v43 = vld [vmem:[%s13122_s1 + $0x78] sm:$0xff]  ;;  %v418_v46 = vunpack.c.l.b16 %v100_v39  ;;  %v9587_v47 = vpack.c.b16 %v400_v40, %v400_v40  ;;  %v9074_v49 = vld [vmem:[%s13122_s1 + $0x30] sm:$0xff]  ;;  %v712_v57 = vshrl.u32 %v9052_v45, 16  ;;  %v103_v1 = vld [vmem:[%s13121_s0 + $0x104] sm:$0x1] }
  0x11   :  { %v9571_v41 = vsel %vm470_vm0, %v489_v32, %v493_v33  ;;  %v9034_v44 = vld [vmem:[%s13121_s0 + $0x18] sm:$0xff]  ;;  %v9082_v53 = vld [vmem:[%s13122_s1 + $0x70] sm:$0xff]  ;;  %v716_v58 = vrot.slane %v714_v52, 1  ;;  %v510_v8 = vshll.u32 %v9035_v2, 16  ;;  %v9054_v29 = vld [vmem:[%s13121_s0 + $0x108] sm:$0xff] }
  0x12   :  { %13323 = vst [vmem:[#allocation10_spill] sm:$0xff] %v9571_v41  ;;  %v9574_v42 = vsel %vm470_vm0, %v705_v34, %v709_v35  ;;  %v498_v50 = vshll.u32 %v9034_v44, 16  ;;  %v9595_v51 = vpack.c.b16 %v418_v46, %v418_v46  ;;  %v496_v54 = vshrl.u32 %v9034_v44, 16  ;;  %v9053_v5 = vld [vmem:[%s13121_s0 + $0xfc] sm:$0xff]  ;;  %v52_v24 = vld [vmem:[%s13121_s0 + $0x38] sm:$0x1]  ;;  %vm10862_vm6 = vmand %vm3393_vm2, %vm3492_vm5 }
  0x13   :  { %1328 = vmatpush.bf16.msra.mxu0 %v9096_v6  ;;  %9251 = vmatpush.bf16.msra.mxu2 %v9096_v6  ;;  %13324 = vst [vmem:[#allocation11_spill] sm:$0xff] %v9574_v42  ;;  %v503_v55 = vshll.u32 %v9587_v47, 16  ;;  %v717_v62 = vor.u32 %v716_v58, %v712_v57  ;;  %v401_v6 = vunpack.c.l.b16 %v49_v0  ;;  %v724_v15 = vshrl.u32 %v9053_v5, 16  ;;  %v9036_v26 = vld [vmem:[%s13121_s0 + $0x30] sm:$0xff]  ;;  %v9113_v33 = vld [vmem:[%s13122_s1 + $0x168] sm:$0xff]  ;;  %vm10899_vm8 = vmand %vm4296_vm7, %vm3492_vm5 }
  0x14   :  { %1497 = vmatpush.bf16.msra.mxu1 %v9104_v7  ;;  %9259 = vmatpush.bf16.msra.mxu3 %v9104_v7  ;;  %13325 = vst [vmem:[#allocation12_spill] sm:$0xff] %v9595_v51  ;;  %v500_v56 = vrot.slane %v498_v50, 1  ;;  %v719_v59 = vshll.u32 %v9595_v51, 16  ;;  %v419_v7 = vunpack.c.l.b16 %v103_v1  ;;  %v522_v32 = vshll.u32 %v9036_v26, 16  ;;  %v9073_v34 = vld [vmem:[%s13122_s1 + $0x28] sm:$0xff]  ;;  %v9055_v58 = vld [vmem:[%s13121_s0 + $0x114] sm:$0xff]  ;;  %vm10910_vm10 = vmor %vm3394_vm3, %vm3654_vm9 }
  0x15   :  { %v505_v61 = vrot.slane %v503_v55, 1  ;;  %v9622_v9 = vpack.c.b16 %v401_v6, %v401_v6  ;;  %v9081_v35 = vld [vmem:[%s13122_s1 + $0x68] sm:$0xff]  ;;  %v520_v39 = vshrl.u32 %v9036_v26, 16  ;;  %v9037_v55 = vld [vmem:[%s13121_s0 + $0x3c] sm:$0xff]  ;;  %v750_v0 = vshll.u32 %v9055_v58, 16 }
  0x16   :  { %v501_v60 = vor.u32 %v500_v56, %v496_v54  ;;  %v721_v63 = vrot.slane %v719_v59, 1  ;;  %v524_v40 = vrot.slane %v522_v32, 1  ;;  %v109_v54 = vld [vmem:[%s13121_s0 + $0x11c] sm:$0x1]  ;;  %v532_v1 = vshrl.u32 %v9037_v55, 16 }
  0x17   :  { %1329 = vmatpush.bf16.msra.mxu0 %v9095_v10  ;;  %9252 = vmatpush.bf16.msra.mxu2 %v9095_v10  ;;  %v9624_v10 = vpack.c.b16 %v419_v7, %v419_v7  ;;  %v515_v14 = vshll.u32 %v9622_v9, 16  ;;  %v748_v6 = vshrl.u32 %v9055_v58, 16  ;;  %v752_v7 = vrot.slane %v750_v0, 1 }
  0x18   :  { %1498 = vmatpush.bf16.msra.mxu1 %v9103_v11  ;;  %9260 = vmatpush.bf16.msra.mxu3 %v9103_v11  ;;  %v9612_v3 = vsel %vm470_vm0, %v501_v60, %v505_v61  ;;  %v9615_v4 = vsel %vm470_vm0, %v717_v62, %v721_v63  ;;  %v726_v11 = vshll.u32 %v9053_v5, 16  ;;  %v421_v60 = vunpack.c.l.b16 %v109_v54 }
  0x19   :  { %13326 = vst [vmem:[#allocation13_spill] sm:$0xff] %v9612_v3  ;;  %v517_v21 = vrot.slane %v515_v14, 1  ;;  %v534_v61 = vshll.u32 %v9037_v55, 16 }
  0x1a   :  { %13327 = vst [vmem:[#allocation14_spill] sm:$0xff] %v9615_v4  ;;  %v9685_v63 = vpack.c.b16 %v421_v60, %v421_v60 }
  0x1b   :  { %1330 = vmatpush.bf16.msra.mxu0 %v9094_v16  ;;  %9253 = vmatpush.bf16.msra.mxu2 %v9094_v16  ;;  %13328 = vst [vmem:[#allocation15_spill] sm:$0xff] %v9624_v10  ;;  %v728_v16 = vrot.slane %v726_v11, 1 }
  0x1c   :  { %1499 = vmatpush.bf16.msra.mxu1 %v9102_v17  ;;  %9261 = vmatpush.bf16.msra.mxu3 %v9102_v17  ;;  %v731_v17 = vshll.u32 %v9624_v10, 16  ;;  %13334 = vst [vmem:[#allocation21_spill] sm:$0xff] %v9685_v63 }
  0x1e   :  { %v733_v23 = vrot.slane %v731_v17, 1  ;;  %v9038_v17 = vld [vmem:[%s13121_s0 + $0x48] sm:$0xff] }
  0x1f   :  { %1331 = vmatpush.bf16.msra.mxu0 %v9093_v22  ;;  %9254 = vmatpush.bf16.msra.mxu2 %v9093_v22  ;;  %v729_v22 = vor.u32 %v728_v16, %v724_v15  ;;  %v58_v15 = vld [vmem:[%s13121_s0 + $0x50] sm:$0x1]  ;;  %v112_v16 = vld [vmem:[%s13121_s0 + $0x128] sm:$0x1] }
  0x20   :  { %1500 = vmatpush.bf16.msra.mxu1 %v9101_v25  ;;  %9262 = vmatpush.bf16.msra.mxu3 %v9101_v25  ;;  %v106_v25 = vld [vmem:[%s13121_s0 + $0x110] sm:$0x1] }
  0x21   :  { %v9641_v28 = vsel %vm470_vm0, %v729_v22, %v733_v23  ;;  %v9056_v22 = vld [vmem:[%s13121_s0 + $0x120] sm:$0xff]  ;;  %v404_v23 = vunpack.c.l.b16 %v58_v15 }
  0x22   :  { %13330 = vst [vmem:[#allocation17_spill] sm:$0xff] %v9641_v28 }
  0x23   :  { %1332 = vmatpush.bf16.msra.mxu0 %v9092_v30  ;;  %9255 = vmatpush.bf16.msra.mxu2 %v9092_v30  ;;  %v402_v30 = vunpack.c.l.b16 %v52_v24  ;;  %v422_v24 = vunpack.c.l.b16 %v112_v16  ;;  %v64_v16 = vld [vmem:[%s13121_s0 + $0x68] sm:$0x1] }
  0x24   :  { %1501 = vmatpush.bf16.msra.mxu1 %v9100_v31  ;;  %9263 = vmatpush.bf16.msra.mxu3 %v9100_v31  ;;  %v420_v31 = vunpack.c.l.b16 %v106_v25  ;;  %v546_v25 = vshll.u32 %v9038_v17, 16 }
  0x25   :  { %v9657_v36 = vpack.c.b16 %v402_v30, %v402_v30  ;;  %v9080_v30 = vld [vmem:[%s13122_s1 + $0x60] sm:$0xff]  ;;  %v9720_v32 = vpack.c.b16 %v422_v24, %v422_v24 }
  0x26   :  { %1333 = vmatmul.bf16.vlgmr.msra.gmra.mxu0 %v9033_v12  ;;  %1413 = vmatmul.bf16.vlgmr.msra.gmra.mxu2 %v9051_v13  ;;  %v508_v12 = vshrl.u32 %v9035_v2, 16  ;;  %v512_v13 = vrot.slane %v510_v8, 1  ;;  %v755_v8 = vshll.u32 %v9685_v63, 16 }
  0x27   :  { %1663 = vmatpush.bf16.msrb.mxu2 %v9115_v37  ;;  %1502 = vmatmul.bf16.vlgmr.msra.gmra.mxu1 %v9571_v41  ;;  %v9659_v37 = vpack.c.b16 %v420_v31, %v420_v31  ;;  %v9718_v31 = vpack.c.b16 %v404_v23, %v404_v23  ;;  %13337 = vst [vmem:[#allocation24_spill] sm:$0xff] %v9720_v32 }
  0x28   :  { %1976 = vmatpush.bf16.msrb.mxu3 %v9075_v38  ;;  %2145 = vmatpush.bf16.msrb.mxu0 %v9083_v43  ;;  %v513_v19 = vor.u32 %v512_v13, %v508_v12  ;;  %v738_v38 = vshll.u32 %v9054_v29, 16  ;;  %v527_v43 = vshll.u32 %v9657_v36, 16  ;;  %v753_v13 = vor.u32 %v752_v7, %v748_v6 }
  0x29   :  { %1582 = vmatmul.bf16.vlgmr.msra.gmra.mxu3 %v9574_v42  ;;  %13331 = vst [vmem:[#allocation18_spill] sm:$0xff] %v9659_v37  ;;  %v743_v46 = vshll.u32 %v9659_v37, 16  ;;  %v757_v14 = vrot.slane %v755_v8, 1 }
  0x2a   :  { %v9638_v27 = vsel %vm470_vm0, %v513_v19, %v517_v21 }
  0x2b   :  { %1664 = vmatpush.bf16.msrb.mxu2 %v9114_v48  ;;  %13329 = vst [vmem:[#allocation16_spill] sm:$0xff] %v9638_v27  ;;  %v525_v48 = vor.u32 %v524_v40, %v520_v39  ;;  %v745_v52 = vrot.slane %v743_v46, 1  ;;  %v9702_v21 = vsel %vm470_vm0, %v753_v13, %v757_v14  ;;  %v760_v39 = vshrl.u32 %v9056_v22, 16 }
  0x2c   :  { %1977 = vmatpush.bf16.msrb.mxu3 %v9074_v49  ;;  %2146 = vmatpush.bf16.msrb.mxu0 %v9082_v53  ;;  %v529_v49 = vrot.slane %v527_v43, 1  ;;  %v55_v53 = vld [vmem:[%s13121_s0 + $0x44] sm:$0x1]  ;;  %13336 = vst [vmem:[#allocation23_spill] sm:$0xff] %v9702_v21  ;;  %v767_v43 = vshll.u32 %v9720_v32, 16 }
  0x2d   :  { %v403_v59 = vunpack.c.l.b16 %v55_v53 }
  0x2e   :  { %v9673_v56 = vsel %vm470_vm0, %v525_v48, %v529_v49  ;;  %v769_v48 = vrot.slane %v767_v43, 1  ;;  %v61_v49 = vld [vmem:[%s13121_s0 + $0x5c] sm:$0x1] }
  0x2f   :  { %1665 = vmatpush.bf16.msrb.mxu2 %v9113_v33  ;;  %13332 = vst [vmem:[#allocation19_spill] sm:$0xff] %v9673_v56  ;;  %v9683_v62 = vpack.c.b16 %v403_v59, %v403_v59  ;;  %v762_v33 = vshll.u32 %v9056_v22, 16 }
  0x30   :  { %1978 = vmatpush.bf16.msrb.mxu3 %v9073_v34  ;;  %2147 = vmatpush.bf16.msrb.mxu0 %v9081_v35  ;;  %v544_v34 = vshrl.u32 %v9038_v17, 16  ;;  %v548_v35 = vrot.slane %v546_v25, 1  ;;  %v9058_v25 = vld [vmem:[%s13121_s0 + $0x138] sm:$0xff] }
  0x31   :  { %v764_v40 = vrot.slane %v762_v33, 1  ;;  %v9111_v33 = vld [vmem:[%s13122_s1 + $0x158] sm:$0xff] }
  0x33   :  { %v765_v46 = vor.u32 %v764_v40, %v760_v39  ;;  %v786_v39 = vshll.u32 %v9058_v25, 16 }
  0x34   :  { %2148 = vmatpush.bf16.msrb.mxu0 %v9080_v30 }
  0x35   :  { %v9737_v54 = vsel %vm470_vm0, %v765_v46, %v769_v48  ;;  %v788_v46 = vrot.slane %v786_v39, 1  ;;  %v70_v39 = vld [vmem:[%s13121_s0 + $0x80] sm:$0x1] }
  0x36   :  { %1338 = vmatmul.bf16.gmra.mxu0 %v9034_v44  ;;  %1418 = vmatmul.bf16.gmra.mxu2 %v9052_v45  ;;  %v736_v44 = vshrl.u32 %v9054_v29, 16  ;;  %v740_v45 = vrot.slane %v738_v38, 1  ;;  %v551_v38 = vshll.u32 %v9718_v31, 16  ;;  %13339 = vst [vmem:[#allocation26_spill] sm:$0xff] %v9737_v54 }
  0x37   :  { %1507 = vmatmul.bf16.gmra.mxu1 %v9612_v3 }
  0x38   :  { %v741_v50 = vor.u32 %v740_v45, %v736_v44  ;;  %v549_v44 = vor.u32 %v548_v35, %v544_v34  ;;  %v553_v45 = vrot.slane %v551_v38, 1  ;;  %v9071_v34 = vld [vmem:[%s13122_s1 + $0x18] sm:$0xff] }
  0x39   :  { %1587 = vmatmul.bf16.gmra.mxu3 %v9615_v4 }
  0x3a   :  { %v9676_v57 = vsel %vm470_vm0, %v741_v50, %v745_v52  ;;  %v115_v50 = vld [vmem:[%s13121_s0 + $0x134] sm:$0x1]  ;;  %v9734_v53 = vsel %vm470_vm0, %v549_v44, %v553_v45  ;;  %v784_v45 = vshrl.u32 %v9058_v25, 16 }
  0x3b   :  { %13333 = vst [vmem:[#allocation20_spill] sm:$0xff] %v9676_v57  ;;  %v9039_v52 = vld [vmem:[%s13121_s0 + $0x54] sm:$0xff]  ;;  %v423_v59 = vunpack.c.l.b16 %v115_v50 }
  0x3c   :  { %13338 = vst [vmem:[#allocation25_spill] sm:$0xff] %v9734_v53  ;;  %v558_v60 = vshll.u32 %v9039_v52, 16 }
  0x3d   :  { %v9746_v0 = vpack.c.b16 %v423_v59, %v423_v59  ;;  %v67_v59 = vld [vmem:[%s13121_s0 + $0x74] sm:$0x1] }
  0x3f   :  { %13340 = vst [vmem:[#allocation27_spill] sm:$0xff] %v9746_v0 }
  0x46   :  { %1343 = vmatmul.bf16.gmra.mxu0 %v9035_v2  ;;  %1423 = vmatmul.bf16.gmra.mxu2 %v9053_v5  ;;  %v536_v2 = vrot.slane %v534_v61, 1  ;;  %v539_v5 = vshll.u32 %v9683_v62, 16 }
  0x47   :  { %1512 = vmatmul.bf16.gmra.mxu1 %v9638_v27 }
  0x48   :  { %v537_v11 = vor.u32 %v536_v2, %v532_v1  ;;  %v541_v12 = vrot.slane %v539_v5, 1  ;;  %v556_v2 = vshrl.u32 %v9039_v52, 16  ;;  %v560_v5 = vrot.slane %v558_v60, 1  ;;  %v121_v60 = vld [vmem:[%s13121_s0 + $0x14c] sm:$0x1] }
  0x49   :  { %1592 = vmatmul.bf16.gmra.mxu3 %v9641_v28 }
  0x4a   :  { %v9699_v19 = vsel %vm470_vm0, %v537_v11, %v541_v12  ;;  %v779_v11 = vshll.u32 %v9746_v0, 16  ;;  %v561_v12 = vor.u32 %v560_v5, %v556_v2 }
  0x4b   :  { %13335 = vst [vmem:[#allocation22_spill] sm:$0xff] %v9699_v19 }
  0x4c   :  { %v781_v15 = vrot.slane %v779_v11, 1 }
  0x56   :  { %1348 = vmatmul.bf16.gmra.mxu0 %v9036_v26  ;;  %1428 = vmatmul.bf16.gmra.mxu2 %v9054_v29  ;;  %v9112_v26 = vld [vmem:[%s13122_s1 + $0x160] sm:$0xff] }
  0x57   :  { %1517 = vmatmul.bf16.gmra.mxu1 %v9673_v56  ;;  %v9072_v29 = vld [vmem:[%s13122_s1 + $0x20] sm:$0xff]  ;;  %1666 = vmatpush.bf16.msrb.mxu2 %v9112_v26  ;;  %v406_v26 = vunpack.c.l.b16 %v64_v16 }
  0x58   :  { %1979 = vmatpush.bf16.msrb.mxu3 %v9072_v29 }
  0x59   :  { %1597 = vmatmul.bf16.gmra.mxu3 %v9676_v57  ;;  %v9776_v35 = vpack.c.b16 %v406_v26, %v406_v26 }
  0x5b   :  { %1667 = vmatpush.bf16.msrb.mxu2 %v9111_v33  ;;  %v575_v44 = vshll.u32 %v9776_v35, 16 }
  0x5c   :  { %1980 = vmatpush.bf16.msrb.mxu3 %v9071_v34 }
  0x66   :  { %1353 = vmatmul.bf16.gmra.mxu0 %v9037_v55  ;;  %1433 = vmatmul.bf16.gmra.mxu2 %v9055_v58  ;;  %v9057_v55 = vld [vmem:[%s13121_s0 + $0x12c] sm:$0xff]  ;;  %v405_v58 = vunpack.c.l.b16 %v61_v49  ;;  %v9079_v49 = vld [vmem:[%s13122_s1 + $0x58] sm:$0xff] }
  0x67   :  { %1522 = vmatmul.bf16.gmra.mxu1 %v9699_v19  ;;  %v774_v1 = vshll.u32 %v9057_v55, 16  ;;  %v772_v7 = vshrl.u32 %v9057_v55, 16  ;;  %2149 = vmatpush.bf16.msrb.mxu0 %v9079_v49  ;;  %v9060_v49 = vld [vmem:[%s13121_s0 + $0x150] sm:$0xff] }
  0x68   :  { %v9744_v61 = vpack.c.b16 %v405_v58, %v405_v58 }
  0x69   :  { %1602 = vmatmul.bf16.gmra.mxu3 %v9702_v21  ;;  %v776_v8 = vrot.slane %v774_v1, 1  ;;  %v9041_v1 = vld [vmem:[%s13121_s0 + $0x6c] sm:$0xff] }
  0x6a   :  { %v563_v6 = vshll.u32 %v9744_v61, 16  ;;  %v582_v11 = vshll.u32 %v9041_v1, 16 }
  0x6b   :  { %v777_v14 = vor.u32 %v776_v8, %v772_v7  ;;  %v407_v7 = vunpack.c.l.b16 %v67_v59  ;;  %v425_v8 = vunpack.c.l.b16 %v121_v60  ;;  %v9110_v59 = vld [vmem:[%s13122_s1 + $0x150] sm:$0xff] }
  0x6c   :  { %v565_v13 = vrot.slane %v563_v6, 1  ;;  %v9059_v6 = vld [vmem:[%s13121_s0 + $0x144] sm:$0xff]  ;;  %v584_v16 = vrot.slane %v582_v11, 1  ;;  %v9070_v60 = vld [vmem:[%s13122_s1 + $0x10] sm:$0xff]  ;;  %v810_v11 = vshll.u32 %v9060_v49, 16  ;;  %1668 = vmatpush.bf16.msrb.mxu2 %v9110_v59 }
  0x6d   :  { %v9763_v24 = vsel %vm470_vm0, %v777_v14, %v781_v15  ;;  %v798_v14 = vshll.u32 %v9059_v6, 16  ;;  %v580_v15 = vshrl.u32 %v9041_v1, 16  ;;  %v796_v26 = vshrl.u32 %v9059_v6, 16  ;;  %1981 = vmatpush.bf16.msrb.mxu3 %v9070_v60  ;;  %v127_v59 = vld [vmem:[%s13121_s0 + $0x164] sm:$0x1] }
  0x6e   :  { %v9760_v23 = vsel %vm470_vm0, %v561_v12, %v565_v13  ;;  %13342 = vst [vmem:[#allocation29_spill] sm:$0xff] %v9763_v24  ;;  %v9805_v12 = vpack.c.b16 %v407_v7, %v407_v7  ;;  %v9807_v13 = vpack.c.b16 %v425_v8, %v425_v8 }
  0x6f   :  { %13341 = vst [vmem:[#allocation28_spill] sm:$0xff] %v9760_v23 }
  0x70   :  { %13346 = vst [vmem:[#allocation33_spill] sm:$0xff] %v9807_v13 }
  0x76   :  { %1358 = vmatmul.bf16.gmra.mxu0 %v9038_v17  ;;  %1438 = vmatmul.bf16.gmra.mxu2 %v9056_v22  ;;  %v118_v17 = vld [vmem:[%s13121_s0 + $0x140] sm:$0x1] }
  0x77   :  { %1527 = vmatmul.bf16.gmra.mxu1 %v9734_v53  ;;  %v9040_v22 = vld [vmem:[%s13121_s0 + $0x60] sm:$0xff]  ;;  %v424_v29 = vunpack.c.l.b16 %v118_v17  ;;  %v587_v17 = vshll.u32 %v9805_v12, 16 }
  0x78   :  { %v570_v30 = vshll.u32 %v9040_v22, 16  ;;  %v568_v40 = vshrl.u32 %v9040_v22, 16 }
  0x79   :  { %1607 = vmatmul.bf16.gmra.mxu3 %v9737_v54  ;;  %v9778_v38 = vpack.c.b16 %v424_v29, %v424_v29  ;;  %v800_v29 = vrot.slane %v798_v14, 1 }
  0x7a   :  { %v572_v43 = vrot.slane %v570_v30, 1  ;;  %v803_v30 = vshll.u32 %v9807_v13, 16 }
  0x7b   :  { %13343 = vst [vmem:[#allocation30_spill] sm:$0xff] %v9778_v38  ;;  %v791_v48 = vshll.u32 %v9778_v38, 16  ;;  %v801_v33 = vor.u32 %v800_v29, %v796_v26 }
  0x7c   :  { %v573_v50 = vor.u32 %v572_v43, %v568_v40  ;;  %v805_v34 = vrot.slane %v803_v30, 1  ;;  %v124_v40 = vld [vmem:[%s13121_s0 + $0x158] sm:$0x1]  ;;  %v808_v30 = vshrl.u32 %v9060_v49, 16 }
  0x7d   :  { %v793_v58 = vrot.slane %v791_v48, 1 }
  0x7e   :  { %v9824_v48 = vsel %vm470_vm0, %v801_v33, %v805_v34  ;;  %v9078_v34 = vld [vmem:[%s13122_s1 + $0x50] sm:$0xff] }
  0x7f   :  { %13348 = vst [vmem:[#allocation35_spill] sm:$0xff] %v9824_v48  ;;  %2150 = vmatpush.bf16.msrb.mxu0 %v9078_v34 }
  0x86   :  { %1363 = vmatmul.bf16.gmra.mxu0 %v9039_v52  ;;  %1443 = vmatmul.bf16.gmra.mxu2 %v9057_v55  ;;  %v577_v52 = vrot.slane %v575_v44, 1  ;;  %v789_v55 = vor.u32 %v788_v46, %v784_v45  ;;  %v9042_v44 = vld [vmem:[%s13121_s0 + $0x78] sm:$0xff] }
  0x87   :  { %1532 = vmatmul.bf16.gmra.mxu1 %v9760_v23 }
  0x88   :  { %v9795_v2 = vsel %vm470_vm0, %v573_v50, %v577_v52  ;;  %v9798_v5 = vsel %vm470_vm0, %v789_v55, %v793_v58  ;;  %v408_v50 = vunpack.c.l.b16 %v70_v39  ;;  %v426_v52 = vunpack.c.l.b16 %v124_v40  ;;  %v9091_v39 = vld [vmem:[%s13122_s1 + $0xb8] sm:$0xff] }
  0x89   :  { %1612 = vmatmul.bf16.gmra.mxu3 %v9763_v24  ;;  %13344 = vst [vmem:[#allocation31_spill] sm:$0xff] %v9795_v2  ;;  %v594_v58 = vshll.u32 %v9042_v44, 16  ;;  %2314 = vmatpush.bf16.msrb.mxu1 %v9091_v39 }
  0x8a   :  { %13345 = vst [vmem:[#allocation32_spill] sm:$0xff] %v9798_v5  ;;  %v9839_v7 = vpack.c.b16 %v408_v50, %v408_v50  ;;  %v9841_v8 = vpack.c.b16 %v426_v52, %v426_v52 }
  0x8c   :  { %13349 = vst [vmem:[#allocation36_spill] sm:$0xff] %v9841_v8  ;;  %v599_v29 = vshll.u32 %v9839_v7, 16 }
  0x96   :  { %1368 = vmatmul.bf16.gmra.mxu0 %v9040_v22  ;;  %1448 = vmatmul.bf16.gmra.mxu2 %v9058_v25  ;;  %v585_v22 = vor.u32 %v584_v16, %v580_v15  ;;  %v589_v25 = vrot.slane %v587_v17, 1  ;;  %v592_v16 = vshrl.u32 %v9042_v44, 16  ;;  %v596_v17 = vrot.slane %v594_v58, 1  ;;  %v73_v58 = vld [vmem:[%s13121_s0 + $0x8c] sm:$0x1] }
  0x97   :  { %1537 = vmatmul.bf16.gmra.mxu1 %v9795_v2 }
  0x98   :  { %v9821_v46 = vsel %vm470_vm0, %v585_v22, %v589_v25  ;;  %v812_v22 = vrot.slane %v810_v11, 1  ;;  %v815_v25 = vshll.u32 %v9841_v8, 16  ;;  %v597_v40 = vor.u32 %v596_v17, %v592_v16 }
  0x99   :  { %1617 = vmatmul.bf16.gmra.mxu3 %v9798_v5  ;;  %13347 = vst [vmem:[#allocation34_spill] sm:$0xff] %v9821_v46 }
  0x9a   :  { %v817_v50 = vrot.slane %v815_v25, 1 }
  0xa3   :  { %v1334_v43 = vpop.f32.mrf.mxu0 }
  0xa4   :  { %v1503_v45 = vpop.f32.mrf.mxu1 }
  0xa5   :  { %v9829_v55 = vadd.f32 %v1503_v45, %v1334_v43  ;;  %v601_v43 = vrot.slane %v599_v29, 1  ;;  %v813_v45 = vor.u32 %v812_v22, %v808_v30  ;;  %v409_v29 = vunpack.c.l.b16 %v73_v58 }
  0xa6   :  { %1373 = vmatmul.bf16.gmra.mxu0 %v9041_v1  ;;  %1453 = vmatmul.bf16.gmra.mxu2 %v9059_v6  ;;  %v427_v30 = vunpack.c.l.b16 %v127_v59 }
  0xa7   :  { %1542 = vmatmul.bf16.gmra.mxu1 %v9821_v46  ;;  %v9869_v16 = vsel %vm470_vm0, %v597_v40, %v601_v43  ;;  %v9872_v17 = vsel %vm470_vm0, %v813_v45, %v817_v50  ;;  %v9882_v34 = vpack.c.b16 %v409_v29, %v409_v29 }
  0xa8   :  { %13352 = vst [vmem:[#allocation39_spill] sm:$0xff] %v9869_v16  ;;  %v9884_v39 = vpack.c.b16 %v427_v30, %v427_v30 }
  0xa9   :  { %1622 = vmatmul.bf16.gmra.mxu3 %v9824_v48  ;;  %v1414_v1 = vpop.f32.mrf.mxu2  ;;  %13353 = vst [vmem:[#allocation40_spill] sm:$0xff] %v9872_v17  ;;  %v611_v59 = vshll.u32 %v9882_v34, 16 }
  0xaa   :  { %13354 = vst [vmem:[#allocation41_spill] sm:$0xff] %v9884_v39 }
  0xab   :  { %v1336_v15 = vpop.f32.mrf.mxu0 }
  0xac   :  { %v1583_v6 = vpop.f32.mrf.mxu3  ;;  %v1505_v26 = vpop.f32.mrf.mxu1 }
  0xad   :  { %v9843_v14 = vadd.f32 %v1583_v6, %v1414_v1  ;;  %v9847_v33 = vadd.f32 %v1505_v26, %v1336_v15  ;;  %v9866_v6 = vld [vmem:[%s13121_s0 + $0x84] sm:$0xff]  ;;  %v9061_v26 = vld [vmem:[%s13121_s0 + $0x15c] sm:$0xff] }
  0xae   :  { %v606_v25 = vshll.u32 %v9866_v6, 16  ;;  %v822_v40 = vshll.u32 %v9061_v26, 16  ;;  %v604_v58 = vshrl.u32 %v9866_v6, 16 }
  0xaf   :  { %13350 = vst [vmem:[#allocation37_spill] sm:$0xff] %v9843_v14 }
  0xb1   :  { %v1416_v52 = vpop.f32.mrf.mxu2 }
  0xb3   :  { %v1339_v1 = vpop.f32.mrf.mxu0 }
  0xb4   :  { %v1585_v60 = vpop.f32.mrf.mxu3  ;;  %v1508_v15 = vpop.f32.mrf.mxu1 }
  0xb5   :  { %v9861_v11 = vadd.f32 %v1585_v60, %v1416_v52  ;;  %v9877_v22 = vadd.f32 %v1508_v15, %v1339_v1  ;;  %v820_v60 = vshrl.u32 %v9061_v26, 16  ;;  %v824_v1 = vrot.slane %v822_v40, 1 }
  0xb6   :  { %1378 = vmatmul.bf16.gmra.mxu0 %v9042_v44  ;;  %1458 = vmatmul.bf16.gmra.mxu2 %v9060_v49  ;;  %v608_v44 = vrot.slane %v606_v25, 1  ;;  %v827_v15 = vshll.u32 %v9884_v39, 16  ;;  %v130_v25 = vld [vmem:[%s13121_s0 + $0x170] sm:$0x1] }
  0xb7   :  { %13351 = vst [vmem:[#allocation38_spill] sm:$0xff] %v9861_v11  ;;  %1547 = vmatmul.bf16.gmra.mxu1 %v9869_v16  ;;  %v825_v48 = vor.u32 %v824_v1, %v820_v60 }
  0xb8   :  { %v609_v30 = vor.u32 %v608_v44, %v604_v58  ;;  %v829_v11 = vrot.slane %v827_v15, 1 }
  0xb9   :  { %1627 = vmatmul.bf16.gmra.mxu3 %v9872_v17  ;;  %v1419_v43 = vpop.f32.mrf.mxu2  ;;  %v613_v17 = vrot.slane %v611_v59, 1  ;;  %v9062_v59 = vld [vmem:[%s13121_s0 + $0x168] sm:$0xff] }
  0xba   :  { %v832_v14 = vshrl.u32 %v9062_v59, 16 }
  0xbb   :  { %v1341_v52 = vpop.f32.mrf.mxu0  ;;  %v9907_v44 = vsel %vm470_vm0, %v609_v30, %v613_v17 }
  0xbc   :  { %v1588_v45 = vpop.f32.mrf.mxu3  ;;  %v1510_v49 = vpop.f32.mrf.mxu1  ;;  %13357 = vst [vmem:[#allocation44_spill] sm:$0xff] %v9907_v44 }
  0xbd   :  { %v9886_v50 = vadd.f32 %v1588_v45, %v1419_v43  ;;  %v9891_v29 = vadd.f32 %v1510_v49, %v1341_v52  ;;  %v76_v43 = vld [vmem:[%s13121_s0 + $0x98] sm:$0x1]  ;;  %v9904_v52 = vld [vmem:[%s13121_s0 + $0x90] sm:$0xff]  ;;  %v9910_v49 = vsel %vm470_vm0, %v825_v48, %v829_v11  ;;  %v9109_v48 = vld [vmem:[%s13122_s1 + $0x148] sm:$0xff] }
  0xbe   :  { %13358 = vst [vmem:[#allocation45_spill] sm:$0xff] %v9910_v49  ;;  %v410_v60 = vunpack.c.l.b16 %v76_v43  ;;  %v618_v17 = vshll.u32 %v9904_v52, 16  ;;  %v9069_v11 = vld [vmem:[%s13122_s1 + $0x8] sm:$0xff]  ;;  %v834_v43 = vshll.u32 %v9062_v59, 16  ;;  %1669 = vmatpush.bf16.msrb.mxu2 %v9109_v48 }
  0xbf   :  { %13355 = vst [vmem:[#allocation42_spill] sm:$0xff] %v9886_v50  ;;  %1982 = vmatpush.bf16.msrb.mxu3 %v9069_v11  ;;  %v9077_v48 = vld [vmem:[%s13122_s1 + $0x48] sm:$0xff]  ;;  %v9090_v11 = vld [vmem:[%s13122_s1 + $0xb0] sm:$0xff] }
  0xc0   :  { %v9927_v15 = vpack.c.b16 %v410_v60, %v410_v60  ;;  %v836_v5 = vrot.slane %v834_v43, 1  ;;  %2151 = vmatpush.bf16.msrb.mxu0 %v9077_v48  ;;  %2315 = vmatpush.bf16.msrb.mxu1 %v9090_v11  ;;  %v133_v43 = vld [vmem:[%s13121_s0 + $0x17c] sm:$0x1] }
  0xc1   :  { %v1421_v8 = vpop.f32.mrf.mxu2 }
  0xc2   :  { %v623_v39 = vshll.u32 %v9927_v15, 16 }
  0xc3   :  { %v1344_v40 = vpop.f32.mrf.mxu0 }
  0xc4   :  { %v1590_v45 = vpop.f32.mrf.mxu3  ;;  %v1513_v58 = vpop.f32.mrf.mxu1 }
  0xc5   :  { %v9899_v50 = vadd.f32 %v1590_v45, %v1421_v8  ;;  %v428_v8 = vunpack.c.l.b16 %v130_v25  ;;  %v9915_v1 = vadd.f32 %v1513_v58, %v1344_v40  ;;  %v616_v58 = vshrl.u32 %v9904_v52, 16 }
  0xc6   :  { %1383 = vmatmul.bf16.gmra.mxu0 %v9866_v6  ;;  %1463 = vmatmul.bf16.gmra.mxu2 %v9061_v26 }
  0xc7   :  { %13356 = vst [vmem:[#allocation43_spill] sm:$0xff] %v9899_v50  ;;  %1552 = vmatmul.bf16.gmra.mxu1 %v9907_v44  ;;  %v9929_v30 = vpack.c.b16 %v428_v8, %v428_v8 }
  0xc9   :  { %1632 = vmatmul.bf16.gmra.mxu3 %v9910_v49  ;;  %13359 = vst [vmem:[#allocation46_spill] sm:$0xff] %v9929_v30  ;;  %v1424_v26 = vpop.f32.mrf.mxu2  ;;  %v620_v49 = vrot.slane %v618_v17, 1  ;;  %v839_v60 = vshll.u32 %v9929_v30, 16 }
  0xcb   :  { %v1346_v40 = vpop.f32.mrf.mxu0  ;;  %v621_v17 = vor.u32 %v620_v49, %v616_v58  ;;  %v9955_v49 = vld [vmem:[%s13121_s0 + $0x9c] sm:$0xff]  ;;  %v9063_v58 = vld [vmem:[%s13121_s0 + $0x174] sm:$0xff] }
  0xcc   :  { %v1593_v25 = vpop.f32.mrf.mxu3  ;;  %v1515_v50 = vpop.f32.mrf.mxu1  ;;  %v630_v11 = vshll.u32 %v9955_v49, 16  ;;  %v844_v38 = vshrl.u32 %v9063_v58, 16 }
  0xcd   :  { %v9931_v45 = vadd.f32 %v1593_v25, %v1424_v26  ;;  %v9936_v8 = vadd.f32 %v1515_v50, %v1346_v40  ;;  %v625_v26 = vrot.slane %v623_v39, 1  ;;  %v837_v25 = vor.u32 %v836_v5, %v832_v14  ;;  %v79_v50 = vld [vmem:[%s13121_s0 + $0xa4] sm:$0x1] }
  0xcf   :  { %13360 = vst [vmem:[#allocation47_spill] sm:$0xff] %v9931_v45  ;;  %v841_v45 = vrot.slane %v839_v60, 1  ;;  %v9958_v14 = vsel %vm470_vm0, %v621_v17, %v625_v26  ;;  %v411_v60 = vunpack.c.l.b16 %v79_v50  ;;  %v846_v26 = vshll.u32 %v9063_v58, 16 }
  0xd0   :  { %13362 = vst [vmem:[#allocation49_spill] sm:$0xff] %v9958_v14 }
  0xd1   :  { %v1426_v13 = vpop.f32.mrf.mxu2  ;;  %v9961_v39 = vsel %vm470_vm0, %v837_v25, %v841_v45  ;;  %v9972_v17 = vpack.c.b16 %v411_v60, %v411_v60 }
  0xd2   :  { %13363 = vst [vmem:[#allocation50_spill] sm:$0xff] %v9961_v39 }
  0xd3   :  { %v1349_v24 = vpop.f32.mrf.mxu0 }
  0xd4   :  { %v1595_v40 = vpop.f32.mrf.mxu3  ;;  %v1518_v5 = vpop.f32.mrf.mxu1 }
  0xd5   :  { %v9950_v30 = vadd.f32 %v1595_v40, %v1426_v13  ;;  %v429_v13 = vunpack.c.l.b16 %v133_v43  ;;  %v9966_v48 = vadd.f32 %v1518_v5, %v1349_v24  ;;  %v628_v43 = vshrl.u32 %v9955_v49, 16 }
  0xd6   :  { %1388 = vmatmul.bf16.gmra.mxu0 %v9904_v52  ;;  %1468 = vmatmul.bf16.gmra.mxu2 %v9062_v59  ;;  %v632_v5 = vrot.slane %v630_v11, 1  ;;  %v136_v11 = vld [vmem:[%s13121_s0 + $0x188] sm:$0x1] }
  0xd7   :  { %13361 = vst [vmem:[#allocation48_spill] sm:$0xff] %v9950_v30  ;;  %1557 = vmatmul.bf16.gmra.mxu1 %v9958_v14  ;;  %v9974_v45 = vpack.c.b16 %v429_v13, %v429_v13  ;;  %v635_v30 = vshll.u32 %v9972_v17, 16 }
  0xd8   :  { %v633_v13 = vor.u32 %v632_v5, %v628_v43 }
  0xd9   :  { %1637 = vmatmul.bf16.gmra.mxu3 %v9961_v39  ;;  %13364 = vst [vmem:[#allocation51_spill] sm:$0xff] %v9974_v45  ;;  %v1429_v25 = vpop.f32.mrf.mxu2  ;;  %v848_v39 = vrot.slane %v846_v26, 1  ;;  %v851_v54 = vshll.u32 %v9974_v45, 16  ;;  %v637_v0 = vrot.slane %v635_v30, 1 }
  0xdb   :  { %v1351_v24 = vpop.f32.mrf.mxu0  ;;  %v849_v21 = vor.u32 %v848_v39, %v844_v38  ;;  %v853_v32 = vrot.slane %v851_v54, 1  ;;  %v9997_v54 = vsel %vm470_vm0, %v633_v13, %v637_v0  ;;  %v9064_v39 = vld [vmem:[%s13121_s0 + $0x180] sm:$0xff] }
  0xdc   :  { %v1598_v40 = vpop.f32.mrf.mxu3  ;;  %v1520_v59 = vpop.f32.mrf.mxu1  ;;  %13367 = vst [vmem:[#allocation54_spill] sm:$0xff] %v9997_v54  ;;  %v856_v63 = vshrl.u32 %v9064_v39, 16 }
  0xdd   :  { %v9976_v50 = vadd.f32 %v1598_v40, %v1429_v25  ;;  %v9981_v60 = vadd.f32 %v1520_v59, %v1351_v24  ;;  %v82_v25 = vld [vmem:[%s13121_s0 + $0xb0] sm:$0x1]  ;;  %v9994_v24 = vld [vmem:[%s13121_s0 + $0xa8] sm:$0xff]  ;;  %v10000_v30 = vsel %vm470_vm0, %v849_v21, %v853_v32  ;;  %v9108_v21 = vld [vmem:[%s13122_s1 + $0x140] sm:$0xff] }
  0xde   :  { %13368 = vst [vmem:[#allocation55_spill] sm:$0xff] %v10000_v30  ;;  %v412_v43 = vunpack.c.l.b16 %v82_v25  ;;  %v642_v0 = vshll.u32 %v9994_v24, 16  ;;  %v9068_v32 = vld [vmem:[%s13122_s1] sm:$0xff]  ;;  %v858_v25 = vshll.u32 %v9064_v39, 16  ;;  %1670 = vmatpush.bf16.msrb.mxu2 %v9108_v21 }
  0xdf   :  { %13365 = vst [vmem:[#allocation52_spill] sm:$0xff] %v9976_v50  ;;  %1983 = vmatpush.bf16.msrb.mxu3 %v9068_v32  ;;  %v9076_v21 = vld [vmem:[%s13122_s1 + $0x40] sm:$0xff]  ;;  %v9089_v32 = vld [vmem:[%s13122_s1 + $0xa8] sm:$0xff] }
  0xe0   :  { %v10017_v59 = vpack.c.b16 %v412_v43, %v412_v43  ;;  %v860_v28 = vrot.slane %v858_v25, 1  ;;  %2152 = vmatpush.bf16.msrb.mxu0 %v9076_v21  ;;  %2316 = vmatpush.bf16.msrb.mxu1 %v9089_v32  ;;  %v139_v25 = vld [vmem:[%s13121_s0 + $0x194] sm:$0x1] }
  0xe1   :  { %v1431_v57 = vpop.f32.mrf.mxu2 }
  0xe2   :  { %v647_v45 = vshll.u32 %v10017_v59, 16 }
  0xe3   :  { %v1354_v26 = vpop.f32.mrf.mxu0 }
  0xe4   :  { %v1600_v40 = vpop.f32.mrf.mxu3  ;;  %v1523_v38 = vpop.f32.mrf.mxu1 }
  0xe5   :  { %v9989_v50 = vadd.f32 %v1600_v40, %v1431_v57  ;;  %v430_v57 = vunpack.c.l.b16 %v136_v11  ;;  %v10005_v5 = vadd.f32 %v1523_v38, %v1354_v26  ;;  %v640_v38 = vshrl.u32 %v9994_v24, 16 }
  0xe6   :  { %1393 = vmatmul.bf16.gmra.mxu0 %v9955_v49  ;;  %1473 = vmatmul.bf16.gmra.mxu2 %v9063_v58 }
  0xe7   :  { %13366 = vst [vmem:[#allocation53_spill] sm:$0xff] %v9989_v50  ;;  %1562 = vmatmul.bf16.gmra.mxu1 %v9997_v54  ;;  %v10019_v13 = vpack.c.b16 %v430_v57, %v430_v57 }
  0xe9   :  { %1642 = vmatmul.bf16.gmra.mxu3 %v10000_v30  ;;  %13369 = vst [vmem:[#allocation56_spill] sm:$0xff] %v10019_v13  ;;  %v1434_v58 = vpop.f32.mrf.mxu2  ;;  %v644_v30 = vrot.slane %v642_v0, 1  ;;  %v863_v43 = vshll.u32 %v10019_v13, 16 }
  0xeb   :  { %v1356_v26 = vpop.f32.mrf.mxu0  ;;  %v645_v0 = vor.u32 %v644_v30, %v640_v38  ;;  %v10045_v30 = vld [vmem:[%s13121_s0 + $0xb4] sm:$0xff]  ;;  %v9065_v38 = vld [vmem:[%s13121_s0 + $0x18c] sm:$0xff] }
  0xec   :  { %v1603_v11 = vpop.f32.mrf.mxu3  ;;  %v1525_v50 = vpop.f32.mrf.mxu1  ;;  %v654_v32 = vshll.u32 %v10045_v30, 16  ;;  %v868_v10 = vshrl.u32 %v9065_v38, 16 }
  0xed   :  { %v10021_v40 = vadd.f32 %v1603_v11, %v1434_v58  ;;  %v10026_v57 = vadd.f32 %v1525_v50, %v1356_v26  ;;  %v649_v58 = vrot.slane %v647_v45, 1  ;;  %v861_v11 = vor.u32 %v860_v28, %v856_v63  ;;  %v85_v50 = vld [vmem:[%s13121_s0 + $0xbc] sm:$0x1] }
  0xef   :  { %13370 = vst [vmem:[#allocation57_spill] sm:$0xff] %v10021_v40  ;;  %v865_v40 = vrot.slane %v863_v43, 1  ;;  %v10048_v63 = vsel %vm470_vm0, %v645_v0, %v649_v58  ;;  %v413_v43 = vunpack.c.l.b16 %v85_v50  ;;  %v870_v58 = vshll.u32 %v9065_v38, 16 }
  0xf0   :  { %13372 = vst [vmem:[#allocation59_spill] sm:$0xff] %v10048_v63 }
  0xf1   :  { %v1436_v37 = vpop.f32.mrf.mxu2  ;;  %v10051_v45 = vsel %vm470_vm0, %v861_v11, %v865_v40  ;;  %v10062_v0 = vpack.c.b16 %v413_v43, %v413_v43 }
  0xf2   :  { %13373 = vst [vmem:[#allocation60_spill] sm:$0xff] %v10051_v45 }
  0xf3   :  { %v1359_v4 = vpop.f32.mrf.mxu0  ;;  %13374 = vst [vmem:[#allocation61_spill] sm:$0xff] %v10062_v0 }
  0xf4   :  { %v1605_v26 = vpop.f32.mrf.mxu3  ;;  %v1528_v28 = vpop.f32.mrf.mxu1 }
  0xf5   :  { %v10040_v13 = vadd.f32 %v1605_v26, %v1436_v37  ;;  %v431_v37 = vunpack.c.l.b16 %v139_v25  ;;  %v10056_v21 = vadd.f32 %v1528_v28, %v1359_v4  ;;  %v652_v25 = vshrl.u32 %v10045_v30, 16 }
  0xf6   :  { %1398 = vmatmul.bf16.gmra.mxu0 %v9994_v24  ;;  %1478 = vmatmul.bf16.gmra.mxu2 %v9064_v39  ;;  %v656_v28 = vrot.slane %v654_v32, 1  ;;  %v88_v32 = vld [vmem:[%s13121_s0 + $0xc8] sm:$0x1] }
  0xf7   :  { %13371 = vst [vmem:[#allocation58_spill] sm:$0xff] %v10040_v13  ;;  %1567 = vmatmul.bf16.gmra.mxu1 %v10048_v63  ;;  %v10064_v40 = vpack.c.b16 %v431_v37, %v431_v37  ;;  %v659_v13 = vshll.u32 %v10062_v0, 16  ;;  %v9088_v37 = vld [vmem:[%s13122_s1 + $0xa0] sm:$0xff] }
  0xf8   :  { %2317 = vmatpush.bf16.msrb.mxu1 %v9088_v37  ;;  %v414_v37 = vunpack.c.l.b16 %v88_v32 }
  0xf9   :  { %1647 = vmatmul.bf16.gmra.mxu3 %v10051_v45  ;;  %13375 = vst [vmem:[#allocation62_spill] sm:$0xff] %v10064_v40  ;;  %v1439_v11 = vpop.f32.mrf.mxu2  ;;  %v872_v45 = vrot.slane %v870_v58, 1  ;;  %v875_v42 = vshll.u32 %v10064_v40, 16  ;;  %v142_v58 = vld [vmem:[%s13121_s0 + $0x1a0] sm:$0x1] }
  0xfa   :  { %v10116_v32 = vpack.c.b16 %v414_v37, %v414_v37 }
  0xfb   :  { %v1361_v4 = vpop.f32.mrf.mxu0  ;;  %v877_v51 = vrot.slane %v875_v42, 1  ;;  %v10090_v42 = vld [vmem:[%s13121_s0 + $0xc0] sm:$0xff] }
  0xfc   :  { %v1608_v26 = vpop.f32.mrf.mxu3  ;;  %v1530_v39 = vpop.f32.mrf.mxu1  ;;  %13379 = vst [vmem:[#allocation66_spill] sm:$0xff] %v10090_v42 }
  0xfd   :  { %v10066_v50 = vadd.f32 %v1608_v26, %v1439_v11  ;;  %v10071_v43 = vadd.f32 %v1530_v39, %v1361_v4  ;;  %v657_v11 = vor.u32 %v656_v28, %v652_v25  ;;  %v661_v26 = vrot.slane %v659_v13, 1  ;;  %v9087_v39 = vld [vmem:[%s13122_s1 + $0x98] sm:$0xff]  ;;  %13383 = vst [vmem:[#allocation70_spill] sm:$0xff] %v10116_v32 }
  0xfe   :  { %v9066_v28 = vld [vmem:[%s13121_s0 + $0x198] sm:$0xff]  ;;  %2318 = vmatpush.bf16.msrb.mxu1 %v9087_v39 }
  0xff   :  { %13376 = vst [vmem:[#allocation63_spill] sm:$0xff] %v10066_v50  ;;  %v873_v50 = vor.u32 %v872_v45, %v868_v10  ;;  %v10093_v13 = vsel %vm470_vm0, %v657_v11, %v661_v26  ;;  %v9086_v11 = vld [vmem:[%s13122_s1 + $0x90] sm:$0xff]  ;;  %v9131_v26 = vld [vmem:[%s13122_s1 + $0x1f8] sm:$0xff]  ;;  %v880_v63 = vshrl.u32 %v9066_v28, 16 }
 0x100   :  { %13377 = vst [vmem:[#allocation64_spill] sm:$0xff] %v10071_v43  ;;  %2845 = vmatpush.bf16.msra.mxu3 %v9131_v26  ;;  %v9139_v26 = vld [vmem:[%s13122_s1 + $0x238] sm:$0xff] }
 0x101   :  { %v1441_v20 = vpop.f32.mrf.mxu2  ;;  %13380 = vst [vmem:[#allocation67_spill] sm:$0xff] %v10093_v13  ;;  %v10096_v45 = vsel %vm470_vm0, %v873_v50, %v877_v51  ;;  %v666_v51 = vshll.u32 %v10090_v42, 16  ;;  %v9123_v50 = vld [vmem:[%s13122_s1 + $0x1b8] sm:$0xff]  ;;  %3014 = vmatpush.bf16.msra.mxu0 %v9139_v26 }
 0x102   :  { %13381 = vst [vmem:[#allocation68_spill] sm:$0xff] %v10096_v45  ;;  %2319 = vmatpush.bf16.msrb.mxu1 %v9086_v11  ;;  %2676 = vmatpush.bf16.msra.mxu2 %v9123_v50 }
 0x103   :  { %v1364_v25 = vpop.f32.mrf.mxu0 }
 0x104   :  { %v1610_v4 = vpop.f32.mrf.mxu3  ;;  %v1533_v10 = vpop.f32.mrf.mxu1 }
 0x105   :  { %v10085_v40 = vadd.f32 %v1610_v4, %v1441_v20  ;;  %v432_v20 = vunpack.c.l.b16 %v142_v58  ;;  %v10101_v4 = vadd.f32 %v1533_v10, %v1364_v25  ;;  %v882_v58 = vshll.u32 %v9066_v28, 16  ;;  %v9085_v10 = vld [vmem:[%s13122_s1 + $0x88] sm:$0xff] }
 0x106   :  { %1403 = vmatmul.bf16.gmra.mxu0 %v10045_v30  ;;  %1483 = vmatmul.bf16.gmra.mxu2 %v9065_v38 }
 0x107   :  { %13378 = vst [vmem:[#allocation65_spill] sm:$0xff] %v10085_v40  ;;  %1572 = vmatmul.bf16.gmra.mxu1 %v10093_v13  ;;  %v10118_v38 = vpack.c.b16 %v432_v20, %v432_v20  ;;  %v664_v13 = vshrl.u32 %v10090_v42, 16  ;;  %v671_v20 = vshll.u32 %v10116_v32, 16  ;;  %v884_v43 = vrot.slane %v882_v58, 1  ;;  %v40_v58 = vld [vmem:[%s13121_s0 + $0x8] sm:$0x1] }
 0x108   :  { %13382 = vst [vmem:[#allocation69_spill] sm:$0xff] %v10101_v4  ;;  %v668_v4 = vrot.slane %v666_v51, 1  ;;  %2320 = vmatpush.bf16.msrb.mxu1 %v9085_v10  ;;  %v398_v0 = vunpack.c.l.b16 %v40_v58 }
 0x109   :  { %1652 = vmatmul.bf16.gmra.mxu3 %v10096_v45  ;;  %13384 = vst [vmem:[#allocation71_spill] sm:$0xff] %v10118_v38  ;;  %v1444_v39 = vpop.f32.mrf.mxu2  ;;  %v887_v11 = vshll.u32 %v10118_v38, 16 }
 0x10a   :  { %v669_v51 = vor.u32 %v668_v4, %v664_v13  ;;  %v434_v4 = vpack.c.b16 %v398_v0, %v398_v0 }
 0x10b   :  { %v1366_v40 = vpop.f32.mrf.mxu0  ;;  %v889_v32 = vrot.slane %v887_v11, 1 }
 0x10c   :  { %v1613_v25 = vpop.f32.mrf.mxu3  ;;  %v1535_v37 = vpop.f32.mrf.mxu1 }
 0x10d   :  { %v10123_v45 = vadd.f32 %v1613_v25, %v1444_v39  ;;  %v10128_v50 = vadd.f32 %v1535_v37, %v1366_v40  ;;  %v9084_v39 = vld [vmem:[%s13122_s1 + $0x80] sm:$0xff]  ;;  %v673_v25 = vrot.slane %v671_v20, 1 }
 0x10e   :  { %2321 = vmatpush.bf16.msrb.mxu1 %v9084_v39 }
 0x10f   :  { %13385 = vst [vmem:[#allocation72_spill] sm:$0xff] %v10123_v45  ;;  %v885_v45 = vor.u32 %v884_v43, %v880_v63  ;;  %v10145_v13 = vsel %vm470_vm0, %v669_v51, %v673_v25 }
 0x110   :  { %13386 = vst [vmem:[#allocation73_spill] sm:$0xff] %v10128_v50  ;;  %v9032_v50 = vld [vmem:[%s13121_s0] sm:$0xff] }
 0x111   :  { %v1446_v40 = vpop.f32.mrf.mxu2  ;;  %13388 = vst [vmem:[#allocation75_spill] sm:$0xff] %v10145_v13  ;;  %v10148_v63 = vsel %vm470_vm0, %v885_v45, %v889_v32  ;;  %v474_v20 = vshll.u32 %v9032_v50, 16  ;;  %v472_v25 = vshrl.u32 %v9032_v50, 16  ;;  %v479_v45 = vshll.u32 %v434_v4, 16 }
 0x112   :  { %13389 = vst [vmem:[#allocation76_spill] sm:$0xff] %v10148_v63 }
 0x113   :  { %v1369_v38 = vpop.f32.mrf.mxu0 }
 0x114   :  { %v1615_v10 = vpop.f32.mrf.mxu3  ;;  %v1538_v26 = vpop.f32.mrf.mxu1 }
 0x115   :  { %v10139_v37 = vadd.f32 %v1615_v10, %v1446_v40  ;;  %v10150_v43 = vadd.f32 %v1538_v26, %v1369_v38  ;;  %v476_v40 = vrot.slane %v474_v20, 1  ;;  %v944_v26 = vrot.slane %v9540_v18, 1 }
 0x116   :  { %1408 = vmatmul.bf16.gmra.mxu0 %v10090_v42  ;;  %1488 = vmatmul.bf16.gmra.mxu2 %v9066_v28  ;;  %v9273_v28 = vld [vmem:[%s13121_s0 + $0xc] sm:$0xff] }
 0x117   :  { %13387 = vst [vmem:[#allocation74_spill] sm:$0xff] %v10139_v37  ;;  %1577 = vmatmul.bf16.gmra.mxu1 %v10145_v13  ;;  %v943_v10 = vrot.slane %v9273_v28, 1  ;;  %v477_v0 = vor.u32 %v476_v40, %v472_v25  ;;  %v940_v13 = vrot.slane %v9032_v50, 1 }
 0x118   :  { %13390 = vst [vmem:[#allocation77_spill] sm:$0xff] %v10150_v43 }
 0x119   :  { %1657 = vmatmul.bf16.gmra.mxu3 %v10148_v63  ;;  %v1449_v11 = vpop.f32.mrf.mxu2  ;;  %v481_v63 = vrot.slane %v479_v45, 1 }
 0x11b   :  { %v1371_v51 = vpop.f32.mrf.mxu0 }
 0x11c   :  { %v1618_v39 = vpop.f32.mrf.mxu3  ;;  %v1540_v32 = vpop.f32.mrf.mxu1 }
 0x11d   :  { %v10155_v58 = vadd.f32 %v1618_v39, %v1449_v11  ;;  %v10157_v38 = vadd.f32 %v1540_v32, %v1371_v51  ;;  %v941_v11 = vrot.slane %v434_v4, 1  ;;  %v945_v51 = vsel %vm939_vm1, %v943_v10, %v944_v26 }
 0x11e   :  { %v482_v32 = vsel %vm470_vm0, %v477_v0, %v481_v63  ;;  %v9274_v63 = vld [vmem:[%s13121_s0 + $0x18] sm:$0xff] }
 0x11f   :  { %13391 = vst [vmem:[#allocation78_spill] sm:$0xff] %v10155_v58  ;;  %v942_v43 = vsel %vm939_vm1, %v940_v13, %v941_v11  ;;  %v946_v10 = vrot.slane %v9274_v63, 1  ;;  %v947_v13 = vrot.slane %v9587_v47, 1 }
 0x120   :  { %13392 = vst [vmem:[#allocation79_spill] sm:$0xff] %v10157_v38 }
 0x121   :  { %v1451_v39 = vpop.f32.mrf.mxu2 }
 0x123   :  { %v1374_v20 = vpop.f32.mrf.mxu0 }
 0x124   :  { %v1620_v58 = vpop.f32.mrf.mxu3  ;;  %v1543_v38 = vpop.f32.mrf.mxu1 }
 0x125   :  { %v10163_v37 = vadd.f32 %v1620_v58, %v1451_v39  ;;  %v10168_v42 = vadd.f32 %v1543_v38, %v1374_v20 }
 0x126   :  { %1671 = vmatmul.bf16.vlgmr.msrb.gmra.mxu2 %v945_v51  ;;  %2153 = vmatmul.bf16.vlgmr.msrb.gmra.mxu0 %v482_v32 }
 0x127   :  { %2322 = vmatmul.bf16.vlgmr.msrb.gmra.mxu1 %v942_v43  ;;  %v10181_v43 = vsel %vm939_vm1, %v946_v10, %v947_v13  ;;  %v950_v13 = vrot.slane %v9622_v9, 1  ;;  %v9122_v9 = vld [vmem:[%s13122_s1 + $0x1b0] sm:$0xff] }
 0x128   :  { %2677 = vmatpush.bf16.msra.mxu2 %v9122_v9 }
 0x129   :  { %1984 = vmatmul.bf16.vlgmr.msrb.gmra.mxu3 %v9032_v50  ;;  %v1454_v18 = vpop.f32.mrf.mxu2 }
 0x12b   :  { %v1376_v58 = vpop.f32.mrf.mxu0 }
 0x12c   :  { %v1623_v4 = vpop.f32.mrf.mxu3  ;;  %v1545_v40 = vpop.f32.mrf.mxu1 }
 0x12d   :  { %v10170_v25 = vadd.f32 %v1623_v4, %v1454_v18  ;;  %v10172_v45 = vadd.f32 %v1545_v40, %v1376_v58  ;;  %v9275_v40 = vld [vmem:[%s13121_s0 + $0x24] sm:$0xff] }
 0x12e   :  { %v949_v10 = vrot.slane %v9275_v40, 1 }
 0x12f   :  { %13393 = vst [vmem:[#allocation80_spill] sm:$0xff] %v10170_v25 }
 0x131   :  { %v1456_v38 = vpop.f32.mrf.mxu2 }
 0x133   :  { %v1379_v50 = vpop.f32.mrf.mxu0 }
 0x134   :  { %v1625_v26 = vpop.f32.mrf.mxu3  ;;  %v1548_v11 = vpop.f32.mrf.mxu1 }
 0x135   :  { %v10178_v0 = vadd.f32 %v1625_v26, %v1456_v38  ;;  %v10183_v39 = vadd.f32 %v1548_v11, %v1379_v50 }
 0x136   :  { %1676 = vmatmul.bf16.gmra.mxu2 %v10181_v43  ;;  %2158 = vmatmul.bf16.gmra.mxu0 %v9571_v41  ;;  %v953_v41 = vrot.slane %v9657_v36, 1 }
 0x137   :  { %13394 = vst [vmem:[#allocation81_spill] sm:$0xff] %v10178_v0  ;;  %2327 = vmatmul.bf16.gmra.mxu1 %v945_v51  ;;  %v10198_v51 = vsel %vm939_vm1, %v949_v10, %v950_v13 }
 0x138   :  { %13397 = vst [vmem:[#allocation84_spill] sm:$0xff] %v10198_v51 }
 0x139   :  { %1989 = vmatmul.bf16.gmra.mxu3 %v9273_v28  ;;  %v1459_v20 = vpop.f32.mrf.mxu2 }
 0x13b   :  { %v1381_v18 = vpop.f32.mrf.mxu0 }
 0x13c   :  { %v1628_v32 = vpop.f32.mrf.mxu3  ;;  %v1550_v4 = vpop.f32.mrf.mxu1 }
 0x13d   :  { %v10187_v47 = vadd.f32 %v1628_v32, %v1459_v20  ;;  %v10189_v58 = vadd.f32 %v1550_v4, %v1381_v18  ;;  %v9130_v32 = vld [vmem:[%s13122_s1 + $0x1f0] sm:$0xff] }
 0x13e   :  { %2846 = vmatpush.bf16.msra.mxu3 %v9130_v32 }
 0x13f   :  { %13395 = vst [vmem:[#allocation82_spill] sm:$0xff] %v10187_v47 }
 0x141   :  { %v1461_v38 = vpop.f32.mrf.mxu2 }
 0x143   :  { %v1384_v28 = vpop.f32.mrf.mxu0 }
 0x144   :  { %v1630_v26 = vpop.f32.mrf.mxu3  ;;  %v1553_v11 = vpop.f32.mrf.mxu1 }
 0x145   :  { %v10195_v50 = vadd.f32 %v1630_v26, %v1461_v38  ;;  %v10200_v20 = vadd.f32 %v1553_v11, %v1384_v28  ;;  %v9276_v28 = vld [vmem:[%s13121_s0 + $0x30] sm:$0xff] }
 0x146   :  { %1681 = vmatmul.bf16.gmra.mxu2 %v10198_v51  ;;  %2163 = vmatmul.bf16.gmra.mxu0 %v9612_v3  ;;  %v952_v11 = vrot.slane %v9276_v28, 1 }
 0x147   :  { %13396 = vst [vmem:[#allocation83_spill] sm:$0xff] %v10195_v50  ;;  %2332 = vmatmul.bf16.gmra.mxu1 %v10181_v43 }
 0x149   :  { %1994 = vmatmul.bf16.gmra.mxu3 %v9274_v63  ;;  %v1464_v18 = vpop.f32.mrf.mxu2  ;;  %v9138_v63 = vld [vmem:[%s13122_s1 + $0x230] sm:$0xff] }
 0x14a   :  { %3015 = vmatpush.bf16.msra.mxu0 %v9138_v63 }
 0x14b   :  { %v1386_v13 = vpop.f32.mrf.mxu0 }
 0x14c   :  { %v1633_v4 = vpop.f32.mrf.mxu3  ;;  %v1555_v38 = vpop.f32.mrf.mxu1 }
 0x14d   :  { %v10211_v10 = vadd.f32 %v1633_v4, %v1464_v18  ;;  %v10213_v26 = vadd.f32 %v1555_v38, %v1386_v13  ;;  %v10225_v13 = vsel %vm939_vm1, %v952_v11, %v953_v41  ;;  %v9277_v41 = vld [vmem:[%s13121_s0 + $0x3c] sm:$0xff] }
 0x14e   :  { %13400 = vst [vmem:[#allocation87_spill] sm:$0xff] %v10225_v13  ;;  %v955_v11 = vrot.slane %v9277_v41, 1 }
 0x14f   :  { %13398 = vst [vmem:[#allocation85_spill] sm:$0xff] %v10211_v10 }
 0x151   :  { %v1466_v9 = vpop.f32.mrf.mxu2 }
 0x153   :  { %v1389_v4 = vpop.f32.mrf.mxu0 }
 0x154   :  { %v1635_v32 = vpop.f32.mrf.mxu3  ;;  %v1558_v38 = vpop.f32.mrf.mxu1 }
 0x155   :  { %v10222_v18 = vadd.f32 %v1635_v32, %v1466_v9  ;;  %v10227_v10 = vadd.f32 %v1558_v38, %v1389_v4  ;;  %v956_v4 = vrot.slane %v9683_v62, 1 }
 0x156   :  { %1686 = vmatmul.bf16.gmra.mxu2 %v10225_v13  ;;  %2168 = vmatmul.bf16.gmra.mxu0 %v9638_v27 }
 0x157   :  { %13399 = vst [vmem:[#allocation86_spill] sm:$0xff] %v10222_v18  ;;  %2337 = vmatmul.bf16.gmra.mxu1 %v10198_v51  ;;  %v10243_v51 = vsel %vm939_vm1, %v955_v11, %v956_v4  ;;  %v959_v4 = vrot.slane %v9718_v31, 1 }
 0x158   :  { %13403 = vst [vmem:[#allocation90_spill] sm:$0xff] %v10243_v51 }
 0x159   :  { %1999 = vmatmul.bf16.gmra.mxu3 %v9275_v40  ;;  %v1469_v36 = vpop.f32.mrf.mxu2 }
 0x15b   :  { %v1391_v9 = vpop.f32.mrf.mxu0 }
 0x15c   :  { %v1638_v63 = vpop.f32.mrf.mxu3  ;;  %v1560_v32 = vpop.f32.mrf.mxu1 }
 0x15d   :  { %v10232_v50 = vadd.f32 %v1638_v63, %v1469_v36  ;;  %v10234_v18 = vadd.f32 %v1560_v32, %v1391_v9 }
 0x15f   :  { %13401 = vst [vmem:[#allocation88_spill] sm:$0xff] %v10232_v50 }
 0x161   :  { %v1471_v38 = vpop.f32.mrf.mxu2 }
 0x163   :  { %v1394_v27 = vpop.f32.mrf.mxu0 }
 0x164   :  { %v1640_v47 = vpop.f32.mrf.mxu3  ;;  %v1563_v36 = vpop.f32.mrf.mxu1 }
 0x165   :  { %v10240_v40 = vadd.f32 %v1640_v47, %v1471_v38  ;;  %v10245_v63 = vadd.f32 %v1563_v36, %v1394_v27  ;;  %v9278_v27 = vld [vmem:[%s13121_s0 + $0x48] sm:$0xff] }
 0x166   :  { %1691 = vmatmul.bf16.gmra.mxu2 %v10243_v51  ;;  %2173 = vmatmul.bf16.gmra.mxu0 %v9673_v56  ;;  %v958_v11 = vrot.slane %v9278_v27, 1 }
 0x167   :  { %13402 = vst [vmem:[#allocation89_spill] sm:$0xff] %v10240_v40  ;;  %2342 = vmatmul.bf16.gmra.mxu1 %v10225_v13 }
 0x168   :  { %v10261_v13 = vsel %vm939_vm1, %v958_v11, %v959_v4  ;;  %v962_v4 = vrot.slane %v9744_v61, 1  ;;  %v9121_v61 = vld [vmem:[%s13122_s1 + $0x1a8] sm:$0xff] }
 0x169   :  { %2004 = vmatmul.bf16.gmra.mxu3 %v9276_v28  ;;  %v1474_v9 = vpop.f32.mrf.mxu2  ;;  %13406 = vst [vmem:[#allocation93_spill] sm:$0xff] %v10261_v13  ;;  %2678 = vmatpush.bf16.msra.mxu2 %v9121_v61  ;;  %v965_v61 = vrot.slane %v9776_v35, 1 }
 0x16b   :  { %v1396_v47 = vpop.f32.mrf.mxu0 }
 0x16c   :  { %v1643_v62 = vpop.f32.mrf.mxu3  ;;  %v1565_v38 = vpop.f32.mrf.mxu1 }
 0x16d   :  { %v10250_v32 = vadd.f32 %v1643_v62, %v1474_v9  ;;  %v10252_v40 = vadd.f32 %v1565_v38, %v1396_v47 }
 0x16f   :  { %13404 = vst [vmem:[#allocation91_spill] sm:$0xff] %v10250_v32 }
 0x171   :  { %v1476_v36 = vpop.f32.mrf.mxu2 }
 0x173   :  { %v1399_v56 = vpop.f32.mrf.mxu0 }
 0x174   :  { %v1645_v50 = vpop.f32.mrf.mxu3  ;;  %v1568_v9 = vpop.f32.mrf.mxu1 }
 0x175   :  { %v10258_v28 = vadd.f32 %v1645_v50, %v1476_v36  ;;  %v10263_v62 = vadd.f32 %v1568_v9, %v1399_v56  ;;  %v9279_v56 = vld [vmem:[%s13121_s0 + $0x54] sm:$0xff] }
 0x176   :  { %1696 = vmatmul.bf16.gmra.mxu2 %v10261_v13  ;;  %2178 = vmatmul.bf16.gmra.mxu0 %v9699_v19  ;;  %v961_v11 = vrot.slane %v9279_v56, 1 }
 0x177   :  { %13405 = vst [vmem:[#allocation92_spill] sm:$0xff] %v10258_v28  ;;  %2347 = vmatmul.bf16.gmra.mxu1 %v10243_v51 }
 0x178   :  { %v10279_v51 = vsel %vm939_vm1, %v961_v11, %v962_v4 }
 0x179   :  { %2009 = vmatmul.bf16.gmra.mxu3 %v9277_v41  ;;  %v1479_v47 = vpop.f32.mrf.mxu2  ;;  %13409 = vst [vmem:[#allocation96_spill] sm:$0xff] %v10279_v51 }
 0x17b   :  { %v1401_v50 = vpop.f32.mrf.mxu0 }
 0x17c   :  { %v1648_v31 = vpop.f32.mrf.mxu3  ;;  %v1570_v36 = vpop.f32.mrf.mxu1 }
 0x17d   :  { %v10268_v38 = vadd.f32 %v1648_v31, %v1479_v47  ;;  %v10270_v28 = vadd.f32 %v1570_v36, %v1401_v50 }
 0x17f   :  { %13407 = vst [vmem:[#allocation94_spill] sm:$0xff] %v10268_v38 }
 0x181   :  { %v1481_v9 = vpop.f32.mrf.mxu2 }
 0x183   :  { %v1404_v19 = vpop.f32.mrf.mxu0 }
 0x184   :  { %v1650_v32 = vpop.f32.mrf.mxu3  ;;  %v1573_v47 = vpop.f32.mrf.mxu1 }
 0x185   :  { %v10276_v41 = vadd.f32 %v1650_v32, %v1481_v9  ;;  %v10281_v31 = vadd.f32 %v1573_v47, %v1404_v19  ;;  %v9129_v32 = vld [vmem:[%s13122_s1 + $0x1e8] sm:$0xff]  ;;  %v9280_v47 = vld [vmem:[%s13121_s0 + $0x60] sm:$0xff] }
 0x186   :  { %1701 = vmatmul.bf16.gmra.mxu2 %v10279_v51  ;;  %2183 = vmatmul.bf16.gmra.mxu0 %v9734_v53 }
 0x187   :  { %13408 = vst [vmem:[#allocation95_spill] sm:$0xff] %v10276_v41  ;;  %2352 = vmatmul.bf16.gmra.mxu1 %v10261_v13  ;;  %2847 = vmatpush.bf16.msra.mxu3 %v9129_v32  ;;  %v964_v41 = vrot.slane %v9280_v47, 1 }
 0x189   :  { %2014 = vmatmul.bf16.gmra.mxu3 %v9278_v27  ;;  %v1484_v50 = vpop.f32.mrf.mxu2  ;;  %v9137_v27 = vld [vmem:[%s13122_s1 + $0x228] sm:$0xff] }
 0x18a   :  { %3016 = vmatpush.bf16.msra.mxu0 %v9137_v27 }
 0x18b   :  { %v1406_v11 = vpop.f32.mrf.mxu0 }
 0x18c   :  { %v1653_v19 = vpop.f32.mrf.mxu3  ;;  %v1575_v4 = vpop.f32.mrf.mxu1 }
 0x18d   :  { %v10292_v36 = vadd.f32 %v1653_v19, %v1484_v50  ;;  %v10297_v9 = vadd.f32 %v1575_v4, %v1406_v11 }
 0x18f   :  { %13410 = vst [vmem:[#allocation97_spill] sm:$0xff] %v10292_v36  ;;  %v10306_v36 = vsel %vm939_vm1, %v964_v41, %v965_v61  ;;  %v968_v61 = vrot.slane %v9805_v12, 1 }
 0x190   :  { %13412 = vst [vmem:[#allocation99_spill] sm:$0xff] %v10306_v36 }
 0x191   :  { %v1486_v32 = vpop.f32.mrf.mxu2 }
 0x193   :  { %v1409_v19 = vpop.f32.mrf.mxu0 }
 0x194   :  { %v1655_v38 = vpop.f32.mrf.mxu3  ;;  %v1578_v53 = vpop.f32.mrf.mxu1 }
 0x195   :  { %v10303_v50 = vadd.f32 %v1655_v38, %v1486_v32  ;;  %v10308_v13 = vadd.f32 %v1578_v53, %v1409_v19  ;;  %v9281_v53 = vld [vmem:[%s13121_s0 + $0x6c] sm:$0xff] }
 0x196   :  { %1706 = vmatmul.bf16.gmra.mxu2 %v10306_v36  ;;  %2188 = vmatmul.bf16.gmra.mxu0 %v9760_v23  ;;  %v967_v41 = vrot.slane %v9281_v53, 1 }
 0x197   :  { %13411 = vst [vmem:[#allocation98_spill] sm:$0xff] %v10303_v50  ;;  %2357 = vmatmul.bf16.gmra.mxu1 %v10279_v51 }
 0x198   :  { %v10324_v51 = vsel %vm939_vm1, %v967_v41, %v968_v61  ;;  %v9282_v41 = vld [vmem:[%s13121_s0 + $0x78] sm:$0xff] }
 0x199   :  { %2019 = vmatmul.bf16.gmra.mxu3 %v9279_v56  ;;  %v1489_v11 = vpop.f32.mrf.mxu2  ;;  %v970_v61 = vrot.slane %v9282_v41, 1 }
 0x19b   :  { %v1411_v38 = vpop.f32.mrf.mxu0 }
 0x19c   :  { %v1658_v35 = vpop.f32.mrf.mxu3  ;;  %v1580_v27 = vpop.f32.mrf.mxu1 }
 0x19d   :  { %v10313_v4 = vadd.f32 %v1658_v35, %v1489_v11  ;;  %v10315_v32 = vadd.f32 %v1580_v27, %v1411_v38 }
 0x19f   :  { %13413 = vst [vmem:[#allocation100_spill] sm:$0xff] %v10313_v4 }
 0x1a1   :  { %v1491_v19 = vpop.f32.mrf.mxu2 }
 0x1a3   :  { %v2154_v23 = vpop.f32.mrf.mxu0 }
 0x1a4   :  { %v1660_v50 = vpop.f32.mrf.mxu3  ;;  %v2323_v11 = vpop.f32.mrf.mxu1 }
 0x1a5   :  { %v10321_v56 = vadd.f32 %v1660_v50, %v1491_v19 }
 0x1a6   :  { %1711 = vmatmul.bf16.gmra.mxu2 %v10324_v51  ;;  %2193 = vmatmul.bf16.gmra.mxu0 %v9795_v2 }
 0x1a7   :  { %13414 = vst [vmem:[#allocation101_spill] sm:$0xff] %v10321_v56  ;;  %2362 = vmatmul.bf16.gmra.mxu1 %v10306_v36  ;;  %v971_v56 = vrot.slane %v9839_v7, 1 }
 0x1a9   :  { %2024 = vmatmul.bf16.gmra.mxu3 %v9280_v47  ;;  %v1672_v35 = vpop.f32.mrf.mxu2  ;;  %v9207_v47 = vld [vmem:[#allocation3 + $0xf8] sm:$0xff] }
 0x1aa   :  { %v1673_v38 = vadd.f32 %v1672_v35, %v9829_v55  ;;  %5807 = vmatpush.bf16.msra.mxu1 %v9207_v47  ;;  %v10338_v35 = vsel %vm939_vm1, %v970_v61, %v971_v56 }
 0x1ab   :  { %v2156_v27 = vpop.f32.mrf.mxu0 }
 0x1ac   :  { %v1985_v12 = vpop.f32.mrf.mxu3  ;;  %v2325_v50 = vpop.f32.mrf.mxu1 }
 0x1ad   :  { %v1986_v4 = vadd.f32 %v1985_v12, %v1673_v38 }
 0x1af   :  { %v2155_v19 = vadd.f32 %v2154_v23, %v1986_v4 }
 0x1b1   :  { %v10334_v0 = vadd.f32 %v2323_v11, %v2155_v19  ;;  %v1674_v2 = vpop.f32.mrf.mxu2 }
 0x1b2   :  { %v1675_v36 = vadd.f32 %v1674_v2, %v9847_v33 }
 0x1b3   :  { %v2159_v55 = vpop.f32.mrf.mxu0 }
 0x1b4   :  { %v1987_v25 = vpop.f32.mrf.mxu3  ;;  %v2328_v4 = vpop.f32.mrf.mxu1 }
 0x1b5   :  { %v1988_v23 = vadd.f32 %v1987_v25, %v1675_v36  ;;  %v973_v25 = vrot.slane %v9866_v6, 1  ;;  %v974_v36 = vrot.slane %v9882_v34, 1  ;;  %v9120_v6 = vld [vmem:[%s13122_s1 + $0x1a0] sm:$0xff] }
 0x1b6   :  { %1716 = vmatmul.bf16.gmra.mxu2 %v10338_v35  ;;  %2198 = vmatmul.bf16.gmra.mxu0 %v9821_v46  ;;  %v9128_v34 = vld [vmem:[%s13122_s1 + $0x1e0] sm:$0xff] }
 0x1b7   :  { %v2157_v38 = vadd.f32 %v2156_v27, %v1988_v23  ;;  %2367 = vmatmul.bf16.gmra.mxu1 %v10324_v51  ;;  %2679 = vmatpush.bf16.msra.mxu2 %v9120_v6 }
 0x1b8   :  { %2848 = vmatpush.bf16.msra.mxu3 %v9128_v34 }
 0x1b9   :  { %2029 = vmatmul.bf16.gmra.mxu3 %v9281_v53  ;;  %v10343_v7 = vadd.f32 %v2325_v50, %v2157_v38  ;;  %v1677_v11 = vpop.f32.mrf.mxu2  ;;  %v10352_v38 = vsel %vm939_vm1, %v973_v25, %v974_v36  ;;  %v976_v36 = vrot.slane %v9904_v52, 1  ;;  %v9283_v52 = vld [vmem:[%s13121_s0 + $0x84] sm:$0xff] }
 0x1ba   :  { %v1678_v2 = vadd.f32 %v1677_v11, %v9877_v22 }
 0x1bb   :  { %v2161_v12 = vpop.f32.mrf.mxu0 }
 0x1bc   :  { %v1990_v33 = vpop.f32.mrf.mxu3  ;;  %v2330_v56 = vpop.f32.mrf.mxu1 }
 0x1bd   :  { %v1991_v19 = vadd.f32 %v1990_v33, %v1678_v2 }
 0x1bf   :  { %v2160_v61 = vadd.f32 %v2159_v55, %v1991_v19 }
 0x1c1   :  { %v10348_v47 = vadd.f32 %v2328_v4, %v2160_v61  ;;  %v1679_v27 = vpop.f32.mrf.mxu2  ;;  %v9136_v61 = vld [vmem:[%s13122_s1 + $0x220] sm:$0xff] }
 0x1c2   :  { %v1680_v53 = vadd.f32 %v1679_v27, %v9891_v29  ;;  %3017 = vmatpush.bf16.msra.mxu0 %v9136_v61 }
 0x1c3   :  { %v2164_v50 = vpop.f32.mrf.mxu0 }
 0x1c4   :  { %v1992_v23 = vpop.f32.mrf.mxu3  ;;  %v2333_v11 = vpop.f32.mrf.mxu1 }
 0x1c5   :  { %v1993_v22 = vadd.f32 %v1992_v23, %v1680_v53 }
 0x1c6   :  { %1721 = vmatmul.bf16.gmra.mxu2 %v10352_v38  ;;  %2203 = vmatmul.bf16.gmra.mxu0 %v9869_v16 }
 0x1c7   :  { %v2162_v55 = vadd.f32 %v2161_v12, %v1993_v22  ;;  %2372 = vmatmul.bf16.gmra.mxu1 %v10338_v35 }
 0x1c9   :  { %2034 = vmatmul.bf16.gmra.mxu3 %v9282_v41  ;;  %v10363_v29 = vadd.f32 %v2330_v56, %v2162_v55  ;;  %v1682_v4 = vpop.f32.mrf.mxu2  ;;  %v977_v56 = vrot.slane %v9927_v15, 1 }
 0x1ca   :  { %v1683_v2 = vadd.f32 %v1682_v4, %v9915_v1 }
 0x1cb   :  { %v2166_v12 = vpop.f32.mrf.mxu0  ;;  %v10375_v55 = vsel %vm939_vm1, %v976_v36, %v977_v56 }
 0x1cc   :  { %v1995_v33 = vpop.f32.mrf.mxu3  ;;  %v2335_v19 = vpop.f32.mrf.mxu1 }
 0x1cd   :  { %v1996_v41 = vadd.f32 %v1995_v33, %v1683_v2 }
 0x1cf   :  { %v2165_v25 = vadd.f32 %v2164_v50, %v1996_v41 }
 0x1d1   :  { %v10371_v27 = vadd.f32 %v2333_v11, %v2165_v25  ;;  %v1684_v53 = vpop.f32.mrf.mxu2  ;;  %v979_v25 = vrot.slane %v9955_v49, 1 }
 0x1d2   :  { %v1685_v23 = vadd.f32 %v1684_v53, %v9936_v8 }
 0x1d3   :  { %v2169_v22 = vpop.f32.mrf.mxu0 }
 0x1d4   :  { %v1997_v1 = vpop.f32.mrf.mxu3  ;;  %v2338_v34 = vpop.f32.mrf.mxu1 }
 0x1d5   :  { %v1998_v6 = vadd.f32 %v1997_v1, %v1685_v23 }
 0x1d6   :  { %1726 = vmatmul.bf16.gmra.mxu2 %v10375_v55  ;;  %2208 = vmatmul.bf16.gmra.mxu0 %v9907_v44 }
 0x1d7   :  { %v2167_v50 = vadd.f32 %v2166_v12, %v1998_v6  ;;  %2377 = vmatmul.bf16.gmra.mxu1 %v10352_v38  ;;  %v980_v12 = vrot.slane %v9972_v17, 1  ;;  %v9284_v17 = vld [vmem:[%s13121_s0 + $0x90] sm:$0xff] }
 0x1d9   :  { %2039 = vmatmul.bf16.gmra.mxu3 %v9283_v52  ;;  %v10383_v15 = vadd.f32 %v2335_v19, %v2167_v50  ;;  %v1687_v8 = vpop.f32.mrf.mxu2  ;;  %v10392_v1 = vsel %vm939_vm1, %v979_v25, %v980_v12  ;;  %v9206_v12 = vld [vmem:[#allocation3 + $0xf0] sm:$0xff] }
 0x1da   :  { %v1688_v11 = vadd.f32 %v1687_v8, %v9966_v48  ;;  %5808 = vmatpush.bf16.msra.mxu1 %v9206_v12 }
 0x1db   :  { %v2171_v2 = vpop.f32.mrf.mxu0 }
 0x1dc   :  { %v2000_v4 = vpop.f32.mrf.mxu3  ;;  %v2340_v41 = vpop.f32.mrf.mxu1 }
 0x1dd   :  { %v2001_v33 = vadd.f32 %v2000_v4, %v1688_v11 }
 0x1df   :  { %v2170_v61 = vadd.f32 %v2169_v22, %v2001_v33 }
 0x1e1   :  { %v10388_v36 = vadd.f32 %v2338_v34, %v2170_v61  ;;  %v1689_v56 = vpop.f32.mrf.mxu2  ;;  %v982_v61 = vrot.slane %v9994_v24, 1 }
 0x1e2   :  { %v1690_v53 = vadd.f32 %v1689_v56, %v9981_v60 }
 0x1e3   :  { %v2174_v19 = vpop.f32.mrf.mxu0 }
 0x1e4   :  { %v2002_v23 = vpop.f32.mrf.mxu3  ;;  %v2343_v6 = vpop.f32.mrf.mxu1 }
 0x1e5   :  { %v2003_v48 = vadd.f32 %v2002_v23, %v1690_v53 }
 0x1e6   :  { %1731 = vmatmul.bf16.gmra.mxu2 %v10392_v1  ;;  %2213 = vmatmul.bf16.gmra.mxu0 %v9958_v14 }
 0x1e7   :  { %v2172_v22 = vadd.f32 %v2171_v2, %v2003_v48  ;;  %2382 = vmatmul.bf16.gmra.mxu1 %v10375_v55  ;;  %v983_v2 = vrot.slane %v10017_v59, 1 }
 0x1e9   :  { %2044 = vmatmul.bf16.gmra.mxu3 %v9284_v17  ;;  %v10400_v60 = vadd.f32 %v2340_v41, %v2172_v22  ;;  %v1692_v34 = vpop.f32.mrf.mxu2 }
 0x1ea   :  { %v1693_v50 = vadd.f32 %v1692_v34, %v10005_v5  ;;  %v10409_v5 = vsel %vm939_vm1, %v982_v61, %v983_v2  ;;  %v13419_v61 = vld [vmem:[#allocation61_spill] sm:$0xff] }
 0x1eb   :  { %13415 = vst [vmem:[#allocation102_spill] sm:$0xff] %v10400_v60  ;;  %v2176_v8 = vpop.f32.mrf.mxu0  ;;  %v986_v2 = vrot.slane %v13419_v61, 1 }
 0x1ec   :  { %v2005_v52 = vpop.f32.mrf.mxu3  ;;  %v2345_v4 = vpop.f32.mrf.mxu1  ;;  %13417 = vst [vmem:[#allocation104_spill] sm:$0xff] %v10409_v5 }
 0x1ed   :  { %v2006_v11 = vadd.f32 %v2005_v52, %v1693_v50 }
 0x1ef   :  { %v2175_v33 = vadd.f32 %v2174_v19, %v2006_v11 }
 0x1f1   :  { %v10405_v25 = vadd.f32 %v2343_v6, %v2175_v33  ;;  %v1694_v56 = vpop.f32.mrf.mxu2  ;;  %v985_v33 = vrot.slane %v10045_v30, 1 }
 0x1f2   :  { %v1695_v53 = vadd.f32 %v1694_v56, %v10026_v57 }
 0x1f3   :  { %13416 = vst [vmem:[#allocation103_spill] sm:$0xff] %v10405_v25  ;;  %v2179_v23 = vpop.f32.mrf.mxu0  ;;  %v13435_v25 = vld [vmem:[#allocation79_spill] sm:$0xff] }
 0x1f4   :  { %v2007_v41 = vpop.f32.mrf.mxu3  ;;  %v2348_v22 = vpop.f32.mrf.mxu1 }
 0x1f5   :  { %v2008_v48 = vadd.f32 %v2007_v41, %v1695_v53  ;;  %v10424_v41 = vsel %vm939_vm1, %v985_v33, %v986_v2  ;;  %v9135_v2 = vld [vmem:[%s13122_s1 + $0x218] sm:$0xff] }
 0x1f6   :  { %1736 = vmatmul.bf16.gmra.mxu2 %v10409_v5  ;;  %2218 = vmatmul.bf16.gmra.mxu0 %v9997_v54 }
 0x1f7   :  { %v2177_v19 = vadd.f32 %v2176_v8, %v2008_v48  ;;  %2387 = vmatmul.bf16.gmra.mxu1 %v10392_v1  ;;  %3018 = vmatpush.bf16.msra.mxu0 %v9135_v2 }
 0x1f9   :  { %2049 = vmatmul.bf16.gmra.mxu3 %v9955_v49  ;;  %v10415_v59 = vadd.f32 %v2345_v4, %v2177_v19  ;;  %v1697_v57 = vpop.f32.mrf.mxu2  ;;  %v13421_v49 = vld [vmem:[#allocation64_spill] sm:$0xff]  ;;  %v13423_v19 = vld [vmem:[#allocation59_spill] sm:$0xff] }
 0x1fa   :  { %v1698_v6 = vadd.f32 %v1697_v57, %v10056_v21  ;;  %13422 = vst [vmem:[#allocation64_spill] sm:$0xff] %v10424_v41  ;;  %v9127_v57 = vld [vmem:[%s13122_s1 + $0x1d8] sm:$0xff] }
 0x1fb   :  { %13418 = vst [vmem:[#allocation105_spill] sm:$0xff] %v10415_v59  ;;  %v2181_v34 = vpop.f32.mrf.mxu0  ;;  %2849 = vmatpush.bf16.msra.mxu3 %v9127_v57  ;;  %v13429_v57 = vld [vmem:[#allocation73_spill] sm:$0xff] }
 0x1fc   :  { %v2010_v17 = vpop.f32.mrf.mxu3  ;;  %v2350_v52 = vpop.f32.mrf.mxu1 }
 0x1fd   :  { %v2011_v50 = vadd.f32 %v2010_v17, %v1698_v6 }
 0x1ff   :  { %v2180_v11 = vadd.f32 %v2179_v23, %v2011_v50  ;;  %v13425_v50 = vld [vmem:[#allocation69_spill] sm:$0xff] }
 0x201   :  { %v10420_v12 = vadd.f32 %v2348_v22, %v2180_v11  ;;  %v1699_v8 = vpop.f32.mrf.mxu2  ;;  %v9119_v22 = vld [vmem:[%s13122_s1 + $0x198] sm:$0xff] }
 0x202   :  { %v1700_v56 = vadd.f32 %v1699_v8, %v13421_v49  ;;  %2680 = vmatpush.bf16.msra.mxu2 %v9119_v22  ;;  %v13426_v49 = vld [vmem:[#allocation66_spill] sm:$0xff] }
 0x203   :  { %13420 = vst [vmem:[#allocation61_spill] sm:$0xff] %v10420_v12  ;;  %v2184_v4 = vpop.f32.mrf.mxu0 }
 0x204   :  { %v2012_v53 = vpop.f32.mrf.mxu3  ;;  %v2353_v48 = vpop.f32.mrf.mxu1 }
 0x205   :  { %v2013_v21 = vadd.f32 %v2012_v53, %v1700_v56  ;;  %v988_v56 = vrot.slane %v13426_v49, 1  ;;  %v13427_v53 = vld [vmem:[#allocation70_spill] sm:$0xff] }
 0x206   :  { %1741 = vmatmul.bf16.gmra.mxu2 %v10424_v41  ;;  %2223 = vmatmul.bf16.gmra.mxu0 %v13423_v19 }
 0x207   :  { %v2182_v23 = vadd.f32 %v2181_v34, %v2013_v21  ;;  %2392 = vmatmul.bf16.gmra.mxu1 %v10409_v5 }
 0x209   :  { %2054 = vmatmul.bf16.gmra.mxu3 %v9994_v24  ;;  %v10436_v6 = vadd.f32 %v2350_v52, %v2182_v23  ;;  %v1702_v17 = vpop.f32.mrf.mxu2  ;;  %v989_v52 = vrot.slane %v13427_v53, 1  ;;  %v94_v23 = vld [vmem:[%s13121_s0 + $0xe0] sm:$0x1] }
 0x20a   :  { %v1703_v11 = vadd.f32 %v1702_v17, %v13425_v50 }
 0x20b   :  { %13424 = vst [vmem:[#allocation106_spill] sm:$0xff] %v10436_v6  ;;  %v2186_v33 = vpop.f32.mrf.mxu0 }
 0x20c   :  { %v2015_v34 = vpop.f32.mrf.mxu3  ;;  %v2355_v61 = vpop.f32.mrf.mxu1 }
 0x20d   :  { %v2016_v24 = vadd.f32 %v2015_v34, %v1703_v11  ;;  %v10451_v34 = vsel %vm939_vm1, %v988_v56, %v989_v52 }
 0x20e   :  { %13430 = vst [vmem:[#allocation66_spill] sm:$0xff] %v10451_v34 }
 0x20f   :  { %v2185_v8 = vadd.f32 %v2184_v4, %v2016_v24  ;;  %v9050_v4 = vld [vmem:[%s13121_s0 + $0xd8] sm:$0xff]  ;;  %v416_v24 = vunpack.c.l.b16 %v94_v23 }
 0x211   :  { %v10444_v21 = vadd.f32 %v2353_v48, %v2185_v8  ;;  %v1704_v22 = vpop.f32.mrf.mxu2  ;;  %v13431_v8 = vld [vmem:[#allocation67_spill] sm:$0xff]  ;;  %v452_v53 = vpack.c.b16 %v416_v24, %v416_v24  ;;  %v13434_v24 = vld [vmem:[#allocation9_spill] sm:$0xff] }
 0x212   :  { %v1705_v17 = vadd.f32 %v1704_v22, %v13429_v57  ;;  %v690_v22 = vshll.u32 %v9050_v4, 16  ;;  %v13433_v57 = vld [vmem:[#allocation77_spill] sm:$0xff] }
 0x213   :  { %13428 = vst [vmem:[#allocation69_spill] sm:$0xff] %v10444_v21  ;;  %v2189_v11 = vpop.f32.mrf.mxu0  ;;  %v695_v12 = vshll.u32 %v452_v53, 16 }
 0x214   :  { %v2017_v50 = vpop.f32.mrf.mxu3  ;;  %v2358_v48 = vpop.f32.mrf.mxu1 }
 0x215   :  { %v2018_v2 = vadd.f32 %v2017_v50, %v1705_v17  ;;  %v688_v17 = vshrl.u32 %v9050_v4, 16  ;;  %v692_v50 = vrot.slane %v690_v22, 1 }
 0x216   :  { %1746 = vmatmul.bf16.gmra.mxu2 %v10451_v34  ;;  %2228 = vmatmul.bf16.gmra.mxu0 %v13431_v8 }
 0x217   :  { %v2187_v49 = vadd.f32 %v2186_v33, %v2018_v2  ;;  %2397 = vmatmul.bf16.gmra.mxu1 %v10424_v41  ;;  %v998_v2 = vrot.slane %v13434_v24, 1 }
 0x219   :  { %2059 = vmatmul.bf16.gmra.mxu3 %v10045_v30  ;;  %v10460_v56 = vadd.f32 %v2355_v61, %v2187_v49  ;;  %v1707_v52 = vpop.f32.mrf.mxu2  ;;  %v9285_v30 = vld [vmem:[%s13121_s0 + $0xe4] sm:$0xff]  ;;  %v693_v61 = vor.u32 %v692_v50, %v688_v17  ;;  %v697_v49 = vrot.slane %v695_v12, 1 }
 0x21a   :  { %v1708_v21 = vadd.f32 %v1707_v52, %v13433_v57  ;;  %v997_v33 = vrot.slane %v9285_v30, 1  ;;  %v994_v52 = vrot.slane %v9050_v4, 1  ;;  %v995_v57 = vrot.slane %v452_v53, 1 }
 0x21b   :  { %13432 = vst [vmem:[#allocation70_spill] sm:$0xff] %v10460_v56  ;;  %v2191_v23 = vpop.f32.mrf.mxu0 }
 0x21c   :  { %v2020_v6 = vpop.f32.mrf.mxu3  ;;  %v2360_v59 = vpop.f32.mrf.mxu1  ;;  %v996_v5 = vsel %vm939_vm1, %v994_v52, %v995_v57 }
 0x21d   :  { %v2021_v34 = vadd.f32 %v2020_v6, %v1708_v21  ;;  %v999_v21 = vsel %vm939_vm1, %v997_v33, %v998_v2  ;;  %v13436_v2 = vld [vmem:[#allocation12_spill] sm:$0xff] }
 0x21f   :  { %v2190_v8 = vadd.f32 %v2189_v11, %v2021_v34  ;;  %v698_v11 = vsel %vm470_vm0, %v693_v61, %v697_v49  ;;  %v1001_v61 = vrot.slane %v13436_v2, 1  ;;  %v13438_v2 = vld [vmem:[#allocation15_spill] sm:$0xff] }
 0x221   :  { %v10467_v56 = vadd.f32 %v2358_v48, %v2190_v8  ;;  %v1709_v41 = vpop.f32.mrf.mxu2 }
 0x222   :  { %v1710_v22 = vadd.f32 %v1709_v41, %v13435_v25 }
 0x223   :  { %v2194_v6 = vpop.f32.mrf.mxu0 }
 0x224   :  { %v2022_v19 = vpop.f32.mrf.mxu3  ;;  %v2363_v60 = vpop.f32.mrf.mxu1 }
 0x225   :  { %v2023_v34 = vadd.f32 %v2022_v19, %v1710_v22  ;;  %v9286_v19 = vld [vmem:[%s13121_s0 + $0xf0] sm:$0xff] }
 0x226   :  { %1751 = vmatmul.bf16.gmra.mxu2 %v999_v21  ;;  %2233 = vmatmul.bf16.gmra.mxu0 %v698_v11  ;;  %v1000_v24 = vrot.slane %v9286_v19, 1 }
 0x227   :  { %v2192_v12 = vadd.f32 %v2191_v23, %v2023_v34  ;;  %2402 = vmatmul.bf16.gmra.mxu1 %v996_v5  ;;  %v9205_v5 = vld [vmem:[#allocation3 + $0xe8] sm:$0xff] }
 0x228   :  { %5809 = vmatpush.bf16.msra.mxu1 %v9205_v5  ;;  %v10484_v52 = vsel %vm939_vm1, %v1000_v24, %v1001_v61  ;;  %v1004_v61 = vrot.slane %v13438_v2, 1  ;;  %v13440_v2 = vld [vmem:[#allocation18_spill] sm:$0xff] }
 0x229   :  { %2064 = vmatmul.bf16.gmra.mxu3 %v9050_v4  ;;  %v10473_v48 = vadd.f32 %v2360_v59, %v2192_v12  ;;  %v1712_v8 = vpop.f32.mrf.mxu2 }
 0x22a   :  { %v1713_v25 = vadd.f32 %v1712_v8, %v10168_v42 }
 0x22b   :  { %v2196_v53 = vpop.f32.mrf.mxu0 }
 0x22c   :  { %v2025_v41 = vpop.f32.mrf.mxu3  ;;  %v2365_v50 = vpop.f32.mrf.mxu1 }
 0x22d   :  { %v2026_v17 = vadd.f32 %v2025_v41, %v1713_v25 }
 0x22f   :  { %v2195_v33 = vadd.f32 %v2194_v6, %v2026_v17  ;;  %v13437_v6 = vld [vmem:[#allocation11_spill] sm:$0xff] }
 0x231   :  { %v10480_v23 = vadd.f32 %v2363_v60, %v2195_v33  ;;  %v1714_v59 = vpop.f32.mrf.mxu2  ;;  %v9287_v33 = vld [vmem:[%s13121_s0 + $0xfc] sm:$0xff] }
 0x232   :  { %v1715_v4 = vadd.f32 %v1714_v59, %v10172_v45  ;;  %v1003_v24 = vrot.slane %v9287_v33, 1 }
 0x233   :  { %v2199_v42 = vpop.f32.mrf.mxu0 }
 0x234   :  { %v2027_v49 = vpop.f32.mrf.mxu3  ;;  %v2368_v22 = vpop.f32.mrf.mxu1 }
 0x235   :  { %v2028_v57 = vadd.f32 %v2027_v49, %v1715_v4  ;;  %v13439_v49 = vld [vmem:[#allocation14_spill] sm:$0xff] }
 0x236   :  { %1756 = vmatmul.bf16.gmra.mxu2 %v10484_v52  ;;  %2238 = vmatmul.bf16.gmra.mxu0 %v13437_v6 }
 0x237   :  { %v2197_v11 = vadd.f32 %v2196_v53, %v2028_v57  ;;  %2407 = vmatmul.bf16.gmra.mxu1 %v999_v21  ;;  %v9118_v57 = vld [vmem:[%s13122_s1 + $0x190] sm:$0xff] }
 0x238   :  { %2681 = vmatpush.bf16.msra.mxu2 %v9118_v57 }
 0x239   :  { %2069 = vmatmul.bf16.gmra.mxu3 %v9285_v30  ;;  %v10488_v60 = vadd.f32 %v2365_v50, %v2197_v11  ;;  %v1717_v34 = vpop.f32.mrf.mxu2 }
 0x23a   :  { %v1718_v45 = vadd.f32 %v1717_v34, %v10183_v39  ;;  %v10499_v39 = vsel %vm939_vm1, %v1003_v24, %v1004_v61  ;;  %v1007_v61 = vrot.slane %v13440_v2, 1  ;;  %v9289_v2 = vld [vmem:[%s13121_s0 + $0x114] sm:$0xff] }
 0x23b   :  { %v2201_v8 = vpop.f32.mrf.mxu0 }
 0x23c   :  { %v2030_v12 = vpop.f32.mrf.mxu3  ;;  %v2370_v41 = vpop.f32.mrf.mxu1 }
 0x23d   :  { %v2031_v25 = vadd.f32 %v2030_v12, %v1718_v45 }
 0x23f   :  { %v2200_v17 = vadd.f32 %v2199_v42, %v2031_v25  ;;  %v9134_v25 = vld [vmem:[%s13122_s1 + $0x210] sm:$0xff] }
 0x240   :  { %3019 = vmatpush.bf16.msra.mxu0 %v9134_v25 }
 0x241   :  { %v10495_v53 = vadd.f32 %v2368_v22, %v2200_v17  ;;  %v1719_v30 = vpop.f32.mrf.mxu2 }
 0x242   :  { %v1720_v21 = vadd.f32 %v1719_v30, %v10189_v58  ;;  %v9126_v58 = vld [vmem:[%s13122_s1 + $0x1d0] sm:$0xff] }
 0x243   :  { %v2204_v5 = vpop.f32.mrf.mxu0  ;;  %2850 = vmatpush.bf16.msra.mxu3 %v9126_v58  ;;  %v13441_v58 = vld [vmem:[#allocation17_spill] sm:$0xff] }
 0x244   :  { %v2032_v50 = vpop.f32.mrf.mxu3  ;;  %v2373_v4 = vpop.f32.mrf.mxu1 }
 0x245   :  { %v2033_v59 = vadd.f32 %v2032_v50, %v1720_v21 }
 0x246   :  { %1761 = vmatmul.bf16.gmra.mxu2 %v10499_v39  ;;  %2243 = vmatmul.bf16.gmra.mxu0 %v13439_v49 }
 0x247   :  { %v2202_v42 = vadd.f32 %v2201_v8, %v2033_v59  ;;  %2412 = vmatmul.bf16.gmra.mxu1 %v10484_v52 }
 0x249   :  { %2074 = vmatmul.bf16.gmra.mxu3 %v9286_v19  ;;  %v10510_v22 = vadd.f32 %v2370_v41, %v2202_v42  ;;  %v1722_v11 = vpop.f32.mrf.mxu2  ;;  %v9288_v41 = vld [vmem:[%s13121_s0 + $0x108] sm:$0xff] }
 0x24a   :  { %v1723_v34 = vadd.f32 %v1722_v11, %v10200_v20  ;;  %v1006_v24 = vrot.slane %v9288_v41, 1 }
 0x24b   :  { %v2206_v12 = vpop.f32.mrf.mxu0 }
 0x24c   :  { %v2035_v45 = vpop.f32.mrf.mxu3  ;;  %v2375_v8 = vpop.f32.mrf.mxu1  ;;  %v10524_v42 = vsel %vm939_vm1, %v1006_v24, %v1007_v61  ;;  %v1009_v61 = vrot.slane %v9289_v2, 1 }
 0x24d   :  { %v2036_v19 = vadd.f32 %v2035_v45, %v1723_v34 }
 0x24f   :  { %v2205_v17 = vadd.f32 %v2204_v5, %v2036_v19 }
 0x251   :  { %v10520_v30 = vadd.f32 %v2373_v4, %v2205_v17  ;;  %v1724_v20 = vpop.f32.mrf.mxu2 }
 0x252   :  { %v1725_v21 = vadd.f32 %v1724_v20, %v10213_v26  ;;  %v13442_v20 = vld [vmem:[#allocation21_spill] sm:$0xff] }
 0x253   :  { %v2209_v59 = vpop.f32.mrf.mxu0 }
 0x254   :  { %v2037_v50 = vpop.f32.mrf.mxu3  ;;  %v2378_v5 = vpop.f32.mrf.mxu1 }
 0x255   :  { %v2038_v57 = vadd.f32 %v2037_v50, %v1725_v21 }
 0x256   :  { %1766 = vmatmul.bf16.gmra.mxu2 %v10524_v42  ;;  %2248 = vmatmul.bf16.gmra.mxu0 %v13441_v58 }
 0x257   :  { %v2207_v11 = vadd.f32 %v2206_v12, %v2038_v57  ;;  %2417 = vmatmul.bf16.gmra.mxu1 %v10499_v39  ;;  %v1010_v12 = vrot.slane %v13442_v20, 1 }
 0x259   :  { %2079 = vmatmul.bf16.gmra.mxu3 %v9287_v33  ;;  %v10529_v4 = vadd.f32 %v2375_v8, %v2207_v11  ;;  %v1727_v34 = vpop.f32.mrf.mxu2 }
 0x25a   :  { %v1728_v26 = vadd.f32 %v1727_v34, %v10227_v10  ;;  %v10540_v10 = vsel %vm939_vm1, %v1009_v61, %v1010_v12 }
 0x25b   :  { %v2211_v19 = vpop.f32.mrf.mxu0 }
 0x25c   :  { %v2040_v45 = vpop.f32.mrf.mxu3  ;;  %v2380_v17 = vpop.f32.mrf.mxu1 }
 0x25d   :  { %v2041_v25 = vadd.f32 %v2040_v45, %v1728_v26 }
 0x25f   :  { %v2210_v24 = vadd.f32 %v2209_v59, %v2041_v25  ;;  %v13443_v59 = vld [vmem:[#allocation20_spill] sm:$0xff] }
 0x261   :  { %v10536_v33 = vadd.f32 %v2378_v5, %v2210_v24  ;;  %v1729_v21 = vpop.f32.mrf.mxu2 }
 0x262   :  { %v1730_v8 = vadd.f32 %v1729_v21, %v10234_v18  ;;  %v9290_v21 = vld [vmem:[%s13121_s0 + $0x120] sm:$0xff] }
 0x263   :  { %v2214_v57 = vpop.f32.mrf.mxu0 }
 0x264   :  { %v2042_v50 = vpop.f32.mrf.mxu3  ;;  %v2383_v34 = vpop.f32.mrf.mxu1 }
 0x265   :  { %v2043_v11 = vadd.f32 %v2042_v50, %v1730_v8  ;;  %v1012_v8 = vrot.slane %v9290_v21, 1  ;;  %v13444_v50 = vld [vmem:[#allocation24_spill] sm:$0xff] }
 0x266   :  { %1771 = vmatmul.bf16.gmra.mxu2 %v10540_v10  ;;  %2253 = vmatmul.bf16.gmra.mxu0 %v13443_v59 }
 0x267   :  { %v2212_v26 = vadd.f32 %v2211_v19, %v2043_v11  ;;  %2422 = vmatmul.bf16.gmra.mxu1 %v10524_v42  ;;  %v1013_v19 = vrot.slane %v13444_v50, 1  ;;  %v9204_v11 = vld [vmem:[#allocation3 + $0xe0] sm:$0xff] }
 0x268   :  { %5810 = vmatpush.bf16.msra.mxu1 %v9204_v11 }
 0x269   :  { %2084 = vmatmul.bf16.gmra.mxu3 %v9288_v41  ;;  %v10545_v5 = vadd.f32 %v2380_v17, %v2212_v26  ;;  %v1732_v45 = vpop.f32.mrf.mxu2 }
 0x26a   :  { %v1733_v18 = vadd.f32 %v1732_v45, %v10245_v63  ;;  %v10556_v45 = vsel %vm939_vm1, %v1012_v8, %v1013_v19 }
 0x26b   :  { %v2216_v24 = vpop.f32.mrf.mxu0 }
 0x26c   :  { %v2045_v25 = vpop.f32.mrf.mxu3  ;;  %v2385_v61 = vpop.f32.mrf.mxu1 }
 0x26d   :  { %v2046_v20 = vadd.f32 %v2045_v25, %v1733_v18  ;;  %v13446_v25 = vld [vmem:[#allocation23_spill] sm:$0xff] }
 0x26f   :  { %v2215_v12 = vadd.f32 %v2214_v57, %v2046_v20 }
 0x271   :  { %v10552_v41 = vadd.f32 %v2383_v34, %v2215_v12  ;;  %v1734_v17 = vpop.f32.mrf.mxu2 }
 0x272   :  { %v1735_v26 = vadd.f32 %v1734_v17, %v10252_v40 }
 0x273   :  { %13445 = vst [vmem:[#allocation73_spill] sm:$0xff] %v10552_v41  ;;  %v2219_v63 = vpop.f32.mrf.mxu0  ;;  %v13448_v41 = vld [vmem:[#allocation27_spill] sm:$0xff] }
 0x274   :  { %v2047_v6 = vpop.f32.mrf.mxu3  ;;  %v2388_v18 = vpop.f32.mrf.mxu1 }
 0x275   :  { %v2048_v57 = vadd.f32 %v2047_v6, %v1735_v26  ;;  %v9291_v6 = vld [vmem:[%s13121_s0 + $0x12c] sm:$0xff] }
 0x276   :  { %1776 = vmatmul.bf16.gmra.mxu2 %v10556_v45  ;;  %2258 = vmatmul.bf16.gmra.mxu0 %v13446_v25  ;;  %v1015_v26 = vrot.slane %v9291_v6, 1 }
 0x277   :  { %v2217_v20 = vadd.f32 %v2216_v24, %v2048_v57  ;;  %2427 = vmatmul.bf16.gmra.mxu1 %v10540_v10  ;;  %v1016_v24 = vrot.slane %v13448_v41, 1  ;;  %v9117_v41 = vld [vmem:[%s13122_s1 + $0x188] sm:$0xff] }
 0x278   :  { %2682 = vmatpush.bf16.msra.mxu2 %v9117_v41 }
 0x279   :  { %2089 = vmatmul.bf16.gmra.mxu3 %v9289_v2  ;;  %v10561_v34 = vadd.f32 %v2385_v61, %v2217_v20  ;;  %v1737_v12 = vpop.f32.mrf.mxu2 }
 0x27a   :  { %v1738_v40 = vadd.f32 %v1737_v12, %v10263_v62  ;;  %v10572_v62 = vsel %vm939_vm1, %v1015_v26, %v1016_v24 }
 0x27b   :  { %13447 = vst [vmem:[#allocation77_spill] sm:$0xff] %v10561_v34  ;;  %v2221_v11 = vpop.f32.mrf.mxu0 }
 0x27c   :  { %v2050_v50 = vpop.f32.mrf.mxu3  ;;  %v2390_v8 = vpop.f32.mrf.mxu1 }
 0x27d   :  { %v2051_v17 = vadd.f32 %v2050_v50, %v1738_v40 }
 0x27f   :  { %v2220_v19 = vadd.f32 %v2219_v63, %v2051_v17  ;;  %v13450_v63 = vld [vmem:[#allocation26_spill] sm:$0xff] }
 0x281   :  { %v10568_v2 = vadd.f32 %v2388_v18, %v2220_v19  ;;  %v1739_v57 = vpop.f32.mrf.mxu2 }
 0x282   :  { %v1740_v61 = vadd.f32 %v1739_v57, %v10270_v28  ;;  %v9125_v28 = vld [vmem:[%s13122_s1 + $0x1c8] sm:$0xff] }
 0x283   :  { %13449 = vst [vmem:[#allocation9_spill] sm:$0xff] %v10568_v2  ;;  %v2224_v34 = vpop.f32.mrf.mxu0  ;;  %2851 = vmatpush.bf16.msra.mxu3 %v9125_v28  ;;  %v9133_v57 = vld [vmem:[%s13122_s1 + $0x208] sm:$0xff]  ;;  %v13457_v2 = vld [vmem:[#allocation33_spill] sm:$0xff] }
 0x284   :  { %v2052_v20 = vpop.f32.mrf.mxu3  ;;  %v2393_v40 = vpop.f32.mrf.mxu1  ;;  %3020 = vmatpush.bf16.msra.mxu0 %v9133_v57 }
 0x285   :  { %v2053_v12 = vadd.f32 %v2052_v20, %v1740_v61 }
 0x286   :  { %1781 = vmatmul.bf16.gmra.mxu2 %v10572_v62  ;;  %2263 = vmatmul.bf16.gmra.mxu0 %v13450_v63 }
 0x287   :  { %v2222_v50 = vadd.f32 %v2221_v11, %v2053_v12  ;;  %2432 = vmatmul.bf16.gmra.mxu1 %v10556_v45  ;;  %v13452_v12 = vld [vmem:[#allocation30_spill] sm:$0xff] }
 0x289   :  { %2094 = vmatmul.bf16.gmra.mxu3 %v9290_v21  ;;  %v10583_v18 = vadd.f32 %v2390_v8, %v2222_v50  ;;  %v1742_v17 = vpop.f32.mrf.mxu2  ;;  %v9292_v8 = vld [vmem:[%s13121_s0 + $0x138] sm:$0xff]  ;;  %v1019_v50 = vrot.slane %v13452_v12, 1 }
 0x28a   :  { %v1743_v19 = vadd.f32 %v1742_v17, %v10281_v31  ;;  %v1018_v20 = vrot.slane %v9292_v8, 1 }
 0x28b   :  { %13451 = vst [vmem:[#allocation79_spill] sm:$0xff] %v10583_v18  ;;  %v2226_v11 = vpop.f32.mrf.mxu0 }
 0x28c   :  { %v2055_v26 = vpop.f32.mrf.mxu3  ;;  %v2395_v24 = vpop.f32.mrf.mxu1 }
 0x28d   :  { %v2056_v21 = vadd.f32 %v2055_v26, %v1743_v19  ;;  %v10597_v26 = vsel %vm939_vm1, %v1018_v20, %v1019_v50 }
 0x28e   :  { %13454 = vst [vmem:[#allocation15_spill] sm:$0xff] %v10597_v26 }
 0x28f   :  { %v2225_v61 = vadd.f32 %v2224_v34, %v2056_v21  ;;  %v13455_v21 = vld [vmem:[#allocation29_spill] sm:$0xff] }
 0x291   :  { %v10593_v41 = vadd.f32 %v2393_v40, %v2225_v61  ;;  %v1744_v31 = vpop.f32.mrf.mxu2 }
 0x292   :  { %v1745_v28 = vadd.f32 %v1744_v31, %v10297_v9 }
 0x293   :  { %13453 = vst [vmem:[#allocation12_spill] sm:$0xff] %v10593_v41  ;;  %v2229_v19 = vpop.f32.mrf.mxu0 }
 0x294   :  { %v2057_v17 = vpop.f32.mrf.mxu3  ;;  %v2398_v34 = vpop.f32.mrf.mxu1 }
 0x295   :  { %v2058_v18 = vadd.f32 %v2057_v17, %v1745_v28  ;;  %v9293_v28 = vld [vmem:[%s13121_s0 + $0x144] sm:$0xff] }
 0x296   :  { %1786 = vmatmul.bf16.gmra.mxu2 %v10597_v26  ;;  %2268 = vmatmul.bf16.gmra.mxu0 %v13455_v21  ;;  %v1021_v17 = vrot.slane %v9293_v28, 1 }
 0x297   :  { %v2227_v57 = vadd.f32 %v2226_v11, %v2058_v18  ;;  %2437 = vmatmul.bf16.gmra.mxu1 %v10572_v62  ;;  %v1022_v18 = vrot.slane %v13457_v2, 1 }
 0x299   :  { %2099 = vmatmul.bf16.gmra.mxu3 %v9291_v6  ;;  %v10602_v40 = vadd.f32 %v2395_v24, %v2227_v57  ;;  %v1747_v61 = vpop.f32.mrf.mxu2 }
 0x29a   :  { %v1748_v9 = vadd.f32 %v1747_v61, %v10308_v13  ;;  %v10613_v13 = vsel %vm939_vm1, %v1021_v17, %v1022_v18 }
 0x29b   :  { %13456 = vst [vmem:[#allocation18_spill] sm:$0xff] %v10602_v40  ;;  %v2231_v31 = vpop.f32.mrf.mxu0 }
 0x29c   :  { %v2060_v12 = vpop.f32.mrf.mxu3  ;;  %v2400_v20 = vpop.f32.mrf.mxu1  ;;  %13459 = vst [vmem:[#allocation24_spill] sm:$0xff] %v10613_v13 }
 0x29d   :  { %v2061_v41 = vadd.f32 %v2060_v12, %v1748_v9  ;;  %v13462_v12 = vld [vmem:[#allocation37_spill] sm:$0xff] }
 0x29f   :  { %v2230_v50 = vadd.f32 %v2229_v19, %v2061_v41  ;;  %v13460_v41 = vld [vmem:[#allocation32_spill] sm:$0xff] }
 0x2a1   :  { %v10609_v6 = vadd.f32 %v2398_v34, %v2230_v50  ;;  %v1749_v11 = vpop.f32.mrf.mxu2 }
 0x2a2   :  { %v1750_v24 = vadd.f32 %v1749_v11, %v10315_v32 }
 0x2a3   :  { %13458 = vst [vmem:[#allocation21_spill] sm:$0xff] %v10609_v6  ;;  %v2234_v40 = vpop.f32.mrf.mxu0 }
 0x2a4   :  { %v2062_v57 = vpop.f32.mrf.mxu3  ;;  %v2403_v9 = vpop.f32.mrf.mxu1 }
 0x2a5   :  { %v2063_v61 = vadd.f32 %v2062_v57, %v1750_v24  ;;  %v9294_v24 = vld [vmem:[%s13121_s0 + $0x150] sm:$0xff] }
 0x2a6   :  { %1791 = vmatmul.bf16.gmra.mxu2 %v10613_v13  ;;  %2273 = vmatmul.bf16.gmra.mxu0 %v13460_v41  ;;  %v1024_v57 = vrot.slane %v9294_v24, 1  ;;  %v13463_v41 = vld [vmem:[#allocation36_spill] sm:$0xff] }
 0x2a7   :  { %v2232_v19 = vadd.f32 %v2231_v31, %v2063_v61  ;;  %2442 = vmatmul.bf16.gmra.mxu1 %v10597_v26  ;;  %v1025_v31 = vrot.slane %v13463_v41, 1  ;;  %v9203_v61 = vld [vmem:[#allocation3 + $0xd8] sm:$0xff] }
 0x2a8   :  { %5811 = vmatpush.bf16.msra.mxu1 %v9203_v61 }
 0x2a9   :  { %2104 = vmatmul.bf16.gmra.mxu3 %v9292_v8  ;;  %v10618_v2 = vadd.f32 %v2400_v20, %v2232_v19  ;;  %v1752_v34 = vpop.f32.mrf.mxu2  ;;  %v13465_v19 = vld [vmem:[#allocation38_spill] sm:$0xff] }
 0x2aa   :  { %v1753_v32 = vadd.f32 %v1752_v34, %v13462_v12  ;;  %v10629_v12 = vsel %vm939_vm1, %v1024_v57, %v1025_v31 }
 0x2ab   :  { %13461 = vst [vmem:[#allocation27_spill] sm:$0xff] %v10618_v2  ;;  %v2236_v11 = vpop.f32.mrf.mxu0 }
 0x2ac   :  { %v2065_v50 = vpop.f32.mrf.mxu3  ;;  %v2405_v17 = vpop.f32.mrf.mxu1  ;;  %13466 = vst [vmem:[#allocation33_spill] sm:$0xff] %v10629_v12 }
 0x2ad   :  { %v2066_v6 = vadd.f32 %v2065_v50, %v1753_v32  ;;  %v13467_v32 = vld [vmem:[#allocation35_spill] sm:$0xff] }
 0x2af   :  { %v2235_v18 = vadd.f32 %v2234_v40, %v2066_v6 }
 0x2b1   :  { %v10625_v8 = vadd.f32 %v2403_v9, %v2235_v18  ;;  %v1754_v20 = vpop.f32.mrf.mxu2  ;;  %v13469_v18 = vld [vmem:[#allocation42_spill] sm:$0xff] }
 0x2b2   :  { %v1755_v2 = vadd.f32 %v1754_v20, %v13465_v19 }
 0x2b3   :  { %13464 = vst [vmem:[#allocation30_spill] sm:$0xff] %v10625_v8  ;;  %v2239_v34 = vpop.f32.mrf.mxu0 }
 0x2b4   :  { %v2067_v26 = vpop.f32.mrf.mxu3  ;;  %v2408_v6 = vpop.f32.mrf.mxu1 }
 0x2b5   :  { %v2068_v40 = vadd.f32 %v2067_v26, %v1755_v2  ;;  %v9295_v26 = vld [vmem:[%s13121_s0 + $0x15c] sm:$0xff] }
 0x2b6   :  { %1796 = vmatmul.bf16.gmra.mxu2 %v10629_v12  ;;  %2278 = vmatmul.bf16.gmra.mxu0 %v13467_v32  ;;  %v1027_v2 = vrot.slane %v9295_v26, 1  ;;  %v13470_v32 = vld [vmem:[#allocation41_spill] sm:$0xff] }
 0x2b7   :  { %v2237_v50 = vadd.f32 %v2236_v11, %v2068_v40  ;;  %2447 = vmatmul.bf16.gmra.mxu1 %v10613_v13  ;;  %v1028_v11 = vrot.slane %v13470_v32, 1  ;;  %v9124_v32 = vld [vmem:[%s13122_s1 + $0x1c0] sm:$0xff] }
 0x2b8   :  { %2852 = vmatpush.bf16.msra.mxu3 %v9124_v32 }
 0x2b9   :  { %2109 = vmatmul.bf16.gmra.mxu3 %v9293_v28  ;;  %v10634_v9 = vadd.f32 %v2405_v17, %v2237_v50  ;;  %v1757_v41 = vpop.f32.mrf.mxu2  ;;  %v13472_v17 = vld [vmem:[#allocation43_spill] sm:$0xff] }
 0x2ba   :  { %v1758_v20 = vadd.f32 %v1757_v41, %v13469_v18  ;;  %v10645_v41 = vsel %vm939_vm1, %v1027_v2, %v1028_v11 }
 0x2bb   :  { %13468 = vst [vmem:[#allocation37_spill] sm:$0xff] %v10634_v9  ;;  %v2241_v19 = vpop.f32.mrf.mxu0 }
 0x2bc   :  { %v2070_v61 = vpop.f32.mrf.mxu3  ;;  %v2410_v57 = vpop.f32.mrf.mxu1  ;;  %13473 = vst [vmem:[#allocation38_spill] sm:$0xff] %v10645_v41 }
 0x2bd   :  { %v2071_v8 = vadd.f32 %v2070_v61, %v1758_v20 }
 0x2bf   :  { %v2240_v31 = vadd.f32 %v2239_v34, %v2071_v8  ;;  %v13474_v8 = vld [vmem:[#allocation40_spill] sm:$0xff] }
 0x2c1   :  { %v10641_v28 = vadd.f32 %v2408_v6, %v2240_v31  ;;  %v1759_v40 = vpop.f32.mrf.mxu2  ;;  %v9116_v6 = vld [vmem:[%s13122_s1 + $0x180] sm:$0xff] }
 0x2c2   :  { %v1760_v50 = vadd.f32 %v1759_v40, %v13472_v17  ;;  %2683 = vmatpush.bf16.msra.mxu2 %v9116_v6  ;;  %v13476_v31 = vld [vmem:[#allocation47_spill] sm:$0xff] }
 0x2c3   :  { %13471 = vst [vmem:[#allocation36_spill] sm:$0xff] %v10641_v28  ;;  %v2244_v13 = vpop.f32.mrf.mxu0  ;;  %v9132_v17 = vld [vmem:[%s13122_s1 + $0x200] sm:$0xff] }
 0x2c4   :  { %v2072_v9 = vpop.f32.mrf.mxu3  ;;  %v2413_v20 = vpop.f32.mrf.mxu1  ;;  %3021 = vmatpush.bf16.msra.mxu0 %v9132_v17 }
 0x2c5   :  { %v2073_v18 = vadd.f32 %v2072_v9, %v1760_v50 }
 0x2c6   :  { %1801 = vmatmul.bf16.gmra.mxu2 %v10645_v41  ;;  %2283 = vmatmul.bf16.gmra.mxu0 %v13474_v8 }
 0x2c7   :  { %v2242_v34 = vadd.f32 %v2241_v19, %v2073_v18  ;;  %2452 = vmatmul.bf16.gmra.mxu1 %v10629_v12 }
 0x2c9   :  { %2114 = vmatmul.bf16.gmra.mxu3 %v9294_v24  ;;  %v10656_v61 = vadd.f32 %v2410_v57, %v2242_v34  ;;  %v1762_v9 = vpop.f32.mrf.mxu2  ;;  %v9296_v57 = vld [vmem:[%s13121_s0 + $0x168] sm:$0xff]  ;;  %v13477_v34 = vld [vmem:[#allocation46_spill] sm:$0xff] }
 0x2ca   :  { %v1763_v2 = vadd.f32 %v1762_v9, %v13476_v31  ;;  %v1030_v18 = vrot.slane %v9296_v57, 1  ;;  %v1031_v6 = vrot.slane %v13477_v34, 1  ;;  %v13479_v31 = vld [vmem:[#allocation48_spill] sm:$0xff] }
 0x2cb   :  { %13475 = vst [vmem:[#allocation42_spill] sm:$0xff] %v10656_v61  ;;  %v2246_v19 = vpop.f32.mrf.mxu0  ;;  %v13482_v34 = vld [vmem:[#allocation52_spill] sm:$0xff] }
 0x2cc   :  { %v2075_v11 = vpop.f32.mrf.mxu3  ;;  %v2415_v40 = vpop.f32.mrf.mxu1  ;;  %v10670_v28 = vsel %vm939_vm1, %v1030_v18, %v1031_v6 }
 0x2cd   :  { %v2076_v24 = vadd.f32 %v2075_v11, %v1763_v2 }
 0x2cf   :  { %v2245_v50 = vadd.f32 %v2244_v13, %v2076_v24  ;;  %v13480_v24 = vld [vmem:[#allocation45_spill] sm:$0xff] }
 0x2d1   :  { %v10666_v32 = vadd.f32 %v2413_v20, %v2245_v50  ;;  %v1764_v9 = vpop.f32.mrf.mxu2 }
 0x2d2   :  { %v1765_v61 = vadd.f32 %v1764_v9, %v13479_v31 }
 0x2d3   :  { %13478 = vst [vmem:[#allocation41_spill] sm:$0xff] %v10666_v32  ;;  %v2249_v11 = vpop.f32.mrf.mxu0 }
 0x2d4   :  { %v2077_v2 = vpop.f32.mrf.mxu3  ;;  %v2418_v13 = vpop.f32.mrf.mxu1 }
 0x2d5   :  { %v2078_v8 = vadd.f32 %v2077_v2, %v1765_v61  ;;  %v9297_v61 = vld [vmem:[%s13121_s0 + $0x174] sm:$0xff] }
 0x2d6   :  { %1806 = vmatmul.bf16.gmra.mxu2 %v10670_v28  ;;  %2288 = vmatmul.bf16.gmra.mxu0 %v13480_v24  ;;  %v1033_v2 = vrot.slane %v9297_v61, 1  ;;  %v13483_v24 = vld [vmem:[#allocation51_spill] sm:$0xff] }
 0x2d7   :  { %v2247_v17 = vadd.f32 %v2246_v19, %v2078_v8  ;;  %2457 = vmatmul.bf16.gmra.mxu1 %v10645_v41  ;;  %v1034_v8 = vrot.slane %v13483_v24, 1 }
 0x2d9   :  { %2119 = vmatmul.bf16.gmra.mxu3 %v9295_v26  ;;  %v10675_v20 = vadd.f32 %v2415_v40, %v2247_v17  ;;  %v1767_v50 = vpop.f32.mrf.mxu2  ;;  %v13485_v40 = vld [vmem:[#allocation53_spill] sm:$0xff] }
 0x2da   :  { %v1768_v9 = vadd.f32 %v1767_v50, %v13482_v34  ;;  %v10686_v50 = vsel %vm939_vm1, %v1033_v2, %v1034_v8  ;;  %v9298_v8 = vld [vmem:[%s13121_s0 + $0x180] sm:$0xff] }
 0x2db   :  { %13481 = vst [vmem:[#allocation43_spill] sm:$0xff] %v10675_v20  ;;  %v2251_v32 = vpop.f32.mrf.mxu0 }
 0x2dc   :  { %v2080_v31 = vpop.f32.mrf.mxu3  ;;  %v2420_v18 = vpop.f32.mrf.mxu1  ;;  %13486 = vst [vmem:[#allocation46_spill] sm:$0xff] %v10686_v50 }
 0x2dd   :  { %v2081_v12 = vadd.f32 %v2080_v31, %v1768_v9  ;;  %v13489_v31 = vld [vmem:[#allocation57_spill] sm:$0xff] }
 0x2df   :  { %v2250_v6 = vadd.f32 %v2249_v11, %v2081_v12  ;;  %v13487_v12 = vld [vmem:[#allocation50_spill] sm:$0xff] }
 0x2e1   :  { %v10682_v26 = vadd.f32 %v2418_v13, %v2250_v6  ;;  %v1769_v19 = vpop.f32.mrf.mxu2 }
 0x2e2   :  { %v1770_v17 = vadd.f32 %v1769_v19, %v13485_v40 }
 0x2e3   :  { %13484 = vst [vmem:[#allocation47_spill] sm:$0xff] %v10682_v26  ;;  %v2254_v41 = vpop.f32.mrf.mxu0 }
 0x2e4   :  { %v2082_v20 = vpop.f32.mrf.mxu3  ;;  %v2423_v9 = vpop.f32.mrf.mxu1 }
 0x2e5   :  { %v2083_v34 = vadd.f32 %v2082_v20, %v1770_v17  ;;  %v1036_v17 = vrot.slane %v9298_v8, 1 }
 0x2e6   :  { %1811 = vmatmul.bf16.gmra.mxu2 %v10686_v50  ;;  %2293 = vmatmul.bf16.gmra.mxu0 %v13487_v12 }
 0x2e7   :  { %v2252_v11 = vadd.f32 %v2251_v32, %v2083_v34  ;;  %2462 = vmatmul.bf16.gmra.mxu1 %v10670_v28  ;;  %v13491_v32 = vld [vmem:[#allocation56_spill] sm:$0xff] }
 0x2e9   :  { %2124 = vmatmul.bf16.gmra.mxu3 %v9296_v57  ;;  %v10691_v13 = vadd.f32 %v2420_v18, %v2252_v11  ;;  %v1772_v24 = vpop.f32.mrf.mxu2  ;;  %v1037_v57 = vrot.slane %v13491_v32, 1  ;;  %v9202_v18 = vld [vmem:[#allocation3 + $0xd0] sm:$0xff] }
 0x2ea   :  { %v1773_v6 = vadd.f32 %v1772_v24, %v13489_v31  ;;  %5812 = vmatpush.bf16.msra.mxu1 %v9202_v18 }
 0x2eb   :  { %13488 = vst [vmem:[#allocation48_spill] sm:$0xff] %v10691_v13  ;;  %v2256_v40 = vpop.f32.mrf.mxu0  ;;  %v13493_v13 = vld [vmem:[#allocation58_spill] sm:$0xff] }
 0x2ec   :  { %v2085_v19 = vpop.f32.mrf.mxu3  ;;  %v10694_v2 = vpop.f32.mrf.mxu1 }
 0x2ed   :  { %v2086_v26 = vadd.f32 %v2085_v19, %v1773_v6  ;;  %13490 = vst [vmem:[#allocation52_spill] sm:$0xff] %v10694_v2  ;;  %v10704_v6 = vsel %vm939_vm1, %v1036_v17, %v1037_v57  ;;  %v13495_v19 = vld [vmem:[#allocation55_spill] sm:$0xff] }
 0x2ee   :  { %13494 = vst [vmem:[#allocation53_spill] sm:$0xff] %v10704_v6 }
 0x2ef   :  { %v2255_v20 = vadd.f32 %v2254_v41, %v2086_v26 }
 0x2f1   :  { %v10700_v34 = vadd.f32 %v2423_v9, %v2255_v20  ;;  %v1774_v11 = vpop.f32.mrf.mxu2  ;;  %v13497_v20 = vld [vmem:[#allocation63_spill] sm:$0xff] }
 0x2f2   :  { %v1775_v12 = vadd.f32 %v1774_v11, %v13493_v13 }
 0x2f3   :  { %13492 = vst [vmem:[#allocation51_spill] sm:$0xff] %v10700_v34  ;;  %v2259_v31 = vpop.f32.mrf.mxu0 }
 0x2f4   :  { %v2087_v24 = vpop.f32.mrf.mxu3  ;;  %v2428_v26 = vpop.f32.mrf.mxu1 }
 0x2f5   :  { %v2088_v41 = vadd.f32 %v2087_v24, %v1775_v12  ;;  %v9299_v12 = vld [vmem:[%s13121_s0 + $0x18c] sm:$0xff]  ;;  %v13499_v24 = vld [vmem:[#allocation62_spill] sm:$0xff] }
 0x2f6   :  { %1816 = vmatmul.bf16.gmra.mxu2 %v10704_v6  ;;  %2298 = vmatmul.bf16.gmra.mxu0 %v13495_v19  ;;  %v1039_v57 = vrot.slane %v9299_v12, 1 }
 0x2f7   :  { %v10708_v2 = vadd.f32 %v2256_v40, %v2088_v41  ;;  %2467 = vmatmul.bf16.gmra.mxu1 %v10686_v50  ;;  %v1040_v40 = vrot.slane %v13499_v24, 1 }
 0x2f9   :  { %13496 = vst [vmem:[#allocation57_spill] sm:$0xff] %v10708_v2  ;;  %2129 = vmatmul.bf16.gmra.mxu3 %v9297_v61  ;;  %v1777_v9 = vpop.f32.mrf.mxu2  ;;  %v13501_v2 = vld [vmem:[#allocation65_spill] sm:$0xff] }
 0x2fa   :  { %v1778_v13 = vadd.f32 %v1777_v9, %v13497_v20  ;;  %v10722_v20 = vsel %vm939_vm1, %v1039_v57, %v1040_v40  ;;  %v13506_v40 = vld [vmem:[#allocation71_spill] sm:$0xff] }
 0x2fb   :  { %v2261_v18 = vpop.f32.mrf.mxu0 }
 0x2fc   :  { %v2090_v32 = vpop.f32.mrf.mxu3  ;;  %v10712_v34 = vpop.f32.mrf.mxu1 }
 0x2fd   :  { %v2091_v11 = vadd.f32 %v2090_v32, %v1778_v13  ;;  %13498 = vst [vmem:[#allocation56_spill] sm:$0xff] %v10712_v34 }
 0x2ff   :  { %v2260_v17 = vadd.f32 %v2259_v31, %v2091_v11  ;;  %v13502_v31 = vld [vmem:[#allocation60_spill] sm:$0xff] }
 0x301   :  { %v10718_v41 = vadd.f32 %v2428_v26, %v2260_v17  ;;  %v1779_v61 = vpop.f32.mrf.mxu2  ;;  %v13504_v17 = vld [vmem:[#allocation72_spill] sm:$0xff] }
 0x302   :  { %v1780_v19 = vadd.f32 %v1779_v61, %v13501_v2 }
 0x303   :  { %13500 = vst [vmem:[#allocation58_spill] sm:$0xff] %v10718_v41  ;;  %v2264_v9 = vpop.f32.mrf.mxu0 }
 0x304   :  { %v2092_v50 = vpop.f32.mrf.mxu3  ;;  %v2433_v32 = vpop.f32.mrf.mxu1 }
 0x305   :  { %v2093_v13 = vadd.f32 %v2092_v50, %v1780_v19  ;;  %v9300_v50 = vld [vmem:[%s13121_s0 + $0x198] sm:$0xff] }
 0x306   :  { %1821 = vmatmul.bf16.gmra.mxu2 %v10722_v20  ;;  %2303 = vmatmul.bf16.gmra.mxu0 %v13502_v31  ;;  %v1042_v19 = vrot.slane %v9300_v50, 1 }
 0x307   :  { %v10726_v11 = vadd.f32 %v2261_v18, %v2093_v13  ;;  %2472 = vmatmul.bf16.gmra.mxu1 %v10704_v6  ;;  %v1043_v18 = vrot.slane %v13506_v40, 1 }
 0x309   :  { %13503 = vst [vmem:[#allocation63_spill] sm:$0xff] %v10726_v11  ;;  %2134 = vmatmul.bf16.gmra.mxu3 %v9298_v8  ;;  %v1782_v26 = vpop.f32.mrf.mxu2  ;;  %v13508_v11 = vld [vmem:[#allocation74_spill] sm:$0xff] }
 0x30a   :  { %v1783_v24 = vadd.f32 %v1782_v26, %v13504_v17  ;;  %v10740_v17 = vsel %vm939_vm1, %v1042_v19, %v1043_v18 }
 0x30b   :  { %v2266_v61 = vpop.f32.mrf.mxu0 }
 0x30c   :  { %v2095_v2 = vpop.f32.mrf.mxu3  ;;  %v10730_v41 = vpop.f32.mrf.mxu1 }
 0x30d   :  { %v2096_v34 = vadd.f32 %v2095_v2, %v1783_v24  ;;  %13505 = vst [vmem:[#allocation62_spill] sm:$0xff] %v10730_v41 }
 0x30f   :  { %v2265_v57 = vadd.f32 %v2264_v9, %v2096_v34  ;;  %v13509_v34 = vld [vmem:[#allocation68_spill] sm:$0xff] }
 0x311   :  { %v10736_v13 = vadd.f32 %v2433_v32, %v2265_v57  ;;  %v1784_v8 = vpop.f32.mrf.mxu2  ;;  %v13511_v57 = vld [vmem:[#allocation78_spill] sm:$0xff] }
 0x312   :  { %v1785_v31 = vadd.f32 %v1784_v8, %v13508_v11 }
 0x313   :  { %13507 = vst [vmem:[#allocation65_spill] sm:$0xff] %v10736_v13  ;;  %v2269_v26 = vpop.f32.mrf.mxu0 }
 0x314   :  { %v2097_v6 = vpop.f32.mrf.mxu3  ;;  %v2438_v2 = vpop.f32.mrf.mxu1 }
 0x315   :  { %v2098_v24 = vadd.f32 %v2097_v6, %v1785_v31 }
 0x316   :  { %1826 = vmatmul.bf16.gmra.mxu2 %v10740_v17  ;;  %2308 = vmatmul.bf16.gmra.mxu0 %v13509_v34 }
 0x317   :  { %v10744_v9 = vadd.f32 %v2266_v61, %v2098_v24  ;;  %2477 = vmatmul.bf16.gmra.mxu1 %v10722_v20 }
 0x319   :  { %13510 = vst [vmem:[#allocation72_spill] sm:$0xff] %v10744_v9  ;;  %2139 = vmatmul.bf16.gmra.mxu3 %v9299_v12  ;;  %v1787_v32 = vpop.f32.mrf.mxu2  ;;  %v9301_v9 = vld [vmem:[%s13121_s0 + $0x18] sm:$0xff] }
 0x31a   :  { %v1788_v50 = vadd.f32 %v1787_v32, %v13511_v57 }
 0x31b   :  { %v2271_v40 = vpop.f32.mrf.mxu0 }
 0x31c   :  { %v2100_v11 = vpop.f32.mrf.mxu3  ;;  %v10748_v41 = vpop.f32.mrf.mxu1 }
 0x31d   :  { %v2101_v8 = vadd.f32 %v2100_v11, %v1788_v50  ;;  %13512 = vst [vmem:[#allocation71_spill] sm:$0xff] %v10748_v41 }
 0x31f   :  { %v2270_v19 = vadd.f32 %v2269_v26, %v2101_v8 }
 0x321   :  { %v10750_v6 = vadd.f32 %v2438_v2, %v2270_v19  ;;  %v1789_v31 = vpop.f32.mrf.mxu2  ;;  %v13514_v2 = vld [vmem:[#allocation80_spill] sm:$0xff] }
 0x322   :  { %v1790_v18 = vadd.f32 %v1789_v31, %v10163_v37  ;;  %v9201_v31 = vld [vmem:[#allocation3 + $0xc8] sm:$0xff] }
 0x323   :  { %v2274_v61 = vpop.f32.mrf.mxu0  ;;  %5813 = vmatpush.bf16.msra.mxu1 %v9201_v31 }
 0x324   :  { %v2102_v13 = vpop.f32.mrf.mxu3  ;;  %v2443_v12 = vpop.f32.mrf.mxu1 }
 0x325   :  { %v2103_v24 = vadd.f32 %v2102_v13, %v1790_v18 }
 0x326   :  { %2684 = vmatmul.bf16.vlgmr.msra.gmra.mxu2 %v9301_v9  ;;  %3022 = vmatmul.bf16.vlgmr.msra.gmra.mxu0 %v10181_v43  ;;  %v13517_v9 = vld [vmem:[#allocation81_spill] sm:$0xff] }
 0x327   :  { %v10757_v32 = vadd.f32 %v2271_v40, %v2103_v24 }
 0x329   :  { %13513 = vst [vmem:[#allocation74_spill] sm:$0xff] %v10757_v32  ;;  %2853 = vmatmul.bf16.vlgmr.msra.gmra.mxu3 %v9612_v3  ;;  %v1792_v26 = vpop.f32.mrf.mxu2 }
 0x32a   :  { %v1793_v57 = vadd.f32 %v1792_v26, %v13514_v2  ;;  %v9302_v26 = vld [vmem:[%s13121_s0 + $0x24] sm:$0xff] }
 0x32b   :  { %v2276_v37 = vpop.f32.mrf.mxu0  ;;  %v13518_v2 = vld [vmem:[#allocation84_spill] sm:$0xff] }
 0x32c   :  { %v2105_v50 = vpop.f32.mrf.mxu3  ;;  %v10761_v8 = vpop.f32.mrf.mxu1 }
 0x32d   :  { %v2106_v11 = vadd.f32 %v2105_v50, %v1793_v57  ;;  %13515 = vst [vmem:[#allocation78_spill] sm:$0xff] %v10761_v8  ;;  %v13521_v50 = vld [vmem:[#allocation82_spill] sm:$0xff] }
 0x32f   :  { %v2275_v13 = vadd.f32 %v2274_v61, %v2106_v11  ;;  %v13520_v61 = vld [vmem:[#allocation16_spill] sm:$0xff] }
 0x331   :  { %v10763_v19 = vadd.f32 %v2443_v12, %v2275_v13  ;;  %v1794_v18 = vpop.f32.mrf.mxu2 }
 0x332   :  { %v1795_v41 = vadd.f32 %v1794_v18, %v13517_v9 }
 0x333   :  { %13516 = vst [vmem:[#allocation80_spill] sm:$0xff] %v10763_v19  ;;  %v2279_v40 = vpop.f32.mrf.mxu0  ;;  %v13524_v19 = vld [vmem:[#allocation83_spill] sm:$0xff] }
 0x334   :  { %v2107_v43 = vpop.f32.mrf.mxu3  ;;  %v2448_v3 = vpop.f32.mrf.mxu1 }
 0x335   :  { %v2108_v24 = vadd.f32 %v2107_v43, %v1795_v41 }
 0x336   :  { %2689 = vmatmul.bf16.gmra.mxu2 %v9302_v26  ;;  %3027 = vmatmul.bf16.gmra.mxu0 %v13518_v2 }
 0x337   :  { %v10770_v57 = vadd.f32 %v2276_v37, %v2108_v24 }
 0x339   :  { %13519 = vst [vmem:[#allocation81_spill] sm:$0xff] %v10770_v57  ;;  %2858 = vmatmul.bf16.gmra.mxu3 %v13520_v61  ;;  %v1797_v12 = vpop.f32.mrf.mxu2  ;;  %v9303_v61 = vld [vmem:[%s13121_s0 + $0x30] sm:$0xff] }
 0x33a   :  { %v1798_v11 = vadd.f32 %v1797_v12, %v13521_v50  ;;  %v13525_v12 = vld [vmem:[#allocation87_spill] sm:$0xff] }
 0x33b   :  { %v2281_v18 = vpop.f32.mrf.mxu0 }
 0x33c   :  { %v2110_v13 = vpop.f32.mrf.mxu3  ;;  %v10774_v9 = vpop.f32.mrf.mxu1 }
 0x33d   :  { %v2111_v31 = vadd.f32 %v2110_v13, %v1798_v11  ;;  %13522 = vst [vmem:[#allocation84_spill] sm:$0xff] %v10774_v9  ;;  %v13527_v11 = vld [vmem:[#allocation19_spill] sm:$0xff] }
 0x33f   :  { %v2280_v41 = vadd.f32 %v2279_v40, %v2111_v31  ;;  %v13528_v40 = vld [vmem:[#allocation85_spill] sm:$0xff] }
 0x341   :  { %v10776_v43 = vadd.f32 %v2448_v3, %v2280_v41  ;;  %v1799_v8 = vpop.f32.mrf.mxu2 }
 0x342   :  { %v1800_v26 = vadd.f32 %v1799_v8, %v13524_v19 }
 0x343   :  { %13523 = vst [vmem:[#allocation82_spill] sm:$0xff] %v10776_v43  ;;  %v2284_v2 = vpop.f32.mrf.mxu0  ;;  %v13531_v43 = vld [vmem:[#allocation86_spill] sm:$0xff] }
 0x344   :  { %v2112_v32 = vpop.f32.mrf.mxu3  ;;  %v2453_v24 = vpop.f32.mrf.mxu1 }
 0x345   :  { %v2113_v37 = vadd.f32 %v2112_v32, %v1800_v26 }
 0x346   :  { %2694 = vmatmul.bf16.gmra.mxu2 %v9303_v61  ;;  %3032 = vmatmul.bf16.gmra.mxu0 %v13525_v12 }
 0x347   :  { %v10783_v50 = vadd.f32 %v2281_v18, %v2113_v37 }
 0x349   :  { %13526 = vst [vmem:[#allocation83_spill] sm:$0xff] %v10783_v50  ;;  %2863 = vmatmul.bf16.gmra.mxu3 %v13527_v11  ;;  %v1802_v3 = vpop.f32.mrf.mxu2  ;;  %v9304_v11 = vld [vmem:[%s13121_s0 + $0x3c] sm:$0xff] }
 0x34a   :  { %v1803_v13 = vadd.f32 %v1802_v3, %v13528_v40  ;;  %v13532_v3 = vld [vmem:[#allocation90_spill] sm:$0xff] }
 0x34b   :  { %v2286_v8 = vpop.f32.mrf.mxu0 }
 0x34c   :  { %v2115_v31 = vpop.f32.mrf.mxu3  ;;  %v10787_v41 = vpop.f32.mrf.mxu1 }
 0x34d   :  { %v2116_v19 = vadd.f32 %v2115_v31, %v1803_v13  ;;  %13529 = vst [vmem:[#allocation87_spill] sm:$0xff] %v10787_v41  ;;  %v13534_v13 = vld [vmem:[#allocation22_spill] sm:$0xff] }
 0x34f   :  { %v2285_v32 = vadd.f32 %v2284_v2, %v2116_v19 }
 0x351   :  { %v10789_v26 = vadd.f32 %v2453_v24, %v2285_v32  ;;  %v1804_v9 = vpop.f32.mrf.mxu2  ;;  %v13535_v24 = vld [vmem:[#allocation88_spill] sm:$0xff] }
 0x352   :  { %v1805_v61 = vadd.f32 %v1804_v9, %v13531_v43 }
 0x353   :  { %13530 = vst [vmem:[#allocation85_spill] sm:$0xff] %v10789_v26  ;;  %v2289_v12 = vpop.f32.mrf.mxu0  ;;  %v13538_v26 = vld [vmem:[#allocation89_spill] sm:$0xff] }
 0x354   :  { %v2117_v57 = vpop.f32.mrf.mxu3  ;;  %v2458_v37 = vpop.f32.mrf.mxu1 }
 0x355   :  { %v2118_v18 = vadd.f32 %v2117_v57, %v1805_v61 }
 0x356   :  { %2699 = vmatmul.bf16.gmra.mxu2 %v9304_v11  ;;  %3037 = vmatmul.bf16.gmra.mxu0 %v13532_v3 }
 0x357   :  { %v10796_v40 = vadd.f32 %v2286_v8, %v2118_v18 }
 0x359   :  { %13533 = vst [vmem:[#allocation86_spill] sm:$0xff] %v10796_v40  ;;  %2868 = vmatmul.bf16.gmra.mxu3 %v13534_v13  ;;  %v1807_v2 = vpop.f32.mrf.mxu2  ;;  %v9305_v13 = vld [vmem:[%s13121_s0 + $0x48] sm:$0xff] }
 0x35a   :  { %v1808_v31 = vadd.f32 %v1807_v2, %v13535_v24  ;;  %v13539_v2 = vld [vmem:[#allocation93_spill] sm:$0xff] }
 0x35b   :  { %v2291_v9 = vpop.f32.mrf.mxu0 }
 0x35c   :  { %v2120_v19 = vpop.f32.mrf.mxu3  ;;  %v10800_v32 = vpop.f32.mrf.mxu1 }
 0x35d   :  { %v2121_v43 = vadd.f32 %v2120_v19, %v1808_v31  ;;  %13536 = vst [vmem:[#allocation90_spill] sm:$0xff] %v10800_v32  ;;  %v13541_v31 = vld [vmem:[#allocation25_spill] sm:$0xff] }
 0x35e   :  { %v9200_v32 = vld [vmem:[#allocation3 + $0xc0] sm:$0xff] }
 0x35f   :  { %v2290_v57 = vadd.f32 %v2289_v12, %v2121_v43  ;;  %5814 = vmatpush.bf16.msra.mxu1 %v9200_v32 }
 0x361   :  { %v10802_v61 = vadd.f32 %v2458_v37, %v2290_v57  ;;  %v1809_v41 = vpop.f32.mrf.mxu2  ;;  %v13542_v37 = vld [vmem:[#allocation91_spill] sm:$0xff] }
 0x362   :  { %v1810_v11 = vadd.f32 %v1809_v41, %v13538_v26 }
 0x363   :  { %13537 = vst [vmem:[#allocation88_spill] sm:$0xff] %v10802_v61  ;;  %v2294_v3 = vpop.f32.mrf.mxu0 }
 0x364   :  { %v2122_v50 = vpop.f32.mrf.mxu3  ;;  %v2463_v18 = vpop.f32.mrf.mxu1 }
 0x365   :  { %v2123_v8 = vadd.f32 %v2122_v50, %v1810_v11 }
 0x366   :  { %2704 = vmatmul.bf16.gmra.mxu2 %v9305_v13  ;;  %3042 = vmatmul.bf16.gmra.mxu0 %v13539_v2  ;;  %v13545_v13 = vld [vmem:[#allocation92_spill] sm:$0xff] }
 0x367   :  { %v10809_v24 = vadd.f32 %v2291_v9, %v2123_v8 }
 0x369   :  { %13540 = vst [vmem:[#allocation89_spill] sm:$0xff] %v10809_v24  ;;  %2873 = vmatmul.bf16.gmra.mxu3 %v13541_v31  ;;  %v1812_v12 = vpop.f32.mrf.mxu2 }
 0x36a   :  { %v1813_v19 = vadd.f32 %v1812_v12, %v13542_v37  ;;  %v9306_v12 = vld [vmem:[%s13121_s0 + $0x54] sm:$0xff]  ;;  %v13546_v37 = vld [vmem:[#allocation96_spill] sm:$0xff] }
 0x36b   :  { %v2296_v41 = vpop.f32.mrf.mxu0 }
 0x36c   :  { %v2125_v43 = vpop.f32.mrf.mxu3  ;;  %v10813_v57 = vpop.f32.mrf.mxu1 }
 0x36d   :  { %v2126_v26 = vadd.f32 %v2125_v43, %v1813_v19  ;;  %13543 = vst [vmem:[#allocation93_spill] sm:$0xff] %v10813_v57  ;;  %v13548_v43 = vld [vmem:[#allocation94_spill] sm:$0xff] }
 0x36f   :  { %v2295_v50 = vadd.f32 %v2294_v3, %v2126_v26  ;;  %v13547_v3 = vld [vmem:[#allocation28_spill] sm:$0xff] }
 0x371   :  { %v10815_v11 = vadd.f32 %v2463_v18, %v2295_v50  ;;  %v1814_v61 = vpop.f32.mrf.mxu2 }
 0x372   :  { %v1815_v40 = vadd.f32 %v1814_v61, %v13545_v13 }
 0x373   :  { %13544 = vst [vmem:[#allocation91_spill] sm:$0xff] %v10815_v11  ;;  %v2299_v9 = vpop.f32.mrf.mxu0  ;;  %v13551_v11 = vld [vmem:[#allocation95_spill] sm:$0xff] }
 0x374   :  { %v2127_v2 = vpop.f32.mrf.mxu3  ;;  %v2468_v31 = vpop.f32.mrf.mxu1 }
 0x375   :  { %v2128_v8 = vadd.f32 %v2127_v2, %v1815_v40 }
 0x376   :  { %2709 = vmatmul.bf16.gmra.mxu2 %v9306_v12  ;;  %3047 = vmatmul.bf16.gmra.mxu0 %v13546_v37 }
 0x377   :  { %v10822_v19 = vadd.f32 %v2296_v41, %v2128_v8  ;;  %v9307_v8 = vld [vmem:[%s13121_s0 + $0x60] sm:$0xff] }
 0x379   :  { %2878 = vmatmul.bf16.gmra.mxu3 %v13547_v3  ;;  %v1817_v18 = vpop.f32.mrf.mxu2 }
 0x37a   :  { %v1818_v26 = vadd.f32 %v1817_v18, %v13548_v43  ;;  %v13552_v18 = vld [vmem:[#allocation99_spill] sm:$0xff] }
 0x37b   :  { %v2301_v50 = vpop.f32.mrf.mxu0 }
 0x37c   :  { %v2130_v61 = vpop.f32.mrf.mxu3  ;;  %v10826_v40 = vpop.f32.mrf.mxu1 }
 0x37d   :  { %v2131_v32 = vadd.f32 %v2130_v61, %v1818_v26  ;;  %13549 = vst [vmem:[#allocation92_spill] sm:$0xff] %v10826_v40  ;;  %v13554_v61 = vld [vmem:[#allocation97_spill] sm:$0xff]  ;;  %v13556_v40 = vld [vmem:[#allocation98_spill] sm:$0xff] }
 0x37f   :  { %v2300_v13 = vadd.f32 %v2299_v9, %v2131_v32  ;;  %v13553_v9 = vld [vmem:[#allocation31_spill] sm:$0xff] }
 0x381   :  { %v10828_v2 = vadd.f32 %v2468_v31, %v2300_v13  ;;  %v1819_v57 = vpop.f32.mrf.mxu2 }
 0x382   :  { %v1820_v12 = vadd.f32 %v1819_v57, %v13551_v11 }
 0x383   :  { %13550 = vst [vmem:[#allocation96_spill] sm:$0xff] %v10828_v2  ;;  %v2304_v37 = vpop.f32.mrf.mxu0 }
 0x384   :  { %v2132_v24 = vpop.f32.mrf.mxu3  ;;  %v2473_v31 = vpop.f32.mrf.mxu1 }
 0x385   :  { %v2133_v41 = vadd.f32 %v2132_v24, %v1820_v12 }
 0x386   :  { %2714 = vmatmul.bf16.gmra.mxu2 %v9307_v8  ;;  %3052 = vmatmul.bf16.gmra.mxu0 %v13552_v18 }
 0x387   :  { %v10835_v43 = vadd.f32 %v2301_v50, %v2133_v41 }
 0x389   :  { %2883 = vmatmul.bf16.gmra.mxu3 %v13553_v9  ;;  %v1822_v26 = vpop.f32.mrf.mxu2 }
 0x38a   :  { %v1823_v32 = vadd.f32 %v1822_v26, %v13554_v61  ;;  %v3396_v26 = vld [vmem:[#allocation2 + $0xc] sm:$0x1] }
 0x38b   :  { %v2306_v57 = vpop.f32.mrf.mxu0 }
 0x38c   :  { %v2135_v13 = vpop.f32.mrf.mxu3  ;;  %v10842_v41 = vpop.f32.mrf.mxu1 }
 0x38d   :  { %v2136_v11 = vadd.f32 %v2135_v13, %v1823_v32  ;;  %13557 = vst [vmem:[#allocation95_spill] sm:$0xff] %v10842_v41  ;;  %v13561_v32 = vld [vmem:[#allocation100_spill] sm:$0xff] }
 0x38f   :  { %v2305_v3 = vadd.f32 %v2304_v37, %v2136_v11 }
 0x391   :  { %v10839_v24 = vadd.f32 %v2473_v31, %v2305_v3  ;;  %v1824_v12 = vpop.f32.mrf.mxu2  ;;  %v3397_v3 = vsel %vm10846_vm4, 0, %v3396_v26 }
 0x392   :  { %v1825_v2 = vadd.f32 %v1824_v12, %v13556_v40  ;;  %3398 = vst [vmem:[#allocation2 + $0xc] sm:$0x1] %v3397_v3  ;;  %v9308_v40 = vld [vmem:[%s13121_s0 + $0x6c] sm:$0xff] }
 0x393   :  { %13555 = vst [vmem:[#allocation94_spill] sm:$0xff] %v10839_v24  ;;  %v2309_v50 = vpop.f32.mrf.mxu0 }
 0x394   :  { %v2137_v8 = vpop.f32.mrf.mxu3 }
 0x395   :  { %v2138_v61 = vadd.f32 %v2137_v8, %v1825_v2  ;;  %v3494_v8 = vld [vmem:[#allocation2 + $0x14] sm:$0x1] }
 0x396   :  { %2719 = vmatmul.bf16.gmra.mxu2 %v9308_v40  ;;  %3057 = vmatmul.bf16.gmra.mxu0 %v10324_v51  ;;  %v3495_v51 = vsel %vm10862_vm6, 0, %v3494_v8 }
 0x397   :  { %v10856_v37 = vadd.f32 %v2306_v57, %v2138_v61  ;;  %v2478_v57 = vpop.f32.mrf.mxu1  ;;  %3496 = vst [vmem:[#allocation2 + $0x14] sm:$0x1] %v3495_v51  ;;  %v3497_v51 = vld [vmem:[#allocation2 + $0x20] sm:$0x1] }
 0x399   :  { %13560 = vst [vmem:[#allocation99_spill] sm:$0xff] %v10856_v37  ;;  %2888 = vmatmul.bf16.gmra.mxu3 %v9821_v46  ;;  %v1827_v31 = vpop.f32.mrf.mxu2  ;;  %v3399_v37 = vld [vmem:[#allocation2 + $0x18] sm:$0x1] }
 0x39a   :  { %v1828_v13 = vadd.f32 %v1827_v31, %v13561_v32  ;;  %v13565_v31 = vld [vmem:[#allocation101_spill] sm:$0xff]  ;;  %v3400_v24 = vsel %vm10846_vm4, 0, %v3399_v37  ;;  %v10883_v37 = vld [vmem:[%s13123_s2] ss:$0 sm:$0xff] }
 0x39b   :  { %v2311_v11 = vpop.f32.mrf.mxu0  ;;  %3401 = vst [vmem:[#allocation2 + $0x18] sm:$0x1] %v3400_v24 }
 0x39c   :  { %v2140_v2 = vpop.f32.mrf.mxu3 }
 0x39d   :  { %v2141_v26 = vadd.f32 %v2140_v2, %v1828_v13  ;;  %v9309_v13 = vld [vmem:[%s13121_s0 + $0x78] sm:$0xff] }
 0x39f   :  { %v2310_v61 = vadd.f32 %v2309_v50, %v2141_v26 }
 0x3a0   :  { %v13675_v12 = vld [vmem:[#allocation99_spill] sm:$0xff] }
 0x3a1   :  { %v10868_v3 = vadd.f32 %v2478_v57, %v2310_v61  ;;  %v1829_v40 = vpop.f32.mrf.mxu2  ;;  %v3498_v61 = vsel %vm10862_vm6, 0, %v3497_v51 }
 0x3a2   :  { %v1830_v32 = vadd.f32 %v1829_v40, %v13565_v31  ;;  %3499 = vst [vmem:[#allocation2 + $0x20] sm:$0x1] %v3498_v61 }
 0x3a3   :  { %13564 = vst [vmem:[#allocation97_spill] sm:$0xff] %v10868_v3  ;;  %v3023_v9 = vpop.f32.mrf.mxu0 }
 0x3a4   :  { %v2142_v46 = vpop.f32.mrf.mxu3 }
 0x3a5   :  { %v2143_v41 = vadd.f32 %v2142_v46, %v1830_v32 }
 0x3a6   :  { %2724 = vmatmul.bf16.gmra.mxu2 %v9309_v13  ;;  %3062 = vmatmul.bf16.gmra.mxu0 %v10338_v35  ;;  %v3402_v13 = vld [vmem:[#allocation2 + $0x24] sm:$0x1] }
 0x3a7   :  { %v10877_v50 = vadd.f32 %v2311_v11, %v2143_v41 }
 0x3a9   :  { %13566 = vst [vmem:[#allocation98_spill] sm:$0xff] %v10877_v50  ;;  %2893 = vmatmul.bf16.gmra.mxu3 %v9869_v16  ;;  %v2685_v2 = vpop.f32.mrf.mxu2 }
 0x3ab   :  { %v3025_v46 = vpop.f32.mrf.mxu0 }
 0x3ac   :  { %v2854_v8 = vpop.f32.mrf.mxu3 }
 0x3ad   :  { %v2855_v26 = vadd.f32 %v2854_v8, %v2685_v2  ;;  %v3403_v8 = vsel %vm10846_vm4, 0, %v3402_v13 }
 0x3ae   :  { %3404 = vst [vmem:[#allocation2 + $0x24] sm:$0x1] %v3403_v8 }
 0x3af   :  { %v3024_v57 = vadd.f32 %v3023_v9, %v2855_v26  ;;  %v9310_v26 = vld [vmem:[%s13121_s0 + $0x84] sm:$0xff] }
 0x3b1   :  { %v3183_v35 = vadd.f32 %v3024_v57, %v10334_v0  ;;  %v2687_v41 = vpop.f32.mrf.mxu2  ;;  %v9223_v57 = vld [vmem:[#allocation3 + $0x178] sm:$0xff] }
 0x3b2   :  { %6145 = vmatpush.bf16.msrb.mxu3 %v9223_v57  ;;  %v9183_v57 = vld [vmem:[#allocation3 + $0x38] sm:$0xff] }
 0x3b3   :  { %v3251_v24 = vadd.f32 %v10883_v37, %v3183_v35  ;;  %v3028_v32 = vpop.f32.mrf.mxu0  ;;  %6458 = vmatpush.bf16.msrb.mxu0 %v9183_v57  ;;  %v9311_v57 = vld [vmem:[%s13121_s0 + $0x90] sm:$0xff] }
 0x3b4   :  { %v2856_v11 = vpop.f32.mrf.mxu3 }
 0x3b5   :  { %v3315_v40 = vmax.f32 %v3251_v24, 0.0  ;;  %v2857_v31 = vadd.f32 %v2856_v11, %v2687_v41 }
 0x3b6   :  { %2729 = vmatmul.bf16.gmra.mxu2 %v9310_v26  ;;  %3067 = vmatmul.bf16.gmra.mxu0 %v10352_v38  ;;  %v4298_v38 = vld [vmem:[#allocation2 + $0xc] sm:$0xf] }
 0x3b7   :  { %v3590_v9 = vpack.c.bf16 %v3315_v40, %v3315_v40  ;;  %v3026_v2 = vadd.f32 %v3025_v46, %v2857_v31 }
 0x3b9   :  { %v3657_v0 = vshrl.u32 %v3590_v9, 16  ;;  %v3184_v51 = vadd.f32 %v3026_v2, %v10343_v7  ;;  %2898 = vmatmul.bf16.gmra.mxu3 %v9907_v44  ;;  %v3660_v46 = vshll.u32 %v3590_v9, 16  ;;  %v2690_v24 = vpop.f32.mrf.mxu2  ;;  %v3500_v2 = vld [vmem:[#allocation2 + $0x2c] sm:$0x1] }
 0x3ba   :  { %v9191_v44 = vld [vmem:[#allocation3 + $0x78] sm:$0xff] }
 0x3bb   :  { %v3659_v61 = vrot.slane %v3657_v0, 7  ;;  %v3252_v35 = vadd.f32 %v10883_v37, %v3184_v51  ;;  %v3030_v7 = vpop.f32.mrf.mxu0  ;;  %v3501_v0 = vsel %vm10862_vm6, 0, %v3500_v2  ;;  %v9215_v51 = vld [vmem:[#allocation3 + $0x138] sm:$0xff]  ;;  %6627 = vmatpush.bf16.msrb.mxu1 %v9191_v44 }
 0x3bc   :  { %v2859_v11 = vpop.f32.mrf.mxu3  ;;  %3502 = vst [vmem:[#allocation2 + $0x2c] sm:$0x1] %v3501_v0  ;;  %5976 = vmatpush.bf16.msrb.mxu2 %v9215_v51  ;;  %v3405_v51 = vld [vmem:[#allocation2 + $0x30] sm:$0x1] }
 0x3bd   :  { %v3662_v40 = vor.u32 %v3660_v46, %v3659_v61  ;;  %v3316_v31 = vmax.f32 %v3252_v35, 0.0  ;;  %v2860_v13 = vadd.f32 %v2859_v11, %v2690_v24 }
 0x3bf   :  { %v4299_v8 = vsel %vm10899_vm8, %v3662_v40, %v4298_v38  ;;  %v3591_v9 = vpack.c.bf16 %v3316_v31, %v3316_v31  ;;  %v3029_v26 = vadd.f32 %v3028_v32, %v2860_v13  ;;  %v3663_v32 = vrot.slane %v3659_v61, 4  ;;  %v4302_v31 = vld [vmem:[#allocation2 + $0x14] sm:$0x1] }
 0x3c0   :  { %4300 = vst [vmem:[#allocation2 + $0xc] sm:$0xf] %v4299_v8 }
 0x3c1   :  { %v3665_v16 = vshrl.u32 %v3591_v9, 16  ;;  %v3185_v46 = vadd.f32 %v3029_v26, %v10348_v47  ;;  %v3668_v24 = vshll.u32 %v3591_v9, 16  ;;  %v2692_v11 = vpop.f32.mrf.mxu2 }
 0x3c3   :  { %v3667_v35 = vrot.slane %v3665_v16, 7  ;;  %v3253_v38 = vadd.f32 %v10883_v37, %v3185_v46  ;;  %v3033_v0 = vpop.f32.mrf.mxu0  ;;  %v3406_v46 = vsel %vm10846_vm4, 0, %v3405_v51 }
 0x3c4   :  { %v2861_v13 = vpop.f32.mrf.mxu3  ;;  %3407 = vst [vmem:[#allocation2 + $0x30] sm:$0x1] %v3406_v46 }
 0x3c5   :  { %v3670_v2 = vor.u32 %v3668_v24, %v3667_v35  ;;  %v3672_v8 = vrot.slane %v3667_v35, 4  ;;  %v3317_v47 = vmax.f32 %v3253_v38, 0.0  ;;  %v2862_v26 = vadd.f32 %v2861_v13, %v2692_v11 }
 0x3c6   :  { %2734 = vmatmul.bf16.gmra.mxu2 %v9311_v57  ;;  %3072 = vmatmul.bf16.gmra.mxu0 %v10375_v55 }
 0x3c7   :  { %v3671_v16 = vsel %vm10910_vm10, %v3663_v32, %v3670_v2  ;;  %v4303_v44 = vsel %vm10846_vm4, %v3672_v8, %v4302_v31  ;;  %v3592_v61 = vpack.c.bf16 %v3317_v47, %v3317_v47  ;;  %v3031_v9 = vadd.f32 %v3030_v7, %v2862_v26  ;;  %v4305_v31 = vld [vmem:[#allocation2 + $0x18] sm:$0xf] }
 0x3c8   :  { %4301 = vst [vmem:[#allocation2 + $0x10] sm:$0xf] %v3671_v16  ;;  %v3503_v26 = vld [vmem:[#allocation2 + $0x38] sm:$0x1] }
 0x3c9   :  { %4304 = vst [vmem:[#allocation2 + $0x14] sm:$0x1] %v4303_v44  ;;  %v3674_v35 = vshrl.u32 %v3592_v61, 16  ;;  %v3186_v24 = vadd.f32 %v3031_v9, %v10363_v29  ;;  %2903 = vmatmul.bf16.gmra.mxu3 %v9958_v14  ;;  %v3677_v7 = vshll.u32 %v3592_v61, 16  ;;  %v2695_v32 = vpop.f32.mrf.mxu2  ;;  %v3504_v9 = vsel %vm10862_vm6, 0, %v3503_v26 }
 0x3ca   :  { %3505 = vst [vmem:[#allocation2 + $0x38] sm:$0x1] %v3504_v9  ;;  %v3408_v26 = vld [vmem:[#allocation2 + $0x3c] sm:$0x1] }
 0x3cb   :  { %v3676_v38 = vrot.slane %v3674_v35, 7  ;;  %v3254_v11 = vadd.f32 %v10883_v37, %v3186_v24  ;;  %v3035_v47 = vpop.f32.mrf.mxu0 }
 0x3cc   :  { %v2864_v13 = vpop.f32.mrf.mxu3 }
 0x3cd   :  { %v3679_v2 = vor.u32 %v3677_v7, %v3676_v38  ;;  %v3318_v8 = vmax.f32 %v3254_v11, 0.0  ;;  %v2865_v55 = vadd.f32 %v2864_v13, %v2695_v32  ;;  %v3680_v11 = vrot.slane %v3676_v38, 4  ;;  %v4309_v32 = vld [vmem:[#allocation2 + $0x20] sm:$0x1] }
 0x3ce   :  { %v9312_v38 = vld [vmem:[%s13121_s0 + $0x9c] sm:$0xff] }
 0x3cf   :  { %v4306_v51 = vsel %vm10899_vm8, %v3679_v2, %v4305_v31  ;;  %v3593_v16 = vpack.c.bf16 %v3318_v8, %v3318_v8  ;;  %v3034_v29 = vadd.f32 %v3033_v0, %v2865_v55  ;;  %v9141_v44 = vld [vmem:[#allocation2 + $0xc] sm:$0xff] }
 0x3d0   :  { %4307 = vst [vmem:[#allocation2 + $0x18] sm:$0xf] %v4306_v51  ;;  %5815 = vmatmul.bf16.vlgmr.msra.gmra.mxu1 %v9141_v44  ;;  %v3409_v44 = vsel %vm10846_vm4, 0, %v3408_v26 }
 0x3d1   :  { %v3682_v61 = vshrl.u32 %v3593_v16, 16  ;;  %v3187_v57 = vadd.f32 %v3034_v29, %v10371_v27  ;;  %v3685_v35 = vshll.u32 %v3593_v16, 16  ;;  %v2697_v7 = vpop.f32.mrf.mxu2  ;;  %3410 = vst [vmem:[#allocation2 + $0x3c] sm:$0x1] %v3409_v44 }
 0x3d3   :  { %v3684_v46 = vrot.slane %v3682_v61, 7  ;;  %v3255_v24 = vadd.f32 %v10883_v37, %v3187_v57  ;;  %v3038_v55 = vpop.f32.mrf.mxu0 }
 0x3d4   :  { %v2866_v31 = vpop.f32.mrf.mxu3 }
 0x3d5   :  { %v3687_v13 = vor.u32 %v3685_v35, %v3684_v46  ;;  %v3689_v0 = vrot.slane %v3684_v46, 4  ;;  %v3319_v2 = vmax.f32 %v3255_v24, 0.0  ;;  %v2867_v8 = vadd.f32 %v2866_v31, %v2697_v7  ;;  %v4312_v24 = vld [vmem:[#allocation2 + $0x24] sm:$0xf] }
 0x3d6   :  { %2739 = vmatmul.bf16.gmra.mxu2 %v9312_v38  ;;  %3077 = vmatmul.bf16.gmra.mxu0 %v10392_v1 }
 0x3d7   :  { %v3688_v51 = vsel %vm10910_vm10, %v3680_v11, %v3687_v13  ;;  %v4310_v27 = vsel %vm10846_vm4, %v3689_v0, %v4309_v32  ;;  %v3594_v29 = vpack.c.bf16 %v3319_v2, %v3319_v2  ;;  %v3036_v16 = vadd.f32 %v3035_v47, %v2867_v8  ;;  %v3506_v13 = vld [vmem:[#allocation2 + $0x44] sm:$0x1] }
 0x3d8   :  { %4308 = vst [vmem:[#allocation2 + $0x1c] sm:$0xf] %v3688_v51  ;;  %v3507_v26 = vsel %vm10862_vm6, 0, %v3506_v13 }
 0x3d9   :  { %4311 = vst [vmem:[#allocation2 + $0x20] sm:$0x1] %v4310_v27  ;;  %v3691_v9 = vshrl.u32 %v3594_v29, 16  ;;  %v3188_v61 = vadd.f32 %v3036_v16, %v10383_v15  ;;  %2908 = vmatmul.bf16.gmra.mxu3 %v9997_v54  ;;  %v3694_v47 = vshll.u32 %v3594_v29, 16  ;;  %v2700_v35 = vpop.f32.mrf.mxu2 }
 0x3da   :  { %3508 = vst [vmem:[#allocation2 + $0x44] sm:$0x1] %v3507_v26 }
 0x3db   :  { %v3693_v57 = vrot.slane %v3691_v9, 7  ;;  %v3256_v46 = vadd.f32 %v10883_v37, %v3188_v61  ;;  %v3040_v31 = vpop.f32.mrf.mxu0  ;;  %v4316_v61 = vld [vmem:[#allocation2 + $0x2c] sm:$0x1] }
 0x3dc   :  { %v2869_v7 = vpop.f32.mrf.mxu3 }
 0x3dd   :  { %v3696_v11 = vor.u32 %v3694_v47, %v3693_v57  ;;  %v3320_v32 = vmax.f32 %v3256_v46, 0.0  ;;  %v2870_v1 = vadd.f32 %v2869_v7, %v2700_v35  ;;  %v3697_v9 = vrot.slane %v3693_v57, 4  ;;  %v9313_v57 = vld [vmem:[%s13121_s0 + $0xa8] sm:$0xff] }
 0x3df   :  { %v4313_v0 = vsel %vm10899_vm8, %v3696_v11, %v4312_v24  ;;  %v3595_v2 = vpack.c.bf16 %v3320_v32, %v3320_v32  ;;  %v3039_v15 = vadd.f32 %v3038_v55, %v2870_v1  ;;  %v9142_v8 = vld [vmem:[#allocation2 + $0x18] sm:$0xff]  ;;  %v3411_v11 = vld [vmem:[#allocation2 + $0x48] sm:$0x1] }
 0x3e0   :  { %4314 = vst [vmem:[#allocation2 + $0x24] sm:$0xf] %v4313_v0  ;;  %5820 = vmatmul.bf16.gmra.mxu1 %v9142_v8  ;;  %v13571_v0 = vld [vmem:[#allocation104_spill] sm:$0xff]  ;;  %v13572_v8 = vld [vmem:[#allocation102_spill] sm:$0xff] }
 0x3e1   :  { %v3699_v51 = vshrl.u32 %v3595_v2, 16  ;;  %v3189_v27 = vadd.f32 %v3039_v15, %v10388_v36  ;;  %v3702_v16 = vshll.u32 %v3595_v2, 16  ;;  %v2702_v44 = vpop.f32.mrf.mxu2  ;;  %v3412_v2 = vsel %vm10846_vm4, 0, %v3411_v11 }
 0x3e2   :  { %3413 = vst [vmem:[#allocation2 + $0x48] sm:$0x1] %v3412_v2 }
 0x3e3   :  { %v3701_v29 = vrot.slane %v3699_v51, 7  ;;  %v3257_v38 = vadd.f32 %v10883_v37, %v3189_v27  ;;  %v3043_v7 = vpop.f32.mrf.mxu0  ;;  %v13573_v51 = vld [vmem:[#allocation59_spill] sm:$0xff] }
 0x3e4   :  { %v2871_v47 = vpop.f32.mrf.mxu3 }
 0x3e5   :  { %v3704_v46 = vor.u32 %v3702_v16, %v3701_v29  ;;  %v3706_v55 = vrot.slane %v3701_v29, 4  ;;  %v3321_v35 = vmax.f32 %v3257_v38, 0.0  ;;  %v2872_v24 = vadd.f32 %v2871_v47, %v2702_v44  ;;  %v4319_v38 = vld [vmem:[#allocation2 + $0x30] sm:$0xf] }
 0x3e6   :  { %2744 = vmatmul.bf16.gmra.mxu2 %v9313_v57  ;;  %3082 = vmatmul.bf16.gmra.mxu0 %v13571_v0 }
 0x3e7   :  { %v3705_v32 = vsel %vm10910_vm10, %v3697_v9, %v3704_v46  ;;  %v4317_v36 = vsel %vm10846_vm4, %v3706_v55, %v4316_v61  ;;  %v3596_v1 = vpack.c.bf16 %v3321_v35, %v3321_v35  ;;  %v3041_v13 = vadd.f32 %v3040_v31, %v2872_v24  ;;  %v3509_v55 = vld [vmem:[#allocation2 + $0x50] sm:$0x1] }
 0x3e8   :  { %4315 = vst [vmem:[#allocation2 + $0x28] sm:$0xf] %v3705_v32 }
 0x3e9   :  { %4318 = vst [vmem:[#allocation2 + $0x2c] sm:$0x1] %v4317_v36  ;;  %v3708_v15 = vshrl.u32 %v3596_v1, 16  ;;  %v3190_v26 = vadd.f32 %v3041_v13, %v13572_v8  ;;  %2913 = vmatmul.bf16.gmra.mxu3 %v13573_v51  ;;  %v3711_v31 = vshll.u32 %v3596_v1, 16  ;;  %v2705_v16 = vpop.f32.mrf.mxu2  ;;  %v3510_v36 = vsel %vm10862_vm6, 0, %v3509_v55  ;;  %v13574_v13 = vld [vmem:[#allocation103_spill] sm:$0xff] }
 0x3ea   :  { %3511 = vst [vmem:[#allocation2 + $0x50] sm:$0x1] %v3510_v36 }
 0x3eb   :  { %v3710_v27 = vrot.slane %v3708_v15, 7  ;;  %v3258_v29 = vadd.f32 %v10883_v37, %v3190_v26  ;;  %v3045_v46 = vpop.f32.mrf.mxu0 }
 0x3ec   :  { %v2874_v44 = vpop.f32.mrf.mxu3 }
 0x3ed   :  { %v3713_v9 = vor.u32 %v3711_v31, %v3710_v27  ;;  %v3322_v61 = vmax.f32 %v3258_v29, 0.0  ;;  %v2875_v47 = vadd.f32 %v2874_v44, %v2705_v16  ;;  %v3714_v26 = vrot.slane %v3710_v27, 4  ;;  %v4323_v31 = vld [vmem:[#allocation2 + $0x38] sm:$0x1] }
 0x3ee   :  { %v9314_v27 = vld [vmem:[%s13121_s0 + $0xb4] sm:$0xff] }
 0x3ef   :  { %v4320_v35 = vsel %vm10899_vm8, %v3713_v9, %v4319_v38  ;;  %v3597_v24 = vpack.c.bf16 %v3322_v61, %v3322_v61  ;;  %v3044_v11 = vadd.f32 %v3043_v7, %v2875_v47  ;;  %v9143_v32 = vld [vmem:[#allocation2 + $0x24] sm:$0xff]  ;;  %v3414_v61 = vld [vmem:[#allocation2 + $0x54] sm:$0x1] }
 0x3f0   :  { %4321 = vst [vmem:[#allocation2 + $0x30] sm:$0xf] %v4320_v35  ;;  %5825 = vmatmul.bf16.gmra.mxu1 %v9143_v32  ;;  %v3415_v32 = vsel %vm10846_vm4, 0, %v3414_v61 }
 0x3f1   :  { %v3716_v1 = vshrl.u32 %v3597_v24, 16  ;;  %v3191_v57 = vadd.f32 %v3044_v11, %v13574_v13  ;;  %v3719_v2 = vshll.u32 %v3597_v24, 16  ;;  %v2707_v8 = vpop.f32.mrf.mxu2  ;;  %v13575_v11 = vld [vmem:[#allocation64_spill] sm:$0xff]  ;;  %3416 = vst [vmem:[#allocation2 + $0x54] sm:$0x1] %v3415_v32  ;;  %v9190_v32 = vld [vmem:[#allocation3 + $0x70] sm:$0xff] }
 0x3f2   :  { %6628 = vmatpush.bf16.msrb.mxu1 %v9190_v32 }
 0x3f3   :  { %v3718_v0 = vrot.slane %v3716_v1, 7  ;;  %v3259_v15 = vadd.f32 %v10883_v37, %v3191_v57  ;;  %v3048_v9 = vpop.f32.mrf.mxu0  ;;  %v13576_v1 = vld [vmem:[#allocation105_spill] sm:$0xff]  ;;  %v13577_v57 = vld [vmem:[#allocation67_spill] sm:$0xff] }
 0x3f4   :  { %v2876_v29 = vpop.f32.mrf.mxu3 }
 0x3f5   :  { %v3721_v16 = vor.u32 %v3719_v2, %v3718_v0  ;;  %v3723_v7 = vrot.slane %v3718_v0, 4  ;;  %v3323_v38 = vmax.f32 %v3259_v15, 0.0  ;;  %v2877_v44 = vadd.f32 %v2876_v29, %v2707_v8  ;;  %v9222_v0 = vld [vmem:[#allocation3 + $0x170] sm:$0xff] }
 0x3f6   :  { %2749 = vmatmul.bf16.gmra.mxu2 %v9314_v27  ;;  %3087 = vmatmul.bf16.gmra.mxu0 %v13575_v11  ;;  %v9214_v27 = vld [vmem:[#allocation3 + $0x130] sm:$0xff] }
 0x3f7   :  { %v3722_v47 = vsel %vm10910_vm10, %v3714_v26, %v3721_v16  ;;  %v4324_v55 = vsel %vm10846_vm4, %v3723_v7, %v4323_v31  ;;  %v3598_v35 = vpack.c.bf16 %v3323_v38, %v3323_v38  ;;  %v3046_v24 = vadd.f32 %v3045_v46, %v2877_v44  ;;  %6146 = vmatpush.bf16.msrb.mxu3 %v9222_v0  ;;  %v4326_v26 = vld [vmem:[#allocation2 + $0x3c] sm:$0xf]  ;;  %v9182_v11 = vld [vmem:[#allocation3 + $0x30] sm:$0xff] }
 0x3f8   :  { %4322 = vst [vmem:[#allocation2 + $0x34] sm:$0xf] %v3722_v47  ;;  %v3512_v44 = vld [vmem:[#allocation2 + $0x5c] sm:$0x1]  ;;  %5977 = vmatpush.bf16.msrb.mxu2 %v9214_v27  ;;  %6459 = vmatpush.bf16.msrb.mxu0 %v9182_v11 }
 0x3f9   :  { %4325 = vst [vmem:[#allocation2 + $0x38] sm:$0x1] %v4324_v55  ;;  %v3725_v36 = vshrl.u32 %v3598_v35, 16  ;;  %v3192_v13 = vadd.f32 %v3046_v24, %v13576_v1  ;;  %2918 = vmatmul.bf16.gmra.mxu3 %v13577_v57  ;;  %v3728_v2 = vshll.u32 %v3598_v35, 16  ;;  %v2710_v8 = vpop.f32.mrf.mxu2  ;;  %v3513_v35 = vsel %vm10862_vm6, 0, %v3512_v44  ;;  %v13578_v1 = vld [vmem:[#allocation61_spill] sm:$0xff] }
 0x3fa   :  { %3514 = vst [vmem:[#allocation2 + $0x5c] sm:$0x1] %v3513_v35  ;;  %v3417_v35 = vld [vmem:[#allocation2 + $0x60] sm:$0x1] }
 0x3fb   :  { %v3727_v46 = vrot.slane %v3725_v36, 7  ;;  %v3260_v15 = vadd.f32 %v10883_v37, %v3192_v13  ;;  %v3050_v38 = vpop.f32.mrf.mxu0 }
 0x3fc   :  { %v2879_v31 = vpop.f32.mrf.mxu3 }
 0x3fd   :  { %v3730_v29 = vor.u32 %v3728_v2, %v3727_v46  ;;  %v3324_v16 = vmax.f32 %v3260_v15, 0.0  ;;  %v2880_v7 = vadd.f32 %v2879_v31, %v2710_v8  ;;  %v91_v8 = vld [vmem:[%s13121_s0 + $0xd4] sm:$0x1]  ;;  %v4330_v31 = vld [vmem:[#allocation2 + $0x44] sm:$0x1] }
 0x3ff   :  { %v4327_v61 = vsel %vm10899_vm8, %v3730_v29, %v4326_v26  ;;  %v3599_v47 = vpack.c.bf16 %v3324_v16, %v3324_v16  ;;  %v3049_v55 = vadd.f32 %v3048_v9, %v2880_v7  ;;  %v9144_v24 = vld [vmem:[#allocation2 + $0x30] sm:$0xff]  ;;  %v3731_v26 = vrot.slane %v3727_v46, 4 }
 0x400   :  { %4328 = vst [vmem:[#allocation2 + $0x3c] sm:$0xf] %v4327_v61  ;;  %5830 = vmatmul.bf16.gmra.mxu1 %v9144_v24  ;;  %v415_v24 = vunpack.c.l.b16 %v91_v8 }
 0x401   :  { %v3733_v36 = vshrl.u32 %v3599_v47, 16  ;;  %v3193_v13 = vadd.f32 %v3049_v55, %v13578_v1  ;;  %v3736_v2 = vshll.u32 %v3599_v47, 16  ;;  %v2712_v9 = vpop.f32.mrf.mxu2  ;;  %v10996_v47 = vld [vmem:[%s13121_s0 + $0xcc] sm:$0xff]  ;;  %v13579_v1 = vld [vmem:[#allocation66_spill] sm:$0xff] }
 0x402   :  { %v451_v8 = vpack.c.b16 %v415_v24, %v415_v24 }
 0x403   :  { %v3735_v0 = vrot.slane %v3733_v36, 7  ;;  %v3261_v15 = vadd.f32 %v10883_v37, %v3193_v13  ;;  %v3053_v55 = vpop.f32.mrf.mxu0  ;;  %v9315_v36 = vld [vmem:[%s13121_s0 + $0xc0] sm:$0xff]  ;;  %v3418_v13 = vsel %vm10846_vm4, 0, %v3417_v35 }
 0x404   :  { %v2881_v29 = vpop.f32.mrf.mxu3  ;;  %3419 = vst [vmem:[#allocation2 + $0x60] sm:$0x1] %v3418_v13 }
 0x405   :  { %v3738_v16 = vor.u32 %v3736_v2, %v3735_v0  ;;  %v3740_v7 = vrot.slane %v3735_v0, 4  ;;  %v3325_v44 = vmax.f32 %v3261_v15, 0.0  ;;  %v2882_v61 = vadd.f32 %v2881_v29, %v2712_v9  ;;  %v13580_v2 = vld [vmem:[#allocation106_spill] sm:$0xff]  ;;  %v13581_v9 = vld [vmem:[#allocation75_spill] sm:$0xff] }
 0x406   :  { %2754 = vmatmul.bf16.gmra.mxu2 %v9315_v36  ;;  %3092 = vmatmul.bf16.gmra.mxu0 %v13579_v1  ;;  %v676_v36 = vshrl.u32 %v10996_v47, 16  ;;  %v683_v1 = vshll.u32 %v451_v8, 16 }
 0x407   :  { %v3739_v27 = vsel %vm10910_vm10, %v3731_v26, %v3738_v16  ;;  %v4331_v46 = vsel %vm10846_vm4, %v3740_v7, %v4330_v31  ;;  %v3600_v11 = vpack.c.bf16 %v3325_v44, %v3325_v44  ;;  %v3051_v32 = vadd.f32 %v3050_v38, %v2882_v61  ;;  %v4333_v7 = vld [vmem:[#allocation2 + $0x48] sm:$0xf] }
 0x408   :  { %4329 = vst [vmem:[#allocation2 + $0x40] sm:$0xf] %v3739_v27  ;;  %v678_v38 = vshll.u32 %v10996_v47, 16  ;;  %v685_v57 = vrot.slane %v683_v1, 1  ;;  %v13583_v1 = vld [vmem:[#allocation70_spill] sm:$0xff] }
 0x409   :  { %4332 = vst [vmem:[#allocation2 + $0x44] sm:$0x1] %v4331_v46  ;;  %v3742_v0 = vshrl.u32 %v3600_v11, 16  ;;  %v3194_v15 = vadd.f32 %v3051_v32, %v13580_v2  ;;  %2923 = vmatmul.bf16.gmra.mxu3 %v13581_v9  ;;  %v3745_v31 = vshll.u32 %v3600_v11, 16  ;;  %v2715_v16 = vpop.f32.mrf.mxu2  ;;  %v3515_v2 = vld [vmem:[#allocation2 + $0x68] sm:$0x1] }
 0x40a   :  { %v680_v32 = vrot.slane %v678_v38, 1 }
 0x40b   :  { %v3744_v26 = vrot.slane %v3742_v0, 7  ;;  %v3262_v29 = vadd.f32 %v10883_v37, %v3194_v15  ;;  %v3055_v46 = vpop.f32.mrf.mxu0  ;;  %v3516_v15 = vsel %vm10862_vm6, 0, %v3515_v2 }
 0x40c   :  { %v2884_v44 = vpop.f32.mrf.mxu3  ;;  %3517 = vst [vmem:[#allocation2 + $0x68] sm:$0x1] %v3516_v15  ;;  %v681_v38 = vor.u32 %v680_v32, %v676_v36 }
 0x40d   :  { %v3747_v61 = vor.u32 %v3745_v31, %v3744_v26  ;;  %v3326_v27 = vmax.f32 %v3262_v29, 0.0  ;;  %v2885_v35 = vadd.f32 %v2884_v44, %v2715_v16  ;;  %v991_v31 = vrot.slane %v10996_v47, 1  ;;  %v13582_v44 = vld [vmem:[#allocation69_spill] sm:$0xff] }
 0x40e   :  { %v992_v29 = vrot.slane %v451_v8, 1 }
 0x40f   :  { %v4334_v24 = vsel %vm10899_vm8, %v3747_v61, %v4333_v7  ;;  %v3601_v13 = vpack.c.bf16 %v3326_v27, %v3326_v27  ;;  %v3054_v0 = vadd.f32 %v3053_v55, %v2885_v35  ;;  %v9145_v11 = vld [vmem:[#allocation2 + $0x3c] sm:$0xff]  ;;  %v3748_v61 = vrot.slane %v3744_v26, 4  ;;  %v4337_v27 = vld [vmem:[#allocation2 + $0x50] sm:$0x1] }
 0x410   :  { %4335 = vst [vmem:[#allocation2 + $0x48] sm:$0xf] %v4334_v24  ;;  %5835 = vmatmul.bf16.gmra.mxu1 %v9145_v11  ;;  %v993_v2 = vsel %vm939_vm1, %v991_v31, %v992_v29  ;;  %v3420_v11 = vld [vmem:[#allocation2 + $0x6c] sm:$0x1]  ;;  %v4340_v29 = vld [vmem:[#allocation2 + $0x54] sm:$0xf] }
 0x411   :  { %v3750_v16 = vshrl.u32 %v3601_v13, 16  ;;  %v3195_v9 = vadd.f32 %v3054_v0, %v13582_v44  ;;  %v3753_v54 = vshll.u32 %v3601_v13, 16  ;;  %v2717_v55 = vpop.f32.mrf.mxu2  ;;  %v686_v0 = vsel %vm470_vm0, %v681_v38, %v685_v57  ;;  %v3518_v38 = vld [vmem:[#allocation2 + $0x74] sm:$0x1] }
 0x413   :  { %v3752_v51 = vrot.slane %v3750_v16, 7  ;;  %v3263_v7 = vadd.f32 %v10883_v37, %v3195_v9  ;;  %v3058_v3 = vpop.f32.mrf.mxu0 }
 0x414   :  { %v2886_v35 = vpop.f32.mrf.mxu3 }
 0x415   :  { %v3755_v24 = vor.u32 %v3753_v54, %v3752_v51  ;;  %v3757_v14 = vrot.slane %v3752_v51, 4  ;;  %v3327_v8 = vmax.f32 %v3263_v7, 0.0  ;;  %v2887_v50 = vadd.f32 %v2886_v35, %v2717_v55 }
 0x416   :  { %2759 = vmatmul.bf16.gmra.mxu2 %v10996_v47  ;;  %3097 = vmatmul.bf16.gmra.mxu0 %v993_v2  ;;  %v3421_v54 = vsel %vm10846_vm4, 0, %v3420_v11  ;;  %v3519_v35 = vsel %vm10862_vm6, 0, %v3518_v38 }
 0x417   :  { %v3756_v36 = vsel %vm10910_vm10, %v3748_v61, %v3755_v24  ;;  %v4338_v9 = vsel %vm10846_vm4, %v3757_v14, %v4337_v27  ;;  %v3602_v32 = vpack.c.bf16 %v3327_v8, %v3327_v8  ;;  %v3056_v26 = vadd.f32 %v3055_v46, %v2887_v50  ;;  %3422 = vst [vmem:[#allocation2 + $0x6c] sm:$0x1] %v3421_v54 }
 0x418   :  { %4336 = vst [vmem:[#allocation2 + $0x4c] sm:$0xf] %v3756_v36 }
 0x419   :  { %4339 = vst [vmem:[#allocation2 + $0x50] sm:$0x1] %v4338_v9  ;;  %v3759_v51 = vshrl.u32 %v3602_v32, 16  ;;  %v3196_v57 = vadd.f32 %v3056_v26, %v13583_v1  ;;  %2928 = vmatmul.bf16.gmra.mxu3 %v686_v0  ;;  %v3762_v15 = vshll.u32 %v3602_v32, 16  ;;  %v2720_v14 = vpop.f32.mrf.mxu2  ;;  %v4344_v32 = vld [vmem:[#allocation2 + $0x5c] sm:$0x1] }
 0x41a   :  { %3520 = vst [vmem:[#allocation2 + $0x74] sm:$0x1] %v3519_v35 }
 0x41b   :  { %v3761_v13 = vrot.slane %v3759_v51, 7  ;;  %v3264_v31 = vadd.f32 %v10883_v37, %v3196_v57  ;;  %v3060_v44 = vpop.f32.mrf.mxu0 }
 0x41c   :  { %v2889_v50 = vpop.f32.mrf.mxu3 }
 0x41d   :  { %v3764_v46 = vor.u32 %v3762_v15, %v3761_v13  ;;  %v3328_v16 = vmax.f32 %v3264_v31, 0.0  ;;  %v2890_v47 = vadd.f32 %v2889_v50, %v2720_v14  ;;  %v3765_v9 = vrot.slane %v3761_v13, 4  ;;  %v3423_v15 = vld [vmem:[#allocation2 + $0x78] sm:$0x1]  ;;  %v9316_v13 = vld [vmem:[%s13121_s0 + $0xf0] sm:$0xff] }
 0x41e   :  { %v3424_v50 = vsel %vm10846_vm4, 0, %v3423_v15  ;;  %v4351_v15 = vld [vmem:[#allocation2 + $0x68] sm:$0x1] }
 0x41f   :  { %v4341_v7 = vsel %vm10899_vm8, %v3764_v46, %v4340_v29  ;;  %v3603_v55 = vpack.c.bf16 %v3328_v16, %v3328_v16  ;;  %v3059_v61 = vadd.f32 %v3058_v3, %v2890_v47  ;;  %v9146_v27 = vld [vmem:[#allocation2 + $0x48] sm:$0xff]  ;;  %3425 = vst [vmem:[#allocation2 + $0x78] sm:$0x1] %v3424_v50  ;;  %v3426_v50 = vld [vmem:[#allocation2 + $0x84] sm:$0x1] }
 0x420   :  { %4342 = vst [vmem:[#allocation2 + $0x54] sm:$0xf] %v4341_v7  ;;  %5840 = vmatmul.bf16.gmra.mxu1 %v9146_v27 }
 0x421   :  { %v3767_v2 = vshrl.u32 %v3603_v55, 16  ;;  %v3197_v24 = vadd.f32 %v3059_v61, %v10467_v56  ;;  %v3770_v0 = vshll.u32 %v3603_v55, 16  ;;  %v2722_v36 = vpop.f32.mrf.mxu2  ;;  %v4347_v55 = vld [vmem:[#allocation2 + $0x60] sm:$0xf] }
 0x423   :  { %v3769_v8 = vrot.slane %v3767_v2, 7  ;;  %v3265_v11 = vadd.f32 %v10883_v37, %v3197_v24  ;;  %v3063_v57 = vpop.f32.mrf.mxu0  ;;  %v3521_v24 = vld [vmem:[#allocation2 + $0x80] sm:$0x1] }
 0x424   :  { %v2891_v26 = vpop.f32.mrf.mxu3 }
 0x425   :  { %v3772_v54 = vor.u32 %v3770_v0, %v3769_v8  ;;  %v3774_v3 = vrot.slane %v3769_v8, 4  ;;  %v3329_v51 = vmax.f32 %v3265_v11, 0.0  ;;  %v2892_v1 = vadd.f32 %v2891_v26, %v2722_v36 }
 0x426   :  { %2764 = vmatmul.bf16.gmra.mxu2 %v9316_v13  ;;  %3102 = vmatmul.bf16.gmra.mxu0 %v10484_v52  ;;  %v3522_v36 = vsel %vm10862_vm6, 0, %v3521_v24  ;;  %v4354_v24 = vld [vmem:[#allocation2 + $0x6c] sm:$0xf] }
 0x427   :  { %v3773_v31 = vsel %vm10910_vm10, %v3765_v9, %v3772_v54  ;;  %v4345_v56 = vsel %vm10846_vm4, %v3774_v3, %v4344_v32  ;;  %v3604_v14 = vpack.c.bf16 %v3329_v51, %v3329_v51  ;;  %v3061_v29 = vadd.f32 %v3060_v44, %v2892_v1  ;;  %3523 = vst [vmem:[#allocation2 + $0x80] sm:$0x1] %v3522_v36  ;;  %v3524_v36 = vld [vmem:[#allocation2 + $0x8c] sm:$0x1] }
 0x428   :  { %4343 = vst [vmem:[#allocation2 + $0x58] sm:$0xf] %v3773_v31 }
 0x429   :  { %4346 = vst [vmem:[#allocation2 + $0x5c] sm:$0x1] %v4345_v56  ;;  %v3776_v46 = vshrl.u32 %v3604_v14, 16  ;;  %v3198_v16 = vadd.f32 %v3061_v29, %v10473_v48  ;;  %2933 = vmatmul.bf16.gmra.mxu3 %v13439_v49  ;;  %v3779_v44 = vshll.u32 %v3604_v14, 16  ;;  %v2725_v7 = vpop.f32.mrf.mxu2 }
 0x42b   :  { %v3778_v47 = vrot.slane %v3776_v46, 7  ;;  %v3266_v38 = vadd.f32 %v10883_v37, %v3198_v16  ;;  %v3065_v2 = vpop.f32.mrf.mxu0 }
 0x42c   :  { %v2894_v61 = vpop.f32.mrf.mxu3 }
 0x42d   :  { %v3781_v27 = vor.u32 %v3779_v44, %v3778_v47  ;;  %v3330_v35 = vmax.f32 %v3266_v38, 0.0  ;;  %v2895_v52 = vadd.f32 %v2894_v61, %v2725_v7  ;;  %v3782_v1 = vrot.slane %v3778_v47, 4  ;;  %v9317_v47 = vld [vmem:[%s13121_s0 + $0xfc] sm:$0xff] }
 0x42e   :  { %v3427_v38 = vsel %vm10846_vm4, 0, %v3426_v50  ;;  %v9221_v61 = vld [vmem:[#allocation3 + $0x168] sm:$0xff]  ;;  %v4358_v50 = vld [vmem:[#allocation2 + $0x74] sm:$0x1] }
 0x42f   :  { %v4348_v8 = vsel %vm10899_vm8, %v3781_v27, %v4347_v55  ;;  %v3605_v0 = vpack.c.bf16 %v3330_v35, %v3330_v35  ;;  %v3064_v48 = vadd.f32 %v3063_v57, %v2895_v52  ;;  %v9147_v11 = vld [vmem:[#allocation2 + $0x54] sm:$0xff]  ;;  %3428 = vst [vmem:[#allocation2 + $0x84] sm:$0x1] %v3427_v38  ;;  %6147 = vmatpush.bf16.msrb.mxu3 %v9221_v61 }
 0x430   :  { %4349 = vst [vmem:[#allocation2 + $0x60] sm:$0xf] %v4348_v8  ;;  %5845 = vmatmul.bf16.gmra.mxu1 %v9147_v11 }
 0x431   :  { %v3784_v9 = vshrl.u32 %v3605_v0, 16  ;;  %v3199_v32 = vadd.f32 %v3064_v48, %v10480_v23  ;;  %v3787_v54 = vshll.u32 %v3605_v0, 16  ;;  %v2727_v51 = vpop.f32.mrf.mxu2 }
 0x433   :  { %v3786_v26 = vrot.slane %v3784_v9, 7  ;;  %v3267_v3 = vadd.f32 %v10883_v37, %v3199_v32  ;;  %v3068_v13 = vpop.f32.mrf.mxu0 }
 0x434   :  { %v2896_v31 = vpop.f32.mrf.mxu3 }
 0x435   :  { %v3789_v56 = vor.u32 %v3787_v54, %v3786_v26  ;;  %v3791_v57 = vrot.slane %v3786_v26, 4  ;;  %v3331_v14 = vmax.f32 %v3267_v3, 0.0  ;;  %v2897_v29 = vadd.f32 %v2896_v31, %v2727_v51  ;;  %v9213_v3 = vld [vmem:[#allocation3 + $0x128] sm:$0xff] }
 0x436   :  { %2769 = vmatmul.bf16.gmra.mxu2 %v9317_v47  ;;  %3107 = vmatmul.bf16.gmra.mxu0 %v10499_v39  ;;  %v3525_v54 = vsel %vm10862_vm6, 0, %v3524_v36  ;;  %v9181_v51 = vld [vmem:[#allocation3 + $0x28] sm:$0xff] }
 0x437   :  { %v3790_v46 = vsel %vm10910_vm10, %v3782_v1, %v3789_v56  ;;  %v4352_v23 = vsel %vm10846_vm4, %v3791_v57, %v4351_v15  ;;  %v3606_v16 = vpack.c.bf16 %v3331_v14, %v3331_v14  ;;  %v3066_v44 = vadd.f32 %v3065_v2, %v2897_v29  ;;  %v9189_v1 = vld [vmem:[#allocation3 + $0x68] sm:$0xff]  ;;  %3526 = vst [vmem:[#allocation2 + $0x8c] sm:$0x1] %v3525_v54 }
 0x438   :  { %4350 = vst [vmem:[#allocation2 + $0x64] sm:$0xf] %v3790_v46  ;;  %5978 = vmatpush.bf16.msrb.mxu2 %v9213_v3  ;;  %6460 = vmatpush.bf16.msrb.mxu0 %v9181_v51  ;;  %v4361_v36 = vld [vmem:[#allocation2 + $0x78] sm:$0xf] }
 0x439   :  { %4353 = vst [vmem:[#allocation2 + $0x68] sm:$0x1] %v4352_v23  ;;  %v3793_v7 = vshrl.u32 %v3606_v16, 16  ;;  %v3200_v55 = vadd.f32 %v3066_v44, %v10488_v60  ;;  %2938 = vmatmul.bf16.gmra.mxu3 %v13441_v58  ;;  %v3796_v35 = vshll.u32 %v3606_v16, 16  ;;  %v2730_v2 = vpop.f32.mrf.mxu2  ;;  %6629 = vmatpush.bf16.msrb.mxu1 %v9189_v1  ;;  %v3527_v3 = vld [vmem:[#allocation2 + $0x98] sm:$0x1] }
 0x43b   :  { %v3795_v27 = vrot.slane %v3793_v7, 7  ;;  %v3268_v52 = vadd.f32 %v10883_v37, %v3200_v55  ;;  %v3070_v11 = vpop.f32.mrf.mxu0  ;;  %v11075_v7 = vpop.f32.mrf.mxu1 }
 0x43c   :  { %v2899_v8 = vpop.f32.mrf.mxu3 }
 0x43d   :  { %v3798_v39 = vor.u32 %v3796_v35, %v3795_v27  ;;  %v3332_v0 = vmax.f32 %v3268_v52, 0.0  ;;  %v2900_v48 = vadd.f32 %v2899_v8, %v2730_v2 }
 0x43f   :  { %v4355_v60 = vsel %vm10899_vm8, %v3798_v39, %v4354_v24  ;;  %v3607_v9 = vpack.c.bf16 %v3332_v0, %v3332_v0  ;;  %v3069_v32 = vadd.f32 %v3068_v13, %v2900_v48  ;;  %v9148_v26 = vld [vmem:[#allocation2 + $0x60] sm:$0xff]  ;;  %v3799_v13 = vrot.slane %v3795_v27, 4  ;;  %v9318_v27 = vld [vmem:[%s13121_s0 + $0x108] sm:$0xff] }
 0x440   :  { %4356 = vst [vmem:[#allocation2 + $0x6c] sm:$0xf] %v4355_v60  ;;  %5850 = vmatmul.bf16.gmra.mxu1 %v9148_v26 }
 0x441   :  { %v3801_v15 = vshrl.u32 %v3607_v9, 16  ;;  %v3201_v31 = vadd.f32 %v3069_v32, %v10495_v53  ;;  %v3804_v57 = vshll.u32 %v3607_v9, 16  ;;  %v2732_v29 = vpop.f32.mrf.mxu2  ;;  %v3429_v53 = vld [vmem:[#allocation2 + $0x90] sm:$0x1] }
 0x442   :  { %v3430_v2 = vsel %vm10846_vm4, 0, %v3429_v53 }
 0x443   :  { %v3803_v56 = vrot.slane %v3801_v15, 7  ;;  %v3269_v14 = vadd.f32 %v10883_v37, %v3201_v31  ;;  %v3073_v38 = vpop.f32.mrf.mxu0  ;;  %3431 = vst [vmem:[#allocation2 + $0x90] sm:$0x1] %v3430_v2  ;;  %v3528_v31 = vsel %vm10862_vm6, 0, %v3527_v3  ;;  %v9319_v2 = vld [vmem:[%s13121_s0 + $0x114] sm:$0xff] }
 0x444   :  { %v2901_v46 = vpop.f32.mrf.mxu3  ;;  %3529 = vst [vmem:[#allocation2 + $0x98] sm:$0x1] %v3528_v31 }
 0x445   :  { %v3806_v23 = vor.u32 %v3804_v57, %v3803_v56  ;;  %v3808_v16 = vrot.slane %v3803_v56, 4  ;;  %v3333_v44 = vmax.f32 %v3269_v14, 0.0  ;;  %v2902_v47 = vadd.f32 %v2901_v46, %v2732_v29 }
 0x446   :  { %2774 = vmatmul.bf16.gmra.mxu2 %v9318_v27  ;;  %3112 = vmatmul.bf16.gmra.mxu0 %v10524_v42 }
 0x447   :  { %v3807_v55 = vsel %vm10910_vm10, %v3799_v13, %v3806_v23  ;;  %v4359_v61 = vsel %vm10846_vm4, %v3808_v16, %v4358_v50  ;;  %v3608_v35 = vpack.c.bf16 %v3333_v44, %v3333_v44  ;;  %v3071_v52 = vadd.f32 %v3070_v11, %v2902_v47  ;;  %v4365_v23 = vld [vmem:[#allocation2 + $0x80] sm:$0x1] }
 0x448   :  { %4357 = vst [vmem:[#allocation2 + $0x70] sm:$0xf] %v3807_v55 }
 0x449   :  { %4360 = vst [vmem:[#allocation2 + $0x74] sm:$0x1] %v4359_v61  ;;  %v3810_v24 = vshrl.u32 %v3608_v35, 16  ;;  %v3202_v8 = vadd.f32 %v3071_v52, %v10510_v22  ;;  %2943 = vmatmul.bf16.gmra.mxu3 %v13443_v59  ;;  %v3813_v0 = vshll.u32 %v3608_v35, 16  ;;  %v2735_v11 = vpop.f32.mrf.mxu2  ;;  %v3432_v35 = vld [vmem:[#allocation2 + $0x9c] sm:$0x1] }
 0x44b   :  { %v3812_v39 = vrot.slane %v3810_v24, 7  ;;  %v3270_v48 = vadd.f32 %v10883_v37, %v3202_v8  ;;  %v3075_v26 = vpop.f32.mrf.mxu0  ;;  %v3433_v24 = vsel %vm10846_vm4, 0, %v3432_v35 }
 0x44c   :  { %v2904_v60 = vpop.f32.mrf.mxu3  ;;  %3434 = vst [vmem:[#allocation2 + $0x9c] sm:$0x1] %v3433_v24  ;;  %v9321_v24 = vld [vmem:[%s13121_s0 + $0x120] sm:$0xff] }
 0x44d   :  { %v3815_v9 = vor.u32 %v3813_v0, %v3812_v39  ;;  %v3334_v32 = vmax.f32 %v3270_v48, 0.0  ;;  %v2905_v42 = vadd.f32 %v2904_v60, %v2735_v11  ;;  %v11090_v54 = vpop.f32.mrf.mxu1  ;;  %v3816_v46 = vrot.slane %v3812_v39, 4  ;;  %v11115_v11 = vld [vmem:[%s13123_s2] ss:$0 sm:$0xff]  ;;  %v4368_v60 = vld [vmem:[#allocation2 + $0x84] sm:$0xf] }
 0x44f   :  { %v4362_v22 = vsel %vm10899_vm8, %v3815_v9, %v4361_v36  ;;  %v3609_v51 = vpack.c.bf16 %v3334_v32, %v3334_v32  ;;  %v3074_v1 = vadd.f32 %v3073_v38, %v2905_v42  ;;  %v9149_v15 = vld [vmem:[#allocation2 + $0x6c] sm:$0xff] }
 0x450   :  { %4363 = vst [vmem:[#allocation2 + $0x78] sm:$0xf] %v4362_v22  ;;  %5855 = vmatmul.bf16.gmra.mxu1 %v9149_v15  ;;  %v3530_v22 = vld [vmem:[#allocation2 + $0xa4] sm:$0x1] }
 0x451   :  { %v3818_v56 = vshrl.u32 %v3609_v51, 16  ;;  %v3203_v57 = vadd.f32 %v3074_v1, %v10520_v30  ;;  %v3821_v29 = vshll.u32 %v3609_v51, 16  ;;  %v2737_v50 = vpop.f32.mrf.mxu2 }
 0x453   :  { %v3820_v14 = vrot.slane %v3818_v56, 7  ;;  %v3271_v13 = vadd.f32 %v10883_v37, %v3203_v57  ;;  %v3078_v55 = vpop.f32.mrf.mxu0  ;;  %v3531_v56 = vsel %vm10862_vm6, 0, %v3530_v22 }
 0x454   :  { %v2906_v16 = vpop.f32.mrf.mxu3  ;;  %3532 = vst [vmem:[#allocation2 + $0xa4] sm:$0x1] %v3531_v56 }
 0x455   :  { %v3823_v44 = vor.u32 %v3821_v29, %v3820_v14  ;;  %v3825_v47 = vrot.slane %v3820_v14, 4  ;;  %v3335_v38 = vmax.f32 %v3271_v13, 0.0  ;;  %v2907_v53 = vadd.f32 %v2906_v16, %v2737_v50  ;;  %v11098_v61 = vpop.f32.mrf.mxu1  ;;  %v4372_v16 = vld [vmem:[#allocation2 + $0x8c] sm:$0x1] }
 0x456   :  { %2779 = vmatmul.bf16.gmra.mxu2 %v9319_v2  ;;  %3117 = vmatmul.bf16.gmra.mxu0 %v10540_v10 }
 0x457   :  { %v3824_v30 = vsel %vm10910_vm10, %v3816_v46, %v3823_v44  ;;  %v4366_v52 = vsel %vm10846_vm4, %v3825_v47, %v4365_v23  ;;  %v3610_v27 = vpack.c.bf16 %v3335_v38, %v3335_v38  ;;  %v3076_v37 = vadd.f32 %v3075_v26, %v2907_v53 }
 0x458   :  { %4364 = vst [vmem:[#allocation2 + $0x7c] sm:$0xf] %v3824_v30 }
 0x459   :  { %4367 = vst [vmem:[#allocation2 + $0x80] sm:$0x1] %v4366_v52  ;;  %v3827_v8 = vshrl.u32 %v3610_v27, 16  ;;  %v3204_v39 = vadd.f32 %v3076_v37, %v10529_v4  ;;  %2948 = vmatmul.bf16.gmra.mxu3 %v13446_v25  ;;  %v3830_v48 = vshll.u32 %v3610_v27, 16  ;;  %v2740_v10 = vpop.f32.mrf.mxu2  ;;  %v3435_v52 = vld [vmem:[#allocation2 + $0xa8] sm:$0x1] }
 0x45b   :  { %v3829_v0 = vrot.slane %v3827_v8, 7  ;;  %v3272_v36 = vadd.f32 %v11115_v11, %v3204_v39  ;;  %v3080_v3 = vpop.f32.mrf.mxu0  ;;  %v3436_v8 = vsel %vm10846_vm4, 0, %v3435_v52 }
 0x45c   :  { %v2909_v9 = vpop.f32.mrf.mxu3  ;;  %3437 = vst [vmem:[#allocation2 + $0xa8] sm:$0x1] %v3436_v8 }
 0x45d   :  { %v3832_v32 = vor.u32 %v3830_v48, %v3829_v0  ;;  %v3336_v42 = vmax.f32 %v3272_v36, 0.0  ;;  %v2910_v26 = vadd.f32 %v2909_v9, %v2740_v10  ;;  %v11118_v4 = vpop.f32.mrf.mxu1  ;;  %v3833_v23 = vrot.slane %v3829_v0, 4  ;;  %v4375_v9 = vld [vmem:[#allocation2 + $0x90] sm:$0xf] }
 0x45f   :  { %v4369_v51 = vsel %vm10899_vm8, %v3832_v32, %v4368_v60  ;;  %v3611_v1 = vpack.c.bf16 %v3336_v42, %v3336_v42  ;;  %v3079_v15 = vadd.f32 %v3078_v55, %v2910_v26  ;;  %v9150_v31 = vld [vmem:[#allocation2 + $0x78] sm:$0xff] }
 0x460   :  { %4370 = vst [vmem:[#allocation2 + $0x84] sm:$0xf] %v4369_v51  ;;  %5860 = vmatmul.bf16.gmra.mxu1 %v9150_v31  ;;  %v3533_v51 = vld [vmem:[#allocation2 + $0xb0] sm:$0x1] }
 0x461   :  { %v3835_v57 = vshrl.u32 %v3611_v1, 16  ;;  %v3205_v14 = vadd.f32 %v3079_v15, %v10536_v33  ;;  %v3838_v13 = vshll.u32 %v3611_v1, 16  ;;  %v2742_v46 = vpop.f32.mrf.mxu2  ;;  %v3534_v56 = vsel %vm10862_vm6, 0, %v3533_v51 }
 0x462   :  { %3535 = vst [vmem:[#allocation2 + $0xb0] sm:$0x1] %v3534_v56 }
 0x463   :  { %v3837_v29 = vrot.slane %v3835_v57, 7  ;;  %v3273_v50 = vadd.f32 %v11115_v11, %v3205_v14  ;;  %v3083_v35 = vpop.f32.mrf.mxu0  ;;  %v13584_v14 = vld [vmem:[#allocation73_spill] sm:$0xff] }
 0x464   :  { %v2911_v44 = vpop.f32.mrf.mxu3 }
 0x465   :  { %v3840_v47 = vor.u32 %v3838_v13, %v3837_v29  ;;  %v3842_v38 = vrot.slane %v3837_v29, 4  ;;  %v3337_v53 = vmax.f32 %v3273_v50, 0.0  ;;  %v2912_v55 = vadd.f32 %v2911_v44, %v2742_v46  ;;  %v11126_v30 = vpop.f32.mrf.mxu1  ;;  %v4379_v44 = vld [vmem:[#allocation2 + $0x98] sm:$0x1] }
 0x466   :  { %2784 = vmatmul.bf16.gmra.mxu2 %v9321_v24  ;;  %3122 = vmatmul.bf16.gmra.mxu0 %v10556_v45 }
 0x467   :  { %v3841_v33 = vsel %vm10910_vm10, %v3833_v23, %v3840_v47  ;;  %v4373_v27 = vsel %vm10846_vm4, %v3842_v38, %v4372_v16  ;;  %v3612_v37 = vpack.c.bf16 %v3337_v53, %v3337_v53  ;;  %v3081_v2 = vadd.f32 %v3080_v3, %v2912_v55 }
 0x468   :  { %4371 = vst [vmem:[#allocation2 + $0x88] sm:$0xf] %v3841_v33 }
 0x469   :  { %4374 = vst [vmem:[#allocation2 + $0x8c] sm:$0x1] %v4373_v27  ;;  %v3844_v39 = vshrl.u32 %v3612_v37, 16  ;;  %v3206_v0 = vadd.f32 %v3081_v2, %v10545_v5  ;;  %2953 = vmatmul.bf16.gmra.mxu3 %v13450_v63  ;;  %v3847_v36 = vshll.u32 %v3612_v37, 16  ;;  %v2745_v60 = vpop.f32.mrf.mxu2  ;;  %v3438_v27 = vld [vmem:[#allocation2 + $0xb4] sm:$0x1] }
 0x46b   :  { %v3846_v48 = vrot.slane %v3844_v39, 7  ;;  %v3274_v10 = vadd.f32 %v11115_v11, %v3206_v0  ;;  %v3085_v3 = vpop.f32.mrf.mxu0  ;;  %v9322_v39 = vld [vmem:[%s13121_s0 + $0x12c] sm:$0xff]  ;;  %v3439_v0 = vsel %vm10846_vm4, 0, %v3438_v27  ;;  %v4386_v27 = vld [vmem:[#allocation2 + $0xa4] sm:$0x1] }
 0x46c   :  { %v2914_v32 = vpop.f32.mrf.mxu3  ;;  %3440 = vst [vmem:[#allocation2 + $0xb4] sm:$0x1] %v3439_v0 }
 0x46d   :  { %v3849_v42 = vor.u32 %v3847_v36, %v3846_v48  ;;  %v3338_v26 = vmax.f32 %v3274_v10, 0.0  ;;  %v2915_v45 = vadd.f32 %v2914_v32, %v2745_v60  ;;  %v11141_v22 = vpop.f32.mrf.mxu1  ;;  %v3850_v16 = vrot.slane %v3846_v48, 4  ;;  %v13585_v36 = vld [vmem:[#allocation77_spill] sm:$0xff] }
 0x46e   :  { %v9220_v60 = vld [vmem:[#allocation3 + $0x160] sm:$0xff] }
 0x46f   :  { %v4376_v5 = vsel %vm10899_vm8, %v3849_v42, %v4375_v9  ;;  %v3613_v1 = vpack.c.bf16 %v3338_v26, %v3338_v26  ;;  %v3084_v15 = vadd.f32 %v3083_v35, %v2915_v45  ;;  %v9151_v31 = vld [vmem:[#allocation2 + $0x84] sm:$0xff]  ;;  %6148 = vmatpush.bf16.msrb.mxu3 %v9220_v60  ;;  %v4382_v45 = vld [vmem:[#allocation2 + $0x9c] sm:$0xf] }
 0x470   :  { %4377 = vst [vmem:[#allocation2 + $0x90] sm:$0xf] %v4376_v5  ;;  %5865 = vmatmul.bf16.gmra.mxu1 %v9151_v31  ;;  %v3536_v31 = vld [vmem:[#allocation2 + $0xbc] sm:$0x1] }
 0x471   :  { %v3852_v57 = vshrl.u32 %v3613_v1, 16  ;;  %v3207_v29 = vadd.f32 %v3084_v15, %v13584_v14  ;;  %v3855_v50 = vshll.u32 %v3613_v1, 16  ;;  %v2747_v23 = vpop.f32.mrf.mxu2 }
 0x473   :  { %v3854_v13 = vrot.slane %v3852_v57, 7  ;;  %v3275_v46 = vadd.f32 %v11115_v11, %v3207_v29  ;;  %v3088_v52 = vpop.f32.mrf.mxu0 }
 0x474   :  { %v2916_v47 = vpop.f32.mrf.mxu3 }
 0x475   :  { %v3857_v38 = vor.u32 %v3855_v50, %v3854_v13  ;;  %v3859_v53 = vrot.slane %v3854_v13, 4  ;;  %v3339_v55 = vmax.f32 %v3275_v46, 0.0  ;;  %v2917_v35 = vadd.f32 %v2916_v47, %v2747_v23  ;;  %v11149_v33 = vpop.f32.mrf.mxu1  ;;  %v9212_v50 = vld [vmem:[#allocation3 + $0x120] sm:$0xff] }
 0x476   :  { %2789 = vmatmul.bf16.gmra.mxu2 %v9322_v39  ;;  %3127 = vmatmul.bf16.gmra.mxu0 %v10572_v62  ;;  %v3537_v13 = vsel %vm10862_vm6, 0, %v3536_v31  ;;  %v9180_v46 = vld [vmem:[#allocation3 + $0x20] sm:$0xff] }
 0x477   :  { %v3858_v37 = vsel %vm10910_vm10, %v3850_v16, %v3857_v38  ;;  %v4380_v2 = vsel %vm10846_vm4, %v3859_v53, %v4379_v44  ;;  %v3614_v24 = vpack.c.bf16 %v3339_v55, %v3339_v55  ;;  %v3086_v8 = vadd.f32 %v3085_v3, %v2917_v35  ;;  %v9188_v23 = vld [vmem:[#allocation3 + $0x60] sm:$0xff]  ;;  %3538 = vst [vmem:[#allocation2 + $0xbc] sm:$0x1] %v3537_v13 }
 0x478   :  { %4378 = vst [vmem:[#allocation2 + $0x94] sm:$0xf] %v3858_v37  ;;  %v13586_v44 = vld [vmem:[#allocation9_spill] sm:$0xff]  ;;  %5979 = vmatpush.bf16.msrb.mxu2 %v9212_v50  ;;  %6461 = vmatpush.bf16.msrb.mxu0 %v9180_v46 }
 0x479   :  { %4381 = vst [vmem:[#allocation2 + $0x98] sm:$0x1] %v4380_v2  ;;  %v3861_v48 = vshrl.u32 %v3614_v24, 16  ;;  %v3208_v10 = vadd.f32 %v3086_v8, %v13585_v36  ;;  %2958 = vmatmul.bf16.gmra.mxu3 %v13455_v21  ;;  %v3864_v32 = vshll.u32 %v3614_v24, 16  ;;  %v2750_v26 = vpop.f32.mrf.mxu2  ;;  %6630 = vmatpush.bf16.msrb.mxu1 %v9188_v23  ;;  %v3441_v36 = vld [vmem:[#allocation2 + $0xc0] sm:$0x1] }
 0x47b   :  { %v3863_v9 = vrot.slane %v3861_v48, 7  ;;  %v3276_v42 = vadd.f32 %v11115_v11, %v3208_v10  ;;  %v3090_v1 = vpop.f32.mrf.mxu0 }
 0x47c   :  { %v2919_v3 = vpop.f32.mrf.mxu3 }
 0x47d   :  { %v3866_v62 = vor.u32 %v3864_v32, %v3863_v9  ;;  %v3340_v51 = vmax.f32 %v3276_v42, 0.0  ;;  %v2920_v5 = vadd.f32 %v2919_v3, %v2750_v26  ;;  %v11164_v15 = vpop.f32.mrf.mxu1  ;;  %v13587_v26 = vld [vmem:[#allocation15_spill] sm:$0xff] }
 0x47f   :  { %v4383_v56 = vsel %vm10899_vm8, %v3866_v62, %v4382_v45  ;;  %v3615_v57 = vpack.c.bf16 %v3340_v51, %v3340_v51  ;;  %v3089_v14 = vadd.f32 %v3088_v52, %v2920_v5  ;;  %v9152_v29 = vld [vmem:[#allocation2 + $0x90] sm:$0xff]  ;;  %v3867_v52 = vrot.slane %v3863_v9, 4  ;;  %v9323_v9 = vld [vmem:[%s13121_s0 + $0x138] sm:$0xff]  ;;  %v13588_v62 = vld [vmem:[#allocation79_spill] sm:$0xff] }
 0x480   :  { %4384 = vst [vmem:[#allocation2 + $0x9c] sm:$0xf] %v4383_v56  ;;  %5870 = vmatmul.bf16.gmra.mxu1 %v9152_v29  ;;  %v3442_v45 = vsel %vm10846_vm4, 0, %v3441_v36  ;;  %v13589_v5 = vld [vmem:[#allocation32_spill] sm:$0xff] }
 0x481   :  { %v3869_v16 = vshrl.u32 %v3615_v57, 16  ;;  %v3209_v47 = vadd.f32 %v3089_v14, %v13586_v44  ;;  %v3872_v53 = vshll.u32 %v3615_v57, 16  ;;  %v2752_v35 = vpop.f32.mrf.mxu2  ;;  %3443 = vst [vmem:[#allocation2 + $0xc0] sm:$0x1] %v3442_v45  ;;  %v4389_v14 = vld [vmem:[#allocation2 + $0xa8] sm:$0xf] }
 0x482   :  { %v3539_v44 = vld [vmem:[#allocation2 + $0xc8] sm:$0x1] }
 0x483   :  { %v3871_v38 = vrot.slane %v3869_v16, 7  ;;  %v3277_v55 = vadd.f32 %v11115_v11, %v3209_v47  ;;  %v3093_v0 = vpop.f32.mrf.mxu0 }
 0x484   :  { %v2921_v37 = vpop.f32.mrf.mxu3 }
 0x485   :  { %v3874_v2 = vor.u32 %v3872_v53, %v3871_v38  ;;  %v3876_v24 = vrot.slane %v3871_v38, 4  ;;  %v3341_v8 = vmax.f32 %v3277_v55, 0.0  ;;  %v2922_v39 = vadd.f32 %v2921_v37, %v2752_v35  ;;  %v11172_v48 = vpop.f32.mrf.mxu1 }
 0x486   :  { %2794 = vmatmul.bf16.gmra.mxu2 %v9323_v9  ;;  %3132 = vmatmul.bf16.gmra.mxu0 %v13587_v26  ;;  %v3540_v35 = vsel %vm10862_vm6, 0, %v3539_v44 }
 0x487   :  { %v3875_v10 = vsel %vm10910_vm10, %v3867_v52, %v3874_v2  ;;  %v4387_v60 = vsel %vm10846_vm4, %v3876_v24, %v4386_v27  ;;  %v3616_v32 = vpack.c.bf16 %v3341_v8, %v3341_v8  ;;  %v3091_v42 = vadd.f32 %v3090_v1, %v2922_v39  ;;  %v13590_v27 = vld [vmem:[#allocation12_spill] sm:$0xff]  ;;  %3541 = vst [vmem:[#allocation2 + $0xc8] sm:$0x1] %v3540_v35 }
 0x488   :  { %4385 = vst [vmem:[#allocation2 + $0xa0] sm:$0xf] %v3875_v10  ;;  %v4393_v10 = vld [vmem:[#allocation2 + $0xb0] sm:$0x1] }
 0x489   :  { %4388 = vst [vmem:[#allocation2 + $0xa4] sm:$0x1] %v4387_v60  ;;  %v3878_v3 = vshrl.u32 %v3616_v32, 16  ;;  %v3210_v51 = vadd.f32 %v3091_v42, %v13588_v62  ;;  %2963 = vmatmul.bf16.gmra.mxu3 %v13589_v5  ;;  %v3881_v1 = vshll.u32 %v3616_v32, 16  ;;  %v2755_v57 = vpop.f32.mrf.mxu2 }
 0x48b   :  { %v3880_v31 = vrot.slane %v3878_v3, 7  ;;  %v3278_v56 = vadd.f32 %v11115_v11, %v3210_v51  ;;  %v3095_v23 = vpop.f32.mrf.mxu0  ;;  %v3444_v3 = vld [vmem:[#allocation2 + $0xe4] sm:$0x1] }
 0x48c   :  { %v2924_v29 = vpop.f32.mrf.mxu3 }
 0x48d   :  { %v3883_v13 = vor.u32 %v3881_v1, %v3880_v31  ;;  %v3342_v50 = vmax.f32 %v3278_v56, 0.0  ;;  %v2925_v46 = vadd.f32 %v2924_v29, %v2755_v57  ;;  %v11187_v16 = vpop.f32.mrf.mxu1  ;;  %v3884_v36 = vrot.slane %v3880_v31, 4  ;;  %v9324_v31 = vld [vmem:[%s13121_s0 + $0x144] sm:$0xff] }
 0x48e   :  { %v13591_v57 = vld [vmem:[#allocation24_spill] sm:$0xff] }
 0x48f   :  { %v4390_v47 = vsel %vm10899_vm8, %v3883_v13, %v4389_v14  ;;  %v3617_v38 = vpack.c.bf16 %v3342_v50, %v3342_v50  ;;  %v3094_v53 = vadd.f32 %v3093_v0, %v2925_v46  ;;  %v9153_v55 = vld [vmem:[#allocation2 + $0x9c] sm:$0xff]  ;;  %v3445_v14 = vsel %vm10846_vm4, 0, %v3444_v3 }
 0x490   :  { %4391 = vst [vmem:[#allocation2 + $0xa8] sm:$0xf] %v4390_v47  ;;  %5875 = vmatmul.bf16.gmra.mxu1 %v9153_v55  ;;  %v13592_v13 = vld [vmem:[#allocation18_spill] sm:$0xff]  ;;  %v13593_v46 = vld [vmem:[#allocation35_spill] sm:$0xff] }
 0x491   :  { %v3886_v52 = vshrl.u32 %v3617_v38, 16  ;;  %v3211_v37 = vadd.f32 %v3094_v53, %v13590_v27  ;;  %v3889_v24 = vshll.u32 %v3617_v38, 16  ;;  %v2757_v39 = vpop.f32.mrf.mxu2  ;;  %3446 = vst [vmem:[#allocation2 + $0xe4] sm:$0x1] %v3445_v14  ;;  %v4396_v53 = vld [vmem:[#allocation2 + $0xb4] sm:$0xf] }
 0x493   :  { %v3888_v2 = vrot.slane %v3886_v52, 7  ;;  %v3279_v8 = vadd.f32 %v11115_v11, %v3211_v37  ;;  %v3098_v26 = vpop.f32.mrf.mxu0 }
 0x494   :  { %v2926_v60 = vpop.f32.mrf.mxu3 }
 0x495   :  { %v3891_v32 = vor.u32 %v3889_v24, %v3888_v2  ;;  %v3893_v0 = vrot.slane %v3888_v2, 4  ;;  %v3343_v42 = vmax.f32 %v3279_v8, 0.0  ;;  %v2927_v9 = vadd.f32 %v2926_v60, %v2757_v39  ;;  %v11195_v45 = vpop.f32.mrf.mxu1  ;;  %v3542_v24 = vld [vmem:[#allocation2 + $0xec] sm:$0x1] }
 0x496   :  { %2799 = vmatmul.bf16.gmra.mxu2 %v9324_v31  ;;  %3137 = vmatmul.bf16.gmra.mxu0 %v13591_v57  ;;  %v3543_v60 = vsel %vm10862_vm6, 0, %v3542_v24  ;;  %v13596_v24 = vld [vmem:[#allocation27_spill] sm:$0xff] }
 0x497   :  { %v3892_v62 = vsel %vm10910_vm10, %v3884_v36, %v3891_v32  ;;  %v4394_v51 = vsel %vm10846_vm4, %v3893_v0, %v4393_v10  ;;  %v3618_v1 = vpack.c.bf16 %v3343_v42, %v3343_v42  ;;  %v3096_v56 = vadd.f32 %v3095_v23, %v2927_v9  ;;  %v13594_v0 = vld [vmem:[#allocation21_spill] sm:$0xff]  ;;  %3544 = vst [vmem:[#allocation2 + $0xec] sm:$0x1] %v3543_v60 }
 0x498   :  { %4392 = vst [vmem:[#allocation2 + $0xac] sm:$0xf] %v3892_v62 }
 0x499   :  { %4395 = vst [vmem:[#allocation2 + $0xb0] sm:$0x1] %v4394_v51  ;;  %v3895_v29 = vshrl.u32 %v3618_v1, 16  ;;  %v3212_v50 = vadd.f32 %v3096_v56, %v13592_v13  ;;  %2968 = vmatmul.bf16.gmra.mxu3 %v13593_v46  ;;  %v3898_v23 = vshll.u32 %v3618_v1, 16  ;;  %v2760_v38 = vpop.f32.mrf.mxu2  ;;  %v4400_v56 = vld [vmem:[#allocation2 + $0xbc] sm:$0x1] }
 0x49b   :  { %v3897_v44 = vrot.slane %v3895_v29, 7  ;;  %v3280_v47 = vadd.f32 %v11115_v11, %v3212_v50  ;;  %v3100_v37 = vpop.f32.mrf.mxu0 }
 0x49c   :  { %v2929_v55 = vpop.f32.mrf.mxu3 }
 0x49d   :  { %v3900_v35 = vor.u32 %v3898_v23, %v3897_v44  ;;  %v3344_v52 = vmax.f32 %v3280_v47, 0.0  ;;  %v2930_v27 = vadd.f32 %v2929_v55, %v2760_v38  ;;  %v11210_v2 = vpop.f32.mrf.mxu1  ;;  %v3901_v1 = vrot.slane %v3897_v44, 4  ;;  %v3447_v23 = vld [vmem:[#allocation2 + $0xf0] sm:$0x1] }
 0x49e   :  { %v9325_v44 = vld [vmem:[%s13121_s0 + $0x150] sm:$0xff] }
 0x49f   :  { %v4397_v8 = vsel %vm10899_vm8, %v3900_v35, %v4396_v53  ;;  %v3619_v39 = vpack.c.bf16 %v3344_v52, %v3344_v52  ;;  %v3099_v36 = vadd.f32 %v3098_v26, %v2930_v27  ;;  %v9154_v10 = vld [vmem:[#allocation2 + $0xa8] sm:$0xff]  ;;  %v13595_v35 = vld [vmem:[#allocation33_spill] sm:$0xff]  ;;  %v3448_v52 = vsel %vm10846_vm4, 0, %v3447_v23  ;;  %v13598_v23 = vld [vmem:[#allocation30_spill] sm:$0xff] }
 0x4a0   :  { %4398 = vst [vmem:[#allocation2 + $0xb4] sm:$0xf] %v4397_v8  ;;  %5880 = vmatmul.bf16.gmra.mxu1 %v9154_v10 }
 0x4a1   :  { %v3903_v32 = vshrl.u32 %v3619_v39, 16  ;;  %v3213_v42 = vadd.f32 %v3099_v36, %v13594_v0  ;;  %v3906_v3 = vshll.u32 %v3619_v39, 16  ;;  %v2762_v51 = vpop.f32.mrf.mxu2  ;;  %v13597_v39 = vld [vmem:[#allocation40_spill] sm:$0xff]  ;;  %3449 = vst [vmem:[#allocation2 + $0xf0] sm:$0x1] %v3448_v52 }
 0x4a2   :  { %v4407_v52 = vld [vmem:[#allocation2 + $0xc8] sm:$0x1] }
 0x4a3   :  { %v3905_v9 = vrot.slane %v3903_v32, 7  ;;  %v3281_v62 = vadd.f32 %v11115_v11, %v3213_v42  ;;  %v3103_v13 = vpop.f32.mrf.mxu0  ;;  %v4403_v32 = vld [vmem:[#allocation2 + $0xc0] sm:$0xf] }
 0x4a4   :  { %v2931_v31 = vpop.f32.mrf.mxu3 }
 0x4a5   :  { %v3908_v57 = vor.u32 %v3906_v3, %v3905_v9  ;;  %v3910_v26 = vrot.slane %v3905_v9, 4  ;;  %v3345_v14 = vmax.f32 %v3281_v62, 0.0  ;;  %v2932_v29 = vadd.f32 %v2931_v31, %v2762_v51  ;;  %v11218_v50 = vpop.f32.mrf.mxu1 }
 0x4a6   :  { %2804 = vmatmul.bf16.gmra.mxu2 %v9325_v44  ;;  %3142 = vmatmul.bf16.gmra.mxu0 %v13595_v35 }
 0x4a7   :  { %v3909_v47 = vsel %vm10910_vm10, %v3901_v1, %v3908_v57  ;;  %v4401_v38 = vsel %vm10846_vm4, %v3910_v26, %v4400_v56  ;;  %v3620_v53 = vpack.c.bf16 %v3345_v14, %v3345_v14  ;;  %v3101_v55 = vadd.f32 %v3100_v37, %v2932_v29  ;;  %v3545_v1 = vld [vmem:[#allocation2 + $0xf8] sm:$0x1] }
 0x4a8   :  { %4399 = vst [vmem:[#allocation2 + $0xb8] sm:$0xf] %v3909_v47  ;;  %v3546_v14 = vsel %vm10862_vm6, 0, %v3545_v1  ;;  %v13599_v1 = vld [vmem:[#allocation38_spill] sm:$0xff] }
 0x4a9   :  { %4402 = vst [vmem:[#allocation2 + $0xbc] sm:$0x1] %v4401_v38  ;;  %v3912_v27 = vshrl.u32 %v3620_v53, 16  ;;  %v3214_v8 = vadd.f32 %v3101_v55, %v13596_v24  ;;  %2973 = vmatmul.bf16.gmra.mxu3 %v13597_v39  ;;  %v3915_v37 = vshll.u32 %v3620_v53, 16  ;;  %v2765_v60 = vpop.f32.mrf.mxu2 }
 0x4aa   :  { %3547 = vst [vmem:[#allocation2 + $0xf8] sm:$0x1] %v3546_v14  ;;  %v13601_v14 = vld [vmem:[#allocation45_spill] sm:$0xff] }
 0x4ab   :  { %v3914_v36 = vrot.slane %v3912_v27, 7  ;;  %v3282_v10 = vadd.f32 %v11115_v11, %v3214_v8  ;;  %v3105_v62 = vpop.f32.mrf.mxu0 }
 0x4ac   :  { %v2934_v0 = vpop.f32.mrf.mxu3 }
 0x4ad   :  { %v3917_v42 = vor.u32 %v3915_v37, %v3914_v36  ;;  %v3346_v9 = vmax.f32 %v3282_v10, 0.0  ;;  %v2935_v3 = vadd.f32 %v2934_v0, %v2765_v60  ;;  %v11233_v51 = vpop.f32.mrf.mxu1  ;;  %v3918_v35 = vrot.slane %v3914_v36, 4  ;;  %v9326_v36 = vld [vmem:[%s13121_s0 + $0x15c] sm:$0xff] }
 0x4af   :  { %v4404_v56 = vsel %vm10899_vm8, %v3917_v42, %v4403_v32  ;;  %v3621_v31 = vpack.c.bf16 %v3346_v9, %v3346_v9  ;;  %v3104_v57 = vadd.f32 %v3103_v13, %v2935_v3  ;;  %v9155_v26 = vld [vmem:[#allocation2 + $0xb4] sm:$0xff]  ;;  %v3450_v32 = vld [vmem:[#allocation2 + $0xfc] sm:$0x1] }
 0x4b0   :  { %4405 = vst [vmem:[#allocation2 + $0xc0] sm:$0xf] %v4404_v56  ;;  %5885 = vmatmul.bf16.gmra.mxu1 %v9155_v26  ;;  %v3451_v56 = vsel %vm10846_vm4, 0, %v3450_v32 }
 0x4b1   :  { %v3920_v29 = vshrl.u32 %v3621_v31, 16  ;;  %v3215_v47 = vadd.f32 %v3104_v57, %v13598_v23  ;;  %v3923_v53 = vshll.u32 %v3621_v31, 16  ;;  %v2767_v44 = vpop.f32.mrf.mxu2  ;;  %v13600_v57 = vld [vmem:[#allocation37_spill] sm:$0xff]  ;;  %3452 = vst [vmem:[#allocation2 + $0xfc] sm:$0x1] %v3451_v56  ;;  %v13602_v56 = vld [vmem:[#allocation36_spill] sm:$0xff] }
 0x4b3   :  { %v3922_v38 = vrot.slane %v3920_v29, 7  ;;  %v3283_v55 = vadd.f32 %v11115_v11, %v3215_v47  ;;  %v3108_v10 = vpop.f32.mrf.mxu0  ;;  %v9219_v29 = vld [vmem:[#allocation3 + $0x158] sm:$0xff] }
 0x4b4   :  { %v2936_v27 = vpop.f32.mrf.mxu3  ;;  %6149 = vmatpush.bf16.msrb.mxu3 %v9219_v29 }
 0x4b5   :  { %v3925_v24 = vor.u32 %v3923_v53, %v3922_v38  ;;  %v3927_v13 = vrot.slane %v3922_v38, 4  ;;  %v3347_v8 = vmax.f32 %v3283_v55, 0.0  ;;  %v2937_v37 = vadd.f32 %v2936_v27, %v2767_v44  ;;  %v11241_v60 = vpop.f32.mrf.mxu1  ;;  %v4410_v53 = vld [vmem:[#allocation2 + $0xe4] sm:$0xf] }
 0x4b6   :  { %2809 = vmatmul.bf16.gmra.mxu2 %v9326_v36  ;;  %3147 = vmatmul.bf16.gmra.mxu0 %v13599_v1  ;;  %v9187_v36 = vld [vmem:[#allocation3 + $0x58] sm:$0xff] }
 0x4b7   :  { %v3926_v0 = vsel %vm10910_vm10, %v3918_v35, %v3925_v24  ;;  %v4408_v42 = vsel %vm10846_vm4, %v3927_v13, %v4407_v52  ;;  %v3622_v9 = vpack.c.bf16 %v3347_v8, %v3347_v8  ;;  %v3106_v3 = vadd.f32 %v3105_v62, %v2937_v37  ;;  %v3548_v13 = vld [vmem:[#allocation2 + $0x104] sm:$0x1]  ;;  %6631 = vmatpush.bf16.msrb.mxu1 %v9187_v36  ;;  %v13603_v36 = vld [vmem:[#allocation42_spill] sm:$0xff] }
 0x4b8   :  { %4406 = vst [vmem:[#allocation2 + $0xc4] sm:$0xf] %v3926_v0 }
 0x4b9   :  { %4409 = vst [vmem:[#allocation2 + $0xc8] sm:$0x1] %v4408_v42  ;;  %v3929_v31 = vshrl.u32 %v3622_v9, 16  ;;  %v3216_v26 = vadd.f32 %v3106_v3, %v13600_v57  ;;  %2978 = vmatmul.bf16.gmra.mxu3 %v13601_v14  ;;  %v3932_v23 = vshll.u32 %v3622_v9, 16  ;;  %v2770_v38 = vpop.f32.mrf.mxu2  ;;  %v3549_v42 = vsel %vm10862_vm6, 0, %v3548_v13  ;;  %v9211_v9 = vld [vmem:[#allocation3 + $0x118] sm:$0xff] }
 0x4ba   :  { %v9179_v3 = vld [vmem:[#allocation3 + $0x18] sm:$0xff]  ;;  %3550 = vst [vmem:[#allocation2 + $0x104] sm:$0x1] %v3549_v42  ;;  %5980 = vmatpush.bf16.msrb.mxu2 %v9211_v9 }
 0x4bb   :  { %v3931_v62 = vrot.slane %v3929_v31, 7  ;;  %v3284_v47 = vadd.f32 %v11115_v11, %v3216_v26  ;;  %v3110_v27 = vpop.f32.mrf.mxu0  ;;  %6462 = vmatpush.bf16.msrb.mxu0 %v9179_v3 }
 0x4bc   :  { %v2939_v55 = vpop.f32.mrf.mxu3 }
 0x4bd   :  { %v3934_v44 = vor.u32 %v3932_v23, %v3931_v62  ;;  %v3348_v35 = vmax.f32 %v3284_v47, 0.0  ;;  %v2940_v52 = vadd.f32 %v2939_v55, %v2770_v38  ;;  %v11256_v24 = vpop.f32.mrf.mxu1  ;;  %v3935_v23 = vrot.slane %v3931_v62, 4  ;;  %v4414_v47 = vld [vmem:[#allocation2 + $0xec] sm:$0x1] }
 0x4be   :  { %v9327_v62 = vld [vmem:[%s13121_s0 + $0x168] sm:$0xff] }
 0x4bf   :  { %v4411_v8 = vsel %vm10899_vm8, %v3934_v44, %v4410_v53  ;;  %v3623_v37 = vpack.c.bf16 %v3348_v35, %v3348_v35  ;;  %v3109_v32 = vadd.f32 %v3108_v10, %v2940_v52  ;;  %v9156_v0 = vld [vmem:[#allocation2 + $0xc0] sm:$0xff] }
 0x4c0   :  { %4412 = vst [vmem:[#allocation2 + $0xe4] sm:$0xf] %v4411_v8  ;;  %5890 = vmatmul.bf16.gmra.mxu1 %v9156_v0  ;;  %v3453_v8 = vld [vmem:[#allocation2 + $0x108] sm:$0x1] }
 0x4c1   :  { %v3937_v1 = vshrl.u32 %v3623_v37, 16  ;;  %v3217_v31 = vadd.f32 %v3109_v32, %v13602_v56  ;;  %v3940_v26 = vshll.u32 %v3623_v37, 16  ;;  %v2772_v10 = vpop.f32.mrf.mxu2  ;;  %v3454_v9 = vsel %vm10846_vm4, 0, %v3453_v8  ;;  %v13604_v56 = vld [vmem:[#allocation50_spill] sm:$0xff] }
 0x4c2   :  { %3455 = vst [vmem:[#allocation2 + $0x108] sm:$0x1] %v3454_v9 }
 0x4c3   :  { %v3939_v57 = vrot.slane %v3937_v1, 7  ;;  %v3285_v29 = vadd.f32 %v11115_v11, %v3217_v31  ;;  %v3113_v52 = vpop.f32.mrf.mxu0 }
 0x4c4   :  { %v2941_v38 = vpop.f32.mrf.mxu3 }
 0x4c5   :  { %v3942_v53 = vor.u32 %v3940_v26, %v3939_v57  ;;  %v3944_v55 = vrot.slane %v3939_v57, 4  ;;  %v3349_v44 = vmax.f32 %v3285_v29, 0.0  ;;  %v2942_v35 = vadd.f32 %v2941_v38, %v2772_v10  ;;  %v11264_v13 = vpop.f32.mrf.mxu1  ;;  %v4417_v29 = vld [vmem:[#allocation2 + $0xf0] sm:$0xf] }
 0x4c6   :  { %2814 = vmatmul.bf16.gmra.mxu2 %v9327_v62  ;;  %3152 = vmatmul.bf16.gmra.mxu0 %v10670_v28 }
 0x4c7   :  { %v3943_v32 = vsel %vm10910_vm10, %v3935_v23, %v3942_v53  ;;  %v4415_v37 = vsel %vm10846_vm4, %v3944_v55, %v4414_v47  ;;  %v3624_v0 = vpack.c.bf16 %v3349_v44, %v3349_v44  ;;  %v3111_v42 = vadd.f32 %v3110_v27, %v2942_v35  ;;  %v3551_v55 = vld [vmem:[#allocation2 + $0x110] sm:$0x1] }
 0x4c8   :  { %4413 = vst [vmem:[#allocation2 + $0xe8] sm:$0xf] %v3943_v32 }
 0x4c9   :  { %4416 = vst [vmem:[#allocation2 + $0xec] sm:$0x1] %v4415_v37  ;;  %v3946_v3 = vshrl.u32 %v3624_v0, 16  ;;  %v3218_v1 = vadd.f32 %v3111_v42, %v13603_v36  ;;  %2983 = vmatmul.bf16.gmra.mxu3 %v13604_v56  ;;  %v3949_v27 = vshll.u32 %v3624_v0, 16  ;;  %v2775_v26 = vpop.f32.mrf.mxu2  ;;  %v3552_v37 = vsel %vm10862_vm6, 0, %v3551_v55  ;;  %v13605_v42 = vld [vmem:[#allocation41_spill] sm:$0xff] }
 0x4ca   :  { %3553 = vst [vmem:[#allocation2 + $0x110] sm:$0x1] %v3552_v37  ;;  %v3456_v55 = vld [vmem:[#allocation2 + $0x114] sm:$0x1]  ;;  %v13606_v37 = vld [vmem:[#allocation46_spill] sm:$0xff] }
 0x4cb   :  { %v3948_v31 = vrot.slane %v3946_v3, 7  ;;  %v3286_v57 = vadd.f32 %v11115_v11, %v3218_v1  ;;  %v3115_v38 = vpop.f32.mrf.mxu0 }
 0x4cc   :  { %v2944_v10 = vpop.f32.mrf.mxu3 }
 0x4cd   :  { %v3951_v23 = vor.u32 %v3949_v27, %v3948_v31  ;;  %v3350_v47 = vmax.f32 %v3286_v57, 0.0  ;;  %v2945_v28 = vadd.f32 %v2944_v10, %v2775_v26  ;;  %v11279_v53 = vpop.f32.mrf.mxu1  ;;  %v3952_v27 = vrot.slane %v3948_v31, 4  ;;  %v4421_v57 = vld [vmem:[#allocation2 + $0xf8] sm:$0x1] }
 0x4ce   :  { %v9328_v31 = vld [vmem:[%s13121_s0 + $0x174] sm:$0xff] }
 0x4cf   :  { %v4418_v44 = vsel %vm10899_vm8, %v3951_v23, %v4417_v29  ;;  %v3625_v35 = vpack.c.bf16 %v3350_v47, %v3350_v47  ;;  %v3114_v8 = vadd.f32 %v3113_v52, %v2945_v28  ;;  %v9159_v32 = vld [vmem:[#allocation2 + $0xe4] sm:$0xff] }
 0x4d0   :  { %4419 = vst [vmem:[#allocation2 + $0xf0] sm:$0xf] %v4418_v44  ;;  %5895 = vmatmul.bf16.gmra.mxu1 %v9159_v32 }
 0x4d1   :  { %v3954_v0 = vshrl.u32 %v3625_v35, 16  ;;  %v3219_v62 = vadd.f32 %v3114_v8, %v13605_v42  ;;  %v3957_v3 = vshll.u32 %v3625_v35, 16  ;;  %v2777_v1 = vpop.f32.mrf.mxu2  ;;  %v4435_v14 = vld [vmem:[#allocation2 + $0x110] sm:$0x1] }
 0x4d3   :  { %v3956_v9 = vrot.slane %v3954_v0, 7  ;;  %v3287_v36 = vadd.f32 %v11115_v11, %v3219_v62  ;;  %v3118_v47 = vpop.f32.mrf.mxu0  ;;  %v3457_v0 = vsel %vm10846_vm4, 0, %v3456_v55  ;;  %v13607_v62 = vld [vmem:[#allocation43_spill] sm:$0xff]  ;;  %v3554_v55 = vld [vmem:[#allocation2 + $0x11c] sm:$0x1] }
 0x4d4   :  { %v2946_v26 = vpop.f32.mrf.mxu3  ;;  %3458 = vst [vmem:[#allocation2 + $0x114] sm:$0x1] %v3457_v0 }
 0x4d5   :  { %v3959_v29 = vor.u32 %v3957_v3, %v3956_v9  ;;  %v3961_v52 = vrot.slane %v3956_v9, 4  ;;  %v3351_v10 = vmax.f32 %v3287_v36, 0.0  ;;  %v2947_v23 = vadd.f32 %v2946_v26, %v2777_v1  ;;  %v11287_v28 = vpop.f32.mrf.mxu1  ;;  %v13608_v3 = vld [vmem:[#allocation55_spill] sm:$0xff] }
 0x4d6   :  { %2819 = vmatmul.bf16.gmra.mxu2 %v9328_v31  ;;  %3157 = vmatmul.bf16.gmra.mxu0 %v13606_v37 }
 0x4d7   :  { %v3960_v44 = vsel %vm10910_vm10, %v3952_v27, %v3959_v29  ;;  %v4422_v35 = vsel %vm10846_vm4, %v3961_v52, %v4421_v57  ;;  %v3626_v8 = vpack.c.bf16 %v3351_v10, %v3351_v10  ;;  %v3116_v32 = vadd.f32 %v3115_v38, %v2947_v23  ;;  %v4424_v57 = vld [vmem:[#allocation2 + $0xfc] sm:$0xf] }
 0x4d8   :  { %4420 = vst [vmem:[#allocation2 + $0xf4] sm:$0xf] %v3960_v44 }
 0x4d9   :  { %4423 = vst [vmem:[#allocation2 + $0xf8] sm:$0x1] %v4422_v35  ;;  %v3963_v42 = vshrl.u32 %v3626_v8, 16  ;;  %v3220_v9 = vadd.f32 %v3116_v32, %v13607_v62  ;;  %2988 = vmatmul.bf16.gmra.mxu3 %v13608_v3  ;;  %v3966_v38 = vshll.u32 %v3626_v8, 16  ;;  %v2780_v27 = vpop.f32.mrf.mxu2  ;;  %v3555_v8 = vsel %vm10862_vm6, 0, %v3554_v55 }
 0x4da   :  { %3556 = vst [vmem:[#allocation2 + $0x11c] sm:$0x1] %v3555_v8  ;;  %v4428_v3 = vld [vmem:[#allocation2 + $0x104] sm:$0x1] }
 0x4db   :  { %v3965_v36 = vrot.slane %v3963_v42, 7  ;;  %v3288_v1 = vadd.f32 %v11115_v11, %v3220_v9  ;;  %v3120_v23 = vpop.f32.mrf.mxu0  ;;  %v13609_v42 = vld [vmem:[#allocation47_spill] sm:$0xff] }
 0x4dc   :  { %v2949_v26 = vpop.f32.mrf.mxu3 }
 0x4dd   :  { %v3968_v29 = vor.u32 %v3966_v38, %v3965_v36  ;;  %v3352_v52 = vmax.f32 %v3288_v1, 0.0  ;;  %v2950_v10 = vadd.f32 %v2949_v26, %v2780_v27  ;;  %v11302_v44 = vpop.f32.mrf.mxu1  ;;  %v3969_v26 = vrot.slane %v3965_v36, 4  ;;  %v9329_v36 = vld [vmem:[%s13121_s0 + $0x180] sm:$0xff] }
 0x4df   :  { %v4425_v35 = vsel %vm10899_vm8, %v3968_v29, %v4424_v57  ;;  %v3627_v32 = vpack.c.bf16 %v3352_v52, %v3352_v52  ;;  %v3119_v31 = vadd.f32 %v3118_v47, %v2950_v10  ;;  %v9160_v37 = vld [vmem:[#allocation2 + $0xf0] sm:$0xff] }
 0x4e0   :  { %4426 = vst [vmem:[#allocation2 + $0xfc] sm:$0xf] %v4425_v35  ;;  %5900 = vmatmul.bf16.gmra.mxu1 %v9160_v37  ;;  %v3459_v35 = vld [vmem:[#allocation2 + $0x120] sm:$0x1] }
 0x4e1   :  { %v3971_v0 = vshrl.u32 %v3627_v32, 16  ;;  %v3221_v62 = vadd.f32 %v3119_v31, %v13609_v42  ;;  %v3974_v38 = vshll.u32 %v3627_v32, 16  ;;  %v2782_v27 = vpop.f32.mrf.mxu2  ;;  %v3460_v42 = vsel %vm10846_vm4, 0, %v3459_v35  ;;  %v3557_v35 = vld [vmem:[#allocation2 + $0x128] sm:$0x1] }
 0x4e2   :  { %3461 = vst [vmem:[#allocation2 + $0x120] sm:$0x1] %v3460_v42 }
 0x4e3   :  { %v3973_v9 = vrot.slane %v3971_v0, 7  ;;  %v3289_v1 = vadd.f32 %v11115_v11, %v3221_v62  ;;  %v3123_v56 = vpop.f32.mrf.mxu0  ;;  %v13610_v0 = vld [vmem:[#allocation53_spill] sm:$0xff] }
 0x4e4   :  { %v2951_v57 = vpop.f32.mrf.mxu3 }
 0x4e5   :  { %v3976_v29 = vor.u32 %v3974_v38, %v3973_v9  ;;  %v3978_v47 = vrot.slane %v3973_v9, 4  ;;  %v3353_v52 = vmax.f32 %v3289_v1, 0.0  ;;  %v2952_v10 = vadd.f32 %v2951_v57, %v2782_v27  ;;  %v11310_v55 = vpop.f32.mrf.mxu1  ;;  %v13611_v9 = vld [vmem:[#allocation48_spill] sm:$0xff] }
 0x4e6   :  { %2824 = vmatmul.bf16.gmra.mxu2 %v9329_v36  ;;  %3162 = vmatmul.bf16.gmra.mxu0 %v13610_v0  ;;  %v13612_v1 = vld [vmem:[#allocation60_spill] sm:$0xff] }
 0x4e7   :  { %v3977_v31 = vsel %vm10910_vm10, %v3969_v26, %v3976_v29  ;;  %v4429_v32 = vsel %vm10846_vm4, %v3978_v47, %v4428_v3  ;;  %v3628_v37 = vpack.c.bf16 %v3353_v52, %v3353_v52  ;;  %v3121_v8 = vadd.f32 %v3120_v23, %v2952_v10  ;;  %v4431_v57 = vld [vmem:[#allocation2 + $0x108] sm:$0xf] }
 0x4e8   :  { %4427 = vst [vmem:[#allocation2 + $0x100] sm:$0xf] %v3977_v31 }
 0x4e9   :  { %4430 = vst [vmem:[#allocation2 + $0x104] sm:$0x1] %v4429_v32  ;;  %v3980_v62 = vshrl.u32 %v3628_v37, 16  ;;  %v3222_v38 = vadd.f32 %v3121_v8, %v13611_v9  ;;  %2993 = vmatmul.bf16.gmra.mxu3 %v13612_v1  ;;  %v3983_v23 = vshll.u32 %v3628_v37, 16  ;;  %v2785_v26 = vpop.f32.mrf.mxu2  ;;  %v3558_v37 = vsel %vm10862_vm6, 0, %v3557_v35  ;;  %v13613_v9 = vld [vmem:[#allocation51_spill] sm:$0xff] }
 0x4ea   :  { %3559 = vst [vmem:[#allocation2 + $0x128] sm:$0x1] %v3558_v37  ;;  %v13614_v35 = vld [vmem:[#allocation57_spill] sm:$0xff] }
 0x4eb   :  { %v3982_v3 = vrot.slane %v3980_v62, 7  ;;  %v3290_v27 = vadd.f32 %v11115_v11, %v3222_v38  ;;  %v3125_v31 = vpop.f32.mrf.mxu0 }
 0x4ec   :  { %v2954_v29 = vpop.f32.mrf.mxu3 }
 0x4ed   :  { %v3985_v47 = vor.u32 %v3983_v23, %v3982_v3  ;;  %v3354_v52 = vmax.f32 %v3290_v27, 0.0  ;;  %v2955_v10 = vadd.f32 %v2954_v29, %v2785_v26  ;;  %v11325_v36 = vpop.f32.mrf.mxu1  ;;  %v3986_v1 = vrot.slane %v3982_v3, 4 }
 0x4ef   :  { %v4432_v32 = vsel %vm10899_vm8, %v3985_v47, %v4431_v57  ;;  %v3629_v8 = vpack.c.bf16 %v3354_v52, %v3354_v52  ;;  %v3124_v0 = vadd.f32 %v3123_v56, %v2955_v10  ;;  %v9161_v42 = vld [vmem:[#allocation2 + $0xfc] sm:$0xff] }
 0x4f0   :  { %4433 = vst [vmem:[#allocation2 + $0x108] sm:$0xf] %v4432_v32  ;;  %5905 = vmatmul.bf16.gmra.mxu1 %v9161_v42  ;;  %v13615_v32 = vld [vmem:[#allocation52_spill] sm:$0xff] }
 0x4f1   :  { %v3988_v62 = vshrl.u32 %v3629_v8, 16  ;;  %v3223_v38 = vadd.f32 %v3124_v0, %v13613_v9  ;;  %v3991_v27 = vshll.u32 %v3629_v8, 16  ;;  %v2787_v29 = vpop.f32.mrf.mxu2  ;;  %v2426_v46 = vadd.f32 %v13615_v32, %v13614_v35  ;;  %v3462_v0 = vld [vmem:[#allocation2 + $0x12c] sm:$0x1]  ;;  %v3560_v32 = vld [vmem:[#allocation2 + $0x134] sm:$0x1] }
 0x4f2   :  { %v3463_v9 = vsel %vm10846_vm4, 0, %v3462_v0 }
 0x4f3   :  { %v3990_v23 = vrot.slane %v3988_v62, 7  ;;  %v3291_v26 = vadd.f32 %v11115_v11, %v3223_v38  ;;  %v3128_v39 = vpop.f32.mrf.mxu0  ;;  %v9330_v62 = vld [vmem:[%s13121_s0 + $0x18c] sm:$0xff]  ;;  %3464 = vst [vmem:[#allocation2 + $0x12c] sm:$0x1] %v3463_v9  ;;  %v13618_v9 = vld [vmem:[#allocation58_spill] sm:$0xff] }
 0x4f4   :  { %v2956_v57 = vpop.f32.mrf.mxu3 }
 0x4f5   :  { %v3993_v47 = vor.u32 %v3991_v27, %v3990_v23  ;;  %v3995_v56 = vrot.slane %v3990_v23, 4  ;;  %v3355_v52 = vmax.f32 %v3291_v26, 0.0  ;;  %v2957_v10 = vadd.f32 %v2956_v57, %v2787_v29  ;;  %v11335_v5 = vpop.f32.mrf.mxu1  ;;  %v4438_v29 = vld [vmem:[#allocation2 + $0x114] sm:$0xf] }
 0x4f6   :  { %13616 = vst [vmem:[#allocation100_spill] sm:$0xff] %v11335_v5  ;;  %2829 = vmatmul.bf16.gmra.mxu2 %v9330_v62  ;;  %3167 = vmatmul.bf16.gmra.mxu0 %v10722_v20 }
 0x4f7   :  { %v3994_v8 = vsel %vm10910_vm10, %v3986_v1, %v3993_v47  ;;  %v4436_v42 = vsel %vm10846_vm4, %v3995_v56, %v4435_v14  ;;  %v3630_v3 = vpack.c.bf16 %v3355_v52, %v3355_v52  ;;  %v3126_v37 = vadd.f32 %v3125_v31, %v2957_v10  ;;  %v9218_v1 = vld [vmem:[#allocation3 + $0x150] sm:$0xff] }
 0x4f8   :  { %4434 = vst [vmem:[#allocation2 + $0x10c] sm:$0xf] %v3994_v8  ;;  %6150 = vmatpush.bf16.msrb.mxu3 %v9218_v1  ;;  %v9210_v10 = vld [vmem:[#allocation3 + $0x110] sm:$0xff]  ;;  %v9217_v1 = vld [vmem:[#allocation3 + $0x148] sm:$0xff] }
 0x4f9   :  { %4437 = vst [vmem:[#allocation2 + $0x110] sm:$0x1] %v4436_v42  ;;  %v3997_v38 = vshrl.u32 %v3630_v3, 16  ;;  %v3224_v23 = vadd.f32 %v3126_v37, %v2426_v46  ;;  %2998 = vmatmul.bf16.gmra.mxu3 %v13509_v34  ;;  %v4000_v31 = vshll.u32 %v3630_v3, 16  ;;  %v2790_v26 = vpop.f32.mrf.mxu2  ;;  %v9178_v46 = vld [vmem:[#allocation3 + $0x10] sm:$0xff]  ;;  %5981 = vmatpush.bf16.msrb.mxu2 %v9210_v10  ;;  %v3561_v3 = vsel %vm10862_vm6, 0, %v3560_v32 }
 0x4fa   :  { %6463 = vmatpush.bf16.msrb.mxu0 %v9178_v46  ;;  %v9186_v37 = vld [vmem:[#allocation3 + $0x50] sm:$0xff]  ;;  %3562 = vst [vmem:[#allocation2 + $0x134] sm:$0x1] %v3561_v3  ;;  %v4442_v10 = vld [vmem:[#allocation2 + $0x11c] sm:$0x1] }
 0x4fb   :  { %v11348_v14 = vrot.slane %v3997_v38, 7  ;;  %v3292_v27 = vadd.f32 %v11115_v11, %v3224_v23  ;;  %v3130_v52 = vpop.f32.mrf.mxu0  ;;  %6632 = vmatpush.bf16.msrb.mxu1 %v9186_v37  ;;  %v9209_v23 = vld [vmem:[#allocation3 + $0x108] sm:$0xff]  ;;  %v11374_v3 = vld [vmem:[%s13121_s0 + $0x1a4] sm:$0xff]  ;;  %v9208_v37 = vld [vmem:[#allocation3 + $0x100] sm:$0xff] }
 0x4fc   :  { %v2959_v57 = vpop.f32.mrf.mxu3  ;;  %6151 = vmatpush.bf16.msrb.mxu3 %v9217_v1  ;;  %v3465_v1 = vld [vmem:[#allocation2 + $0x138] sm:$0x1] }
 0x4fd   :  { %v4002_v20 = vor.u32 %v4000_v31, %v11348_v14  ;;  %v3356_v47 = vmax.f32 %v3292_v27, 0.0  ;;  %v2960_v56 = vadd.f32 %v2959_v57, %v2790_v26  ;;  %v11352_v35 = vpop.f32.mrf.mxu1  ;;  %v9177_v31 = vld [vmem:[#allocation3 + $0x8] sm:$0xff]  ;;  %5982 = vmatpush.bf16.msrb.mxu2 %v9209_v23 }
 0x4fe   :  { %13617 = vst [vmem:[#allocation101_spill] sm:$0xff] %v11352_v35  ;;  %6464 = vmatpush.bf16.msrb.mxu0 %v9177_v31  ;;  %v13656_v35 = vld [vmem:[#allocation89_spill] sm:$0xff] }
 0x4ff   :  { %v4439_v0 = vsel %vm10899_vm8, %v4002_v20, %v4438_v29  ;;  %v3631_v8 = vpack.c.bf16 %v3356_v47, %v3356_v47  ;;  %v3129_v42 = vadd.f32 %v3128_v39, %v2960_v56  ;;  %v9162_v11 = vld [vmem:[#allocation2 + $0x108] sm:$0xff]  ;;  %v11362_v39 = vld [vmem:[%s13123_s2] ss:$0 sm:$0xff]  ;;  %v13225_v47 = vmov 0  }
 0x500   :  { %4440 = vst [vmem:[#allocation2 + $0x114] sm:$0xf] %v4439_v0  ;;  %5910 = vmatmul.bf16.gmra.mxu1 %v9162_v11  ;;  %v145_v20 = vld [vmem:[%s13121_s0 + $0x1ac] sm:$0x1]  ;;  %v4003_v56 = vrot.slane %v11348_v14, 4 }
 0x501   :  { %v4005_v62 = vshrl.u32 %v3631_v8, 16  ;;  %v3225_v38 = vadd.f32 %v3129_v42, %v13618_v9  ;;  %v4008_v26 = vshll.u32 %v3631_v8, 16  ;;  %v2792_v57 = vpop.f32.mrf.mxu2  ;;  %3379 = vst [vmem:[#allocation2] sm:$0xf] %v13225_v47  ;;  %v13620_v14 = vld [vmem:[#allocation56_spill] sm:$0xff]  ;;  %v433_v23 = vunpack.c.l.b16 %v145_v20  ;;  %v9332_v20 = vld [vmem:[%s13121_s0 + $0x198] sm:$0xff]  ;;  %5983 = vmatpush.bf16.msrb.mxu2 %v9208_v37 }
 0x502   :  { %3380 = vst [vmem:[#allocation2 + $0x4] sm:$0xf] %v13225_v47  ;;  %v9216_v47 = vld [vmem:[#allocation3 + $0x140] sm:$0xff] }
 0x503   :  { %v4007_v27 = vrot.slane %v4005_v62, 7  ;;  %v3293_v29 = vadd.f32 %v11362_v39, %v3225_v38  ;;  %v3133_v11 = vpop.f32.mrf.mxu0  ;;  %v13619_v62 = vld [vmem:[#allocation63_spill] sm:$0xff]  ;;  %6152 = vmatpush.bf16.msrb.mxu3 %v9216_v47 }
 0x504   :  { %v2961_v46 = vpop.f32.mrf.mxu3  ;;  %v2431_v9 = vadd.f32 %v13620_v14, %v13619_v62  ;;  %v3466_v62 = vsel %vm10846_vm4, 0, %v3465_v1  ;;  %v13623_v14 = vld [vmem:[#allocation76_spill] sm:$0xff]  ;;  %v4445_v1 = vld [vmem:[#allocation2 + $0x120] sm:$0xf] }
 0x505   :  { %v4010_v32 = vor.u32 %v4008_v26, %v4007_v27  ;;  %v4012_v0 = vrot.slane %v4007_v27, 4  ;;  %v3357_v8 = vmax.f32 %v3293_v29, 0.0  ;;  %v2962_v42 = vadd.f32 %v2961_v46, %v2792_v57  ;;  %v11378_v38 = vpop.f32.mrf.mxu1  ;;  %v9176_v26 = vld [vmem:[#allocation3] sm:$0xff]  ;;  %3467 = vst [vmem:[#allocation2 + $0x138] sm:$0x1] %v3466_v62 }
 0x506   :  { %13621 = vst [vmem:[#allocation104_spill] sm:$0xff] %v11378_v38  ;;  %v13622_v27 = vmov 0   ;;  %2834 = vmatmul.bf16.gmra.mxu2 %v9332_v20  ;;  %3172 = vmatmul.bf16.gmra.mxu0 %v10740_v17  ;;  %v3563_v20 = vld [vmem:[#allocation2 + $0x140] sm:$0x1]  ;;  %v13649_v38 = vld [vmem:[#allocation86_spill] sm:$0xff] }
 0x507   :  { %3381 = vst [vmem:[#allocation2 + $0x8] sm:$0x1] %v13622_v27  ;;  %v4011_v29 = vsel %vm10910_vm10, %v4003_v56, %v4010_v32  ;;  %v4443_v57 = vsel %vm10846_vm4, %v4012_v0, %v4442_v10  ;;  %v3632_v46 = vpack.c.bf16 %v3357_v8, %v3357_v8  ;;  %v3131_v31 = vadd.f32 %v3130_v52, %v2962_v42 }
 0x508   :  { %3382 = vst [vmem:[#allocation2 + $0xd8] sm:$0xf] %v13622_v27  ;;  %v469_v52 = vpack.c.b16 %v433_v23, %v433_v23  ;;  %v894_v10 = vshll.u32 %v11374_v3, 16  ;;  %6465 = vmatpush.bf16.msrb.mxu0 %v9176_v26 }
 0x509   :  { %4441 = vst [vmem:[#allocation2 + $0x118] sm:$0xf] %v4011_v29  ;;  %v4014_v56 = vshrl.u32 %v3632_v46, 16  ;;  %v3226_v32 = vadd.f32 %v3131_v31, %v2431_v9  ;;  %3003 = vmatmul.bf16.gmra.mxu3 %v13623_v14  ;;  %v4017_v8 = vshll.u32 %v3632_v46, 16  ;;  %v2795_v17 = vpop.f32.mrf.mxu2  ;;  %v892_v31 = vshrl.u32 %v11374_v3, 16  ;;  %v13625_v14 = vld [vmem:[#allocation65_spill] sm:$0xff] }
 0x50a   :  { %4444 = vst [vmem:[#allocation2 + $0x11c] sm:$0x1] %v4443_v57  ;;  %v896_v26 = vrot.slane %v894_v10, 1  ;;  %v899_v46 = vshll.u32 %v469_v52, 16 }
 0x50b   :  { %v4016_v0 = vrot.slane %v4014_v56, 7  ;;  %v3294_v42 = vadd.f32 %v11362_v39, %v3226_v32  ;;  %3383 = vst [vmem:[#allocation2 + $0xdc] sm:$0xf] %v13622_v27  ;;  %v3135_v23 = vpop.f32.mrf.mxu0 }
 0x50c   :  { %v2964_v29 = vpop.f32.mrf.mxu3  ;;  %3384 = vst [vmem:[#allocation2 + $0xe0] sm:$0x1] %v13622_v27  ;;  %v897_v21 = vor.u32 %v896_v26, %v892_v31  ;;  %v901_v63 = vrot.slane %v899_v46, 1 }
 0x50d   :  { %v4019_v9 = vor.u32 %v4017_v8, %v4016_v0  ;;  %v3358_v57 = vmax.f32 %v3294_v42, 0.0  ;;  %v2965_v37 = vadd.f32 %v2964_v29, %v2795_v17  ;;  %3386 = vst [vmem:[#allocation2 + $0xcc] sm:$0xf] %v13622_v27  ;;  %v11399_v47 = vpop.f32.mrf.mxu1  ;;  %v3564_v42 = vsel %vm10862_vm6, 0, %v3563_v20 }
 0x50e   :  { %13624 = vst [vmem:[#allocation102_spill] sm:$0xff] %v11399_v47  ;;  %v1045_v17 = vrot.slane %v11374_v3, 1  ;;  %v1046_v29 = vrot.slane %v469_v52, 1  ;;  %v4020_v20 = vrot.slane %v4016_v0, 4 }
 0x50f   :  { %3387 = vst [vmem:[#allocation2 + $0xd0] sm:$0xf] %v13622_v27  ;;  %v4446_v62 = vsel %vm10899_vm8, %v4019_v9, %v4445_v1  ;;  %v3633_v56 = vpack.c.bf16 %v3358_v57, %v3358_v57  ;;  %v3134_v32 = vadd.f32 %v3133_v11, %v2965_v37  ;;  %v4527_v37 = vld [vmem:[#allocation2 + $0x14] sm:$0x1] }
 0x510   :  { %v9163_v8 = vld [vmem:[#allocation2 + $0x114] sm:$0xff]  ;;  %3388 = vst [vmem:[#allocation2 + $0xd4] sm:$0x1] %v13622_v27  ;;  %v1047_v25 = vsel %vm939_vm1, %v1045_v17, %v1046_v29  ;;  %v4883_v59 = vunpack.c.l.b16 %v4527_v37 }
 0x511   :  { %4447 = vst [vmem:[#allocation2 + $0x120] sm:$0xf] %v4446_v62  ;;  %v4022_v10 = vshrl.u32 %v3633_v56, 16  ;;  %v3227_v34 = vadd.f32 %v3134_v32, %v13625_v14  ;;  %5915 = vmatmul.bf16.gmra.mxu1 %v9163_v8  ;;  %v4025_v1 = vshll.u32 %v3633_v56, 16  ;;  %v2797_v57 = vpop.f32.mrf.mxu2  ;;  %v4449_v62 = vld [vmem:[#allocation2 + $0x128] sm:$0x1] }
 0x512   :  { %3565 = vst [vmem:[#allocation2 + $0x140] sm:$0x1] %v3564_v42  ;;  %v13626_v8 = vld [vmem:[#allocation72_spill] sm:$0xff]  ;;  %v13627_v56 = vld [vmem:[#allocation62_spill] sm:$0xff] }
 0x513   :  { %3389 = vst [vmem:[#allocation2 + $0x1a4] sm:$0xf] %v13622_v27  ;;  %v4024_v11 = vrot.slane %v4022_v10, 7  ;;  %v3295_v9 = vadd.f32 %v11362_v39, %v3227_v34  ;;  %v3138_v32 = vpop.f32.mrf.mxu0  ;;  %v2436_v42 = vadd.f32 %v13627_v56, %v13626_v8  ;;  %v902_v10 = vsel %vm470_vm0, %v897_v21, %v901_v63 }
 0x514   :  { %3390 = vst [vmem:[#allocation2 + $0x1a8] sm:$0xf] %v13622_v27  ;;  %v2966_v52 = vpop.f32.mrf.mxu3  ;;  %v4919_v21 = vpack.c.b16 %v4883_v59, %v4883_v59 }
 0x515   :  { %3391 = vst [vmem:[#allocation2 + $0x1ac] sm:$0x1] %v13622_v27  ;;  %v4027_v14 = vor.u32 %v4025_v1, %v4024_v11  ;;  %v4029_v31 = vrot.slane %v4024_v11, 4  ;;  %v3359_v26 = vmax.f32 %v3295_v9, 0.0  ;;  %v2967_v46 = vadd.f32 %v2966_v52, %v2797_v57  ;;  %v11416_v34 = vpop.f32.mrf.mxu1  ;;  %v3468_v11 = vld [vmem:[#allocation2 + $0x144] sm:$0x1] }
 0x516   :  { %13628 = vst [vmem:[#allocation103_spill] sm:$0xff] %v11416_v34  ;;  %2839 = vmatmul.bf16.gmra.mxu2 %v11374_v3  ;;  %3177 = vmatmul.bf16.gmra.mxu0 %v1047_v25  ;;  %v3469_v1 = vsel %vm10846_vm4, 0, %v3468_v11  ;;  %v11426_v57 = vld [vmem:[#allocation2 + $0xc] sm:$0xff]  ;;  %v4974_v59 = vshll.u32 %v4919_v21, 16 }
 0x517   :  { %v4028_v0 = vsel %vm10910_vm10, %v4020_v20, %v4027_v14  ;;  %v4450_v17 = vsel %vm10846_vm4, %v4029_v31, %v4449_v62  ;;  %v3634_v27 = vpack.c.bf16 %v3359_v26, %v3359_v26  ;;  %v3136_v29 = vadd.f32 %v3135_v23, %v2967_v46  ;;  %3470 = vst [vmem:[#allocation2 + $0x144] sm:$0x1] %v3469_v1  ;;  %v4452_v3 = vld [vmem:[#allocation2 + $0x12c] sm:$0xf] }
 0x518   :  { %4448 = vst [vmem:[#allocation2 + $0x124] sm:$0xf] %v4028_v0  ;;  %v4969_v37 = vshll.u32 %v11426_v57, 16 }
 0x519   :  { %4451 = vst [vmem:[#allocation2 + $0x128] sm:$0x1] %v4450_v17  ;;  %v4031_v9 = vshrl.u32 %v3634_v27, 16  ;;  %v3228_v63 = vadd.f32 %v3136_v29, %v2436_v42  ;;  %3008 = vmatmul.bf16.gmra.mxu3 %v902_v10  ;;  %v4034_v23 = vshll.u32 %v3634_v27, 16  ;;  %v2800_v52 = vpop.f32.mrf.mxu2  ;;  %v3566_v27 = vld [vmem:[#allocation2 + $0x14c] sm:$0x1] }
 0x51a   :  { %v4971_v56 = vrot.slane %v4969_v37, 1  ;;  %v4967_v29 = vshrl.u32 %v11426_v57, 16  ;;  %v3567_v11 = vsel %vm10862_vm6, 0, %v3566_v27  ;;  %v4976_v37 = vrot.slane %v4974_v59, 1 }
 0x51b   :  { %v4033_v20 = vrot.slane %v4031_v9, 7  ;;  %v3296_v62 = vadd.f32 %v11362_v39, %v3228_v63  ;;  %v3140_v46 = vpop.f32.mrf.mxu0  ;;  %3568 = vst [vmem:[#allocation2 + $0x14c] sm:$0x1] %v3567_v11 }
 0x51c   :  { %v2969_v25 = vpop.f32.mrf.mxu3  ;;  %v4972_v63 = vor.u32 %v4971_v56, %v4967_v29  ;;  %v5425_v29 = vrot.slane %v11426_v57, 1 }
 0x51d   :  { %v4036_v14 = vor.u32 %v4034_v23, %v4033_v20  ;;  %v3360_v31 = vmax.f32 %v3296_v62, 0.0  ;;  %v2970_v26 = vadd.f32 %v2969_v25, %v2800_v52  ;;  %v11430_v8 = vpop.f32.mrf.mxu1  ;;  %v4037_v25 = vrot.slane %v4033_v20, 4 }
 0x51e   :  { %13629 = vst [vmem:[#allocation64_spill] sm:$0xff] %v11430_v8 }
 0x51f   :  { %v4453_v42 = vsel %vm10899_vm8, %v4036_v14, %v4452_v3  ;;  %v3635_v10 = vpack.c.bf16 %v3360_v31, %v3360_v31  ;;  %v3139_v0 = vadd.f32 %v3138_v32, %v2970_v26  ;;  %v9164_v17 = vld [vmem:[#allocation2 + $0x120] sm:$0xff]  ;;  %v4456_v14 = vld [vmem:[#allocation2 + $0x134] sm:$0x1]  ;;  %v5426_v26 = vrot.slane %v4919_v21, 1 }
 0x520   :  { %4454 = vst [vmem:[#allocation2 + $0x12c] sm:$0xf] %v4453_v42  ;;  %v4530_v3 = vld [vmem:[#allocation2 + $0x20] sm:$0x1] }
 0x521   :  { %v4039_v1 = vshrl.u32 %v3635_v10, 16  ;;  %v3229_v9 = vadd.f32 %v3139_v0, %v10750_v6  ;;  %5920 = vmatmul.bf16.gmra.mxu1 %v9164_v17  ;;  %v4042_v62 = vshll.u32 %v3635_v10, 16  ;;  %v2802_v32 = vpop.f32.mrf.mxu2  ;;  %v9140_v42 = vld [vmem:[#allocation2] sm:$0xff]  ;;  %v13630_v0 = vld [vmem:[#allocation74_spill] sm:$0xff]  ;;  %v11444_v10 = vsel %vm470_vm0, %v4972_v63, %v4976_v37 }
 0x522   :  { %v13631_v17 = vld [vmem:[#allocation71_spill] sm:$0xff]  ;;  %v4884_v20 = vunpack.c.l.b16 %v4530_v3 }
 0x523   :  { %v4041_v23 = vrot.slane %v4039_v1, 7  ;;  %v3297_v52 = vadd.f32 %v11362_v39, %v3229_v9  ;;  %v3143_v6 = vpop.f32.mrf.mxu0  ;;  %v2441_v56 = vadd.f32 %v13631_v17, %v13630_v0 }
 0x524   :  { %v2971_v31 = vpop.f32.mrf.mxu3 }
 0x525   :  { %v4044_v58 = vor.u32 %v4042_v62, %v4041_v23  ;;  %v4046_v27 = vrot.slane %v4041_v23, 4  ;;  %v3361_v49 = vmax.f32 %v3297_v52, 0.0  ;;  %v2972_v8 = vadd.f32 %v2971_v31, %v2802_v32  ;;  %v11441_v59 = vpop.f32.mrf.mxu1  ;;  %v3471_v23 = vld [vmem:[#allocation2 + $0x150] sm:$0x1]  ;;  %v11458_v32 = vld [vmem:[#allocation2 + $0x18] sm:$0xff] }
 0x526   :  { %13632 = vst [vmem:[#allocation105_spill] sm:$0xff] %v11441_v59  ;;  %5984 = vmatmul.bf16.vlgmr.msrb.gmra.mxu2 %v11444_v10  ;;  %v11453_v62 = vsel %vm939_vm1, %v5425_v29, %v5426_v26  ;;  %6466 = vmatmul.bf16.vlgmr.msrb.gmra.mxu0 %v9140_v42  ;;  %v3472_v63 = vsel %vm10846_vm4, 0, %v3471_v23  ;;  %v4979_v23 = vshrl.u32 %v11458_v32, 16 }
 0x527   :  { %v4045_v21 = vsel %vm10910_vm10, %v4037_v25, %v4044_v58  ;;  %v4457_v11 = vsel %vm10846_vm4, %v4046_v27, %v4456_v14  ;;  %v3636_v1 = vpack.c.bf16 %v3361_v49, %v3361_v49  ;;  %v3141_v9 = vadd.f32 %v3140_v46, %v2972_v8  ;;  %13633 = vst [vmem:[#allocation61_spill] sm:$0xff] %v11453_v62  ;;  %v4459_v14 = vld [vmem:[#allocation2 + $0x138] sm:$0xf] }
 0x528   :  { %4455 = vst [vmem:[#allocation2 + $0x130] sm:$0xf] %v4045_v21  ;;  %v4920_v58 = vpack.c.b16 %v4884_v20, %v4884_v20  ;;  %v4981_v49 = vshll.u32 %v11458_v32, 16 }
 0x529   :  { %4458 = vst [vmem:[#allocation2 + $0x134] sm:$0x1] %v4457_v11  ;;  %v4048_v37 = vshrl.u32 %v3636_v1, 16  ;;  %v3230_v52 = vadd.f32 %v3141_v9, %v2441_v56  ;;  %6153 = vmatmul.bf16.vlgmr.msrb.gmra.mxu3 %v11453_v62  ;;  %v4051_v8 = vshll.u32 %v3636_v1, 16  ;;  %v2805_v25 = vpop.f32.mrf.mxu2  ;;  %v3569_v1 = vld [vmem:[#allocation2 + $0x158] sm:$0x1] }
 0x52a   :  { %3473 = vst [vmem:[#allocation2 + $0x150] sm:$0x1] %v3472_v63  ;;  %v4983_v56 = vrot.slane %v4981_v49, 1  ;;  %v4986_v29 = vshll.u32 %v4920_v58, 16  ;;  %v3570_v63 = vsel %vm10862_vm6, 0, %v3569_v1  ;;  %v5429_v62 = vrot.slane %v4920_v58, 1 }
 0x52b   :  { %v4050_v46 = vrot.slane %v4048_v37, 7  ;;  %v3298_v3 = vadd.f32 %v11362_v39, %v3230_v52  ;;  %v3145_v0 = vpop.f32.mrf.mxu0  ;;  %v13635_v52 = vld [vmem:[#allocation80_spill] sm:$0xff]  ;;  %3571 = vst [vmem:[#allocation2 + $0x158] sm:$0x1] %v3570_v63 }
 0x52c   :  { %v2974_v31 = vpop.f32.mrf.mxu3  ;;  %v4984_v49 = vor.u32 %v4983_v56, %v4979_v23 }
 0x52d   :  { %v4053_v26 = vor.u32 %v4051_v8, %v4050_v46  ;;  %v3362_v42 = vmax.f32 %v3298_v3, 0.0  ;;  %v2975_v27 = vadd.f32 %v2974_v31, %v2805_v25  ;;  %v11462_v17 = vpop.f32.mrf.mxu1  ;;  %v4988_v3 = vrot.slane %v4986_v29, 1 }
 0x52e   :  { %13634 = vst [vmem:[#allocation66_spill] sm:$0xff] %v11462_v17 }
 0x52f   :  { %v4460_v20 = vsel %vm10899_vm8, %v4053_v26, %v4459_v14  ;;  %v3637_v21 = vpack.c.bf16 %v3362_v42, %v3362_v42  ;;  %v3144_v11 = vadd.f32 %v3143_v6, %v2975_v27  ;;  %v9165_v9 = vld [vmem:[#allocation2 + $0x12c] sm:$0xff]  ;;  %v4054_v42 = vrot.slane %v4050_v46, 4  ;;  %v4463_v27 = vld [vmem:[#allocation2 + $0x140] sm:$0x1] }
 0x530   :  { %4461 = vst [vmem:[#allocation2 + $0x138] sm:$0xf] %v4460_v20  ;;  %v4533_v26 = vld [vmem:[#allocation2 + $0x2c] sm:$0x1]  ;;  %v11476_v29 = vsel %vm470_vm0, %v4984_v49, %v4988_v3 }
 0x531   :  { %v4056_v37 = vshrl.u32 %v3637_v21, 16  ;;  %v3231_v8 = vadd.f32 %v3144_v11, %v13635_v52  ;;  %5925 = vmatmul.bf16.gmra.mxu1 %v9165_v9  ;;  %v4059_v31 = vshll.u32 %v3637_v21, 16  ;;  %v2807_v6 = vpop.f32.mrf.mxu2  ;;  %v13636_v11 = vld [vmem:[#allocation81_spill] sm:$0xff]  ;;  %v13637_v9 = vld [vmem:[#allocation78_spill] sm:$0xff]  ;;  %v5428_v21 = vrot.slane %v11458_v32, 1 }
 0x532   :  { %v2446_v63 = vadd.f32 %v13637_v9, %v13636_v11  ;;  %v4885_v23 = vunpack.c.l.b16 %v4533_v26 }
 0x533   :  { %v4058_v25 = vrot.slane %v4056_v37, 7  ;;  %v3299_v14 = vadd.f32 %v11362_v39, %v3231_v8  ;;  %v3148_v47 = vpop.f32.mrf.mxu0  ;;  %v11485_v8 = vsel %vm939_vm1, %v5428_v21, %v5429_v62 }
 0x534   :  { %v2976_v20 = vpop.f32.mrf.mxu3  ;;  %13639 = vst [vmem:[#allocation69_spill] sm:$0xff] %v11485_v8 }
 0x535   :  { %v4061_v17 = vor.u32 %v4059_v31, %v4058_v25  ;;  %v4063_v59 = vrot.slane %v4058_v25, 4  ;;  %v3363_v1 = vmax.f32 %v3299_v14, 0.0  ;;  %v2977_v34 = vadd.f32 %v2976_v20, %v2807_v6  ;;  %v11473_v56 = vpop.f32.mrf.mxu1  ;;  %v3474_v25 = vld [vmem:[#allocation2 + $0x15c] sm:$0x1]  ;;  %v11489_v31 = vld [vmem:[#allocation2 + $0x24] sm:$0xff] }
 0x536   :  { %13638 = vst [vmem:[#allocation106_spill] sm:$0xff] %v11473_v56  ;;  %5989 = vmatmul.bf16.gmra.mxu2 %v11476_v29  ;;  %6471 = vmatmul.bf16.gmra.mxu0 %v11426_v57  ;;  %v4466_v57 = vld [vmem:[#allocation2 + $0x144] sm:$0xf] }
 0x537   :  { %v4062_v46 = vsel %vm10910_vm10, %v4054_v42, %v4061_v17  ;;  %v4464_v58 = vsel %vm10846_vm4, %v4063_v59, %v4463_v27  ;;  %v3638_v37 = vpack.c.bf16 %v3363_v1, %v3363_v1  ;;  %v3146_v52 = vadd.f32 %v3145_v0, %v2977_v34 }
 0x538   :  { %4462 = vst [vmem:[#allocation2 + $0x13c] sm:$0xf] %v4062_v46  ;;  %v4921_v17 = vpack.c.b16 %v4885_v23, %v4885_v23  ;;  %v4993_v59 = vshll.u32 %v11489_v31, 16  ;;  %v3475_v34 = vsel %vm10846_vm4, 0, %v3474_v25  ;;  %v13641_v25 = vld [vmem:[#allocation82_spill] sm:$0xff] }
 0x539   :  { %4465 = vst [vmem:[#allocation2 + $0x140] sm:$0x1] %v4464_v58  ;;  %v4065_v49 = vshrl.u32 %v3638_v37, 16  ;;  %v3232_v3 = vadd.f32 %v3146_v52, %v2446_v63  ;;  %6158 = vmatmul.bf16.gmra.mxu3 %v11485_v8  ;;  %v4068_v14 = vshll.u32 %v3638_v37, 16  ;;  %v2810_v6 = vpop.f32.mrf.mxu2  ;;  %v4991_v37 = vshrl.u32 %v11489_v31, 16  ;;  %v9185_v52 = vld [vmem:[#allocation3 + $0x48] sm:$0xff] }
 0x53a   :  { %3476 = vst [vmem:[#allocation2 + $0x15c] sm:$0x1] %v3475_v34  ;;  %v4995_v9 = vrot.slane %v4993_v59, 1  ;;  %v4998_v63 = vshll.u32 %v4921_v17, 16  ;;  %6633 = vmatpush.bf16.msrb.mxu1 %v9185_v52  ;;  %v5432_v8 = vrot.slane %v4921_v17, 1  ;;  %v5431_v52 = vrot.slane %v11489_v31, 1 }
 0x53b   :  { %v4067_v0 = vrot.slane %v4065_v49, 7  ;;  %v3300_v62 = vadd.f32 %v11362_v39, %v3232_v3  ;;  %v3150_v1 = vpop.f32.mrf.mxu0  ;;  %v3572_v49 = vld [vmem:[#allocation2 + $0x164] sm:$0x1] }
 0x53c   :  { %v2979_v26 = vpop.f32.mrf.mxu3  ;;  %v4996_v59 = vor.u32 %v4995_v9, %v4991_v37  ;;  %v13643_v9 = vld [vmem:[#allocation84_spill] sm:$0xff] }
 0x53d   :  { %v4070_v42 = vor.u32 %v4068_v14, %v4067_v0  ;;  %v3364_v27 = vmax.f32 %v3300_v62, 0.0  ;;  %v2980_v20 = vadd.f32 %v2979_v26, %v2810_v6  ;;  %v11495_v11 = vpop.f32.mrf.mxu1  ;;  %v3573_v14 = vsel %vm10862_vm6, 0, %v3572_v49  ;;  %v13642_v49 = vld [vmem:[#allocation83_spill] sm:$0xff] }
 0x53e   :  { %13640 = vst [vmem:[#allocation70_spill] sm:$0xff] %v11495_v11  ;;  %v5000_v62 = vrot.slane %v4998_v63, 1  ;;  %v2451_v63 = vadd.f32 %v13643_v9, %v13642_v49 }
 0x53f   :  { %v4467_v21 = vsel %vm10899_vm8, %v4070_v42, %v4466_v57  ;;  %v3639_v23 = vpack.c.bf16 %v3364_v27, %v3364_v27  ;;  %v3149_v46 = vadd.f32 %v3148_v47, %v2980_v20  ;;  %v9166_v58 = vld [vmem:[#allocation2 + $0x138] sm:$0xff]  ;;  %3574 = vst [vmem:[#allocation2 + $0x164] sm:$0x1] %v3573_v14  ;;  %v4071_v27 = vrot.slane %v4067_v0, 4  ;;  %v4470_v20 = vld [vmem:[#allocation2 + $0x14c] sm:$0x1] }
 0x540   :  { %4468 = vst [vmem:[#allocation2 + $0x144] sm:$0xf] %v4467_v21  ;;  %v4536_v42 = vld [vmem:[#allocation2 + $0x38] sm:$0x1] }
 0x541   :  { %v4073_v3 = vshrl.u32 %v3639_v23, 16  ;;  %v3233_v34 = vadd.f32 %v3149_v46, %v13641_v25  ;;  %5930 = vmatmul.bf16.gmra.mxu1 %v9166_v58  ;;  %v4076_v57 = vshll.u32 %v3639_v23, 16  ;;  %v2812_v26 = vpop.f32.mrf.mxu2  ;;  %v11509_v23 = vsel %vm470_vm0, %v4996_v59, %v5000_v62 }
 0x542   :  { %13645 = vst [vmem:[#allocation77_spill] sm:$0xff] %v11509_v23 }
 0x543   :  { %v4075_v6 = vrot.slane %v4073_v3, 7  ;;  %v3301_v47 = vadd.f32 %v11362_v39, %v3233_v34  ;;  %v3153_v56 = vpop.f32.mrf.mxu0  ;;  %v4886_v3 = vunpack.c.l.b16 %v4536_v42 }
 0x544   :  { %v2981_v21 = vpop.f32.mrf.mxu3 }
 0x545   :  { %v4078_v11 = vor.u32 %v4076_v57, %v4075_v6  ;;  %v4080_v46 = vrot.slane %v4075_v6, 4  ;;  %v3365_v58 = vmax.f32 %v3301_v47, 0.0  ;;  %v2982_v25 = vadd.f32 %v2981_v21, %v2812_v26  ;;  %v11506_v37 = vpop.f32.mrf.mxu1  ;;  %v3477_v26 = vld [vmem:[#allocation2 + $0x168] sm:$0x1] }
 0x546   :  { %13644 = vst [vmem:[#allocation73_spill] sm:$0xff] %v11506_v37  ;;  %5994 = vmatmul.bf16.gmra.mxu2 %v11509_v23  ;;  %v11518_v6 = vsel %vm939_vm1, %v5431_v52, %v5432_v8  ;;  %6476 = vmatmul.bf16.gmra.mxu0 %v11458_v32  ;;  %v4922_v57 = vpack.c.b16 %v4886_v3, %v4886_v3  ;;  %v3478_v8 = vsel %vm10846_vm4, 0, %v3477_v26  ;;  %v4473_v32 = vld [vmem:[#allocation2 + $0x150] sm:$0xf] }
 0x547   :  { %v4079_v0 = vsel %vm10910_vm10, %v4071_v27, %v4078_v11  ;;  %v4471_v17 = vsel %vm10846_vm4, %v4080_v46, %v4470_v20  ;;  %v3640_v34 = vpack.c.bf16 %v3365_v58, %v3365_v58  ;;  %v3151_v14 = vadd.f32 %v3150_v1, %v2982_v25  ;;  %13646 = vst [vmem:[#allocation9_spill] sm:$0xff] %v11518_v6  ;;  %v11522_v11 = vld [vmem:[#allocation2 + $0x30] sm:$0xff] }
 0x548   :  { %4469 = vst [vmem:[#allocation2 + $0x148] sm:$0xf] %v4079_v0  ;;  %v5005_v47 = vshll.u32 %v11522_v11, 16  ;;  %v5010_v52 = vshll.u32 %v4922_v57, 16  ;;  %v13648_v26 = vld [vmem:[#allocation85_spill] sm:$0xff] }
 0x549   :  { %4472 = vst [vmem:[#allocation2 + $0x14c] sm:$0x1] %v4471_v17  ;;  %v4082_v59 = vshrl.u32 %v3640_v34, 16  ;;  %v3234_v62 = vadd.f32 %v3151_v14, %v2451_v63  ;;  %6163 = vmatmul.bf16.gmra.mxu3 %v11518_v6  ;;  %v4085_v42 = vshll.u32 %v3640_v34, 16  ;;  %v2815_v20 = vpop.f32.mrf.mxu2  ;;  %v5003_v14 = vshrl.u32 %v11522_v11, 16 }
 0x54a   :  { %3479 = vst [vmem:[#allocation2 + $0x168] sm:$0x1] %v3478_v8  ;;  %v5007_v63 = vrot.slane %v5005_v47, 1  ;;  %v5012_v47 = vrot.slane %v5010_v52, 1  ;;  %v5435_v6 = vrot.slane %v4922_v57, 1 }
 0x54b   :  { %v4084_v1 = vrot.slane %v4082_v59, 7  ;;  %v3302_v27 = vadd.f32 %v11362_v39, %v3234_v62  ;;  %v3155_v49 = vpop.f32.mrf.mxu0  ;;  %v3575_v59 = vld [vmem:[#allocation2 + $0x170] sm:$0x1] }
 0x54c   :  { %v2984_v21 = vpop.f32.mrf.mxu3 }
 0x54d   :  { %v4087_v46 = vor.u32 %v4085_v42, %v4084_v1  ;;  %v3366_v58 = vmax.f32 %v3302_v27, 0.0  ;;  %v2985_v25 = vadd.f32 %v2984_v21, %v2815_v20  ;;  %v11528_v9 = vpop.f32.mrf.mxu1  ;;  %v3576_v27 = vsel %vm10862_vm6, 0, %v3575_v59  ;;  %v13650_v59 = vld [vmem:[#allocation87_spill] sm:$0xff] }
 0x54e   :  { %13647 = vst [vmem:[#allocation15_spill] sm:$0xff] %v11528_v9  ;;  %v5008_v20 = vor.u32 %v5007_v63, %v5003_v14  ;;  %v2456_v63 = vadd.f32 %v13650_v59, %v13649_v38  ;;  %v5434_v14 = vrot.slane %v11522_v11, 1 }
 0x54f   :  { %v4474_v3 = vsel %vm10899_vm8, %v4087_v46, %v4473_v32  ;;  %v3641_v0 = vpack.c.bf16 %v3366_v58, %v3366_v58  ;;  %v3154_v17 = vadd.f32 %v3153_v56, %v2985_v25  ;;  %v9167_v34 = vld [vmem:[#allocation2 + $0x144] sm:$0xff]  ;;  %3577 = vst [vmem:[#allocation2 + $0x170] sm:$0x1] %v3576_v27  ;;  %v4088_v58 = vrot.slane %v4084_v1, 4  ;;  %v4477_v25 = vld [vmem:[#allocation2 + $0x158] sm:$0x1] }
 0x550   :  { %4475 = vst [vmem:[#allocation2 + $0x150] sm:$0xf] %v4474_v3  ;;  %v4539_v46 = vld [vmem:[#allocation2 + $0x44] sm:$0x1]  ;;  %v11551_v38 = vsel %vm939_vm1, %v5434_v14, %v5435_v6 }
 0x551   :  { %v4090_v62 = vshrl.u32 %v3641_v0, 16  ;;  %v3235_v42 = vadd.f32 %v3154_v17, %v13648_v26  ;;  %5935 = vmatmul.bf16.gmra.mxu1 %v9167_v34  ;;  %v4093_v21 = vshll.u32 %v3641_v0, 16  ;;  %v2817_v56 = vpop.f32.mrf.mxu2  ;;  %v11542_v0 = vsel %vm470_vm0, %v5008_v20, %v5012_v47  ;;  %13653 = vst [vmem:[#allocation24_spill] sm:$0xff] %v11551_v38 }
 0x552   :  { %13652 = vst [vmem:[#allocation12_spill] sm:$0xff] %v11542_v0 }
 0x553   :  { %v4092_v8 = vrot.slane %v4090_v62, 7  ;;  %v3303_v32 = vadd.f32 %v11362_v39, %v3235_v42  ;;  %v3158_v26 = vpop.f32.mrf.mxu0  ;;  %v4887_v62 = vunpack.c.l.b16 %v4539_v46 }
 0x554   :  { %v2986_v3 = vpop.f32.mrf.mxu3 }
 0x555   :  { %v4095_v9 = vor.u32 %v4093_v21, %v4092_v8  ;;  %v4097_v37 = vrot.slane %v4092_v8, 4  ;;  %v3367_v17 = vmax.f32 %v3303_v32, 0.0  ;;  %v2987_v34 = vadd.f32 %v2986_v3, %v2817_v56  ;;  %v11539_v52 = vpop.f32.mrf.mxu1  ;;  %v3480_v21 = vld [vmem:[#allocation2 + $0x174] sm:$0x1] }
 0x556   :  { %13651 = vst [vmem:[#allocation79_spill] sm:$0xff] %v11539_v52  ;;  %5999 = vmatmul.bf16.gmra.mxu2 %v11542_v0  ;;  %6481 = vmatmul.bf16.gmra.mxu0 %v11489_v31  ;;  %v4923_v8 = vpack.c.b16 %v4887_v62, %v4887_v62  ;;  %v3481_v6 = vsel %vm10846_vm4, 0, %v3480_v21  ;;  %v4480_v31 = vld [vmem:[#allocation2 + $0x15c] sm:$0xf]  ;;  %v13655_v21 = vld [vmem:[#allocation88_spill] sm:$0xff] }
 0x557   :  { %v4096_v1 = vsel %vm10910_vm10, %v4088_v58, %v4095_v9  ;;  %v4478_v57 = vsel %vm10846_vm4, %v4097_v37, %v4477_v25  ;;  %v3642_v42 = vpack.c.bf16 %v3367_v17, %v3367_v17  ;;  %v3156_v27 = vadd.f32 %v3155_v49, %v2987_v34  ;;  %v11555_v9 = vld [vmem:[#allocation2 + $0x3c] sm:$0xff]  ;;  %3482 = vst [vmem:[#allocation2 + $0x174] sm:$0x1] %v3481_v6 }
 0x558   :  { %4476 = vst [vmem:[#allocation2 + $0x154] sm:$0xf] %v4096_v1  ;;  %v5017_v37 = vshll.u32 %v11555_v9, 16  ;;  %v5022_v14 = vshll.u32 %v4923_v8, 16 }
 0x559   :  { %4479 = vst [vmem:[#allocation2 + $0x158] sm:$0x1] %v4478_v57  ;;  %v4099_v20 = vshrl.u32 %v3642_v42, 16  ;;  %v3236_v47 = vadd.f32 %v3156_v27, %v2456_v63  ;;  %6168 = vmatmul.bf16.gmra.mxu3 %v11551_v38  ;;  %v4102_v32 = vshll.u32 %v3642_v42, 16  ;;  %v2820_v46 = vpop.f32.mrf.mxu2  ;;  %v5015_v27 = vshrl.u32 %v11555_v9, 16 }
 0x55a   :  { %v5019_v63 = vrot.slane %v5017_v37, 1  ;;  %v5024_v37 = vrot.slane %v5022_v14, 1  ;;  %v5438_v38 = vrot.slane %v4923_v8, 1 }
 0x55b   :  { %v4101_v49 = vrot.slane %v4099_v20, 7  ;;  %v3304_v56 = vadd.f32 %v11362_v39, %v3236_v47  ;;  %v3160_v34 = vpop.f32.mrf.mxu0  ;;  %v3578_v20 = vld [vmem:[#allocation2 + $0x17c] sm:$0x1] }
 0x55c   :  { %v2989_v58 = vpop.f32.mrf.mxu3 }
 0x55d   :  { %v4104_v25 = vor.u32 %v4102_v32, %v4101_v49  ;;  %v3368_v3 = vmax.f32 %v3304_v56, 0.0  ;;  %v2990_v17 = vadd.f32 %v2989_v58, %v2820_v46  ;;  %v11561_v59 = vpop.f32.mrf.mxu1  ;;  %v3579_v56 = vsel %vm10862_vm6, 0, %v3578_v20  ;;  %v13657_v20 = vld [vmem:[#allocation90_spill] sm:$0xff] }
 0x55e   :  { %13654 = vst [vmem:[#allocation18_spill] sm:$0xff] %v11561_v59  ;;  %v5020_v46 = vor.u32 %v5019_v63, %v5015_v27  ;;  %v2461_v63 = vadd.f32 %v13657_v20, %v13656_v35  ;;  %v5437_v27 = vrot.slane %v11555_v9, 1 }
 0x55f   :  { %v4481_v62 = vsel %vm10899_vm8, %v4104_v25, %v4480_v31  ;;  %v3643_v1 = vpack.c.bf16 %v3368_v3, %v3368_v3  ;;  %v3159_v57 = vadd.f32 %v3158_v26, %v2990_v17  ;;  %v9168_v42 = vld [vmem:[#allocation2 + $0x150] sm:$0xff]  ;;  %3580 = vst [vmem:[#allocation2 + $0x17c] sm:$0x1] %v3579_v56  ;;  %v4105_v3 = vrot.slane %v4101_v49, 4  ;;  %v4484_v17 = vld [vmem:[#allocation2 + $0x164] sm:$0x1] }
 0x560   :  { %4482 = vst [vmem:[#allocation2 + $0x15c] sm:$0xf] %v4481_v62  ;;  %v4542_v25 = vld [vmem:[#allocation2 + $0x50] sm:$0x1]  ;;  %v11584_v35 = vsel %vm939_vm1, %v5437_v27, %v5438_v38 }
 0x561   :  { %v4107_v47 = vshrl.u32 %v3643_v1, 16  ;;  %v3237_v32 = vadd.f32 %v3159_v57, %v13655_v21  ;;  %5940 = vmatmul.bf16.gmra.mxu1 %v9168_v42  ;;  %v4110_v58 = vshll.u32 %v3643_v1, 16  ;;  %v2822_v26 = vpop.f32.mrf.mxu2  ;;  %v11575_v1 = vsel %vm470_vm0, %v5020_v46, %v5024_v37  ;;  %13660 = vst [vmem:[#allocation27_spill] sm:$0xff] %v11584_v35 }
 0x562   :  { %13659 = vst [vmem:[#allocation33_spill] sm:$0xff] %v11575_v1 }
 0x563   :  { %v4109_v6 = vrot.slane %v4107_v47, 7  ;;  %v3305_v31 = vadd.f32 %v11362_v39, %v3237_v32  ;;  %v3163_v21 = vpop.f32.mrf.mxu0  ;;  %v4888_v47 = vunpack.c.l.b16 %v4542_v25 }
 0x564   :  { %v2991_v62 = vpop.f32.mrf.mxu3 }
 0x565   :  { %v4112_v59 = vor.u32 %v4110_v58, %v4109_v6  ;;  %v4114_v52 = vrot.slane %v4109_v6, 4  ;;  %v3369_v57 = vmax.f32 %v3305_v31, 0.0  ;;  %v2992_v42 = vadd.f32 %v2991_v62, %v2822_v26  ;;  %v11572_v14 = vpop.f32.mrf.mxu1  ;;  %v3483_v58 = vld [vmem:[#allocation2 + $0x180] sm:$0x1] }
 0x566   :  { %13658 = vst [vmem:[#allocation21_spill] sm:$0xff] %v11572_v14  ;;  %6004 = vmatmul.bf16.gmra.mxu2 %v11575_v1  ;;  %6486 = vmatmul.bf16.gmra.mxu0 %v11522_v11  ;;  %v4924_v6 = vpack.c.b16 %v4888_v47, %v4888_v47  ;;  %v3484_v38 = vsel %vm10846_vm4, 0, %v3483_v58  ;;  %v4487_v11 = vld [vmem:[#allocation2 + $0x168] sm:$0xf]  ;;  %v13662_v58 = vld [vmem:[#allocation91_spill] sm:$0xff] }
 0x567   :  { %v4113_v49 = vsel %vm10910_vm10, %v4105_v3, %v4112_v59  ;;  %v4485_v8 = vsel %vm10846_vm4, %v4114_v52, %v4484_v17  ;;  %v3644_v32 = vpack.c.bf16 %v3369_v57, %v3369_v57  ;;  %v3161_v56 = vadd.f32 %v3160_v34, %v2992_v42  ;;  %v11588_v59 = vld [vmem:[#allocation2 + $0x48] sm:$0xff]  ;;  %3485 = vst [vmem:[#allocation2 + $0x180] sm:$0x1] %v3484_v38 }
 0x568   :  { %4483 = vst [vmem:[#allocation2 + $0x160] sm:$0xf] %v4113_v49  ;;  %v5029_v52 = vshll.u32 %v11588_v59, 16  ;;  %v5034_v27 = vshll.u32 %v4924_v6, 16 }
 0x569   :  { %4486 = vst [vmem:[#allocation2 + $0x164] sm:$0x1] %v4485_v8  ;;  %v4116_v46 = vshrl.u32 %v3644_v32, 16  ;;  %v3238_v37 = vadd.f32 %v3161_v56, %v2461_v63  ;;  %6173 = vmatmul.bf16.gmra.mxu3 %v11584_v35  ;;  %v4119_v31 = vshll.u32 %v3644_v32, 16  ;;  %v2825_v25 = vpop.f32.mrf.mxu2  ;;  %v5027_v56 = vshrl.u32 %v11588_v59, 16 }
 0x56a   :  { %v5031_v63 = vrot.slane %v5029_v52, 1  ;;  %v5036_v52 = vrot.slane %v5034_v27, 1  ;;  %v5441_v35 = vrot.slane %v4924_v6, 1 }
 0x56b   :  { %v4118_v34 = vrot.slane %v4116_v46, 7  ;;  %v3306_v26 = vadd.f32 %v11362_v39, %v3238_v37  ;;  %v3165_v42 = vpop.f32.mrf.mxu0  ;;  %v3581_v46 = vld [vmem:[#allocation2 + $0x188] sm:$0x1] }
 0x56c   :  { %v2994_v3 = vpop.f32.mrf.mxu3 }
 0x56d   :  { %v4121_v17 = vor.u32 %v4119_v31, %v4118_v34  ;;  %v3370_v62 = vmax.f32 %v3306_v26, 0.0  ;;  %v2995_v57 = vadd.f32 %v2994_v3, %v2825_v25  ;;  %v11594_v20 = vpop.f32.mrf.mxu1  ;;  %v3582_v26 = vsel %vm10862_vm6, 0, %v3581_v46  ;;  %v13663_v46 = vld [vmem:[#allocation93_spill] sm:$0xff] }
 0x56e   :  { %13661 = vst [vmem:[#allocation30_spill] sm:$0xff] %v11594_v20  ;;  %v5032_v25 = vor.u32 %v5031_v63, %v5027_v56  ;;  %v2466_v63 = vadd.f32 %v13663_v46, %v10822_v19  ;;  %v5440_v56 = vrot.slane %v11588_v59, 1 }
 0x56f   :  { %v4488_v47 = vsel %vm10899_vm8, %v4121_v17, %v4487_v11  ;;  %v3645_v49 = vpack.c.bf16 %v3370_v62, %v3370_v62  ;;  %v3164_v8 = vadd.f32 %v3163_v21, %v2995_v57  ;;  %v9169_v32 = vld [vmem:[#allocation2 + $0x15c] sm:$0xff]  ;;  %3583 = vst [vmem:[#allocation2 + $0x188] sm:$0x1] %v3582_v26  ;;  %v4122_v62 = vrot.slane %v4118_v34, 4  ;;  %v4491_v57 = vld [vmem:[#allocation2 + $0x170] sm:$0x1] }
 0x570   :  { %4489 = vst [vmem:[#allocation2 + $0x168] sm:$0xf] %v4488_v47  ;;  %v4545_v17 = vld [vmem:[#allocation2 + $0x5c] sm:$0x1]  ;;  %v11617_v19 = vsel %vm939_vm1, %v5440_v56, %v5441_v35 }
 0x571   :  { %v4124_v37 = vshrl.u32 %v3645_v49, 16  ;;  %v3239_v31 = vadd.f32 %v3164_v8, %v13662_v58  ;;  %5945 = vmatmul.bf16.gmra.mxu1 %v9169_v32  ;;  %v4127_v3 = vshll.u32 %v3645_v49, 16  ;;  %v2827_v21 = vpop.f32.mrf.mxu2  ;;  %v11608_v49 = vsel %vm470_vm0, %v5032_v25, %v5036_v52  ;;  %13666 = vst [vmem:[#allocation36_spill] sm:$0xff] %v11617_v19 }
 0x572   :  { %13665 = vst [vmem:[#allocation37_spill] sm:$0xff] %v11608_v49 }
 0x573   :  { %v4126_v38 = vrot.slane %v4124_v37, 7  ;;  %v3307_v11 = vadd.f32 %v11362_v39, %v3239_v31  ;;  %v3168_v58 = vpop.f32.mrf.mxu0  ;;  %v4889_v37 = vunpack.c.l.b16 %v4545_v17  ;;  %v4494_v17 = vld [vmem:[#allocation2 + $0x174] sm:$0xf] }
 0x574   :  { %v2996_v47 = vpop.f32.mrf.mxu3 }
 0x575   :  { %v4129_v20 = vor.u32 %v4127_v3, %v4126_v38  ;;  %v4131_v14 = vrot.slane %v4126_v38, 4  ;;  %v3371_v8 = vmax.f32 %v3307_v11, 0.0  ;;  %v2997_v32 = vadd.f32 %v2996_v47, %v2827_v21  ;;  %v11605_v27 = vpop.f32.mrf.mxu1 }
 0x576   :  { %13664 = vst [vmem:[#allocation38_spill] sm:$0xff] %v11605_v27  ;;  %6009 = vmatmul.bf16.gmra.mxu2 %v11608_v49  ;;  %6491 = vmatmul.bf16.gmra.mxu0 %v11555_v9  ;;  %v11621_v38 = vpack.c.b16 %v4889_v37, %v4889_v37 }
 0x577   :  { %v4130_v34 = vsel %vm10910_vm10, %v4122_v62, %v4129_v20  ;;  %v4492_v6 = vsel %vm10846_vm4, %v4131_v14, %v4491_v57  ;;  %v3646_v31 = vpack.c.bf16 %v3371_v8, %v3371_v8  ;;  %v3166_v26 = vadd.f32 %v3165_v42, %v2997_v32  ;;  %v11623_v20 = vld [vmem:[#allocation2 + $0x54] sm:$0xff]  ;;  %v3486_v42 = vld [vmem:[#allocation2 + $0x18c] sm:$0x1] }
 0x578   :  { %4490 = vst [vmem:[#allocation2 + $0x16c] sm:$0xf] %v4130_v34  ;;  %v5041_v14 = vshll.u32 %v11623_v20, 16  ;;  %v3487_v9 = vsel %vm10846_vm4, 0, %v3486_v42  ;;  %v5046_v56 = vshll.u32 %v11621_v38, 16  ;;  %v13668_v42 = vld [vmem:[#allocation96_spill] sm:$0xff] }
 0x579   :  { %4493 = vst [vmem:[#allocation2 + $0x170] sm:$0x1] %v4492_v6  ;;  %v4133_v25 = vshrl.u32 %v3646_v31, 16  ;;  %v3240_v52 = vadd.f32 %v3166_v26, %v2466_v63  ;;  %6178 = vmatmul.bf16.gmra.mxu3 %v11617_v19  ;;  %v4136_v11 = vshll.u32 %v3646_v31, 16  ;;  %v2830_v35 = vpop.f32.mrf.mxu2  ;;  %v5039_v31 = vshrl.u32 %v11623_v20, 16  ;;  %v9184_v26 = vld [vmem:[#allocation3 + $0x40] sm:$0xff] }
 0x57a   :  { %3488 = vst [vmem:[#allocation2 + $0x18c] sm:$0x1] %v3487_v9  ;;  %v5043_v63 = vrot.slane %v5041_v14, 1  ;;  %6634 = vmatpush.bf16.msrb.mxu1 %v9184_v26 }
 0x57b   :  { %v4135_v3 = vrot.slane %v4133_v25, 7  ;;  %v3308_v21 = vadd.f32 %v11362_v39, %v3240_v52  ;;  %v3170_v32 = vpop.f32.mrf.mxu0  ;;  %v3584_v25 = vld [vmem:[#allocation2 + $0x194] sm:$0x1] }
 0x57c   :  { %v2999_v62 = vpop.f32.mrf.mxu3  ;;  %v3585_v14 = vsel %vm10862_vm6, 0, %v3584_v25 }
 0x57d   :  { %v4138_v57 = vor.u32 %v4136_v11, %v4135_v3  ;;  %v3372_v47 = vmax.f32 %v3308_v21, 0.0  ;;  %v3000_v8 = vadd.f32 %v2999_v62, %v2830_v35  ;;  %v11629_v46 = vpop.f32.mrf.mxu1  ;;  %v5044_v21 = vor.u32 %v5043_v63, %v5039_v31  ;;  %3586 = vst [vmem:[#allocation2 + $0x194] sm:$0x1] %v3585_v14 }
 0x57e   :  { %13667 = vst [vmem:[#allocation42_spill] sm:$0xff] %v11629_v46  ;;  %v5048_v35 = vrot.slane %v5046_v56, 1 }
 0x57f   :  { %v4495_v37 = vsel %vm10899_vm8, %v4138_v57, %v4494_v17  ;;  %v3647_v39 = vpack.c.bf16 %v3372_v47, %v3372_v47  ;;  %v3169_v34 = vadd.f32 %v3168_v58, %v3000_v8  ;;  %v9170_v6 = vld [vmem:[#allocation2 + $0x168] sm:$0xff]  ;;  %v11641_v58 = vld [vmem:[%s13123_s2] ss:$0 sm:$0xff]  ;;  %v4139_v8 = vrot.slane %v4135_v3, 4 }
 0x580   :  { %4496 = vst [vmem:[#allocation2 + $0x174] sm:$0xf] %v4495_v37  ;;  %v4548_v47 = vld [vmem:[#allocation2 + $0x68] sm:$0x1]  ;;  %v4498_v37 = vld [vmem:[#allocation2 + $0x17c] sm:$0x1]  ;;  %v11650_v14 = vsel %vm470_vm0, %v5044_v21, %v5048_v35 }
 0x581   :  { %v4141_v52 = vshrl.u32 %v3647_v39, 16  ;;  %v3241_v11 = vadd.f32 %v3169_v34, %v13668_v42  ;;  %5950 = vmatmul.bf16.gmra.mxu1 %v9170_v6  ;;  %v4144_v17 = vshll.u32 %v3647_v39, 16  ;;  %v2832_v57 = vpop.f32.mrf.mxu2  ;;  %v5444_v6 = vrot.slane %v11621_v38, 1  ;;  %v13669_v39 = vld [vmem:[#allocation92_spill] sm:$0xff]  ;;  %13671 = vst [vmem:[#allocation46_spill] sm:$0xff] %v11650_v14 }
 0x582   :  { %v4890_v3 = vunpack.c.l.b16 %v4548_v47 }
 0x583   :  { %v4143_v9 = vrot.slane %v4141_v52, 7  ;;  %v3309_v62 = vadd.f32 %v11641_v58, %v3241_v11  ;;  %v3173_v25 = vpop.f32.mrf.mxu0  ;;  %v2471_v52 = vadd.f32 %v13669_v39, %v10835_v43  ;;  %v5443_v11 = vrot.slane %v11623_v20, 1 }
 0x584   :  { %v3001_v34 = vpop.f32.mrf.mxu3 }
 0x585   :  { %v4146_v63 = vor.u32 %v4144_v17, %v4143_v9  ;;  %v4148_v56 = vrot.slane %v4143_v9, 4  ;;  %v3373_v31 = vmax.f32 %v3309_v62, 0.0  ;;  %v3002_v26 = vadd.f32 %v3001_v34, %v2832_v57  ;;  %v11647_v42 = vpop.f32.mrf.mxu1  ;;  %v11663_v57 = vld [vmem:[#allocation2 + $0x60] sm:$0xff] }
 0x586   :  { %13670 = vst [vmem:[#allocation41_spill] sm:$0xff] %v11647_v42  ;;  %6014 = vmatmul.bf16.gmra.mxu2 %v11650_v14  ;;  %v11659_v43 = vsel %vm939_vm1, %v5443_v11, %v5444_v6  ;;  %6496 = vmatmul.bf16.gmra.mxu0 %v11588_v59  ;;  %v4926_v62 = vpack.c.b16 %v4890_v3, %v4890_v3  ;;  %v5053_v47 = vshll.u32 %v11663_v57, 16  ;;  %v4501_v59 = vld [vmem:[#allocation2 + $0x180] sm:$0xf] }
 0x587   :  { %v4147_v19 = vsel %vm10910_vm10, %v4139_v8, %v4146_v63  ;;  %v4499_v38 = vsel %vm10846_vm4, %v4148_v56, %v4498_v37  ;;  %v3648_v9 = vpack.c.bf16 %v3373_v31, %v3373_v31  ;;  %v3171_v17 = vadd.f32 %v3170_v32, %v3002_v26  ;;  %13672 = vst [vmem:[#allocation43_spill] sm:$0xff] %v11659_v43  ;;  %v3489_v8 = vld [vmem:[#allocation2 + $0x198] sm:$0x1] }
 0x588   :  { %4497 = vst [vmem:[#allocation2 + $0x178] sm:$0xf] %v4147_v19  ;;  %v3490_v6 = vsel %vm10846_vm4, 0, %v3489_v8  ;;  %v5055_v11 = vrot.slane %v5053_v47, 1  ;;  %v5058_v3 = vshll.u32 %v4926_v62, 16  ;;  %v5447_v42 = vrot.slane %v4926_v62, 1 }
 0x589   :  { %4500 = vst [vmem:[#allocation2 + $0x17c] sm:$0x1] %v4499_v38  ;;  %v4150_v21 = vshrl.u32 %v3648_v9, 16  ;;  %v3242_v35 = vadd.f32 %v3171_v17, %v2471_v52  ;;  %6183 = vmatmul.bf16.gmra.mxu3 %v11659_v43  ;;  %v4153_v19 = vshll.u32 %v3648_v9, 16  ;;  %v2835_v34 = vpop.f32.mrf.mxu2  ;;  %v3587_v8 = vld [vmem:[#allocation2 + $0x1a0] sm:$0x1] }
 0x58a   :  { %3491 = vst [vmem:[#allocation2 + $0x198] sm:$0x1] %v3490_v6  ;;  %v13674_v6 = vld [vmem:[#allocation94_spill] sm:$0xff]  ;;  %v5060_v47 = vrot.slane %v5058_v3, 1 }
 0x58b   :  { %v4152_v32 = vrot.slane %v4150_v21, 7  ;;  %v3310_v37 = vadd.f32 %v11641_v58, %v3242_v35  ;;  %v3175_v39 = vpop.f32.mrf.mxu0  ;;  %v5051_v35 = vshrl.u32 %v11663_v57, 16 }
 0x58c   :  { %v3004_v63 = vpop.f32.mrf.mxu3 }
 0x58d   :  { %v4155_v56 = vor.u32 %v4153_v19, %v4152_v32  ;;  %v3374_v31 = vmax.f32 %v3310_v37, 0.0  ;;  %v3005_v26 = vadd.f32 %v3004_v63, %v2835_v34  ;;  %v3588_v37 = vsel %vm10862_vm6, 0, %v3587_v8  ;;  %v13676_v8 = vld [vmem:[#allocation95_spill] sm:$0xff] }
 0x58e   :  { %v11669_v52 = vpop.f32.mrf.mxu1  ;;  %v5056_v34 = vor.u32 %v5055_v11, %v5051_v35  ;;  %3589 = vst [vmem:[#allocation2 + $0x1a0] sm:$0x1] %v3588_v37  ;;  %v2476_v11 = vadd.f32 %v13676_v8, %v13675_v12 }
 0x58f   :  { %13673 = vst [vmem:[#allocation47_spill] sm:$0xff] %v11669_v52  ;;  %v4502_v38 = vsel %vm10899_vm8, %v4155_v56, %v4501_v59  ;;  %v3649_v9 = vpack.c.bf16 %v3374_v31, %v3374_v31  ;;  %v3174_v17 = vadd.f32 %v3173_v25, %v3005_v26  ;;  %v9171_v21 = vld [vmem:[#allocation2 + $0x174] sm:$0xff]  ;;  %v4156_v31 = vrot.slane %v4152_v32, 4  ;;  %v4505_v26 = vld [vmem:[#allocation2 + $0x188] sm:$0x1] }
 0x590   :  { %4503 = vst [vmem:[#allocation2 + $0x180] sm:$0xf] %v4502_v38  ;;  %v4551_v56 = vld [vmem:[#allocation2 + $0x74] sm:$0x1] }
 0x591   :  { %v4158_v43 = vshrl.u32 %v3649_v9, 16  ;;  %v3243_v19 = vadd.f32 %v3174_v17, %v13674_v6  ;;  %5955 = vmatmul.bf16.gmra.mxu1 %v9171_v21  ;;  %v4161_v52 = vshll.u32 %v3649_v9, 16  ;;  %v2837_v25 = vpop.f32.mrf.mxu2  ;;  %v5446_v9 = vrot.slane %v11663_v57, 1 }
 0x592   :  { %v4891_v35 = vunpack.c.l.b16 %v4551_v56 }
 0x593   :  { %v4160_v63 = vrot.slane %v4158_v43, 7  ;;  %v3311_v59 = vadd.f32 %v11641_v58, %v3243_v19  ;;  %v3178_v6 = vpop.f32.mrf.mxu0  ;;  %v11683_v43 = vsel %vm470_vm0, %v5056_v34, %v5060_v47  ;;  %v11692_v37 = vsel %vm939_vm1, %v5446_v9, %v5447_v42 }
 0x594   :  { %v3006_v38 = vpop.f32.mrf.mxu3  ;;  %13678 = vst [vmem:[#allocation48_spill] sm:$0xff] %v11683_v43 }
 0x595   :  { %v4163_v46 = vor.u32 %v4161_v52, %v4160_v63  ;;  %v4165_v27 = vrot.slane %v4160_v63, 4  ;;  %v3375_v17 = vmax.f32 %v3311_v59, 0.0  ;;  %v3007_v21 = vadd.f32 %v3006_v38, %v2837_v25  ;;  %13679 = vst [vmem:[#allocation51_spill] sm:$0xff] %v11692_v37 }
 0x596   :  { %v11680_v3 = vpop.f32.mrf.mxu1  ;;  %6019 = vmatmul.bf16.gmra.mxu2 %v11683_v43  ;;  %6501 = vmatmul.bf16.gmra.mxu0 %v11623_v20  ;;  %v4927_v63 = vpack.c.b16 %v4891_v35, %v4891_v35  ;;  %v13682_v43 = vld [vmem:[#allocation98_spill] sm:$0xff] }
 0x597   :  { %13677 = vst [vmem:[#allocation53_spill] sm:$0xff] %v11680_v3  ;;  %v4164_v32 = vsel %vm10910_vm10, %v4156_v31, %v4163_v46  ;;  %v4506_v62 = vsel %vm10846_vm4, %v4165_v27, %v4505_v26  ;;  %v3650_v52 = vpack.c.bf16 %v3375_v17, %v3375_v17  ;;  %v3176_v19 = vadd.f32 %v3175_v39, %v3007_v21  ;;  %v11696_v46 = vld [vmem:[#allocation2 + $0x6c] sm:$0xff] }
 0x598   :  { %4504 = vst [vmem:[#allocation2 + $0x184] sm:$0xf] %v4164_v32  ;;  %v5065_v27 = vshll.u32 %v11696_v46, 16  ;;  %v4508_v31 = vld [vmem:[#allocation2 + $0x18c] sm:$0xf]  ;;  %v5070_v8 = vshll.u32 %v4927_v63, 16 }
 0x599   :  { %4507 = vst [vmem:[#allocation2 + $0x188] sm:$0x1] %v4506_v62  ;;  %v4167_v34 = vshrl.u32 %v3650_v52, 16  ;;  %v3244_v47 = vadd.f32 %v3176_v19, %v2476_v11  ;;  %6188 = vmatmul.bf16.gmra.mxu3 %v11692_v37  ;;  %v4170_v39 = vshll.u32 %v3650_v52, 16  ;;  %v2840_v56 = vpop.f32.mrf.mxu2  ;;  %v5063_v62 = vshrl.u32 %v11696_v46, 16  ;;  %v13681_v19 = vld [vmem:[#allocation97_spill] sm:$0xff] }
 0x59a   :  { %v5067_v12 = vrot.slane %v5065_v27, 1  ;;  %v4554_v37 = vld [vmem:[#allocation2 + $0x80] sm:$0x1] }
 0x59b   :  { %v4169_v59 = vrot.slane %v4167_v34, 7  ;;  %v3312_v25 = vadd.f32 %v11641_v58, %v3244_v47  ;;  %v3180_v17 = vpop.f32.mrf.mxu0 }
 0x59c   :  { %v3009_v42 = vpop.f32.mrf.mxu3  ;;  %v5068_v47 = vor.u32 %v5067_v12, %v5063_v62 }
 0x59d   :  { %v4172_v26 = vor.u32 %v4170_v39, %v4169_v59  ;;  %v3376_v38 = vmax.f32 %v3312_v25, 0.0  ;;  %v3010_v20 = vadd.f32 %v3009_v42, %v2840_v56  ;;  %v5072_v39 = vrot.slane %v5070_v8, 1 }
 0x59e   :  { %v11700_v21 = vpop.f32.mrf.mxu1 }
 0x59f   :  { %13680 = vst [vmem:[#allocation57_spill] sm:$0xff] %v11700_v21  ;;  %v4509_v11 = vsel %vm10899_vm8, %v4172_v26, %v4508_v31  ;;  %v3651_v9 = vpack.c.bf16 %v3376_v38, %v3376_v38  ;;  %v3179_v35 = vadd.f32 %v3178_v6, %v3010_v20  ;;  %v9172_v32 = vld [vmem:[#allocation2 + $0x180] sm:$0xff]  ;;  %v4173_v21 = vrot.slane %v4169_v59, 4  ;;  %v4512_v31 = vld [vmem:[#allocation2 + $0x194] sm:$0x1] }
 0x5a0   :  { %4510 = vst [vmem:[#allocation2 + $0x18c] sm:$0xf] %v4509_v11  ;;  %v5450_v6 = vrot.slane %v4927_v63, 1  ;;  %v11712_v8 = vsel %vm470_vm0, %v5068_v47, %v5072_v39 }
 0x5a1   :  { %v4175_v52 = vshrl.u32 %v3651_v9, 16  ;;  %v3245_v34 = vadd.f32 %v3179_v35, %v13681_v19  ;;  %5960 = vmatmul.bf16.gmra.mxu1 %v9172_v32  ;;  %v4178_v56 = vshll.u32 %v3651_v9, 16  ;;  %v2842_v42 = vpop.f32.mrf.mxu2  ;;  %v2481_v35 = vadd.f32 %v11075_v7, %v13682_v43  ;;  %13683 = vst [vmem:[#allocation52_spill] sm:$0xff] %v11712_v8 }
 0x5a2   :  { %v5449_v9 = vrot.slane %v11696_v46, 1  ;;  %v4892_v32 = vunpack.c.l.b16 %v4554_v37  ;;  %v9231_v37 = vld [vmem:[#allocation3 + $0x1b8] sm:$0xff] }
 0x5a3   :  { %v4177_v25 = vrot.slane %v4175_v52, 7  ;;  %v3313_v27 = vadd.f32 %v11641_v58, %v3245_v34  ;;  %v6467_v5 = vpop.f32.mrf.mxu0  ;;  %7158 = vmatpush.bf16.msra.mxu3 %v9231_v37 }
 0x5a4   :  { %v3011_v26 = vpop.f32.mrf.mxu3  ;;  %v11721_v7 = vsel %vm939_vm1, %v5449_v9, %v5450_v6 }
 0x5a5   :  { %v4180_v38 = vor.u32 %v4178_v56, %v4177_v25  ;;  %v4182_v20 = vrot.slane %v4177_v25, 4  ;;  %v3377_v11 = vmax.f32 %v3313_v27, 0.0  ;;  %v3012_v3 = vadd.f32 %v3011_v26, %v2842_v42  ;;  %13684 = vst [vmem:[#allocation58_spill] sm:$0xff] %v11721_v7  ;;  %v4515_v56 = vld [vmem:[#allocation2 + $0x198] sm:$0xf] }
 0x5a6   :  { %v11709_v12 = vpop.f32.mrf.mxu1  ;;  %6024 = vmatmul.bf16.gmra.mxu2 %v11712_v8  ;;  %6506 = vmatmul.bf16.gmra.mxu0 %v11663_v57  ;;  %v4928_v25 = vpack.c.b16 %v4892_v32, %v4892_v32 }
 0x5a7   :  { %v4181_v59 = vsel %vm10910_vm10, %v4173_v21, %v4180_v38  ;;  %v4513_v63 = vsel %vm10846_vm4, %v4182_v20, %v4512_v31  ;;  %v3652_v62 = vpack.c.bf16 %v3377_v11, %v3377_v11  ;;  %v3181_v52 = vadd.f32 %v3180_v17, %v3012_v3  ;;  %v11725_v21 = vld [vmem:[#allocation2 + $0x78] sm:$0xff]  ;;  %v9199_v20 = vld [vmem:[#allocation3 + $0xb8] sm:$0xff] }
 0x5a8   :  { %4511 = vst [vmem:[#allocation2 + $0x190] sm:$0xf] %v4181_v59  ;;  %v5077_v34 = vshll.u32 %v11725_v21, 16  ;;  %v9239_v11 = vld [vmem:[#allocation3 + $0x1f8] sm:$0xff]  ;;  %v5082_v32 = vshll.u32 %v4928_v25, 16  ;;  %6796 = vmatpush.bf16.msra.mxu2 %v9199_v20 }
 0x5a9   :  { %4514 = vst [vmem:[#allocation2 + $0x194] sm:$0x1] %v4513_v63  ;;  %v4184_v43 = vshrl.u32 %v3652_v62, 16  ;;  %v3246_v19 = vadd.f32 %v3181_v52, %v2481_v35  ;;  %6193 = vmatmul.bf16.gmra.mxu3 %v11721_v7  ;;  %v4187_v3 = vshll.u32 %v3652_v62, 16  ;;  %v5985_v39 = vpop.f32.mrf.mxu2  ;;  %7327 = vmatpush.bf16.msra.mxu0 %v9239_v11  ;;  %v5075_v62 = vshrl.u32 %v11725_v21, 16  ;;  %v9247_v52 = vld [vmem:[#allocation3 + $0x238] sm:$0xff] }
 0x5aa   :  { %v5986_v57 = vadd.f32 %v5985_v39, %v11090_v54  ;;  %v5079_v59 = vrot.slane %v5077_v34, 1  ;;  %v5084_v41 = vrot.slane %v5082_v32, 1  ;;  %7496 = vmatpush.bf16.msra.mxu1 %v9247_v52  ;;  %v5452_v11 = vrot.slane %v11725_v21, 1 }
 0x5ab   :  { %v4186_v47 = vrot.slane %v4184_v43, 7  ;;  %v3314_v17 = vadd.f32 %v11641_v58, %v3246_v19  ;;  %v6469_v26 = vpop.f32.mrf.mxu0 }
 0x5ac   :  { %v6154_v27 = vpop.f32.mrf.mxu3 }
 0x5ad   :  { %v4189_v42 = vor.u32 %v4187_v3, %v4186_v47  ;;  %v3378_v31 = vmax.f32 %v3314_v17, 0.0  ;;  %v6155_v6 = vadd.f32 %v6154_v27, %v5986_v57  ;;  %v5080_v3 = vor.u32 %v5079_v59, %v5075_v62  ;;  %v4519_v17 = vld [vmem:[#allocation2 + $0x1a0] sm:$0x1]  ;;  %v4557_v57 = vld [vmem:[#allocation2 + $0x8c] sm:$0x1]  ;;  %v11756_v59 = vld [vmem:[#allocation2 + $0x84] sm:$0xff] }
 0x5ae   :  { %v11730_v38 = vpop.f32.mrf.mxu1  ;;  %v4190_v27 = vrot.slane %v4186_v47, 4  ;;  %v5089_v32 = vshll.u32 %v11756_v59, 16 }
 0x5af   :  { %v4516_v35 = vsel %vm10899_vm8, %v4189_v42, %v4515_v56  ;;  %v3653_v9 = vpack.c.bf16 %v3378_v31, %v3378_v31  ;;  %v9173_v58 = vld [vmem:[#allocation2 + $0x18c] sm:$0xff]  ;;  %v11734_v54 = vadd.f32 %v6467_v5, %v6155_v6  ;;  %v5453_v56 = vrot.slane %v4928_v25, 1 }
 0x5b0   :  { %4517 = vst [vmem:[#allocation2 + $0x198] sm:$0xf] %v4516_v35  ;;  %v4893_v25 = vunpack.c.l.b16 %v4557_v57 }
 0x5b1   :  { %v4192_v63 = vshrl.u32 %v3653_v9, 16  ;;  %5965 = vmatmul.bf16.gmra.mxu1 %v9173_v58  ;;  %v4195_v19 = vshll.u32 %v3653_v9, 16  ;;  %v5987_v37 = vpop.f32.mrf.mxu2  ;;  %v11750_v47 = vsel %vm939_vm1, %v5452_v11, %v5453_v56  ;;  %v9345_v56 = vld [vmem:[#allocation2] sm:$0xff] }
 0x5b2   :  { %v5988_v34 = vadd.f32 %v5987_v37, %v11098_v61  ;;  %v11746_v61 = vsel %vm470_vm0, %v5080_v3, %v5084_v41  ;;  %13686 = vst [vmem:[#allocation56_spill] sm:$0xff] %v11750_v47  ;;  %v4929_v18 = vpack.c.b16 %v4893_v25, %v4893_v25  ;;  %v5091_v3 = vrot.slane %v5089_v32, 1 }
 0x5b3   :  { %v4194_v43 = vrot.slane %v4192_v63, 7  ;;  %v6472_v31 = vpop.f32.mrf.mxu0  ;;  %13685 = vst [vmem:[#allocation63_spill] sm:$0xff] %v11746_v61  ;;  %v4524_v63 = vld [vmem:[#allocation2 + $0x8] sm:$0x1]  ;;  %v4957_v57 = vshll.u32 %v9345_v56, 16  ;;  %v5455_v25 = vrot.slane %v11756_v59, 1 }
 0x5b4   :  { %v6156_v39 = vpop.f32.mrf.mxu3  ;;  %v5094_v41 = vshll.u32 %v4929_v18, 16  ;;  %v5456_v11 = vrot.slane %v4929_v18, 1  ;;  %v4955_v32 = vshrl.u32 %v9345_v56, 16 }
 0x5b5   :  { %v4197_v5 = vor.u32 %v4195_v19, %v4194_v43  ;;  %v4199_v42 = vrot.slane %v4194_v43, 4  ;;  %v6157_v6 = vadd.f32 %v6156_v39, %v5988_v34  ;;  %v5087_v34 = vshrl.u32 %v11756_v59, 16 }
 0x5b6   :  { %v11738_v20 = vpop.f32.mrf.mxu1  ;;  %6029 = vmatmul.bf16.gmra.mxu2 %v11746_v61  ;;  %6511 = vmatmul.bf16.gmra.mxu0 %v11696_v46  ;;  %v4882_v46 = vunpack.c.l.b16 %v4524_v63  ;;  %v4959_v63 = vrot.slane %v4957_v57, 1 }
 0x5b7   :  { %v4198_v35 = vsel %vm10910_vm10, %v4190_v27, %v4197_v5  ;;  %v4520_v9 = vsel %vm10846_vm4, %v4199_v42, %v4519_v17  ;;  %v11753_v58 = vadd.f32 %v6469_v26, %v6157_v6  ;;  %v5096_v5 = vrot.slane %v5094_v41, 1 }
 0x5b8   :  { %4518 = vst [vmem:[#allocation2 + $0x19c] sm:$0xf] %v4198_v35  ;;  %v11765_v39 = vpack.c.b16 %v4882_v46, %v4882_v46  ;;  %v4560_v35 = vld [vmem:[#allocation2 + $0x98] sm:$0x1]  ;;  %v4960_v46 = vor.u32 %v4959_v63, %v4955_v32 }
 0x5b9   :  { %4521 = vst [vmem:[#allocation2 + $0x1a0] sm:$0x1] %v4520_v9  ;;  %6198 = vmatmul.bf16.gmra.mxu3 %v11750_v47  ;;  %v5990_v40 = vpop.f32.mrf.mxu2  ;;  %v4569_v47 = vld [vmem:[#allocation2 + $0xbc] sm:$0x1] }
 0x5ba   :  { %v5991_v62 = vadd.f32 %v5990_v40, %v11118_v4  ;;  %v5092_v4 = vor.u32 %v5091_v3, %v5087_v34  ;;  %v9346_v34 = vld [vmem:[#allocation2 + $0x90] sm:$0xff] }
 0x5bb   :  { %v6474_v43 = vpop.f32.mrf.mxu0  ;;  %v5101_v56 = vshll.u32 %v9346_v34, 16 }
 0x5bc   :  { %v6159_v52 = vpop.f32.mrf.mxu3 }
 0x5bd   :  { %v6160_v19 = vadd.f32 %v6159_v52, %v5991_v62  ;;  %v4962_v62 = vshll.u32 %v11765_v39, 16  ;;  %v11773_v52 = vsel %vm470_vm0, %v5092_v4, %v5096_v5 }
 0x5be   :  { %v11760_v37 = vpop.f32.mrf.mxu1  ;;  %13687 = vst [vmem:[#allocation65_spill] sm:$0xff] %v11773_v52 }
 0x5bf   :  { %v9174_v26 = vld [vmem:[#allocation2 + $0x198] sm:$0xff]  ;;  %v11762_v17 = vadd.f32 %v6472_v31, %v6160_v19  ;;  %v4894_v19 = vunpack.c.l.b16 %v4560_v35  ;;  %v5099_v35 = vshrl.u32 %v9346_v34, 16 }
 0x5c1   :  { %5970 = vmatmul.bf16.gmra.mxu1 %v9174_v26  ;;  %v5992_v27 = vpop.f32.mrf.mxu2  ;;  %v4964_v26 = vrot.slane %v4962_v62, 1  ;;  %v4930_v41 = vpack.c.b16 %v4894_v19, %v4894_v19  ;;  %v4563_v19 = vld [vmem:[#allocation2 + $0xa4] sm:$0x1] }
 0x5c2   :  { %v5993_v42 = vadd.f32 %v5992_v27, %v11126_v30  ;;  %v11777_v30 = vsel %vm939_vm1, %v5455_v25, %v5456_v11 }
 0x5c3   :  { %v6477_v9 = vpop.f32.mrf.mxu0  ;;  %13688 = vst [vmem:[#allocation72_spill] sm:$0xff] %v11777_v30 }
 0x5c4   :  { %v6161_v6 = vpop.f32.mrf.mxu3 }
 0x5c5   :  { %v6162_v31 = vadd.f32 %v6161_v6, %v5993_v42  ;;  %v4965_v6 = vsel %vm470_vm0, %v4960_v46, %v4964_v26 }
 0x5c6   :  { %v11769_v40 = vpop.f32.mrf.mxu1  ;;  %6034 = vmatmul.bf16.gmra.mxu2 %v11773_v52  ;;  %6516 = vmatmul.bf16.gmra.mxu0 %v11725_v21  ;;  %v5103_v21 = vrot.slane %v5101_v56, 1 }
 0x5c7   :  { %v11780_v18 = vadd.f32 %v6474_v43, %v6162_v31  ;;  %v5106_v43 = vshll.u32 %v4930_v41, 16 }
 0x5c8   :  { %v5104_v31 = vor.u32 %v5103_v21, %v5099_v35 }
 0x5c9   :  { %6203 = vmatmul.bf16.gmra.mxu3 %v11777_v30  ;;  %v5995_v3 = vpop.f32.mrf.mxu2  ;;  %v5108_v32 = vrot.slane %v5106_v43, 1  ;;  %v5458_v30 = vrot.slane %v9346_v34, 1 }
 0x5ca   :  { %v5996_v57 = vadd.f32 %v5995_v3, %v11141_v22  ;;  %v5459_v22 = vrot.slane %v4930_v41, 1 }
 0x5cb   :  { %v6479_v4 = vpop.f32.mrf.mxu0  ;;  %v11793_v46 = vsel %vm470_vm0, %v5104_v31, %v5108_v32 }
 0x5cc   :  { %v6164_v27 = vpop.f32.mrf.mxu3  ;;  %13689 = vst [vmem:[#allocation62_spill] sm:$0xff] %v11793_v46  ;;  %v11797_v26 = vsel %vm939_vm1, %v5458_v30, %v5459_v22 }
 0x5cd   :  { %v6165_v5 = vadd.f32 %v6164_v27, %v5996_v57  ;;  %13690 = vst [vmem:[#allocation74_spill] sm:$0xff] %v11797_v26 }
 0x5ce   :  { %v11784_v42 = vpop.f32.mrf.mxu1 }
 0x5cf   :  { %v11787_v11 = vadd.f32 %v6477_v9, %v6165_v5  ;;  %v4895_v9 = vunpack.c.l.b16 %v4563_v19  ;;  %v11803_v5 = vld [vmem:[#allocation2 + $0x9c] sm:$0xff] }
 0x5d1   :  { %6635 = vmatmul.bf16.vlgmr.msrb.gmra.mxu1 %v4965_v6  ;;  %v5997_v25 = vpop.f32.mrf.mxu2  ;;  %v4931_v56 = vpack.c.b16 %v4895_v9, %v4895_v9  ;;  %v5113_v6 = vshll.u32 %v11803_v5, 16  ;;  %v4566_v9 = vld [vmem:[#allocation2 + $0xb0] sm:$0x1] }
 0x5d2   :  { %v5998_v63 = vadd.f32 %v5997_v25, %v11149_v33 }
 0x5d3   :  { %v6482_v3 = vpop.f32.mrf.mxu0  ;;  %v5115_v30 = vrot.slane %v5113_v6, 1  ;;  %v5118_v32 = vshll.u32 %v4931_v56, 16  ;;  %v5461_v6 = vrot.slane %v11803_v5, 1 }
 0x5d4   :  { %v6166_v62 = vpop.f32.mrf.mxu3 }
 0x5d5   :  { %v6167_v57 = vadd.f32 %v6166_v62, %v5998_v63  ;;  %v5120_v22 = vrot.slane %v5118_v32, 1 }
 0x5d6   :  { %v11790_v27 = vpop.f32.mrf.mxu1  ;;  %6039 = vmatmul.bf16.gmra.mxu2 %v11793_v46  ;;  %6521 = vmatmul.bf16.gmra.mxu0 %v11756_v59 }
 0x5d7   :  { %v11800_v33 = vadd.f32 %v6479_v4, %v6167_v57  ;;  %v5111_v4 = vshrl.u32 %v11803_v5, 16 }
 0x5d9   :  { %6208 = vmatmul.bf16.gmra.mxu3 %v11797_v26  ;;  %v6000_v41 = vpop.f32.mrf.mxu2  ;;  %v5116_v62 = vor.u32 %v5115_v30, %v5111_v4  ;;  %v11827_v4 = vld [vmem:[#allocation2 + $0xa8] sm:$0xff] }
 0x5da   :  { %v6001_v21 = vadd.f32 %v6000_v41, %v11164_v15  ;;  %v5462_v15 = vrot.slane %v4931_v56, 1  ;;  %v9230_v56 = vld [vmem:[#allocation3 + $0x1b0] sm:$0xff] }
 0x5db   :  { %v6484_v35 = vpop.f32.mrf.mxu0  ;;  %7159 = vmatpush.bf16.msra.mxu3 %v9230_v56  ;;  %v9246_v56 = vld [vmem:[#allocation3 + $0x230] sm:$0xff] }
 0x5dc   :  { %v6169_v43 = vpop.f32.mrf.mxu3  ;;  %7497 = vmatpush.bf16.msra.mxu1 %v9246_v56 }
 0x5dd   :  { %v6170_v25 = vadd.f32 %v6169_v43, %v6001_v21 }
 0x5de   :  { %v11807_v31 = vpop.f32.mrf.mxu1 }
 0x5df   :  { %13691 = vst [vmem:[#allocation71_spill] sm:$0xff] %v11807_v31  ;;  %v11809_v59 = vadd.f32 %v6482_v3, %v6170_v25  ;;  %v11818_v3 = vsel %vm470_vm0, %v5116_v62, %v5120_v22  ;;  %v11822_v25 = vsel %vm939_vm1, %v5461_v6, %v5462_v15 }
 0x5e0   :  { %13693 = vst [vmem:[#allocation81_spill] sm:$0xff] %v11818_v3 }
 0x5e1   :  { %6640 = vmatmul.bf16.gmra.mxu1 %v11444_v10  ;;  %v6002_v63 = vpop.f32.mrf.mxu2  ;;  %v4896_v10 = vunpack.c.l.b16 %v4566_v9  ;;  %13694 = vst [vmem:[#allocation78_spill] sm:$0xff] %v11822_v25 }
 0x5e2   :  { %v6003_v19 = vadd.f32 %v6002_v63, %v11172_v48  ;;  %v5125_v63 = vshll.u32 %v11827_v4, 16 }
 0x5e3   :  { %v6487_v41 = vpop.f32.mrf.mxu0  ;;  %v4932_v32 = vpack.c.b16 %v4896_v10, %v4896_v10  ;;  %v5123_v10 = vshrl.u32 %v11827_v4, 16 }
 0x5e4   :  { %v6171_v57 = vpop.f32.mrf.mxu3  ;;  %v5127_v9 = vrot.slane %v5125_v63, 1 }
 0x5e5   :  { %v6172_v21 = vadd.f32 %v6171_v57, %v6003_v19  ;;  %v5465_v26 = vrot.slane %v4932_v32, 1 }
 0x5e6   :  { %v11814_v43 = vpop.f32.mrf.mxu1  ;;  %6044 = vmatmul.bf16.gmra.mxu2 %v11818_v3  ;;  %6526 = vmatmul.bf16.gmra.mxu0 %v9346_v34  ;;  %v9198_v34 = vld [vmem:[#allocation3 + $0xb0] sm:$0xff] }
 0x5e7   :  { %13692 = vst [vmem:[#allocation80_spill] sm:$0xff] %v11814_v43  ;;  %v11824_v48 = vadd.f32 %v6484_v35, %v6172_v21  ;;  %v9238_v35 = vld [vmem:[#allocation3 + $0x1f0] sm:$0xff]  ;;  %v5130_v21 = vshll.u32 %v4932_v32, 16  ;;  %6797 = vmatpush.bf16.msra.mxu2 %v9198_v34 }
 0x5e8   :  { %7328 = vmatpush.bf16.msra.mxu0 %v9238_v35  ;;  %v4897_v35 = vunpack.c.l.b16 %v4569_v47 }
 0x5e9   :  { %6213 = vmatmul.bf16.gmra.mxu3 %v11822_v25  ;;  %v6005_v30 = vpop.f32.mrf.mxu2 }
 0x5ea   :  { %v6006_v62 = vadd.f32 %v6005_v30, %v11187_v16  ;;  %v5128_v16 = vor.u32 %v5127_v9, %v5123_v10  ;;  %v5132_v30 = vrot.slane %v5130_v21, 1  ;;  %v4933_v32 = vpack.c.b16 %v4897_v35, %v4897_v35  ;;  %v9349_v21 = vld [vmem:[#allocation2 + $0xb4] sm:$0xff] }
 0x5eb   :  { %v6489_v19 = vpop.f32.mrf.mxu0  ;;  %v5137_v10 = vshll.u32 %v9349_v21, 16 }
 0x5ec   :  { %v6174_v22 = vpop.f32.mrf.mxu3 }
 0x5ed   :  { %v6175_v57 = vadd.f32 %v6174_v22, %v6006_v62 }
 0x5ee   :  { %v11831_v15 = vpop.f32.mrf.mxu1 }
 0x5ef   :  { %13695 = vst [vmem:[#allocation82_spill] sm:$0xff] %v11831_v15  ;;  %v11833_v6 = vadd.f32 %v6487_v41, %v6175_v57  ;;  %v5464_v41 = vrot.slane %v11827_v4, 1  ;;  %v11842_v57 = vsel %vm470_vm0, %v5128_v16, %v5132_v30  ;;  %v5468_v15 = vrot.slane %v4933_v32, 1 }
 0x5f0   :  { %13697 = vst [vmem:[#allocation84_spill] sm:$0xff] %v11842_v57 }
 0x5f1   :  { %6645 = vmatmul.bf16.gmra.mxu1 %v11476_v29  ;;  %v6007_v25 = vpop.f32.mrf.mxu2  ;;  %v11846_v9 = vsel %vm939_vm1, %v5464_v41, %v5465_v26  ;;  %v5142_v26 = vshll.u32 %v4933_v32, 16 }
 0x5f2   :  { %v6008_v62 = vadd.f32 %v6007_v25, %v11195_v45  ;;  %13698 = vst [vmem:[#allocation85_spill] sm:$0xff] %v11846_v9 }
 0x5f3   :  { %v6492_v63 = vpop.f32.mrf.mxu0 }
 0x5f4   :  { %v6176_v22 = vpop.f32.mrf.mxu3 }
 0x5f5   :  { %v6177_v7 = vadd.f32 %v6176_v22, %v6008_v62  ;;  %v5139_v22 = vrot.slane %v5137_v10, 1 }
 0x5f6   :  { %v11838_v34 = vpop.f32.mrf.mxu1  ;;  %6049 = vmatmul.bf16.gmra.mxu2 %v11842_v57  ;;  %6531 = vmatmul.bf16.gmra.mxu0 %v11803_v5 }
 0x5f7   :  { %13696 = vst [vmem:[#allocation83_spill] sm:$0xff] %v11838_v34  ;;  %v11849_v45 = vadd.f32 %v6489_v19, %v6177_v7  ;;  %v5135_v7 = vshrl.u32 %v9349_v21, 16 }
 0x5f9   :  { %6218 = vmatmul.bf16.gmra.mxu3 %v11846_v9  ;;  %v6010_v25 = vpop.f32.mrf.mxu2  ;;  %v5140_v19 = vor.u32 %v5139_v22, %v5135_v7  ;;  %v5144_v9 = vrot.slane %v5142_v26, 1  ;;  %v9350_v22 = vld [vmem:[#allocation2 + $0xc0] sm:$0xff] }
 0x5fa   :  { %v6011_v56 = vadd.f32 %v6010_v25, %v11210_v2  ;;  %v4572_v2 = vld [vmem:[#allocation2 + $0xc8] sm:$0x1]  ;;  %v5149_v26 = vshll.u32 %v9350_v22, 16 }
 0x5fb   :  { %v6494_v30 = vpop.f32.mrf.mxu0  ;;  %v11862_v10 = vsel %vm470_vm0, %v5140_v19, %v5144_v9 }
 0x5fc   :  { %v6179_v16 = vpop.f32.mrf.mxu3  ;;  %13701 = vst [vmem:[#allocation88_spill] sm:$0xff] %v11862_v10 }
 0x5fd   :  { %v6180_v47 = vadd.f32 %v6179_v16, %v6011_v56  ;;  %v5467_v16 = vrot.slane %v9349_v21, 1 }
 0x5fe   :  { %v11853_v62 = vpop.f32.mrf.mxu1 }
 0x5ff   :  { %13699 = vst [vmem:[#allocation86_spill] sm:$0xff] %v11853_v62  ;;  %v11855_v41 = vadd.f32 %v6492_v63, %v6180_v47  ;;  %v4898_v63 = vunpack.c.l.b16 %v4572_v2  ;;  %v11866_v47 = vsel %vm939_vm1, %v5467_v16, %v5468_v15  ;;  %v5151_v2 = vrot.slane %v5149_v26, 1 }
 0x600   :  { %13702 = vst [vmem:[#allocation89_spill] sm:$0xff] %v11866_v47 }
 0x601   :  { %6650 = vmatmul.bf16.gmra.mxu1 %v11509_v23  ;;  %v6012_v5 = vpop.f32.mrf.mxu2 }
 0x602   :  { %v6013_v35 = vadd.f32 %v6012_v5, %v11218_v50 }
 0x603   :  { %v6497_v25 = vpop.f32.mrf.mxu0 }
 0x604   :  { %v6181_v34 = vpop.f32.mrf.mxu3 }
 0x605   :  { %v6182_v43 = vadd.f32 %v6181_v34, %v6013_v35  ;;  %v4934_v34 = vpack.c.b16 %v4898_v63, %v4898_v63 }
 0x606   :  { %v11859_v56 = vpop.f32.mrf.mxu1  ;;  %6054 = vmatmul.bf16.gmra.mxu2 %v11862_v10  ;;  %6536 = vmatmul.bf16.gmra.mxu0 %v11827_v4 }
 0x607   :  { %13700 = vst [vmem:[#allocation87_spill] sm:$0xff] %v11859_v56  ;;  %v11869_v50 = vadd.f32 %v6494_v30, %v6182_v43  ;;  %v5154_v15 = vshll.u32 %v4934_v34, 16  ;;  %v5147_v43 = vshrl.u32 %v9350_v22, 16  ;;  %v5471_v62 = vrot.slane %v4934_v34, 1 }
 0x609   :  { %6223 = vmatmul.bf16.gmra.mxu3 %v11866_v47  ;;  %v6015_v32 = vpop.f32.mrf.mxu2  ;;  %v5152_v30 = vor.u32 %v5151_v2, %v5147_v43  ;;  %v5156_v47 = vrot.slane %v5154_v15, 1 }
 0x60a   :  { %v6016_v7 = vadd.f32 %v6015_v32, %v11233_v51  ;;  %v4581_v51 = vld [vmem:[#allocation2 + $0xec] sm:$0x1] }
 0x60b   :  { %v6499_v5 = vpop.f32.mrf.mxu0  ;;  %v11882_v26 = vsel %vm470_vm0, %v5152_v30, %v5156_v47 }
 0x60c   :  { %v6184_v9 = vpop.f32.mrf.mxu3  ;;  %13705 = vst [vmem:[#allocation93_spill] sm:$0xff] %v11882_v26 }
 0x60d   :  { %v6185_v19 = vadd.f32 %v6184_v9, %v6016_v7  ;;  %v5470_v9 = vrot.slane %v9350_v22, 1 }
 0x60e   :  { %v11873_v35 = vpop.f32.mrf.mxu1 }
 0x60f   :  { %13703 = vst [vmem:[#allocation90_spill] sm:$0xff] %v11873_v35  ;;  %v11875_v16 = vadd.f32 %v6497_v25, %v6185_v19  ;;  %v4901_v25 = vunpack.c.l.b16 %v4581_v51  ;;  %v11886_v19 = vsel %vm939_vm1, %v5470_v9, %v5471_v62 }
 0x610   :  { %13706 = vst [vmem:[#allocation96_spill] sm:$0xff] %v11886_v19 }
 0x611   :  { %6655 = vmatmul.bf16.gmra.mxu1 %v11542_v0  ;;  %v6017_v4 = vpop.f32.mrf.mxu2  ;;  %v4937_v34 = vpack.c.b16 %v4901_v25, %v4901_v25 }
 0x612   :  { %v6018_v63 = vadd.f32 %v6017_v4, %v11241_v60 }
 0x613   :  { %v6502_v32 = vpop.f32.mrf.mxu0 }
 0x614   :  { %v6186_v56 = vpop.f32.mrf.mxu3 }
 0x615   :  { %v6187_v31 = vadd.f32 %v6186_v56, %v6018_v63  ;;  %v11891_v56 = vld [vmem:[#allocation2 + $0xe4] sm:$0xff]  ;;  %v5190_v63 = vshll.u32 %v4937_v34, 16 }
 0x616   :  { %v11879_v7 = vpop.f32.mrf.mxu1  ;;  %6059 = vmatmul.bf16.gmra.mxu2 %v11882_v26  ;;  %6541 = vmatmul.bf16.gmra.mxu0 %v9349_v21  ;;  %v5185_v22 = vshll.u32 %v11891_v56, 16 }
 0x617   :  { %13704 = vst [vmem:[#allocation91_spill] sm:$0xff] %v11879_v7  ;;  %v11888_v2 = vadd.f32 %v6499_v5, %v6187_v31  ;;  %v5183_v31 = vshrl.u32 %v11891_v56, 16  ;;  %v5192_v9 = vrot.slane %v5190_v63, 1 }
 0x618   :  { %v5187_v62 = vrot.slane %v5185_v22, 1 }
 0x619   :  { %6228 = vmatmul.bf16.gmra.mxu3 %v11886_v19  ;;  %v6020_v60 = vpop.f32.mrf.mxu2 }
 0x61a   :  { %v6021_v47 = vadd.f32 %v6020_v60, %v11256_v24  ;;  %v5188_v51 = vor.u32 %v5187_v62, %v5183_v31  ;;  %v5480_v24 = vrot.slane %v4937_v34, 1  ;;  %v11902_v60 = vld [vmem:[#allocation2 + $0xd8] sm:$0xff]  ;;  %v11918_v31 = vld [vmem:[#allocation2 + $0xf0] sm:$0xff] }
 0x61b   :  { %v6504_v43 = vpop.f32.mrf.mxu0 }
 0x61c   :  { %v6189_v15 = vpop.f32.mrf.mxu3 }
 0x61d   :  { %v6190_v4 = vadd.f32 %v6189_v15, %v6021_v47  ;;  %v4584_v47 = vld [vmem:[#allocation2 + $0xf8] sm:$0x1] }
 0x61e   :  { %v11895_v30 = vpop.f32.mrf.mxu1 }
 0x61f   :  { %13707 = vst [vmem:[#allocation92_spill] sm:$0xff] %v11895_v30  ;;  %v11897_v21 = vadd.f32 %v6502_v32, %v6190_v4  ;;  %v5479_v32 = vrot.slane %v11891_v56, 1  ;;  %v11908_v4 = vsel %vm470_vm0, %v5188_v51, %v5192_v9  ;;  %v4902_v30 = vunpack.c.l.b16 %v4584_v47 }
 0x621   :  { %6660 = vmatmul.bf16.gmra.mxu1 %v11575_v1  ;;  %v6022_v5 = vpop.f32.mrf.mxu2  ;;  %v11912_v62 = vsel %vm939_vm1, %v5479_v32, %v5480_v24  ;;  %v4938_v63 = vpack.c.b16 %v4902_v30, %v4902_v30  ;;  %v9197_v32 = vld [vmem:[#allocation3 + $0xa8] sm:$0xff]  ;;  %v5195_v30 = vshrl.u32 %v11918_v31, 16 }
 0x622   :  { %v6023_v25 = vadd.f32 %v6022_v5, %v11264_v13  ;;  %13709 = vst [vmem:[#allocation99_spill] sm:$0xff] %v11912_v62  ;;  %v5197_v5 = vshll.u32 %v11918_v31, 16  ;;  %6798 = vmatpush.bf16.msra.mxu2 %v9197_v32 }
 0x623   :  { %v6507_v15 = vpop.f32.mrf.mxu0 }
 0x624   :  { %v6191_v19 = vpop.f32.mrf.mxu3 }
 0x625   :  { %v6192_v26 = vadd.f32 %v6191_v19, %v6023_v25  ;;  %v9229_v19 = vld [vmem:[#allocation3 + $0x1a8] sm:$0xff] }
 0x626   :  { %v11904_v22 = vpop.f32.mrf.mxu1  ;;  %6064 = vmatmul.bf16.gmra.mxu2 %v11908_v4  ;;  %6546 = vmatmul.bf16.gmra.mxu0 %v11902_v60 }
 0x627   :  { %13708 = vst [vmem:[#allocation94_spill] sm:$0xff] %v11904_v22  ;;  %v11915_v13 = vadd.f32 %v6504_v43, %v6192_v26  ;;  %7160 = vmatpush.bf16.msra.mxu3 %v9229_v19  ;;  %v5199_v26 = vrot.slane %v5197_v5, 1  ;;  %v5202_v43 = vshll.u32 %v4938_v63, 16  ;;  %v9237_v22 = vld [vmem:[#allocation3 + $0x1e8] sm:$0xff]  ;;  %v4587_v5 = vld [vmem:[#allocation2 + $0x104] sm:$0x1] }
 0x628   :  { %7329 = vmatpush.bf16.msra.mxu0 %v9237_v22  ;;  %v9245_v19 = vld [vmem:[#allocation3 + $0x228] sm:$0xff]  ;;  %v4903_v22 = vunpack.c.l.b16 %v4587_v5 }
 0x629   :  { %6233 = vmatmul.bf16.gmra.mxu3 %v11912_v62  ;;  %v6025_v34 = vpop.f32.mrf.mxu2  ;;  %7498 = vmatpush.bf16.msra.mxu1 %v9245_v19 }
 0x62a   :  { %v6026_v51 = vadd.f32 %v6025_v34, %v11279_v53  ;;  %v5200_v53 = vor.u32 %v5199_v26, %v5195_v30  ;;  %v5204_v34 = vrot.slane %v5202_v43, 1  ;;  %v9353_v43 = vld [vmem:[#allocation2 + $0xfc] sm:$0xff] }
 0x62b   :  { %v6509_v25 = vpop.f32.mrf.mxu0  ;;  %v5209_v30 = vshll.u32 %v9353_v43, 16 }
 0x62c   :  { %v6194_v9 = vpop.f32.mrf.mxu3 }
 0x62d   :  { %v6195_v24 = vadd.f32 %v6194_v9, %v6026_v51  ;;  %v5211_v5 = vrot.slane %v5209_v30, 1 }
 0x62e   :  { %v11922_v47 = vpop.f32.mrf.mxu1 }
 0x62f   :  { %13710 = vst [vmem:[#allocation95_spill] sm:$0xff] %v11922_v47  ;;  %v11924_v62 = vadd.f32 %v6507_v15, %v6195_v24  ;;  %v5483_v47 = vrot.slane %v4938_v63, 1  ;;  %v5482_v15 = vrot.slane %v11918_v31, 1  ;;  %v11933_v24 = vsel %vm470_vm0, %v5200_v53, %v5204_v34 }
 0x630   :  { %13712 = vst [vmem:[#allocation98_spill] sm:$0xff] %v11933_v24  ;;  %v4939_v63 = vpack.c.b16 %v4903_v22, %v4903_v22 }
 0x631   :  { %6665 = vmatmul.bf16.gmra.mxu1 %v11608_v49  ;;  %v6027_v7 = vpop.f32.mrf.mxu2  ;;  %v11937_v26 = vsel %vm939_vm1, %v5482_v15, %v5483_v47 }
 0x632   :  { %v6028_v51 = vadd.f32 %v6027_v7, %v11287_v28  ;;  %13713 = vst [vmem:[#allocation107_spill] sm:$0xff] %v11937_v26  ;;  %v5214_v47 = vshll.u32 %v4939_v63, 16  ;;  %v5486_v49 = vrot.slane %v4939_v63, 1 }
 0x633   :  { %v6512_v35 = vpop.f32.mrf.mxu0 }
 0x634   :  { %v6196_v9 = vpop.f32.mrf.mxu3 }
 0x635   :  { %v6197_v1 = vadd.f32 %v6196_v9, %v6028_v51 }
 0x636   :  { %v11929_v32 = vpop.f32.mrf.mxu1  ;;  %6069 = vmatmul.bf16.gmra.mxu2 %v11933_v24  ;;  %6551 = vmatmul.bf16.gmra.mxu0 %v11891_v56 }
 0x637   :  { %13711 = vst [vmem:[#allocation97_spill] sm:$0xff] %v11929_v32  ;;  %v11940_v28 = vadd.f32 %v6509_v25, %v6197_v1  ;;  %v5207_v1 = vshrl.u32 %v9353_v43, 16 }
 0x639   :  { %6238 = vmatmul.bf16.gmra.mxu3 %v11937_v26  ;;  %v6030_v7 = vpop.f32.mrf.mxu2  ;;  %v5212_v25 = vor.u32 %v5211_v5, %v5207_v1  ;;  %v5216_v26 = vrot.slane %v5214_v47, 1  ;;  %v11963_v5 = vld [vmem:[#allocation2 + $0x108] sm:$0xff] }
 0x63a   :  { %v6031_v19 = vadd.f32 %v6030_v7, %v11302_v44  ;;  %v4590_v44 = vld [vmem:[#allocation2 + $0x110] sm:$0x1]  ;;  %v5221_v47 = vshll.u32 %v11963_v5, 16 }
 0x63b   :  { %v6514_v34 = vpop.f32.mrf.mxu0  ;;  %v11953_v30 = vsel %vm470_vm0, %v5212_v25, %v5216_v26 }
 0x63c   :  { %v6199_v53 = vpop.f32.mrf.mxu3  ;;  %13716 = vst [vmem:[#allocation110_spill] sm:$0xff] %v11953_v30 }
 0x63d   :  { %v6200_v51 = vadd.f32 %v6199_v53, %v6031_v19  ;;  %v5485_v53 = vrot.slane %v9353_v43, 1 }
 0x63e   :  { %v11944_v9 = vpop.f32.mrf.mxu1 }
 0x63f   :  { %13714 = vst [vmem:[#allocation108_spill] sm:$0xff] %v11944_v9  ;;  %v11946_v15 = vadd.f32 %v6512_v35, %v6200_v51  ;;  %v4904_v35 = vunpack.c.l.b16 %v4590_v44  ;;  %v11957_v51 = vsel %vm939_vm1, %v5485_v53, %v5486_v49  ;;  %v13719_v44 = vld [vmem:[#allocation48_spill] sm:$0xff]  ;;  %v5219_v53 = vshrl.u32 %v11963_v5, 16 }
 0x640   :  { %13717 = vst [vmem:[#allocation111_spill] sm:$0xff] %v11957_v51  ;;  %v13720_v9 = vld [vmem:[#allocation100_spill] sm:$0xff] }
 0x641   :  { %6670 = vmatmul.bf16.gmra.mxu1 %v11650_v14  ;;  %v6032_v56 = vpop.f32.mrf.mxu2 }
 0x642   :  { %v6033_v22 = vadd.f32 %v6032_v56, %v11310_v55 }
 0x643   :  { %v6517_v7 = vpop.f32.mrf.mxu0 }
 0x644   :  { %v6201_v32 = vpop.f32.mrf.mxu3 }
 0x645   :  { %v6202_v0 = vadd.f32 %v6201_v32, %v6033_v22  ;;  %v4940_v32 = vpack.c.b16 %v4904_v35, %v4904_v35 }
 0x646   :  { %v11950_v19 = vpop.f32.mrf.mxu1  ;;  %6074 = vmatmul.bf16.gmra.mxu2 %v11953_v30  ;;  %6556 = vmatmul.bf16.gmra.mxu0 %v11918_v31  ;;  %v5223_v31 = vrot.slane %v5221_v47, 1  ;;  %v5488_v47 = vrot.slane %v11963_v5, 1 }
 0x647   :  { %13715 = vst [vmem:[#allocation109_spill] sm:$0xff] %v11950_v19  ;;  %v11960_v55 = vadd.f32 %v6514_v34, %v6202_v0  ;;  %v5226_v0 = vshll.u32 %v4940_v32, 16  ;;  %v5489_v14 = vrot.slane %v4940_v32, 1 }
 0x649   :  { %6243 = vmatmul.bf16.gmra.mxu3 %v11957_v51  ;;  %v6035_v63 = vpop.f32.mrf.mxu2  ;;  %v5224_v51 = vor.u32 %v5223_v31, %v5219_v53  ;;  %v5228_v19 = vrot.slane %v5226_v0, 1  ;;  %v11984_v31 = vsel %vm939_vm1, %v5488_v47, %v5489_v14  ;;  %v11989_v53 = vld [vmem:[#allocation2 + $0x114] sm:$0xff] }
 0x64a   :  { %v6036_v26 = vadd.f32 %v6035_v63, %v11325_v36  ;;  %13722 = vst [vmem:[#allocation113_spill] sm:$0xff] %v11984_v31 }
 0x64b   :  { %v6519_v56 = vpop.f32.mrf.mxu0 }
 0x64c   :  { %v6204_v1 = vpop.f32.mrf.mxu3 }
 0x64d   :  { %v6205_v25 = vadd.f32 %v6204_v1, %v6036_v26  ;;  %v4593_v26 = vld [vmem:[#allocation2 + $0x11c] sm:$0x1] }
 0x64e   :  { %v6636_v22 = vpop.f32.mrf.mxu1 }
 0x64f   :  { %v11968_v49 = vadd.f32 %v6636_v22, %v11734_v54  ;;  %v11970_v34 = vadd.f32 %v6517_v7, %v6205_v25  ;;  %v11980_v25 = vsel %vm470_vm0, %v5224_v51, %v5228_v19  ;;  %v4905_v22 = vunpack.c.l.b16 %v4593_v26 }
 0x651   :  { %13718 = vst [vmem:[#allocation112_spill] sm:$0xff] %v11968_v49  ;;  %6675 = vmatmul.bf16.gmra.mxu1 %v13719_v44  ;;  %v6037_v35 = vpop.f32.mrf.mxu2  ;;  %v4941_v0 = vpack.c.b16 %v4905_v22, %v4905_v22 }
 0x652   :  { %v6038_v36 = vadd.f32 %v6037_v35, %v13720_v9  ;;  %v13723_v35 = vld [vmem:[#allocation101_spill] sm:$0xff] }
 0x653   :  { %v6522_v1 = vpop.f32.mrf.mxu0  ;;  %v5492_v49 = vrot.slane %v4941_v0, 1 }
 0x654   :  { %v6206_v63 = vpop.f32.mrf.mxu3 }
 0x655   :  { %v6207_v23 = vadd.f32 %v6206_v63, %v6038_v36 }
 0x656   :  { %v6638_v54 = vpop.f32.mrf.mxu1  ;;  %6079 = vmatmul.bf16.gmra.mxu2 %v11980_v25  ;;  %6561 = vmatmul.bf16.gmra.mxu0 %v9353_v43 }
 0x657   :  { %v11977_v7 = vadd.f32 %v6638_v54, %v11753_v58  ;;  %v11986_v9 = vadd.f32 %v6519_v56, %v6207_v23  ;;  %v5233_v58 = vshll.u32 %v11989_v53, 16  ;;  %v5238_v23 = vshll.u32 %v4941_v0, 16  ;;  %v9228_v0 = vld [vmem:[#allocation3 + $0x1a0] sm:$0xff] }
 0x658   :  { %v5231_v54 = vshrl.u32 %v11989_v53, 16  ;;  %7161 = vmatpush.bf16.msra.mxu3 %v9228_v0 }
 0x659   :  { %13721 = vst [vmem:[#allocation100_spill] sm:$0xff] %v11977_v7  ;;  %6248 = vmatmul.bf16.gmra.mxu3 %v11984_v31  ;;  %v6040_v32 = vpop.f32.mrf.mxu2  ;;  %v5235_v43 = vrot.slane %v5233_v58, 1  ;;  %v5240_v31 = vrot.slane %v5238_v23, 1  ;;  %v13725_v7 = vld [vmem:[#allocation104_spill] sm:$0xff]  ;;  %v5491_v58 = vrot.slane %v11989_v53, 1 }
 0x65a   :  { %v6041_v19 = vadd.f32 %v6040_v32, %v13723_v35 }
 0x65b   :  { %v6524_v36 = vpop.f32.mrf.mxu0  ;;  %v5236_v22 = vor.u32 %v5235_v43, %v5231_v54  ;;  %v12010_v43 = vsel %vm939_vm1, %v5491_v58, %v5492_v49  ;;  %v9236_v58 = vld [vmem:[#allocation3 + $0x1e0] sm:$0xff] }
 0x65c   :  { %v6209_v51 = vpop.f32.mrf.mxu3  ;;  %13727 = vst [vmem:[#allocation114_spill] sm:$0xff] %v12010_v43  ;;  %7330 = vmatpush.bf16.msra.mxu0 %v9236_v58 }
 0x65d   :  { %v6210_v63 = vadd.f32 %v6209_v51, %v6041_v19  ;;  %v4596_v19 = vld [vmem:[#allocation2 + $0x128] sm:$0x1] }
 0x65e   :  { %v6641_v26 = vpop.f32.mrf.mxu1 }
 0x65f   :  { %v11994_v14 = vadd.f32 %v6641_v26, %v11762_v17  ;;  %v11996_v56 = vadd.f32 %v6522_v1, %v6210_v63  ;;  %v12006_v63 = vsel %vm470_vm0, %v5236_v22, %v5240_v31  ;;  %v4906_v26 = vunpack.c.l.b16 %v4596_v19 }
 0x661   :  { %13724 = vst [vmem:[#allocation101_spill] sm:$0xff] %v11994_v14  ;;  %6680 = vmatmul.bf16.gmra.mxu1 %v11712_v8  ;;  %v6042_v47 = vpop.f32.mrf.mxu2  ;;  %v4942_v54 = vpack.c.b16 %v4906_v26, %v4906_v26 }
 0x662   :  { %v6043_v32 = vadd.f32 %v6042_v47, %v13725_v7  ;;  %v13728_v47 = vld [vmem:[#allocation102_spill] sm:$0xff] }
 0x663   :  { %v6527_v51 = vpop.f32.mrf.mxu0 }
 0x664   :  { %v6211_v35 = vpop.f32.mrf.mxu3 }
 0x665   :  { %v6212_v44 = vadd.f32 %v6211_v35, %v6043_v32 }
 0x666   :  { %v6643_v17 = vpop.f32.mrf.mxu1  ;;  %6084 = vmatmul.bf16.gmra.mxu2 %v12006_v63  ;;  %6566 = vmatmul.bf16.gmra.mxu0 %v11963_v5 }
 0x667   :  { %v12003_v1 = vadd.f32 %v6643_v17, %v11780_v18  ;;  %v12013_v7 = vadd.f32 %v6524_v36, %v6212_v44  ;;  %v12016_v18 = vld [vmem:[#allocation2 + $0x120] sm:$0xff]  ;;  %v9196_v17 = vld [vmem:[#allocation3 + $0xa0] sm:$0xff]  ;;  %v5250_v36 = vshll.u32 %v4942_v54, 16 }
 0x668   :  { %v5245_v31 = vshll.u32 %v12016_v18, 16  ;;  %6799 = vmatpush.bf16.msra.mxu2 %v9196_v17  ;;  %v5243_v0 = vshrl.u32 %v12016_v18, 16 }
 0x669   :  { %13726 = vst [vmem:[#allocation104_spill] sm:$0xff] %v12003_v1  ;;  %6253 = vmatmul.bf16.gmra.mxu3 %v12010_v43  ;;  %v6045_v23 = vpop.f32.mrf.mxu2 }
 0x66a   :  { %v6046_v22 = vadd.f32 %v6045_v23, %v13728_v47  ;;  %v5247_v44 = vrot.slane %v5245_v31, 1  ;;  %v9244_v23 = vld [vmem:[#allocation3 + $0x220] sm:$0xff] }
 0x66b   :  { %v6529_v35 = vpop.f32.mrf.mxu0  ;;  %7499 = vmatpush.bf16.msra.mxu1 %v9244_v23  ;;  %v4599_v31 = vld [vmem:[#allocation2 + $0x134] sm:$0x1] }
 0x66c   :  { %v6214_v32 = vpop.f32.mrf.mxu3  ;;  %v5248_v43 = vor.u32 %v5247_v44, %v5243_v0  ;;  %v12043_v0 = vld [vmem:[#allocation2 + $0x12c] sm:$0xff] }
 0x66d   :  { %v6215_v49 = vadd.f32 %v6214_v32, %v6046_v22  ;;  %v5252_v22 = vrot.slane %v5250_v36, 1  ;;  %v13730_v32 = vld [vmem:[#allocation103_spill] sm:$0xff] }
 0x66e   :  { %v6646_v19 = vpop.f32.mrf.mxu1 }
 0x66f   :  { %v12021_v5 = vadd.f32 %v6646_v19, %v11787_v11  ;;  %v12023_v26 = vadd.f32 %v6527_v51, %v6215_v49  ;;  %v5495_v19 = vrot.slane %v4942_v54, 1  ;;  %v5494_v51 = vrot.slane %v12016_v18, 1 }
 0x670   :  { %v12033_v58 = vsel %vm470_vm0, %v5248_v43, %v5252_v22  ;;  %v13733_v43 = vld [vmem:[#allocation64_spill] sm:$0xff] }
 0x671   :  { %13729 = vst [vmem:[#allocation102_spill] sm:$0xff] %v12021_v5  ;;  %6685 = vmatmul.bf16.gmra.mxu1 %v11746_v61  ;;  %v6047_v47 = vpop.f32.mrf.mxu2  ;;  %v4907_v61 = vunpack.c.l.b16 %v4599_v31  ;;  %v12037_v44 = vsel %vm939_vm1, %v5494_v51, %v5495_v19 }
 0x672   :  { %v6048_v1 = vadd.f32 %v6047_v47, %v13730_v32  ;;  %13732 = vst [vmem:[#allocation115_spill] sm:$0xff] %v12037_v44 }
 0x673   :  { %v6532_v5 = vpop.f32.mrf.mxu0  ;;  %v4943_v36 = vpack.c.b16 %v4907_v61, %v4907_v61  ;;  %v5255_v61 = vshrl.u32 %v12043_v0, 16 }
 0x674   :  { %v6216_v11 = vpop.f32.mrf.mxu3 }
 0x675   :  { %v6217_v14 = vadd.f32 %v6216_v11, %v6048_v1 }
 0x676   :  { %v6648_v17 = vpop.f32.mrf.mxu1  ;;  %6089 = vmatmul.bf16.gmra.mxu2 %v12033_v58  ;;  %6571 = vmatmul.bf16.gmra.mxu0 %v11989_v53 }
 0x677   :  { %v12030_v49 = vadd.f32 %v6648_v17, %v11800_v33  ;;  %v12040_v54 = vadd.f32 %v6529_v35, %v6217_v14  ;;  %v5257_v33 = vshll.u32 %v12043_v0, 16  ;;  %v5262_v14 = vshll.u32 %v4943_v36, 16 }
 0x679   :  { %13731 = vst [vmem:[#allocation103_spill] sm:$0xff] %v12030_v49  ;;  %6258 = vmatmul.bf16.gmra.mxu3 %v12037_v44  ;;  %v6050_v1 = vpop.f32.mrf.mxu2  ;;  %v5259_v53 = vrot.slane %v5257_v33, 1  ;;  %v5264_v51 = vrot.slane %v5262_v14, 1  ;;  %v13735_v44 = vld [vmem:[#allocation105_spill] sm:$0xff]  ;;  %v5498_v49 = vrot.slane %v4943_v36, 1  ;;  %v5497_v33 = vrot.slane %v12043_v0, 1 }
 0x67a   :  { %v6051_v23 = vadd.f32 %v6050_v1, %v13733_v43 }
 0x67b   :  { %v6534_v22 = vpop.f32.mrf.mxu0  ;;  %v5260_v17 = vor.u32 %v5259_v53, %v5255_v61  ;;  %v12064_v53 = vsel %vm939_vm1, %v5497_v33, %v5498_v49  ;;  %v12070_v61 = vld [vmem:[#allocation2 + $0x138] sm:$0xff] }
 0x67c   :  { %v6219_v47 = vpop.f32.mrf.mxu3  ;;  %13737 = vst [vmem:[#allocation116_spill] sm:$0xff] %v12064_v53 }
 0x67d   :  { %v6220_v32 = vadd.f32 %v6219_v47, %v6051_v23  ;;  %v4602_v23 = vld [vmem:[#allocation2 + $0x140] sm:$0x1] }
 0x67e   :  { %v6651_v11 = vpop.f32.mrf.mxu1 }
 0x67f   :  { %v12048_v19 = vadd.f32 %v6651_v11, %v11809_v59  ;;  %v12050_v35 = vadd.f32 %v6532_v5, %v6220_v32  ;;  %v12060_v32 = vsel %vm470_vm0, %v5260_v17, %v5264_v51  ;;  %v4908_v11 = vunpack.c.l.b16 %v4602_v23 }
 0x681   :  { %13734 = vst [vmem:[#allocation64_spill] sm:$0xff] %v12048_v19  ;;  %6690 = vmatmul.bf16.gmra.mxu1 %v11773_v52  ;;  %v6052_v31 = vpop.f32.mrf.mxu2  ;;  %v4944_v14 = vpack.c.b16 %v4908_v11, %v4908_v11 }
 0x682   :  { %v6053_v1 = vadd.f32 %v6052_v31, %v13735_v44  ;;  %v13738_v31 = vld [vmem:[#allocation66_spill] sm:$0xff] }
 0x683   :  { %v6537_v47 = vpop.f32.mrf.mxu0  ;;  %v5501_v19 = vrot.slane %v4944_v14, 1 }
 0x684   :  { %v6221_v43 = vpop.f32.mrf.mxu3 }
 0x685   :  { %v6222_v8 = vadd.f32 %v6221_v43, %v6053_v1 }
 0x686   :  { %v6653_v59 = vpop.f32.mrf.mxu1  ;;  %6094 = vmatmul.bf16.gmra.mxu2 %v12060_v32  ;;  %6576 = vmatmul.bf16.gmra.mxu0 %v12016_v18 }
 0x687   :  { %v12057_v5 = vadd.f32 %v6653_v59, %v11824_v48  ;;  %v12067_v44 = vadd.f32 %v6534_v22, %v6222_v8  ;;  %v5269_v48 = vshll.u32 %v12070_v61, 16  ;;  %v5274_v8 = vshll.u32 %v4944_v14, 16 }
 0x688   :  { %v5267_v59 = vshrl.u32 %v12070_v61, 16 }
 0x689   :  { %13736 = vst [vmem:[#allocation105_spill] sm:$0xff] %v12057_v5  ;;  %6263 = vmatmul.bf16.gmra.mxu3 %v12064_v53  ;;  %v6055_v36 = vpop.f32.mrf.mxu2  ;;  %v5271_v18 = vrot.slane %v5269_v48, 1  ;;  %v5276_v53 = vrot.slane %v5274_v8, 1  ;;  %v13740_v5 = vld [vmem:[#allocation106_spill] sm:$0xff]  ;;  %v5500_v48 = vrot.slane %v12070_v61, 1 }
 0x68a   :  { %v6056_v17 = vadd.f32 %v6055_v36, %v13738_v31 }
 0x68b   :  { %v6539_v1 = vpop.f32.mrf.mxu0  ;;  %v5272_v11 = vor.u32 %v5271_v18, %v5267_v59  ;;  %v12091_v18 = vsel %vm939_vm1, %v5500_v48, %v5501_v19  ;;  %v12097_v59 = vld [vmem:[#allocation2 + $0x144] sm:$0xff] }
 0x68c   :  { %v6224_v51 = vpop.f32.mrf.mxu3  ;;  %13742 = vst [vmem:[#allocation117_spill] sm:$0xff] %v12091_v18 }
 0x68d   :  { %v6225_v43 = vadd.f32 %v6224_v51, %v6056_v17  ;;  %v4605_v17 = vld [vmem:[#allocation2 + $0x14c] sm:$0x1] }
 0x68e   :  { %v6656_v23 = vpop.f32.mrf.mxu1 }
 0x68f   :  { %v12075_v49 = vadd.f32 %v6656_v23, %v11833_v6  ;;  %v12077_v22 = vadd.f32 %v6537_v47, %v6225_v43  ;;  %v12087_v43 = vsel %vm470_vm0, %v5272_v11, %v5276_v53  ;;  %v4909_v23 = vunpack.c.l.b16 %v4605_v17  ;;  %v13743_v53 = vld [vmem:[#allocation70_spill] sm:$0xff] }
 0x691   :  { %13739 = vst [vmem:[#allocation66_spill] sm:$0xff] %v12075_v49  ;;  %6695 = vmatmul.bf16.gmra.mxu1 %v11793_v46  ;;  %v6057_v33 = vpop.f32.mrf.mxu2  ;;  %v4945_v8 = vpack.c.b16 %v4909_v23, %v4909_v23 }
 0x692   :  { %v6058_v36 = vadd.f32 %v6057_v33, %v13740_v5 }
 0x693   :  { %v6542_v51 = vpop.f32.mrf.mxu0  ;;  %v5504_v49 = vrot.slane %v4945_v8, 1 }
 0x694   :  { %v6226_v31 = vpop.f32.mrf.mxu3 }
 0x695   :  { %v6227_v52 = vadd.f32 %v6226_v31, %v6058_v36 }
 0x696   :  { %v6658_v6 = vpop.f32.mrf.mxu1  ;;  %6099 = vmatmul.bf16.gmra.mxu2 %v12087_v43  ;;  %6581 = vmatmul.bf16.gmra.mxu0 %v12043_v0 }
 0x697   :  { %v12084_v47 = vadd.f32 %v6658_v6, %v11849_v45  ;;  %v12094_v5 = vadd.f32 %v6539_v1, %v6227_v52  ;;  %v5281_v45 = vshll.u32 %v12097_v59, 16  ;;  %v5286_v52 = vshll.u32 %v4945_v8, 16  ;;  %v9227_v8 = vld [vmem:[#allocation3 + $0x198] sm:$0xff] }
 0x698   :  { %v5279_v6 = vshrl.u32 %v12097_v59, 16  ;;  %7162 = vmatpush.bf16.msra.mxu3 %v9227_v8 }
 0x699   :  { %13741 = vst [vmem:[#allocation106_spill] sm:$0xff] %v12084_v47  ;;  %6268 = vmatmul.bf16.gmra.mxu3 %v12091_v18  ;;  %v6060_v14 = vpop.f32.mrf.mxu2  ;;  %v5283_v0 = vrot.slane %v5281_v45, 1  ;;  %v5288_v18 = vrot.slane %v5286_v52, 1  ;;  %v13745_v47 = vld [vmem:[#allocation73_spill] sm:$0xff]  ;;  %v5503_v45 = vrot.slane %v12097_v59, 1 }
 0x69a   :  { %v6061_v33 = vadd.f32 %v6060_v14, %v13743_v53 }
 0x69b   :  { %v6544_v36 = vpop.f32.mrf.mxu0  ;;  %v5284_v23 = vor.u32 %v5283_v0, %v5279_v6  ;;  %v12118_v0 = vsel %vm939_vm1, %v5503_v45, %v5504_v49  ;;  %v9235_v45 = vld [vmem:[#allocation3 + $0x1d8] sm:$0xff] }
 0x69c   :  { %v6229_v11 = vpop.f32.mrf.mxu3  ;;  %13748 = vst [vmem:[#allocation119_spill] sm:$0xff] %v12118_v0  ;;  %7331 = vmatpush.bf16.msra.mxu0 %v9235_v45 }
 0x69d   :  { %v6230_v31 = vadd.f32 %v6229_v11, %v6061_v33  ;;  %v4608_v33 = vld [vmem:[#allocation2 + $0x158] sm:$0x1] }
 0x69e   :  { %v6661_v17 = vpop.f32.mrf.mxu1 }
 0x69f   :  { %v12102_v19 = vadd.f32 %v6661_v17, %v11855_v41  ;;  %v12104_v1 = vadd.f32 %v6542_v51, %v6230_v31  ;;  %v12114_v31 = vsel %vm470_vm0, %v5284_v23, %v5288_v18  ;;  %v4910_v17 = vunpack.c.l.b16 %v4608_v33 }
 0x6a0   :  { %13747 = vst [vmem:[#allocation118_spill] sm:$0xff] %v12114_v31 }
 0x6a1   :  { %13744 = vst [vmem:[#allocation70_spill] sm:$0xff] %v12102_v19  ;;  %6700 = vmatmul.bf16.gmra.mxu1 %v11818_v3  ;;  %v6062_v48 = vpop.f32.mrf.mxu2  ;;  %v4946_v6 = vpack.c.b16 %v4910_v17, %v4910_v17 }
 0x6a2   :  { %v6063_v14 = vadd.f32 %v6062_v48, %v13745_v47  ;;  %v13749_v48 = vld [vmem:[#allocation15_spill] sm:$0xff] }
 0x6a3   :  { %v6547_v11 = vpop.f32.mrf.mxu0 }
 0x6a4   :  { %v6231_v53 = vpop.f32.mrf.mxu3 }
 0x6a5   :  { %v6232_v46 = vadd.f32 %v6231_v53, %v6063_v14 }
 0x6a6   :  { %v6663_v41 = vpop.f32.mrf.mxu1  ;;  %6104 = vmatmul.bf16.gmra.mxu2 %v12114_v31  ;;  %6586 = vmatmul.bf16.gmra.mxu0 %v12070_v61 }
 0x6a7   :  { %v12111_v51 = vadd.f32 %v6663_v41, %v11869_v50  ;;  %v12121_v47 = vadd.f32 %v6544_v36, %v6232_v46  ;;  %v12124_v50 = vld [vmem:[#allocation2 + $0x150] sm:$0xff]  ;;  %v9195_v41 = vld [vmem:[#allocation3 + $0x98] sm:$0xff]  ;;  %v5298_v36 = vshll.u32 %v4946_v6, 16 }
 0x6a8   :  { %v5293_v18 = vshll.u32 %v12124_v50, 16  ;;  %6800 = vmatpush.bf16.msra.mxu2 %v9195_v41  ;;  %v5291_v8 = vshrl.u32 %v12124_v50, 16 }
 0x6a9   :  { %13746 = vst [vmem:[#allocation73_spill] sm:$0xff] %v12111_v51  ;;  %6273 = vmatmul.bf16.gmra.mxu3 %v12118_v0  ;;  %v6065_v52 = vpop.f32.mrf.mxu2 }
 0x6aa   :  { %v6066_v23 = vadd.f32 %v6065_v52, %v13749_v48  ;;  %v5295_v61 = vrot.slane %v5293_v18, 1  ;;  %v9243_v52 = vld [vmem:[#allocation3 + $0x218] sm:$0xff]  ;;  %v4611_v18 = vld [vmem:[#allocation2 + $0x164] sm:$0x1] }
 0x6ab   :  { %v6549_v53 = vpop.f32.mrf.mxu0  ;;  %7500 = vmatpush.bf16.msra.mxu1 %v9243_v52  ;;  %v13755_v52 = vld [vmem:[#allocation18_spill] sm:$0xff] }
 0x6ac   :  { %v6234_v14 = vpop.f32.mrf.mxu3  ;;  %v5296_v0 = vor.u32 %v5295_v61, %v5291_v8  ;;  %v12151_v8 = vld [vmem:[#allocation2 + $0x15c] sm:$0xff] }
 0x6ad   :  { %v6235_v49 = vadd.f32 %v6234_v14, %v6066_v23  ;;  %v5300_v23 = vrot.slane %v5298_v36, 1  ;;  %v13751_v14 = vld [vmem:[#allocation79_spill] sm:$0xff] }
 0x6ae   :  { %v6666_v33 = vpop.f32.mrf.mxu1 }
 0x6af   :  { %v12129_v46 = vadd.f32 %v6666_v33, %v11875_v16  ;;  %v12131_v17 = vadd.f32 %v6547_v11, %v6235_v49  ;;  %v5507_v33 = vrot.slane %v4946_v6, 1  ;;  %v5506_v11 = vrot.slane %v12124_v50, 1 }
 0x6b0   :  { %v12141_v45 = vsel %vm470_vm0, %v5296_v0, %v5300_v23  ;;  %v4578_v0 = vld [vmem:[#allocation2 + $0xe0] sm:$0x1] }
 0x6b1   :  { %13750 = vst [vmem:[#allocation15_spill] sm:$0xff] %v12129_v46  ;;  %6705 = vmatmul.bf16.gmra.mxu1 %v11842_v57  ;;  %v6067_v48 = vpop.f32.mrf.mxu2  ;;  %v4911_v57 = vunpack.c.l.b16 %v4611_v18  ;;  %v12145_v61 = vsel %vm939_vm1, %v5506_v11, %v5507_v33  ;;  %v4900_v18 = vunpack.c.l.b16 %v4578_v0 }
 0x6b2   :  { %v6068_v51 = vadd.f32 %v6067_v48, %v13751_v14  ;;  %13753 = vst [vmem:[#allocation120_spill] sm:$0xff] %v12141_v45 }
 0x6b3   :  { %v6552_v46 = vpop.f32.mrf.mxu0  ;;  %13754 = vst [vmem:[#allocation121_spill] sm:$0xff] %v12145_v61  ;;  %v4947_v36 = vpack.c.b16 %v4911_v57, %v4911_v57  ;;  %v5303_v57 = vshrl.u32 %v12151_v8, 16  ;;  %v12162_v11 = vpack.c.b16 %v4900_v18, %v4900_v18 }
 0x6b4   :  { %v6236_v16 = vpop.f32.mrf.mxu3 }
 0x6b5   :  { %v6237_v19 = vadd.f32 %v6236_v16, %v6068_v51  ;;  %13757 = vst [vmem:[#allocation122_spill] sm:$0xff] %v12162_v11  ;;  %v5178_v18 = vshll.u32 %v12162_v11, 16 }
 0x6b6   :  { %v6668_v41 = vpop.f32.mrf.mxu1  ;;  %6109 = vmatmul.bf16.gmra.mxu2 %v12141_v45  ;;  %6591 = vmatmul.bf16.gmra.mxu0 %v12097_v59 }
 0x6b7   :  { %v12138_v49 = vadd.f32 %v6668_v41, %v11888_v2  ;;  %v12148_v6 = vadd.f32 %v6549_v53, %v6237_v19  ;;  %v5305_v2 = vshll.u32 %v12151_v8, 16  ;;  %v5310_v53 = vshll.u32 %v4947_v36, 16 }
 0x6b9   :  { %13752 = vst [vmem:[#allocation79_spill] sm:$0xff] %v12138_v49  ;;  %6278 = vmatmul.bf16.gmra.mxu3 %v12145_v61  ;;  %v6070_v51 = vpop.f32.mrf.mxu2  ;;  %v5307_v19 = vrot.slane %v5305_v2, 1 }
 0x6ba   :  { %v6071_v48 = vadd.f32 %v6070_v51, %v13755_v52  ;;  %v5173_v51 = vshll.u32 %v11902_v60, 16 }
 0x6bb   :  { %v6554_v14 = vpop.f32.mrf.mxu0  ;;  %v5308_v61 = vor.u32 %v5307_v19, %v5303_v57  ;;  %v5180_v57 = vrot.slane %v5178_v18, 1 }
 0x6bc   :  { %v6239_v23 = vpop.f32.mrf.mxu3  ;;  %v5175_v3 = vrot.slane %v5173_v51, 1 }
 0x6bd   :  { %v6240_v16 = vadd.f32 %v6239_v23, %v6071_v48  ;;  %v5312_v48 = vrot.slane %v5310_v53, 1  ;;  %v13758_v23 = vld [vmem:[#allocation21_spill] sm:$0xff] }
 0x6be   :  { %v6671_v33 = vpop.f32.mrf.mxu1 }
 0x6bf   :  { %v12156_v59 = vadd.f32 %v6671_v33, %v11897_v21  ;;  %v12158_v41 = vadd.f32 %v6552_v46, %v6240_v16  ;;  %v5510_v21 = vrot.slane %v4947_v36, 1  ;;  %v4614_v33 = vld [vmem:[#allocation2 + $0x170] sm:$0x1]  ;;  %v5509_v46 = vrot.slane %v12151_v8, 1 }
 0x6c0   :  { %v12173_v19 = vsel %vm470_vm0, %v5308_v61, %v5312_v48  ;;  %v4912_v53 = vunpack.c.l.b16 %v4614_v33 }
 0x6c1   :  { %13756 = vst [vmem:[#allocation18_spill] sm:$0xff] %v12156_v59  ;;  %6710 = vmatmul.bf16.gmra.mxu1 %v11862_v10  ;;  %v6072_v52 = vpop.f32.mrf.mxu2  ;;  %v5171_v10 = vshrl.u32 %v11902_v60, 16  ;;  %v12177_v36 = vsel %vm939_vm1, %v5509_v46, %v5510_v21 }
 0x6c2   :  { %v6073_v0 = vadd.f32 %v6072_v52, %v13758_v23  ;;  %13760 = vst [vmem:[#allocation123_spill] sm:$0xff] %v12173_v19  ;;  %v13762_v52 = vld [vmem:[#allocation30_spill] sm:$0xff] }
 0x6c3   :  { %v6557_v2 = vpop.f32.mrf.mxu0  ;;  %13761 = vst [vmem:[#allocation124_spill] sm:$0xff] %v12177_v36  ;;  %v5176_v60 = vor.u32 %v5175_v3, %v5171_v10 }
 0x6c4   :  { %v6241_v49 = vpop.f32.mrf.mxu3 }
 0x6c5   :  { %v6242_v16 = vadd.f32 %v6241_v49, %v6073_v0 }
 0x6c6   :  { %v6673_v59 = vpop.f32.mrf.mxu1  ;;  %6114 = vmatmul.bf16.gmra.mxu2 %v12173_v19  ;;  %6596 = vmatmul.bf16.gmra.mxu0 %v12124_v50  ;;  %v5181_v50 = vsel %vm470_vm0, %v5176_v60, %v5180_v57 }
 0x6c7   :  { %v12170_v45 = vadd.f32 %v6673_v59, %v11915_v13  ;;  %v12180_v49 = vadd.f32 %v6554_v14, %v6242_v16  ;;  %v4948_v13 = vpack.c.b16 %v4912_v53, %v4912_v53  ;;  %v12183_v59 = vld [vmem:[#allocation2 + $0x168] sm:$0xff] }
 0x6c8   :  { %v5317_v61 = vshll.u32 %v12183_v59, 16  ;;  %v5315_v16 = vshrl.u32 %v12183_v59, 16 }
 0x6c9   :  { %13759 = vst [vmem:[#allocation21_spill] sm:$0xff] %v12170_v45  ;;  %6283 = vmatmul.bf16.gmra.mxu3 %v12177_v36  ;;  %v6075_v51 = vpop.f32.mrf.mxu2  ;;  %v5322_v3 = vshll.u32 %v4948_v13, 16 }
 0x6ca   :  { %v6076_v48 = vadd.f32 %v6075_v51, %v13762_v52  ;;  %v5319_v46 = vrot.slane %v5317_v61, 1  ;;  %v13764_v51 = vld [vmem:[#allocation38_spill] sm:$0xff] }
 0x6cb   :  { %v6559_v0 = vpop.f32.mrf.mxu0  ;;  %v5324_v36 = vrot.slane %v5322_v3, 1 }
 0x6cc   :  { %v6244_v23 = vpop.f32.mrf.mxu3  ;;  %v5320_v53 = vor.u32 %v5319_v46, %v5315_v16  ;;  %v12210_v46 = vld [vmem:[#allocation2 + $0x174] sm:$0xff] }
 0x6cd   :  { %v6245_v21 = vadd.f32 %v6244_v23, %v6076_v48  ;;  %v5513_v48 = vrot.slane %v4948_v13, 1  ;;  %v4617_v23 = vld [vmem:[#allocation2 + $0x17c] sm:$0x1] }
 0x6ce   :  { %v6676_v33 = vpop.f32.mrf.mxu1 }
 0x6cf   :  { %v12189_v14 = vadd.f32 %v6676_v33, %v11924_v62  ;;  %v12191_v10 = vadd.f32 %v6557_v2, %v6245_v21  ;;  %v5512_v62 = vrot.slane %v12183_v59, 1  ;;  %v12200_v2 = vsel %vm470_vm0, %v5320_v53, %v5324_v36  ;;  %v13768_v36 = vld [vmem:[#allocation42_spill] sm:$0xff] }
 0x6d0   :  { %13766 = vst [vmem:[#allocation125_spill] sm:$0xff] %v12200_v2  ;;  %v4913_v21 = vunpack.c.l.b16 %v4617_v23  ;;  %v5327_v23 = vshrl.u32 %v12210_v46, 16 }
 0x6d1   :  { %13763 = vst [vmem:[#allocation30_spill] sm:$0xff] %v12189_v14  ;;  %6715 = vmatmul.bf16.gmra.mxu1 %v5181_v50  ;;  %v6077_v18 = vpop.f32.mrf.mxu2  ;;  %v12204_v33 = vsel %vm939_vm1, %v5512_v62, %v5513_v48  ;;  %v9232_v14 = vld [vmem:[#allocation3 + $0x1c0] sm:$0xff] }
 0x6d2   :  { %v6078_v52 = vadd.f32 %v6077_v18, %v13764_v51  ;;  %13767 = vst [vmem:[#allocation126_spill] sm:$0xff] %v12204_v33  ;;  %v4949_v50 = vpack.c.b16 %v4913_v21, %v4913_v21  ;;  %v13770_v21 = vld [vmem:[#allocation41_spill] sm:$0xff] }
 0x6d3   :  { %v6562_v11 = vpop.f32.mrf.mxu0 }
 0x6d4   :  { %v6246_v45 = vpop.f32.mrf.mxu3 }
 0x6d5   :  { %v6247_v60 = vadd.f32 %v6246_v45, %v6078_v52 }
 0x6d6   :  { %v6678_v57 = vpop.f32.mrf.mxu1  ;;  %6119 = vmatmul.bf16.gmra.mxu2 %v12200_v2  ;;  %6601 = vmatmul.bf16.gmra.mxu0 %v12151_v8 }
 0x6d7   :  { %v12197_v61 = vadd.f32 %v6678_v57, %v11940_v28  ;;  %v12207_v13 = vadd.f32 %v6559_v0, %v6247_v60  ;;  %v5329_v28 = vshll.u32 %v12210_v46, 16  ;;  %v5334_v0 = vshll.u32 %v4949_v50, 16 }
 0x6d9   :  { %13765 = vst [vmem:[#allocation38_spill] sm:$0xff] %v12197_v61  ;;  %6288 = vmatmul.bf16.gmra.mxu3 %v12204_v33  ;;  %v6080_v45 = vpop.f32.mrf.mxu2  ;;  %v5331_v8 = vrot.slane %v5329_v28, 1  ;;  %v5336_v62 = vrot.slane %v5334_v0, 1  ;;  %v5516_v33 = vrot.slane %v4949_v50, 1  ;;  %v5515_v28 = vrot.slane %v12210_v46, 1 }
 0x6da   :  { %v6081_v3 = vadd.f32 %v6080_v45, %v13768_v36 }
 0x6db   :  { %v6564_v18 = vpop.f32.mrf.mxu0  ;;  %v5332_v57 = vor.u32 %v5331_v8, %v5327_v23  ;;  %v9226_v8 = vld [vmem:[#allocation3 + $0x190] sm:$0xff] }
 0x6dc   :  { %v6249_v16 = vpop.f32.mrf.mxu3  ;;  %7163 = vmatpush.bf16.msra.mxu3 %v9226_v8  ;;  %v9242_v8 = vld [vmem:[#allocation3 + $0x210] sm:$0xff] }
 0x6dd   :  { %v6250_v53 = vadd.f32 %v6249_v16, %v6081_v3  ;;  %v4620_v3 = vld [vmem:[#allocation2 + $0x188] sm:$0x1]  ;;  %7501 = vmatpush.bf16.msra.mxu1 %v9242_v8  ;;  %v13780_v8 = vld [vmem:[#allocation57_spill] sm:$0xff] }
 0x6de   :  { %v6681_v51 = vpop.f32.mrf.mxu1 }
 0x6df   :  { %v12215_v52 = vadd.f32 %v6681_v51, %v11946_v15  ;;  %v12217_v48 = vadd.f32 %v6562_v11, %v6250_v53  ;;  %v4914_v53 = vunpack.c.l.b16 %v4620_v3  ;;  %v12231_v51 = vsel %vm939_vm1, %v5515_v28, %v5516_v33  ;;  %v9194_v3 = vld [vmem:[#allocation3 + $0x90] sm:$0xff] }
 0x6e0   :  { %13773 = vst [vmem:[#allocation128_spill] sm:$0xff] %v12231_v51  ;;  %6801 = vmatpush.bf16.msra.mxu2 %v9194_v3 }
 0x6e1   :  { %13769 = vst [vmem:[#allocation42_spill] sm:$0xff] %v12215_v52  ;;  %6720 = vmatmul.bf16.gmra.mxu1 %v11908_v4  ;;  %v6082_v60 = vpop.f32.mrf.mxu2  ;;  %v12227_v4 = vsel %vm470_vm0, %v5332_v57, %v5336_v62  ;;  %v4950_v23 = vpack.c.b16 %v4914_v53, %v4914_v53  ;;  %v13774_v57 = vld [vmem:[#allocation47_spill] sm:$0xff] }
 0x6e2   :  { %v6083_v45 = vadd.f32 %v6082_v60, %v13770_v21  ;;  %13772 = vst [vmem:[#allocation127_spill] sm:$0xff] %v12227_v4 }
 0x6e3   :  { %v6567_v16 = vpop.f32.mrf.mxu0 }
 0x6e4   :  { %v6251_v36 = vpop.f32.mrf.mxu3 }
 0x6e5   :  { %v6252_v61 = vadd.f32 %v6251_v36, %v6083_v45 }
 0x6e6   :  { %v6683_v15 = vpop.f32.mrf.mxu1  ;;  %6124 = vmatmul.bf16.gmra.mxu2 %v12227_v4  ;;  %6606 = vmatmul.bf16.gmra.mxu0 %v12183_v59 }
 0x6e7   :  { %v12224_v11 = vadd.f32 %v6683_v15, %v11960_v55  ;;  %v12234_v50 = vadd.f32 %v6564_v18, %v6252_v61  ;;  %v12237_v55 = vld [vmem:[#allocation2 + $0x180] sm:$0xff]  ;;  %v5346_v18 = vshll.u32 %v4950_v23, 16 }
 0x6e8   :  { %v5341_v60 = vshll.u32 %v12237_v55, 16  ;;  %v9234_v15 = vld [vmem:[#allocation3 + $0x1d0] sm:$0xff]  ;;  %v5339_v53 = vshrl.u32 %v12237_v55, 16 }
 0x6e9   :  { %13771 = vst [vmem:[#allocation41_spill] sm:$0xff] %v12224_v11  ;;  %6293 = vmatmul.bf16.gmra.mxu3 %v12231_v51  ;;  %v6085_v0 = vpop.f32.mrf.mxu2  ;;  %7332 = vmatpush.bf16.msra.mxu0 %v9234_v15 }
 0x6ea   :  { %v6086_v62 = vadd.f32 %v6085_v0, %v13774_v57  ;;  %v5343_v61 = vrot.slane %v5341_v60, 1  ;;  %v4623_v60 = vld [vmem:[#allocation2 + $0x194] sm:$0x1] }
 0x6eb   :  { %v6569_v45 = vpop.f32.mrf.mxu0  ;;  %v4915_v52 = vunpack.c.l.b16 %v4623_v60  ;;  %v9193_v60 = vld [vmem:[#allocation3 + $0x88] sm:$0xff] }
 0x6ec   :  { %v6254_v21 = vpop.f32.mrf.mxu3  ;;  %v5344_v57 = vor.u32 %v5343_v61, %v5339_v53  ;;  %v12264_v53 = vld [vmem:[#allocation2 + $0x18c] sm:$0xff]  ;;  %6802 = vmatpush.bf16.msra.mxu2 %v9193_v60 }
 0x6ed   :  { %v6255_v33 = vadd.f32 %v6254_v21, %v6086_v62  ;;  %v5348_v62 = vrot.slane %v5346_v18, 1  ;;  %v13776_v21 = vld [vmem:[#allocation53_spill] sm:$0xff]  ;;  %v4951_v18 = vpack.c.b16 %v4915_v52, %v4915_v52  ;;  %v5351_v52 = vshrl.u32 %v12264_v53, 16 }
 0x6ee   :  { %v6686_v36 = vpop.f32.mrf.mxu1 }
 0x6ef   :  { %v12242_v59 = vadd.f32 %v6686_v36, %v11970_v34  ;;  %v12244_v28 = vadd.f32 %v6567_v16, %v6255_v33  ;;  %v5519_v36 = vrot.slane %v4950_v23, 1  ;;  %v5518_v16 = vrot.slane %v12237_v55, 1 }
 0x6f0   :  { %v12254_v15 = vsel %vm470_vm0, %v5344_v57, %v5348_v62 }
 0x6f1   :  { %13775 = vst [vmem:[#allocation47_spill] sm:$0xff] %v12242_v59  ;;  %6725 = vmatmul.bf16.gmra.mxu1 %v11933_v24  ;;  %v6087_v0 = vpop.f32.mrf.mxu2  ;;  %v12258_v61 = vsel %vm939_vm1, %v5518_v16, %v5519_v36  ;;  %v9233_v16 = vld [vmem:[#allocation3 + $0x1c8] sm:$0xff] }
 0x6f2   :  { %v6088_v51 = vadd.f32 %v6087_v0, %v13776_v21  ;;  %13778 = vst [vmem:[#allocation129_spill] sm:$0xff] %v12254_v15  ;;  %7333 = vmatpush.bf16.msra.mxu0 %v9233_v16 }
 0x6f3   :  { %v6572_v59 = vpop.f32.mrf.mxu0  ;;  %13779 = vst [vmem:[#allocation130_spill] sm:$0xff] %v12258_v61 }
 0x6f4   :  { %v6256_v34 = vpop.f32.mrf.mxu3 }
 0x6f5   :  { %v6257_v11 = vadd.f32 %v6256_v34, %v6088_v51 }
 0x6f6   :  { %v6688_v3 = vpop.f32.mrf.mxu1  ;;  %6129 = vmatmul.bf16.gmra.mxu2 %v12254_v15  ;;  %6611 = vmatmul.bf16.gmra.mxu0 %v12210_v46 }
 0x6f7   :  { %v12251_v33 = vadd.f32 %v6688_v3, %v11986_v9  ;;  %v12261_v23 = vadd.f32 %v6569_v45, %v6257_v11  ;;  %v5353_v9 = vshll.u32 %v12264_v53, 16  ;;  %v5358_v11 = vshll.u32 %v4951_v18, 16  ;;  %v9225_v3 = vld [vmem:[#allocation3 + $0x188] sm:$0xff]  ;;  %7334 = vmatpush.bf16.msra.mxu0 %v9232_v14 }
 0x6f8   :  { %7164 = vmatpush.bf16.msra.mxu3 %v9225_v3 }
 0x6f9   :  { %13777 = vst [vmem:[#allocation53_spill] sm:$0xff] %v12251_v33  ;;  %6298 = vmatmul.bf16.gmra.mxu3 %v12258_v61  ;;  %v6090_v51 = vpop.f32.mrf.mxu2  ;;  %v5355_v46 = vrot.slane %v5353_v9, 1  ;;  %v4626_v9 = vld [vmem:[#allocation2 + $0x1a0] sm:$0x1]  ;;  %v9192_v33 = vld [vmem:[#allocation3 + $0x80] sm:$0xff] }
 0x6fa   :  { %v6091_v0 = vadd.f32 %v6090_v51, %v13780_v8  ;;  %v5360_v8 = vrot.slane %v5358_v11, 1  ;;  %v4916_v11 = vunpack.c.l.b16 %v4626_v9  ;;  %6803 = vmatpush.bf16.msra.mxu2 %v9192_v33 }
 0x6fb   :  { %v6574_v62 = vpop.f32.mrf.mxu0  ;;  %v5356_v51 = vor.u32 %v5355_v46, %v5351_v52  ;;  %v9366_v52 = vld [vmem:[#allocation2 + $0x198] sm:$0xff] }
 0x6fc   :  { %v6259_v57 = vpop.f32.mrf.mxu3  ;;  %v5365_v60 = vshll.u32 %v9366_v52, 16 }
 0x6fd   :  { %v6260_v21 = vadd.f32 %v6259_v57, %v6091_v0  ;;  %v5522_v57 = vrot.slane %v4951_v18, 1  ;;  %v12281_v46 = vsel %vm470_vm0, %v5356_v51, %v5360_v8  ;;  %v4952_v18 = vpack.c.b16 %v4916_v11, %v4916_v11 }
 0x6fe   :  { %v6691_v34 = vpop.f32.mrf.mxu1  ;;  %13782 = vst [vmem:[#allocation131_spill] sm:$0xff] %v12281_v46 }
 0x6ff   :  { %v12269_v36 = vadd.f32 %v6691_v34, %v11996_v56  ;;  %v12271_v45 = vadd.f32 %v6572_v59, %v6260_v21 }
 0x701   :  { %13781 = vst [vmem:[#allocation57_spill] sm:$0xff] %v12269_v36  ;;  %6730 = vmatmul.bf16.gmra.mxu1 %v11953_v30  ;;  %v6092_v61 = vpop.f32.mrf.mxu2  ;;  %v5521_v36 = vrot.slane %v12264_v53, 1  ;;  %v9224_v30 = vld [vmem:[#allocation3 + $0x180] sm:$0xff] }
 0x702   :  { %v6093_v0 = vadd.f32 %v6092_v61, %v11709_v12  ;;  %7165 = vmatpush.bf16.msra.mxu3 %v9224_v30  ;;  %v5363_v30 = vshrl.u32 %v9366_v52, 16 }
 0x703   :  { %v6577_v59 = vpop.f32.mrf.mxu0  ;;  %v12285_v12 = vsel %vm939_vm1, %v5521_v36, %v5522_v57 }
 0x704   :  { %v6261_v56 = vpop.f32.mrf.mxu3  ;;  %13783 = vst [vmem:[#allocation132_spill] sm:$0xff] %v12285_v12 }
 0x705   :  { %v6262_v21 = vadd.f32 %v6261_v56, %v6093_v0 }
 0x706   :  { %v6693_v34 = vpop.f32.mrf.mxu1  ;;  %6134 = vmatmul.bf16.gmra.mxu2 %v12281_v46  ;;  %6616 = vmatmul.bf16.gmra.mxu0 %v12237_v55  ;;  %v5367_v55 = vrot.slane %v5365_v60, 1 }
 0x707   :  { %v12278_v24 = vadd.f32 %v6693_v34, %v12013_v7  ;;  %v12288_v61 = vadd.f32 %v6574_v62, %v6262_v21  ;;  %v5370_v62 = vshll.u32 %v4952_v18, 16  ;;  %v5525_v21 = vrot.slane %v4952_v18, 1 }
 0x708   :  { %v5368_v33 = vor.u32 %v5367_v55, %v5363_v30  ;;  %v9367_v30 = vld [vmem:[#allocation2] sm:$0xff] }
 0x709   :  { %6303 = vmatmul.bf16.gmra.mxu3 %v12285_v12  ;;  %v6095_v7 = vpop.f32.mrf.mxu2  ;;  %v5372_v57 = vrot.slane %v5370_v62, 1 }
 0x70a   :  { %v6096_v3 = vadd.f32 %v6095_v7, %v11730_v38 }
 0x70b   :  { %v6579_v51 = vpop.f32.mrf.mxu0 }
 0x70c   :  { %v6264_v16 = vpop.f32.mrf.mxu3 }
 0x70d   :  { %v6265_v8 = vadd.f32 %v6264_v16, %v6096_v3  ;;  %v5524_v3 = vrot.slane %v9366_v52, 1 }
 0x70e   :  { %v6696_v36 = vpop.f32.mrf.mxu1 }
 0x70f   :  { %v12293_v0 = vadd.f32 %v6696_v36, %v12023_v26  ;;  %v12295_v56 = vadd.f32 %v6577_v59, %v6265_v8  ;;  %v12303_v59 = vsel %vm470_vm0, %v5368_v33, %v5372_v57  ;;  %v12307_v60 = vsel %vm939_vm1, %v5524_v3, %v5525_v21 }
 0x710   :  { %13784 = vst [vmem:[#allocation133_spill] sm:$0xff] %v12303_v59 }
 0x711   :  { %6735 = vmatmul.bf16.gmra.mxu1 %v11980_v25  ;;  %v6097_v14 = vpop.f32.mrf.mxu2  ;;  %13785 = vst [vmem:[#allocation134_spill] sm:$0xff] %v12307_v60 }
 0x712   :  { %v6098_v9 = vadd.f32 %v6097_v14, %v11738_v20 }
 0x713   :  { %v6582_v34 = vpop.f32.mrf.mxu0 }
 0x714   :  { %v6266_v38 = vpop.f32.mrf.mxu3 }
 0x715   :  { %v6267_v11 = vadd.f32 %v6266_v38, %v6098_v9 }
 0x716   :  { %v6698_v7 = vpop.f32.mrf.mxu1  ;;  %6139 = vmatmul.bf16.gmra.mxu2 %v12303_v59  ;;  %6621 = vmatmul.bf16.gmra.mxu0 %v12264_v53  ;;  %v5422_v53 = vrot.slane %v9367_v30, 1 }
 0x717   :  { %v12300_v26 = vadd.f32 %v6698_v7, %v12040_v54  ;;  %v12310_v20 = vadd.f32 %v6579_v51, %v6267_v11  ;;  %v5423_v51 = vrot.slane %v11765_v39, 1  ;;  %v9368_v11 = vld [vmem:[#allocation2 + $0x18] sm:$0xff] }
 0x719   :  { %6308 = vmatmul.bf16.gmra.mxu3 %v12307_v60  ;;  %v6100_v18 = vpop.f32.mrf.mxu2  ;;  %v5424_v9 = vsel %vm939_vm1, %v5422_v53, %v5423_v51 }
 0x71a   :  { %v6101_v52 = vadd.f32 %v6100_v18, %v11760_v37 }
 0x71b   :  { %v6584_v54 = vpop.f32.mrf.mxu0 }
 0x71c   :  { %v6269_v16 = vpop.f32.mrf.mxu3 }
 0x71d   :  { %v6270_v8 = vadd.f32 %v6269_v16, %v6101_v52 }
 0x71e   :  { %v6701_v36 = vpop.f32.mrf.mxu1 }
 0x71f   :  { %v12315_v55 = vadd.f32 %v6701_v36, %v12050_v35  ;;  %v12317_v62 = vadd.f32 %v6582_v34, %v6270_v8 }
 0x721   :  { %6740 = vmatmul.bf16.gmra.mxu1 %v12006_v63  ;;  %v6102_v14 = vpop.f32.mrf.mxu2 }
 0x722   :  { %v6103_v33 = vadd.f32 %v6102_v14, %v11769_v40  ;;  %v13787_v14 = vld [vmem:[#allocation61_spill] sm:$0xff] }
 0x723   :  { %v6587_v37 = vpop.f32.mrf.mxu0 }
 0x724   :  { %v6271_v57 = vpop.f32.mrf.mxu3 }
 0x725   :  { %v6272_v38 = vadd.f32 %v6271_v57, %v6103_v33  ;;  %v9369_v57 = vld [vmem:[#allocation2 + $0x24] sm:$0xff] }
 0x726   :  { %v6703_v21 = vpop.f32.mrf.mxu1  ;;  %6804 = vmatmul.bf16.vlgmr.msra.gmra.mxu2 %v5424_v9  ;;  %7335 = vmatmul.bf16.vlgmr.msra.gmra.mxu0 %v11476_v29  ;;  %v13789_v9 = vld [vmem:[#allocation71_spill] sm:$0xff] }
 0x727   :  { %v12324_v35 = vadd.f32 %v6703_v21, %v12067_v44  ;;  %v12327_v34 = vadd.f32 %v6584_v54, %v6272_v38  ;;  %v9241_v44 = vld [vmem:[#allocation3 + $0x208] sm:$0xff] }
 0x728   :  { %7502 = vmatpush.bf16.msra.mxu1 %v9241_v44 }
 0x729   :  { %7166 = vmatmul.bf16.vlgmr.msra.gmra.mxu3 %v9368_v11  ;;  %v6105_v39 = vpop.f32.mrf.mxu2 }
 0x72a   :  { %v6106_v7 = vadd.f32 %v6105_v39, %v11784_v42 }
 0x72b   :  { %v6589_v3 = vpop.f32.mrf.mxu0 }
 0x72c   :  { %v6274_v40 = vpop.f32.mrf.mxu3 }
 0x72d   :  { %v6275_v18 = vadd.f32 %v6274_v40, %v6106_v7 }
 0x72e   :  { %v6706_v52 = vpop.f32.mrf.mxu1 }
 0x72f   :  { %v12331_v16 = vadd.f32 %v6706_v52, %v12077_v22  ;;  %v12333_v8 = vadd.f32 %v6587_v37, %v6275_v18  ;;  %v13788_v22 = vld [vmem:[#allocation77_spill] sm:$0xff]  ;;  %v13791_v18 = vld [vmem:[#allocation80_spill] sm:$0xff] }
 0x731   :  { %6745 = vmatmul.bf16.gmra.mxu1 %v12033_v58  ;;  %v6107_v29 = vpop.f32.mrf.mxu2 }
 0x732   :  { %v6108_v54 = vadd.f32 %v6107_v29, %v11790_v27 }
 0x733   :  { %v6592_v30 = vpop.f32.mrf.mxu0 }
 0x734   :  { %v6276_v36 = vpop.f32.mrf.mxu3 }
 0x735   :  { %v6277_v53 = vadd.f32 %v6276_v36, %v6108_v54 }
 0x736   :  { %v6708_v42 = vpop.f32.mrf.mxu1  ;;  %6809 = vmatmul.bf16.gmra.mxu2 %v13787_v14  ;;  %7340 = vmatmul.bf16.gmra.mxu0 %v13788_v22  ;;  %v13795_v22 = vld [vmem:[#allocation82_spill] sm:$0xff] }
 0x737   :  { %v12338_v51 = vadd.f32 %v6708_v42, %v12094_v5  ;;  %v12342_v33 = vadd.f32 %v6589_v3, %v6277_v53  ;;  %v13793_v53 = vld [vmem:[#allocation69_spill] sm:$0xff]  ;;  %v13794_v42 = vld [vmem:[#allocation12_spill] sm:$0xff] }
 0x739   :  { %13786 = vst [vmem:[#allocation135_spill] sm:$0xff] %v12338_v51  ;;  %7171 = vmatmul.bf16.gmra.mxu3 %v9369_v57  ;;  %v6110_v37 = vpop.f32.mrf.mxu2 }
 0x73a   :  { %v6111_v38 = vadd.f32 %v6110_v37, %v13789_v9 }
 0x73b   :  { %v6594_v27 = vpop.f32.mrf.mxu0 }
 0x73c   :  { %v6279_v21 = vpop.f32.mrf.mxu3 }
 0x73d   :  { %v6280_v11 = vadd.f32 %v6279_v21, %v6111_v38 }
 0x73e   :  { %v6711_v39 = vpop.f32.mrf.mxu1 }
 0x73f   :  { %v12346_v7 = vadd.f32 %v6711_v39, %v12104_v1  ;;  %v12348_v5 = vadd.f32 %v6592_v30, %v6280_v11  ;;  %v9370_v30 = vld [vmem:[#allocation2 + $0x30] sm:$0xff] }
 0x741   :  { %13790 = vst [vmem:[#allocation61_spill] sm:$0xff] %v12346_v7  ;;  %6750 = vmatmul.bf16.gmra.mxu1 %v12060_v32  ;;  %v6112_v40 = vpop.f32.mrf.mxu2 }
 0x742   :  { %v6113_v3 = vadd.f32 %v6112_v40, %v13791_v18  ;;  %v13797_v40 = vld [vmem:[#allocation83_spill] sm:$0xff] }
 0x743   :  { %v6597_v44 = vpop.f32.mrf.mxu0 }
 0x744   :  { %v6281_v52 = vpop.f32.mrf.mxu3 }
 0x745   :  { %v6282_v29 = vadd.f32 %v6281_v52, %v6113_v3 }
 0x746   :  { %v6713_v54 = vpop.f32.mrf.mxu1  ;;  %6814 = vmatmul.bf16.gmra.mxu2 %v13793_v53  ;;  %7345 = vmatmul.bf16.gmra.mxu0 %v13794_v42  ;;  %v13799_v42 = vld [vmem:[#allocation9_spill] sm:$0xff] }
 0x747   :  { %v12353_v36 = vadd.f32 %v6713_v54, %v12121_v47  ;;  %v12357_v1 = vadd.f32 %v6594_v27, %v6282_v29 }
 0x749   :  { %13792 = vst [vmem:[#allocation77_spill] sm:$0xff] %v12353_v36  ;;  %7176 = vmatmul.bf16.gmra.mxu3 %v9370_v30  ;;  %v6115_v14 = vpop.f32.mrf.mxu2  ;;  %v13800_v30 = vld [vmem:[#allocation33_spill] sm:$0xff] }
 0x74a   :  { %v6116_v57 = vadd.f32 %v6115_v14, %v13795_v22  ;;  %v13801_v22 = vld [vmem:[#allocation86_spill] sm:$0xff] }
 0x74b   :  { %v6599_v9 = vpop.f32.mrf.mxu0 }
 0x74c   :  { %v6284_v37 = vpop.f32.mrf.mxu3 }
 0x74d   :  { %v6285_v38 = vadd.f32 %v6284_v37, %v6116_v57 }
 0x74e   :  { %v6716_v21 = vpop.f32.mrf.mxu1 }
 0x74f   :  { %v12361_v11 = vadd.f32 %v6716_v21, %v12131_v17  ;;  %v12363_v47 = vadd.f32 %v6597_v44, %v6285_v38  ;;  %v9371_v44 = vld [vmem:[#allocation2 + $0x3c] sm:$0xff] }
 0x751   :  { %13796 = vst [vmem:[#allocation71_spill] sm:$0xff] %v12361_v11  ;;  %6755 = vmatmul.bf16.gmra.mxu1 %v12087_v43  ;;  %v6117_v39 = vpop.f32.mrf.mxu2 }
 0x752   :  { %v6118_v27 = vadd.f32 %v6117_v39, %v13797_v40 }
 0x753   :  { %v6602_v3 = vpop.f32.mrf.mxu0 }
 0x754   :  { %v6286_v18 = vpop.f32.mrf.mxu3 }
 0x755   :  { %v6287_v52 = vadd.f32 %v6286_v18, %v6118_v27  ;;  %v13803_v18 = vld [vmem:[#allocation87_spill] sm:$0xff] }
 0x756   :  { %v6718_v29 = vpop.f32.mrf.mxu1  ;;  %6819 = vmatmul.bf16.gmra.mxu2 %v13799_v42  ;;  %7350 = vmatmul.bf16.gmra.mxu0 %v13800_v30 }
 0x757   :  { %v12368_v54 = vadd.f32 %v6718_v29, %v12148_v6  ;;  %v12372_v17 = vadd.f32 %v6599_v9, %v6287_v52 }
 0x759   :  { %13798 = vst [vmem:[#allocation80_spill] sm:$0xff] %v12368_v54  ;;  %7181 = vmatmul.bf16.gmra.mxu3 %v9371_v44  ;;  %v6120_v14 = vpop.f32.mrf.mxu2 }
 0x75a   :  { %v6121_v57 = vadd.f32 %v6120_v14, %v13801_v22  ;;  %v13805_v22 = vld [vmem:[#allocation24_spill] sm:$0xff] }
 0x75b   :  { %v6604_v38 = vpop.f32.mrf.mxu0 }
 0x75c   :  { %v6289_v37 = vpop.f32.mrf.mxu3 }
 0x75d   :  { %v6290_v21 = vadd.f32 %v6289_v37, %v6121_v57  ;;  %v13806_v57 = vld [vmem:[#allocation37_spill] sm:$0xff] }
 0x75e   :  { %v6721_v39 = vpop.f32.mrf.mxu1 }
 0x75f   :  { %v12376_v40 = vadd.f32 %v6721_v39, %v12158_v41  ;;  %v12378_v6 = vadd.f32 %v6602_v3, %v6290_v21  ;;  %v9372_v3 = vld [vmem:[#allocation2 + $0x48] sm:$0xff]  ;;  %v13807_v21 = vld [vmem:[#allocation90_spill] sm:$0xff] }
 0x761   :  { %13802 = vst [vmem:[#allocation69_spill] sm:$0xff] %v12376_v40  ;;  %6760 = vmatmul.bf16.gmra.mxu1 %v12114_v31  ;;  %v6122_v27 = vpop.f32.mrf.mxu2 }
 0x762   :  { %v6123_v9 = vadd.f32 %v6122_v27, %v13803_v18 }
 0x763   :  { %v6607_v29 = vpop.f32.mrf.mxu0 }
 0x764   :  { %v6291_v52 = vpop.f32.mrf.mxu3 }
 0x765   :  { %v6292_v30 = vadd.f32 %v6291_v52, %v6123_v9  ;;  %v13809_v52 = vld [vmem:[#allocation120_spill] sm:$0xff] }
 0x766   :  { %v6723_v44 = vpop.f32.mrf.mxu1  ;;  %6824 = vmatmul.bf16.gmra.mxu2 %v13805_v22  ;;  %7355 = vmatmul.bf16.gmra.mxu0 %v13806_v57 }
 0x767   :  { %v12383_v14 = vadd.f32 %v6723_v44, %v12180_v49  ;;  %v12387_v41 = vadd.f32 %v6604_v38, %v6292_v30  ;;  %v9240_v44 = vld [vmem:[#allocation3 + $0x200] sm:$0xff]  ;;  %v13810_v38 = vld [vmem:[#allocation91_spill] sm:$0xff] }
 0x768   :  { %7503 = vmatpush.bf16.msra.mxu1 %v9240_v44 }
 0x769   :  { %13804 = vst [vmem:[#allocation12_spill] sm:$0xff] %v12383_v14  ;;  %7186 = vmatmul.bf16.gmra.mxu3 %v9372_v3  ;;  %v6125_v37 = vpop.f32.mrf.mxu2 }
 0x76a   :  { %v6126_v39 = vadd.f32 %v6125_v37, %v13807_v21 }
 0x76b   :  { %v6609_v27 = vpop.f32.mrf.mxu0 }
 0x76c   :  { %v6294_v60 = vpop.f32.mrf.mxu3 }
 0x76d   :  { %v6295_v18 = vadd.f32 %v6294_v60, %v6126_v39  ;;  %v13812_v60 = vld [vmem:[#allocation27_spill] sm:$0xff] }
 0x76e   :  { %v6726_v12 = vpop.f32.mrf.mxu1 }
 0x76f   :  { %v12391_v9 = vadd.f32 %v6726_v12, %v12191_v10  ;;  %v12393_v49 = vadd.f32 %v6607_v29, %v6295_v18  ;;  %v13813_v10 = vld [vmem:[#allocation46_spill] sm:$0xff]  ;;  %v13814_v18 = vld [vmem:[#allocation92_spill] sm:$0xff] }
 0x770   :  { %v9373_v29 = vld [vmem:[#allocation2 + $0x54] sm:$0xff] }
 0x771   :  { %13808 = vst [vmem:[#allocation82_spill] sm:$0xff] %v12391_v9  ;;  %6765 = vmatmul.bf16.gmra.mxu1 %v13809_v52  ;;  %v6127_v57 = vpop.f32.mrf.mxu2 }
 0x772   :  { %v6128_v30 = vadd.f32 %v6127_v57, %v13810_v38 }
 0x773   :  { %v6612_v59 = vpop.f32.mrf.mxu0 }
 0x774   :  { %v6296_v3 = vpop.f32.mrf.mxu3 }
 0x775   :  { %v6297_v14 = vadd.f32 %v6296_v3, %v6128_v30 }
 0x776   :  { %v6728_v37 = vpop.f32.mrf.mxu1  ;;  %6829 = vmatmul.bf16.gmra.mxu2 %v13812_v60  ;;  %7360 = vmatmul.bf16.gmra.mxu0 %v13813_v10 }
 0x777   :  { %v12398_v21 = vadd.f32 %v6728_v37, %v12207_v13  ;;  %v12402_v12 = vadd.f32 %v6609_v27, %v6297_v14  ;;  %v13816_v37 = vld [vmem:[#allocation94_spill] sm:$0xff] }
 0x779   :  { %13811 = vst [vmem:[#allocation83_spill] sm:$0xff] %v12398_v21  ;;  %7191 = vmatmul.bf16.gmra.mxu3 %v9373_v29  ;;  %v6130_v39 = vpop.f32.mrf.mxu2 }
 0x77a   :  { %v6131_v44 = vadd.f32 %v6130_v39, %v13814_v18  ;;  %v13818_v18 = vld [vmem:[#allocation36_spill] sm:$0xff] }
 0x77b   :  { %v6614_v57 = vpop.f32.mrf.mxu0 }
 0x77c   :  { %v6299_v9 = vpop.f32.mrf.mxu3 }
 0x77d   :  { %v6300_v38 = vadd.f32 %v6299_v9, %v6131_v44  ;;  %v13819_v9 = vld [vmem:[#allocation48_spill] sm:$0xff]  ;;  %v13820_v44 = vld [vmem:[#allocation95_spill] sm:$0xff] }
 0x77e   :  { %v6731_v40 = vpop.f32.mrf.mxu1 }
 0x77f   :  { %v12406_v30 = vadd.f32 %v6731_v40, %v12217_v48  ;;  %v12408_v13 = vadd.f32 %v6612_v59, %v6300_v38  ;;  %v9374_v59 = vld [vmem:[#allocation2 + $0x60] sm:$0xff] }
 0x781   :  { %13815 = vst [vmem:[#allocation9_spill] sm:$0xff] %v12406_v30  ;;  %6770 = vmatmul.bf16.gmra.mxu1 %v12173_v19  ;;  %v6132_v3 = vpop.f32.mrf.mxu2 }
 0x782   :  { %v6133_v14 = vadd.f32 %v6132_v3, %v13816_v37 }
 0x783   :  { %v6617_v10 = vpop.f32.mrf.mxu0 }
 0x784   :  { %v6301_v27 = vpop.f32.mrf.mxu3 }
 0x785   :  { %v6302_v29 = vadd.f32 %v6301_v27, %v6133_v14  ;;  %v13822_v27 = vld [vmem:[#allocation97_spill] sm:$0xff] }
 0x786   :  { %v6733_v21 = vpop.f32.mrf.mxu1  ;;  %6834 = vmatmul.bf16.gmra.mxu2 %v13818_v18  ;;  %7365 = vmatmul.bf16.gmra.mxu0 %v13819_v9 }
 0x787   :  { %v12413_v39 = vadd.f32 %v6733_v21, %v12234_v50  ;;  %v12417_v48 = vadd.f32 %v6614_v57, %v6302_v29 }
 0x789   :  { %13817 = vst [vmem:[#allocation33_spill] sm:$0xff] %v12413_v39  ;;  %7196 = vmatmul.bf16.gmra.mxu3 %v9374_v59  ;;  %v6135_v40 = vpop.f32.mrf.mxu2 }
 0x78a   :  { %v6136_v38 = vadd.f32 %v6135_v40, %v13820_v44  ;;  %v13824_v44 = vld [vmem:[#allocation43_spill] sm:$0xff] }
 0x78b   :  { %v6619_v3 = vpop.f32.mrf.mxu0 }
 0x78c   :  { %v6304_v30 = vpop.f32.mrf.mxu3 }
 0x78d   :  { %v6305_v37 = vadd.f32 %v6304_v30, %v6136_v38  ;;  %v13825_v30 = vld [vmem:[#allocation52_spill] sm:$0xff] }
 0x78e   :  { %v6736_v19 = vpop.f32.mrf.mxu1  ;;  %v13826_v38 = vld [vmem:[#allocation108_spill] sm:$0xff] }
 0x78f   :  { %v12421_v14 = vadd.f32 %v6736_v19, %v12244_v28  ;;  %v12423_v50 = vadd.f32 %v6617_v10, %v6305_v37  ;;  %v9375_v28 = vld [vmem:[#allocation2 + $0x6c] sm:$0xff] }
 0x791   :  { %13821 = vst [vmem:[#allocation86_spill] sm:$0xff] %v12421_v14  ;;  %6775 = vmatmul.bf16.gmra.mxu1 %v12200_v2  ;;  %v6137_v21 = vpop.f32.mrf.mxu2 }
 0x792   :  { %v6138_v57 = vadd.f32 %v6137_v21, %v13822_v27 }
 0x793   :  { %v6622_v9 = vpop.f32.mrf.mxu0 }
 0x794   :  { %v6306_v29 = vpop.f32.mrf.mxu3 }
 0x795   :  { %v6307_v59 = vadd.f32 %v6306_v29, %v6138_v57  ;;  %v13828_v29 = vld [vmem:[#allocation109_spill] sm:$0xff] }
 0x796   :  { %v6738_v39 = vpop.f32.mrf.mxu1  ;;  %6839 = vmatmul.bf16.gmra.mxu2 %v13824_v44  ;;  %7370 = vmatmul.bf16.gmra.mxu0 %v13825_v30 }
 0x797   :  { %v12428_v40 = vadd.f32 %v6738_v39, %v12261_v23  ;;  %v12432_v19 = vadd.f32 %v6619_v3, %v6307_v59 }
 0x799   :  { %13823 = vst [vmem:[#allocation87_spill] sm:$0xff] %v12428_v40  ;;  %7201 = vmatmul.bf16.gmra.mxu3 %v9375_v28  ;;  %v6140_v10 = vpop.f32.mrf.mxu2 }
 0x79a   :  { %v6141_v37 = vadd.f32 %v6140_v10, %v13826_v38  ;;  %v13830_v38 = vld [vmem:[#allocation51_spill] sm:$0xff] }
 0x79b   :  { %v6624_v21 = vpop.f32.mrf.mxu0 }
 0x79c   :  { %v6309_v14 = vpop.f32.mrf.mxu3 }
 0x79d   :  { %v6310_v27 = vadd.f32 %v6309_v14, %v6141_v37  ;;  %v13831_v14 = vld [vmem:[#allocation63_spill] sm:$0xff]  ;;  %v13832_v37 = vld [vmem:[#allocation112_spill] sm:$0xff] }
 0x79e   :  { %v6741_v2 = vpop.f32.mrf.mxu1 }
 0x79f   :  { %v12436_v57 = vadd.f32 %v6741_v2, %v12271_v45  ;;  %v12438_v23 = vadd.f32 %v6622_v9, %v6310_v27  ;;  %v9376_v45 = vld [vmem:[#allocation2 + $0x78] sm:$0xff] }
 0x7a1   :  { %13827 = vst [vmem:[#allocation24_spill] sm:$0xff] %v12436_v57  ;;  %6780 = vmatmul.bf16.gmra.mxu1 %v12227_v4  ;;  %v6142_v39 = vpop.f32.mrf.mxu2 }
 0x7a2   :  { %v6143_v3 = vadd.f32 %v6142_v39, %v13828_v29 }
 0x7a3   :  { %v7336_v30 = vpop.f32.mrf.mxu0 }
 0x7a4   :  { %v6311_v59 = vpop.f32.mrf.mxu3 }
 0x7a5   :  { %v6312_v28 = vadd.f32 %v6311_v59, %v6143_v3 }
 0x7a6   :  { %v6743_v40 = vpop.f32.mrf.mxu1  ;;  %6844 = vmatmul.bf16.gmra.mxu2 %v13830_v38  ;;  %7375 = vmatmul.bf16.gmra.mxu0 %v13831_v14  ;;  %v13834_v14 = vld [vmem:[#allocation100_spill] sm:$0xff] }
 0x7a7   :  { %v12443_v10 = vadd.f32 %v6743_v40, %v12288_v61  ;;  %v12447_v2 = vadd.f32 %v6624_v21, %v6312_v28 }
 0x7a9   :  { %13829 = vst [vmem:[#allocation37_spill] sm:$0xff] %v12443_v10  ;;  %7206 = vmatmul.bf16.gmra.mxu3 %v9376_v45  ;;  %v6805_v9 = vpop.f32.mrf.mxu2 }
 0x7aa   :  { %v12450_v27 = vadd.f32 %v6805_v9, %v13832_v37 }
 0x7ab   :  { %v7338_v3 = vpop.f32.mrf.mxu0 }
 0x7ac   :  { %v7167_v39 = vpop.f32.mrf.mxu3 }
 0x7ad   :  { %v12452_v29 = vadd.f32 %v7336_v30, %v7167_v39  ;;  %v13836_v30 = vld [vmem:[#allocation58_spill] sm:$0xff]  ;;  %v13837_v39 = vld [vmem:[#allocation65_spill] sm:$0xff] }
 0x7ae   :  { %v6746_v59 = vpop.f32.mrf.mxu1 }
 0x7af   :  { %v12455_v61 = vadd.f32 %v6746_v59, %v12295_v56  ;;  %v9377_v56 = vld [vmem:[#allocation2 + $0x84] sm:$0xff] }
 0x7b1   :  { %13833 = vst [vmem:[#allocation90_spill] sm:$0xff] %v12455_v61  ;;  %6785 = vmatmul.bf16.gmra.mxu1 %v12254_v15  ;;  %v6807_v40 = vpop.f32.mrf.mxu2  ;;  %v13838_v61 = vld [vmem:[#allocation101_spill] sm:$0xff] }
 0x7b2   :  { %v12459_v21 = vadd.f32 %v6807_v40, %v13834_v14 }
 0x7b3   :  { %v7341_v10 = vpop.f32.mrf.mxu0 }
 0x7b4   :  { %v7169_v28 = vpop.f32.mrf.mxu3 }
 0x7b5   :  { %v12461_v45 = vadd.f32 %v7338_v3, %v7169_v28 }
 0x7b6   :  { %v6748_v9 = vpop.f32.mrf.mxu1  ;;  %6849 = vmatmul.bf16.gmra.mxu2 %v13836_v30  ;;  %7380 = vmatmul.bf16.gmra.mxu0 %v13837_v39 }
 0x7b7   :  { %v12464_v37 = vadd.f32 %v6748_v9, %v12310_v20  ;;  %v13840_v9 = vld [vmem:[#allocation104_spill] sm:$0xff] }
 0x7b9   :  { %13835 = vst [vmem:[#allocation91_spill] sm:$0xff] %v12464_v37  ;;  %7211 = vmatmul.bf16.gmra.mxu3 %v9377_v56  ;;  %v6810_v59 = vpop.f32.mrf.mxu2 }
 0x7ba   :  { %v12469_v57 = vadd.f32 %v6810_v59, %v13838_v61 }
 0x7bb   :  { %v7343_v3 = vpop.f32.mrf.mxu0 }
 0x7bc   :  { %v7172_v40 = vpop.f32.mrf.mxu3 }
 0x7bd   :  { %v12471_v14 = vadd.f32 %v7341_v10, %v7172_v40  ;;  %v13842_v10 = vld [vmem:[#allocation56_spill] sm:$0xff]  ;;  %v13843_v40 = vld [vmem:[#allocation62_spill] sm:$0xff] }
 0x7be   :  { %v6751_v28 = vpop.f32.mrf.mxu1 }
 0x7bf   :  { %v12474_v15 = vadd.f32 %v6751_v28, %v12317_v62  ;;  %v9378_v62 = vld [vmem:[#allocation2 + $0x90] sm:$0xff] }
 0x7c1   :  { %13839 = vst [vmem:[#allocation27_spill] sm:$0xff] %v12474_v15  ;;  %6790 = vmatmul.bf16.gmra.mxu1 %v12281_v46  ;;  %v6812_v20 = vpop.f32.mrf.mxu2  ;;  %v13844_v15 = vld [vmem:[#allocation102_spill] sm:$0xff] }
 0x7c2   :  { %v12478_v37 = vadd.f32 %v6812_v20, %v13840_v9 }
 0x7c3   :  { %v7346_v4 = vpop.f32.mrf.mxu0 }
 0x7c4   :  { %v7174_v39 = vpop.f32.mrf.mxu3 }
 0x7c5   :  { %v12480_v56 = vadd.f32 %v7343_v3, %v7174_v39 }
 0x7c6   :  { %v6753_v61 = vpop.f32.mrf.mxu1  ;;  %6854 = vmatmul.bf16.gmra.mxu2 %v13842_v10  ;;  %7385 = vmatmul.bf16.gmra.mxu0 %v13843_v40 }
 0x7c7   :  { %v12483_v59 = vadd.f32 %v6753_v61, %v12327_v34  ;;  %v13846_v61 = vld [vmem:[#allocation103_spill] sm:$0xff] }
 0x7c9   :  { %13841 = vst [vmem:[#allocation46_spill] sm:$0xff] %v12483_v59  ;;  %7216 = vmatmul.bf16.gmra.mxu3 %v9378_v62  ;;  %v6815_v28 = vpop.f32.mrf.mxu2 }
 0x7ca   :  { %v12488_v46 = vadd.f32 %v6815_v28, %v13844_v15 }
 0x7cb   :  { %v7348_v3 = vpop.f32.mrf.mxu0 }
 0x7cc   :  { %v7177_v20 = vpop.f32.mrf.mxu3 }
 0x7cd   :  { %v12490_v9 = vadd.f32 %v7346_v4, %v7177_v20  ;;  %v13848_v4 = vld [vmem:[#allocation72_spill] sm:$0xff]  ;;  %v13849_v20 = vld [vmem:[#allocation81_spill] sm:$0xff] }
 0x7ce   :  { %v6756_v39 = vpop.f32.mrf.mxu1 }
 0x7cf   :  { %v12493_v54 = vadd.f32 %v6756_v39, %v12333_v8  ;;  %v9379_v8 = vld [vmem:[#allocation2 + $0x9c] sm:$0xff] }
 0x7d1   :  { %13845 = vst [vmem:[#allocation92_spill] sm:$0xff] %v12493_v54  ;;  %7504 = vmatmul.bf16.vlgmr.msra.gmra.mxu1 %v13793_v53  ;;  %v6817_v34 = vpop.f32.mrf.mxu2  ;;  %v13850_v53 = vld [vmem:[#allocation64_spill] sm:$0xff] }
 0x7d2   :  { %v12497_v59 = vadd.f32 %v6817_v34, %v13846_v61 }
 0x7d3   :  { %v7351_v11 = vpop.f32.mrf.mxu0 }
 0x7d4   :  { %v7179_v40 = vpop.f32.mrf.mxu3 }
 0x7d5   :  { %v12499_v62 = vadd.f32 %v7348_v3, %v7179_v40 }
 0x7d6   :  { %v6758_v15 = vpop.f32.mrf.mxu1  ;;  %6859 = vmatmul.bf16.gmra.mxu2 %v13848_v4  ;;  %7390 = vmatmul.bf16.gmra.mxu0 %v13849_v20 }
 0x7d7   :  { %v12502_v28 = vadd.f32 %v6758_v15, %v12342_v33  ;;  %v13852_v15 = vld [vmem:[#allocation105_spill] sm:$0xff] }
 0x7d9   :  { %13847 = vst [vmem:[#allocation94_spill] sm:$0xff] %v12502_v28  ;;  %7221 = vmatmul.bf16.gmra.mxu3 %v9379_v8  ;;  %v6820_v39 = vpop.f32.mrf.mxu2 }
 0x7da   :  { %v12507_v54 = vadd.f32 %v6820_v39, %v13850_v53 }
 0x7db   :  { %v7353_v3 = vpop.f32.mrf.mxu0 }
 0x7dc   :  { %v7182_v34 = vpop.f32.mrf.mxu3 }
 0x7dd   :  { %v12509_v61 = vadd.f32 %v7351_v11, %v7182_v34  ;;  %v13854_v11 = vld [vmem:[#allocation74_spill] sm:$0xff]  ;;  %v13855_v34 = vld [vmem:[#allocation84_spill] sm:$0xff] }
 0x7de   :  { %v6761_v40 = vpop.f32.mrf.mxu1 }
 0x7df   :  { %v12512_v52 = vadd.f32 %v6761_v40, %v12348_v5  ;;  %v9380_v5 = vld [vmem:[#allocation2 + $0xa8] sm:$0xff] }
 0x7e1   :  { %13851 = vst [vmem:[#allocation36_spill] sm:$0xff] %v12512_v52  ;;  %7509 = vmatmul.bf16.gmra.mxu1 %v13799_v42  ;;  %v6822_v33 = vpop.f32.mrf.mxu2  ;;  %v13856_v42 = vld [vmem:[#allocation66_spill] sm:$0xff] }
 0x7e2   :  { %v12516_v28 = vadd.f32 %v6822_v33, %v13852_v15 }
 0x7e3   :  { %v7356_v36 = vpop.f32.mrf.mxu0 }
 0x7e4   :  { %v7184_v20 = vpop.f32.mrf.mxu3 }
 0x7e5   :  { %v12518_v8 = vadd.f32 %v7353_v3, %v7184_v20 }
 0x7e6   :  { %v6763_v39 = vpop.f32.mrf.mxu1  ;;  %6864 = vmatmul.bf16.gmra.mxu2 %v13854_v11  ;;  %7395 = vmatmul.bf16.gmra.mxu0 %v13855_v34 }
 0x7e7   :  { %v12521_v53 = vadd.f32 %v6763_v39, %v12357_v1  ;;  %v13858_v39 = vld [vmem:[#allocation106_spill] sm:$0xff] }
 0x7e9   :  { %13853 = vst [vmem:[#allocation48_spill] sm:$0xff] %v12521_v53  ;;  %7226 = vmatmul.bf16.gmra.mxu3 %v9380_v5  ;;  %v6825_v40 = vpop.f32.mrf.mxu2 }
 0x7ea   :  { %v12526_v52 = vadd.f32 %v6825_v40, %v13856_v42 }
 0x7eb   :  { %v7358_v3 = vpop.f32.mrf.mxu0 }
 0x7ec   :  { %v7187_v33 = vpop.f32.mrf.mxu3 }
 0x7ed   :  { %v12528_v15 = vadd.f32 %v7356_v36, %v7187_v33  ;;  %v13862_v36 = vld [vmem:[#allocation78_spill] sm:$0xff]  ;;  %v13863_v33 = vld [vmem:[#allocation88_spill] sm:$0xff] }
 0x7ee   :  { %v6766_v20 = vpop.f32.mrf.mxu1 }
 0x7ef   :  { %v12531_v7 = vadd.f32 %v6766_v20, %v12363_v47  ;;  %v9381_v47 = vld [vmem:[#allocation2 + $0xb4] sm:$0xff] }
 0x7f1   :  { %13857 = vst [vmem:[#allocation95_spill] sm:$0xff] %v12531_v7  ;;  %7514 = vmatmul.bf16.gmra.mxu1 %v13805_v22  ;;  %v6827_v1 = vpop.f32.mrf.mxu2  ;;  %v13864_v22 = vld [vmem:[#allocation70_spill] sm:$0xff] }
 0x7f2   :  { %v12535_v53 = vadd.f32 %v6827_v1, %v13858_v39 }
 0x7f3   :  { %v7361_v31 = vpop.f32.mrf.mxu0 }
 0x7f4   :  { %13859 = vst [vmem:[#allocation97_spill] sm:$0xff] %v12535_v53  ;;  %v7189_v34 = vpop.f32.mrf.mxu3 }
 0x7f5   :  { %v12537_v5 = vadd.f32 %v7358_v3, %v7189_v34 }
 0x7f6   :  { %v6768_v40 = vpop.f32.mrf.mxu1  ;;  %6869 = vmatmul.bf16.gmra.mxu2 %v13862_v36  ;;  %7400 = vmatmul.bf16.gmra.mxu0 %v13863_v33 }
 0x7f7   :  { %13860 = vst [vmem:[#allocation43_spill] sm:$0xff] %v12537_v5  ;;  %v12540_v42 = vadd.f32 %v6768_v40, %v12372_v17  ;;  %v4575_v17 = vld [vmem:[#allocation2 + $0xd4] sm:$0x1] }
 0x7f9   :  { %13861 = vst [vmem:[#allocation52_spill] sm:$0xff] %v12540_v42  ;;  %7231 = vmatmul.bf16.gmra.mxu3 %v9381_v47  ;;  %v6830_v20 = vpop.f32.mrf.mxu2  ;;  %v13868_v42 = vld [vmem:[#allocation73_spill] sm:$0xff] }
 0x7fa   :  { %v12545_v7 = vadd.f32 %v6830_v20, %v13864_v22  ;;  %v12558_v22 = vld [vmem:[#allocation2 + $0xcc] sm:$0xff] }
 0x7fb   :  { %v7363_v3 = vpop.f32.mrf.mxu0 }
 0x7fc   :  { %13865 = vst [vmem:[#allocation108_spill] sm:$0xff] %v12545_v7  ;;  %v7192_v1 = vpop.f32.mrf.mxu3 }
 0x7fd   :  { %v12547_v39 = vadd.f32 %v7361_v31, %v7192_v1  ;;  %v4899_v31 = vunpack.c.l.b16 %v4575_v17 }
 0x7fe   :  { %v6771_v34 = vpop.f32.mrf.mxu1 }
 0x7ff   :  { %13866 = vst [vmem:[#allocation109_spill] sm:$0xff] %v12547_v39  ;;  %v12550_v53 = vadd.f32 %v6771_v34, %v12378_v6  ;;  %v13872_v6 = vld [vmem:[#allocation85_spill] sm:$0xff] }
 0x800   :  { %v13873_v34 = vld [vmem:[#allocation93_spill] sm:$0xff] }
 0x801   :  { %13867 = vst [vmem:[#allocation51_spill] sm:$0xff] %v12550_v53  ;;  %7519 = vmatmul.bf16.gmra.mxu1 %v13812_v60  ;;  %v6832_v40 = vpop.f32.mrf.mxu2  ;;  %v9382_v60 = vld [vmem:[#allocation2 + $0xc0] sm:$0xff]  ;;  %v12565_v53 = vpack.c.b16 %v4899_v31, %v4899_v31 }
 0x802   :  { %v12554_v33 = vadd.f32 %v6832_v40, %v13868_v42  ;;  %v5161_v42 = vshll.u32 %v12558_v22, 16  ;;  %v13875_v40 = vld [vmem:[#allocation15_spill] sm:$0xff] }
 0x803   :  { %v7366_v20 = vpop.f32.mrf.mxu0  ;;  %13874 = vst [vmem:[#allocation58_spill] sm:$0xff] %v12565_v53 }
 0x804   :  { %13869 = vst [vmem:[#allocation63_spill] sm:$0xff] %v12554_v33  ;;  %v7194_v47 = vpop.f32.mrf.mxu3 }
 0x805   :  { %v12556_v5 = vadd.f32 %v7363_v3, %v7194_v47 }
 0x806   :  { %v6773_v1 = vpop.f32.mrf.mxu1  ;;  %6874 = vmatmul.bf16.gmra.mxu2 %v13872_v6  ;;  %7405 = vmatmul.bf16.gmra.mxu0 %v13873_v34 }
 0x807   :  { %13870 = vst [vmem:[#allocation112_spill] sm:$0xff] %v12556_v5  ;;  %v12561_v7 = vadd.f32 %v6773_v1, %v12387_v41  ;;  %v5159_v41 = vshrl.u32 %v12558_v22, 16  ;;  %v5163_v1 = vrot.slane %v5161_v42, 1 }
 0x809   :  { %13871 = vst [vmem:[#allocation100_spill] sm:$0xff] %v12561_v7  ;;  %7236 = vmatmul.bf16.gmra.mxu3 %v9382_v60  ;;  %v6835_v3 = vpop.f32.mrf.mxu2  ;;  %v5166_v7 = vshll.u32 %v12565_v53, 16  ;;  %v5164_v31 = vor.u32 %v5163_v1, %v5159_v41 }
 0x80a   :  { %v12569_v47 = vadd.f32 %v6835_v3, %v13875_v40  ;;  %v13879_v3 = vld [vmem:[#allocation79_spill] sm:$0xff] }
 0x80b   :  { %v7368_v5 = vpop.f32.mrf.mxu0  ;;  %v5168_v39 = vrot.slane %v5166_v7, 1 }
 0x80c   :  { %13876 = vst [vmem:[#allocation65_spill] sm:$0xff] %v12569_v47  ;;  %v7197_v33 = vpop.f32.mrf.mxu3 }
 0x80d   :  { %v12571_v17 = vadd.f32 %v7366_v20, %v7197_v33  ;;  %v5169_v42 = vsel %vm470_vm0, %v5164_v31, %v5168_v39  ;;  %v13884_v31 = vld [vmem:[#allocation122_spill] sm:$0xff] }
 0x80e   :  { %v6776_v34 = vpop.f32.mrf.mxu1 }
 0x80f   :  { %13877 = vst [vmem:[#allocation101_spill] sm:$0xff] %v12571_v17  ;;  %v12576_v60 = vadd.f32 %v6776_v34, %v12393_v49  ;;  %v13881_v49 = vld [vmem:[#allocation89_spill] sm:$0xff] }
 0x811   :  { %13878 = vst [vmem:[#allocation104_spill] sm:$0xff] %v12576_v60  ;;  %7524 = vmatmul.bf16.gmra.mxu1 %v13818_v18  ;;  %v6837_v51 = vpop.f32.mrf.mxu2  ;;  %v13882_v18 = vld [vmem:[#allocation18_spill] sm:$0xff] }
 0x812   :  { %v12580_v40 = vadd.f32 %v6837_v51, %v13879_v3  ;;  %v5477_v3 = vrot.slane %v13884_v31, 1  ;;  %v13888_v31 = vld [vmem:[#allocation30_spill] sm:$0xff] }
 0x813   :  { %v7371_v47 = vpop.f32.mrf.mxu0 }
 0x814   :  { %v7199_v33 = vpop.f32.mrf.mxu3 }
 0x815   :  { %v12582_v20 = vadd.f32 %v7368_v5, %v7199_v33 }
 0x816   :  { %v6778_v17 = vpop.f32.mrf.mxu1  ;;  %6879 = vmatmul.bf16.gmra.mxu2 %v13881_v49  ;;  %7410 = vmatmul.bf16.gmra.mxu0 %v5169_v42  ;;  %v13885_v42 = vld [vmem:[#allocation21_spill] sm:$0xff] }
 0x817   :  { %v12586_v53 = vadd.f32 %v6778_v17, %v12402_v12  ;;  %v9383_v12 = vld [vmem:[#allocation2 + $0xd8] sm:$0xff] }
 0x818   :  { %v5476_v17 = vrot.slane %v9383_v12, 1 }
 0x819   :  { %13880 = vst [vmem:[#allocation56_spill] sm:$0xff] %v12586_v53  ;;  %7241 = vmatmul.bf16.gmra.mxu3 %v12558_v22  ;;  %v6840_v7 = vpop.f32.mrf.mxu2 }
 0x81a   :  { %v12591_v41 = vadd.f32 %v6840_v7, %v13882_v18 }
 0x81b   :  { %v7373_v5 = vpop.f32.mrf.mxu0 }
 0x81c   :  { %v7202_v51 = vpop.f32.mrf.mxu3 }
 0x81d   :  { %v12593_v1 = vadd.f32 %v7371_v47, %v7202_v51  ;;  %v5478_v51 = vsel %vm939_vm1, %v5476_v17, %v5477_v3 }
 0x81e   :  { %v6781_v34 = vpop.f32.mrf.mxu1 }
 0x81f   :  { %v12596_v39 = vadd.f32 %v6781_v34, %v12408_v13  ;;  %v9384_v34 = vld [vmem:[#allocation2 + $0xf0] sm:$0xff] }
 0x821   :  { %13883 = vst [vmem:[#allocation62_spill] sm:$0xff] %v12596_v39  ;;  %7529 = vmatmul.bf16.gmra.mxu1 %v13824_v44  ;;  %v6842_v33 = vpop.f32.mrf.mxu2  ;;  %v13887_v44 = vld [vmem:[#allocation98_spill] sm:$0xff] }
 0x822   :  { %v12601_v53 = vadd.f32 %v6842_v33, %v13885_v42 }
 0x823   :  { %v7376_v47 = vpop.f32.mrf.mxu0 }
 0x824   :  { %v7204_v7 = vpop.f32.mrf.mxu3 }
 0x825   :  { %v12603_v18 = vadd.f32 %v7373_v5, %v7204_v7 }
 0x826   :  { %v6783_v60 = vpop.f32.mrf.mxu1  ;;  %6884 = vmatmul.bf16.gmra.mxu2 %v5478_v51  ;;  %7415 = vmatmul.bf16.gmra.mxu0 %v13887_v44 }
 0x827   :  { %v12607_v13 = vadd.f32 %v6783_v60, %v12417_v48  ;;  %v13890_v60 = vld [vmem:[#allocation38_spill] sm:$0xff] }
 0x829   :  { %13886 = vst [vmem:[#allocation102_spill] sm:$0xff] %v12607_v13  ;;  %7246 = vmatmul.bf16.gmra.mxu3 %v9384_v34  ;;  %v6845_v12 = vpop.f32.mrf.mxu2 }
 0x82a   :  { %v12611_v39 = vadd.f32 %v6845_v12, %v13888_v31 }
 0x82b   :  { %v7378_v5 = vpop.f32.mrf.mxu0 }
 0x82c   :  { %v7207_v33 = vpop.f32.mrf.mxu3 }
 0x82d   :  { %v12613_v42 = vadd.f32 %v7376_v47, %v7207_v33  ;;  %v13892_v47 = vld [vmem:[#allocation99_spill] sm:$0xff]  ;;  %v13893_v33 = vld [vmem:[#allocation110_spill] sm:$0xff] }
 0x82e   :  { %v6786_v7 = vpop.f32.mrf.mxu1 }
 0x82f   :  { %v12616_v17 = vadd.f32 %v6786_v7, %v12423_v50  ;;  %v9385_v50 = vld [vmem:[#allocation2 + $0xfc] sm:$0xff] }
 0x831   :  { %13889 = vst [vmem:[#allocation103_spill] sm:$0xff] %v12616_v17  ;;  %7534 = vmatmul.bf16.gmra.mxu1 %v13830_v38  ;;  %v6847_v48 = vpop.f32.mrf.mxu2  ;;  %v13894_v38 = vld [vmem:[#allocation42_spill] sm:$0xff] }
 0x832   :  { %v12620_v3 = vadd.f32 %v6847_v48, %v13890_v60 }
 0x833   :  { %v7381_v34 = vpop.f32.mrf.mxu0 }
 0x834   :  { %v7209_v51 = vpop.f32.mrf.mxu3 }
 0x835   :  { %v12622_v44 = vadd.f32 %v7378_v5, %v7209_v51 }
 0x836   :  { %v6788_v12 = vpop.f32.mrf.mxu1  ;;  %6889 = vmatmul.bf16.gmra.mxu2 %v13892_v47  ;;  %7420 = vmatmul.bf16.gmra.mxu0 %v13893_v33 }
 0x837   :  { %v12625_v31 = vadd.f32 %v6788_v12, %v12432_v19  ;;  %v13897_v12 = vld [vmem:[#allocation41_spill] sm:$0xff] }
 0x839   :  { %13891 = vst [vmem:[#allocation72_spill] sm:$0xff] %v12625_v31  ;;  %7251 = vmatmul.bf16.gmra.mxu3 %v9385_v50  ;;  %v6850_v7 = vpop.f32.mrf.mxu2 }
 0x83a   :  { %v12630_v17 = vadd.f32 %v6850_v7, %v13894_v38 }
 0x83b   :  { %v7383_v5 = vpop.f32.mrf.mxu0 }
 0x83c   :  { %13895 = vst [vmem:[#allocation81_spill] sm:$0xff] %v12630_v17  ;;  %v7212_v48 = vpop.f32.mrf.mxu3  ;;  %v13907_v17 = vld [vmem:[#allocation111_spill] sm:$0xff] }
 0x83d   :  { %v12632_v60 = vadd.f32 %v7381_v34, %v7212_v48  ;;  %v13901_v34 = vld [vmem:[#allocation107_spill] sm:$0xff] }
 0x83e   :  { %v6791_v51 = vpop.f32.mrf.mxu1 }
 0x83f   :  { %v12635_v13 = vadd.f32 %v6791_v51, %v12438_v23  ;;  %v9386_v23 = vld [vmem:[#allocation2 + $0x108] sm:$0xff] }
 0x841   :  { %13896 = vst [vmem:[#allocation64_spill] sm:$0xff] %v12635_v13  ;;  %7539 = vmatmul.bf16.gmra.mxu1 %v13836_v30  ;;  %v6852_v19 = vpop.f32.mrf.mxu2  ;;  %v13902_v30 = vld [vmem:[#allocation47_spill] sm:$0xff] }
 0x842   :  { %v12639_v47 = vadd.f32 %v6852_v19, %v13897_v12 }
 0x843   :  { %v7386_v31 = vpop.f32.mrf.mxu0 }
 0x844   :  { %13898 = vst [vmem:[#allocation105_spill] sm:$0xff] %v12639_v47  ;;  %v7214_v33 = vpop.f32.mrf.mxu3 }
 0x845   :  { %v12641_v50 = vadd.f32 %v7383_v5, %v7214_v33 }
 0x846   :  { %v6793_v7 = vpop.f32.mrf.mxu1  ;;  %6894 = vmatmul.bf16.gmra.mxu2 %v13901_v34  ;;  %7425 = vmatmul.bf16.gmra.mxu0 %v11980_v25 }
 0x847   :  { %13899 = vst [vmem:[#allocation74_spill] sm:$0xff] %v12641_v50  ;;  %v12644_v38 = vadd.f32 %v6793_v7, %v12447_v2  ;;  %v12657_v2 = vld [vmem:[%s13125_s4] ss:$0 sm:$0xff]  ;;  %v13905_v7 = vld [vmem:[#allocation10_spill] sm:$0xff] }
 0x848   :  { %v7797_v25 = vunpack.c.l.bf16 %v13905_v7 }
 0x849   :  { %13900 = vst [vmem:[#allocation84_spill] sm:$0xff] %v12644_v38  ;;  %7256 = vmatmul.bf16.gmra.mxu3 %v9386_v23  ;;  %v6855_v48 = vpop.f32.mrf.mxu2 }
 0x84a   :  { %v12649_v51 = vadd.f32 %v6855_v48, %v13902_v30 }
 0x84b   :  { %v7388_v5 = vpop.f32.mrf.mxu0 }
 0x84c   :  { %13903 = vst [vmem:[#allocation66_spill] sm:$0xff] %v12649_v51  ;;  %v7217_v19 = vpop.f32.mrf.mxu3 }
 0x84d   :  { %v12651_v12 = vadd.f32 %v7386_v31, %v7217_v19  ;;  %v13906_v31 = vld [vmem:[#allocation53_spill] sm:$0xff] }
 0x84e   :  { %v7505_v33 = vpop.f32.mrf.mxu1 }
 0x84f   :  { %13904 = vst [vmem:[#allocation106_spill] sm:$0xff] %v12651_v12  ;;  %v7506_v13 = vadd.f32 %v7505_v33, %v12452_v29 }
 0x851   :  { %v7665_v23 = vadd.f32 %v7506_v13, %v12450_v27  ;;  %7544 = vmatmul.bf16.gmra.mxu1 %v13842_v10  ;;  %v6857_v30 = vpop.f32.mrf.mxu2  ;;  %v7798_v27 = vunpack.c.h.bf16 %v13905_v7  ;;  %v9387_v13 = vld [vmem:[#allocation2 + $0x114] sm:$0xff] }
 0x852   :  { %v12664_v19 = vadd.f32 %v6857_v30, %v13906_v31 }
 0x853   :  { %v7733_v48 = vadd.f32 %v12657_v2, %v7665_v23  ;;  %v7391_v33 = vpop.f32.mrf.mxu0 }
 0x854   :  { %v7219_v38 = vpop.f32.mrf.mxu3 }
 0x855   :  { %v7861_v51 = vadd.f32 %v7797_v25, %v7733_v48  ;;  %v12666_v29 = vadd.f32 %v7388_v5, %v7219_v38  ;;  %v13908_v5 = vld [vmem:[#allocation57_spill] sm:$0xff] }
 0x856   :  { %v7507_v12 = vpop.f32.mrf.mxu1  ;;  %6899 = vmatmul.bf16.gmra.mxu2 %v13907_v17  ;;  %7430 = vmatmul.bf16.gmra.mxu0 %v12006_v63 }
 0x857   :  { %v7925_v47 = vmax.f32 %v7861_v51, 0.0  ;;  %v7508_v50 = vadd.f32 %v7507_v12, %v12461_v45 }
 0x859   :  { %7989 = vst [vmem:[#allocation6] sm:$0xff] %v7925_v47  ;;  %v7666_v10 = vadd.f32 %v7508_v50, %v12459_v21  ;;  %7261 = vmatmul.bf16.gmra.mxu3 %v9387_v13  ;;  %v6860_v38 = vpop.f32.mrf.mxu2  ;;  %v13909_v47 = vld [vmem:[#allocation13_spill] sm:$0xff] }
 0x85a   :  { %v12675_v23 = vadd.f32 %v6860_v38, %v13908_v5  ;;  %v7799_v50 = vunpack.c.l.bf16 %v13909_v47 }
 0x85b   :  { %v7734_v25 = vadd.f32 %v12657_v2, %v7666_v10  ;;  %v7393_v12 = vpop.f32.mrf.mxu0 }
 0x85c   :  { %v7222_v51 = vpop.f32.mrf.mxu3 }
 0x85d   :  { %v7862_v48 = vadd.f32 %v7798_v27, %v7734_v25  ;;  %v12677_v45 = vadd.f32 %v7391_v33, %v7222_v51 }
 0x85e   :  { %v7510_v30 = vpop.f32.mrf.mxu1 }
 0x85f   :  { %v7926_v63 = vmax.f32 %v7862_v48, 0.0  ;;  %v7511_v7 = vadd.f32 %v7510_v30, %v12471_v14  ;;  %v7800_v48 = vunpack.c.h.bf16 %v13909_v47  ;;  %v13911_v47 = vld [vmem:[#allocation16_spill] sm:$0xff] }
 0x861   :  { %7990 = vst [vmem:[#allocation6 + $0x8] sm:$0xff] %v7926_v63  ;;  %v7667_v21 = vadd.f32 %v7511_v7, %v12469_v57  ;;  %7549 = vmatmul.bf16.gmra.mxu1 %v13848_v4  ;;  %v6862_v10 = vpop.f32.mrf.mxu2  ;;  %v13910_v57 = vld [vmem:[#allocation113_spill] sm:$0xff] }
 0x862   :  { %v12685_v13 = vadd.f32 %v6862_v10, %v12278_v24  ;;  %v9388_v24 = vld [vmem:[#allocation2 + $0x120] sm:$0xff] }
 0x863   :  { %v7735_v31 = vadd.f32 %v12657_v2, %v7667_v21  ;;  %v7396_v38 = vpop.f32.mrf.mxu0 }
 0x864   :  { %v7224_v33 = vpop.f32.mrf.mxu3 }
 0x865   :  { %v7863_v27 = vadd.f32 %v7799_v50, %v7735_v31  ;;  %v12687_v25 = vadd.f32 %v7393_v12, %v7224_v33  ;;  %v7801_v33 = vunpack.c.l.bf16 %v13911_v47 }
 0x866   :  { %v7512_v5 = vpop.f32.mrf.mxu1  ;;  %6904 = vmatmul.bf16.gmra.mxu2 %v13910_v57  ;;  %7435 = vmatmul.bf16.gmra.mxu0 %v12033_v58 }
 0x867   :  { %v7927_v14 = vmax.f32 %v7863_v27, 0.0  ;;  %v7513_v51 = vadd.f32 %v7512_v5, %v12480_v56 }
 0x869   :  { %7991 = vst [vmem:[#allocation6 + $0x10] sm:$0xff] %v7927_v14  ;;  %v7668_v4 = vadd.f32 %v7513_v51, %v12478_v37  ;;  %7266 = vmatmul.bf16.gmra.mxu3 %v9388_v24  ;;  %v6865_v12 = vpop.f32.mrf.mxu2 }
 0x86a   :  { %v12696_v63 = vadd.f32 %v6865_v12, %v12293_v0 }
 0x86b   :  { %v7736_v30 = vadd.f32 %v12657_v2, %v7668_v4  ;;  %v7398_v50 = vpop.f32.mrf.mxu0 }
 0x86c   :  { %v7227_v7 = vpop.f32.mrf.mxu3 }
 0x86d   :  { %v7864_v21 = vadd.f32 %v7800_v48, %v7736_v30  ;;  %v12698_v56 = vadd.f32 %v7396_v38, %v7227_v7  ;;  %v7802_v30 = vunpack.c.h.bf16 %v13911_v47  ;;  %v13913_v47 = vld [vmem:[#allocation19_spill] sm:$0xff] }
 0x86e   :  { %v7515_v31 = vpop.f32.mrf.mxu1 }
 0x86f   :  { %v7928_v58 = vmax.f32 %v7864_v21, 0.0  ;;  %v7516_v10 = vadd.f32 %v7515_v31, %v12490_v9 }
 0x871   :  { %7992 = vst [vmem:[#allocation6 + $0x18] sm:$0xff] %v7928_v58  ;;  %v7669_v37 = vadd.f32 %v7516_v10, %v12488_v46  ;;  %7554 = vmatmul.bf16.gmra.mxu1 %v13854_v11  ;;  %v6867_v0 = vpop.f32.mrf.mxu2  ;;  %v13912_v46 = vld [vmem:[#allocation114_spill] sm:$0xff] }
 0x872   :  { %v12706_v5 = vadd.f32 %v6867_v0, %v12300_v26  ;;  %v9389_v26 = vld [vmem:[#allocation2 + $0x12c] sm:$0xff] }
 0x873   :  { %v7737_v27 = vadd.f32 %v12657_v2, %v7669_v37  ;;  %v7401_v4 = vpop.f32.mrf.mxu0 }
 0x874   :  { %v7229_v38 = vpop.f32.mrf.mxu3 }
 0x875   :  { %v7865_v14 = vadd.f32 %v7801_v33, %v7737_v27  ;;  %v12708_v51 = vadd.f32 %v7398_v50, %v7229_v38  ;;  %v7803_v33 = vunpack.c.l.bf16 %v13913_v47 }
 0x876   :  { %v7517_v48 = vpop.f32.mrf.mxu1  ;;  %6909 = vmatmul.bf16.gmra.mxu2 %v13912_v46  ;;  %7440 = vmatmul.bf16.gmra.mxu0 %v12060_v32 }
 0x877   :  { %v7929_v9 = vmax.f32 %v7865_v14, 0.0  ;;  %v7518_v24 = vadd.f32 %v7517_v48, %v12499_v62 }
 0x879   :  { %7993 = vst [vmem:[#allocation6 + $0x20] sm:$0xff] %v7929_v9  ;;  %v7670_v11 = vadd.f32 %v7518_v24, %v12497_v59  ;;  %7271 = vmatmul.bf16.gmra.mxu3 %v9389_v26  ;;  %v6870_v7 = vpop.f32.mrf.mxu2 }
 0x87a   :  { %v12717_v21 = vadd.f32 %v6870_v7, %v12315_v55 }
 0x87b   :  { %v7738_v12 = vadd.f32 %v12657_v2, %v7670_v11  ;;  %v7403_v58 = vpop.f32.mrf.mxu0  ;;  %v7804_v11 = vunpack.c.h.bf16 %v13913_v47  ;;  %v13916_v47 = vld [vmem:[#allocation135_spill] sm:$0xff] }
 0x87c   :  { %v7232_v50 = vpop.f32.mrf.mxu3 }
 0x87d   :  { %v7866_v31 = vadd.f32 %v7802_v30, %v7738_v12  ;;  %v12719_v62 = vadd.f32 %v7401_v4, %v7232_v50 }
 0x87e   :  { %v7520_v10 = vpop.f32.mrf.mxu1 }
 0x87f   :  { %v7930_v32 = vmax.f32 %v7866_v31, 0.0  ;;  %v7521_v37 = vadd.f32 %v7520_v10, %v12509_v61 }
 0x881   :  { %7994 = vst [vmem:[#allocation6 + $0x28] sm:$0xff] %v7930_v32  ;;  %v7671_v59 = vadd.f32 %v7521_v37, %v12507_v54  ;;  %7559 = vmatmul.bf16.gmra.mxu1 %v13862_v36  ;;  %v6872_v55 = vpop.f32.mrf.mxu2  ;;  %v13914_v54 = vld [vmem:[#allocation115_spill] sm:$0xff]  ;;  %v13915_v32 = vld [vmem:[#allocation22_spill] sm:$0xff] }
 0x882   :  { %v12727_v0 = vadd.f32 %v6872_v55, %v12324_v35  ;;  %v9390_v35 = vld [vmem:[#allocation2 + $0x138] sm:$0xff]  ;;  %v7805_v37 = vunpack.c.l.bf16 %v13915_v32 }
 0x883   :  { %v7739_v27 = vadd.f32 %v12657_v2, %v7671_v59  ;;  %v7406_v48 = vpop.f32.mrf.mxu0 }
 0x884   :  { %v7234_v38 = vpop.f32.mrf.mxu3 }
 0x885   :  { %v7867_v14 = vadd.f32 %v7803_v33, %v7739_v27  ;;  %v12729_v4 = vadd.f32 %v7403_v58, %v7234_v38 }
 0x886   :  { %v7522_v9 = vpop.f32.mrf.mxu1  ;;  %6914 = vmatmul.bf16.gmra.mxu2 %v13914_v54  ;;  %7445 = vmatmul.bf16.gmra.mxu0 %v12087_v43 }
 0x887   :  { %v7931_v61 = vmax.f32 %v7867_v14, 0.0  ;;  %v7523_v24 = vadd.f32 %v7522_v9, %v12518_v8  ;;  %v13917_v9 = vld [vmem:[#allocation43_spill] sm:$0xff] }
 0x889   :  { %7995 = vst [vmem:[#allocation6 + $0x30] sm:$0xff] %v7931_v61  ;;  %v7672_v36 = vadd.f32 %v7523_v24, %v12516_v28  ;;  %7276 = vmatmul.bf16.gmra.mxu3 %v9390_v35  ;;  %v6875_v26 = vpop.f32.mrf.mxu2  ;;  %v13919_v24 = vld [vmem:[#allocation118_spill] sm:$0xff]  ;;  %v9391_v35 = vld [vmem:[#allocation2 + $0x144] sm:$0xff] }
 0x88a   :  { %v12738_v12 = vadd.f32 %v6875_v26, %v12331_v16 }
 0x88b   :  { %v7740_v30 = vadd.f32 %v12657_v2, %v7672_v36  ;;  %v7408_v31 = vpop.f32.mrf.mxu0 }
 0x88c   :  { %v7237_v7 = vpop.f32.mrf.mxu3 }
 0x88d   :  { %v7868_v50 = vadd.f32 %v7804_v11, %v7740_v30  ;;  %v12740_v8 = vadd.f32 %v7406_v48, %v7237_v7  ;;  %v7806_v11 = vunpack.c.h.bf16 %v13915_v32  ;;  %v13921_v7 = vld [vmem:[#allocation61_spill] sm:$0xff] }
 0x88e   :  { %v7525_v58 = vpop.f32.mrf.mxu1 }
 0x88f   :  { %v7932_v43 = vmax.f32 %v7868_v50, 0.0  ;;  %v7526_v10 = vadd.f32 %v7525_v58, %v12528_v15 }
 0x891   :  { %7996 = vst [vmem:[#allocation6 + $0x38] sm:$0xff] %v7932_v43  ;;  %v7673_v28 = vadd.f32 %v7526_v10, %v12526_v52  ;;  %7564 = vmatmul.bf16.gmra.mxu1 %v13872_v6  ;;  %v6877_v16 = vpop.f32.mrf.mxu2  ;;  %v13918_v52 = vld [vmem:[#allocation116_spill] sm:$0xff]  ;;  %v13920_v6 = vld [vmem:[#allocation97_spill] sm:$0xff] }
 0x892   :  { %v12748_v33 = vadd.f32 %v6877_v16, %v13916_v47  ;;  %v13923_v47 = vld [vmem:[#allocation108_spill] sm:$0xff] }
 0x893   :  { %v7741_v59 = vadd.f32 %v12657_v2, %v7673_v28  ;;  %v7411_v14 = vpop.f32.mrf.mxu0 }
 0x894   :  { %v7239_v27 = vpop.f32.mrf.mxu3 }
 0x895   :  { %v7869_v55 = vadd.f32 %v7805_v37, %v7741_v59  ;;  %v12750_v38 = vadd.f32 %v7408_v31, %v7239_v27  ;;  %v13922_v59 = vld [vmem:[#allocation109_spill] sm:$0xff] }
 0x896   :  { %v7527_v48 = vpop.f32.mrf.mxu1  ;;  %6919 = vmatmul.bf16.gmra.mxu2 %v13918_v52  ;;  %7450 = vmatmul.bf16.gmra.mxu0 %v13919_v24  ;;  %v13924_v27 = vld [vmem:[#allocation25_spill] sm:$0xff] }
 0x897   :  { %v7933_v15 = vmax.f32 %v7869_v55, 0.0  ;;  %v7528_v61 = vadd.f32 %v7527_v48, %v13917_v9  ;;  %v7807_v55 = vunpack.c.l.bf16 %v13924_v27  ;;  %v13925_v9 = vld [vmem:[#allocation77_spill] sm:$0xff] }
 0x899   :  { %7997 = vst [vmem:[#allocation6 + $0x40] sm:$0xff] %v7933_v15  ;;  %v7674_v36 = vadd.f32 %v7528_v61, %v13920_v6  ;;  %7281 = vmatmul.bf16.gmra.mxu3 %v9391_v35  ;;  %v6880_v26 = vpop.f32.mrf.mxu2 }
 0x89a   :  { %v12759_v50 = vadd.f32 %v6880_v26, %v13921_v7  ;;  %v13927_v7 = vld [vmem:[#allocation117_spill] sm:$0xff] }
 0x89b   :  { %v7742_v30 = vadd.f32 %v12657_v2, %v7674_v36  ;;  %v7413_v10 = vpop.f32.mrf.mxu0 }
 0x89c   :  { %v7242_v31 = vpop.f32.mrf.mxu3 }
 0x89d   :  { %v7870_v58 = vadd.f32 %v7806_v11, %v7742_v30  ;;  %v12761_v43 = vadd.f32 %v7411_v14, %v7242_v31  ;;  %v13926_v30 = vld [vmem:[#allocation112_spill] sm:$0xff] }
 0x89e   :  { %v7530_v28 = vpop.f32.mrf.mxu1  ;;  %v13928_v31 = vld [vmem:[#allocation120_spill] sm:$0xff] }
 0x89f   :  { %v7934_v37 = vmax.f32 %v7870_v58, 0.0  ;;  %v7531_v16 = vadd.f32 %v7530_v28, %v13922_v59  ;;  %v7808_v28 = vunpack.c.h.bf16 %v13924_v27 }
 0x8a1   :  { %7998 = vst [vmem:[#allocation6 + $0x48] sm:$0xff] %v7934_v37  ;;  %v7675_v32 = vadd.f32 %v7531_v16, %v13923_v47  ;;  %7569 = vmatmul.bf16.gmra.mxu1 %v13881_v49  ;;  %v6882_v15 = vpop.f32.mrf.mxu2  ;;  %v13929_v49 = vld [vmem:[#allocation63_spill] sm:$0xff]  ;;  %v9392_v37 = vld [vmem:[#allocation2 + $0x150] sm:$0xff] }
 0x8a2   :  { %v12769_v61 = vadd.f32 %v6882_v15, %v13925_v9  ;;  %v13930_v16 = vld [vmem:[#allocation71_spill] sm:$0xff] }
 0x8a3   :  { %v7743_v48 = vadd.f32 %v12657_v2, %v7675_v32  ;;  %v7416_v36 = vpop.f32.mrf.mxu0 }
 0x8a4   :  { %v7244_v14 = vpop.f32.mrf.mxu3 }
 0x8a5   :  { %v7871_v24 = vadd.f32 %v7807_v55, %v7743_v48  ;;  %v12771_v6 = vadd.f32 %v7413_v10, %v7244_v14 }
 0x8a6   :  { %v7532_v11 = vpop.f32.mrf.mxu1  ;;  %6924 = vmatmul.bf16.gmra.mxu2 %v13927_v7  ;;  %7455 = vmatmul.bf16.gmra.mxu0 %v13928_v31  ;;  %v13934_v31 = vld [vmem:[#allocation96_spill] sm:$0xff] }
 0x8a7   :  { %v7935_v35 = vmax.f32 %v7871_v24, 0.0  ;;  %v7533_v26 = vadd.f32 %v7532_v11, %v13926_v30  ;;  %v13931_v24 = vld [vmem:[#allocation101_spill] sm:$0xff]  ;;  %v13933_v30 = vld [vmem:[#allocation28_spill] sm:$0xff] }
 0x8a9   :  { %7999 = vst [vmem:[#allocation6 + $0x50] sm:$0xff] %v7935_v35  ;;  %v7676_v58 = vadd.f32 %v7533_v26, %v13929_v49  ;;  %7286 = vmatmul.bf16.gmra.mxu3 %v9392_v37  ;;  %v6885_v10 = vpop.f32.mrf.mxu2  ;;  %v13932_v35 = vld [vmem:[#allocation65_spill] sm:$0xff]  ;;  %v7809_v26 = vunpack.c.l.bf16 %v13933_v30  ;;  %v13935_v37 = vld [vmem:[#allocation80_spill] sm:$0xff] }
 0x8aa   :  { %v12780_v47 = vadd.f32 %v6885_v10, %v13930_v16 }
 0x8ab   :  { %v7744_v59 = vadd.f32 %v12657_v2, %v7676_v58  ;;  %v7418_v15 = vpop.f32.mrf.mxu0 }
 0x8ac   :  { %v7247_v32 = vpop.f32.mrf.mxu3 }
 0x8ad   :  { %v7872_v55 = vadd.f32 %v7808_v28, %v7744_v59  ;;  %v12782_v48 = vadd.f32 %v7416_v36, %v7247_v32 }
 0x8ae   :  { %v7535_v9 = vpop.f32.mrf.mxu1 }
 0x8af   :  { %v7936_v14 = vmax.f32 %v7872_v55, 0.0  ;;  %v7536_v11 = vadd.f32 %v7535_v9, %v13931_v24  ;;  %v13937_v24 = vld [vmem:[#allocation123_spill] sm:$0xff] }
 0x8b1   :  { %8000 = vst [vmem:[#allocation6 + $0x58] sm:$0xff] %v7936_v14  ;;  %v7677_v27 = vadd.f32 %v7536_v11, %v13932_v35  ;;  %7574 = vmatmul.bf16.gmra.mxu1 %v13934_v31  ;;  %v6887_v58 = vpop.f32.mrf.mxu2  ;;  %v13936_v14 = vld [vmem:[#allocation119_spill] sm:$0xff]  ;;  %v7810_v35 = vunpack.c.h.bf16 %v13933_v30 }
 0x8b2   :  { %v12790_v10 = vadd.f32 %v6887_v58, %v13935_v37  ;;  %v13939_v37 = vld [vmem:[#allocation69_spill] sm:$0xff] }
 0x8b3   :  { %v7745_v49 = vadd.f32 %v12657_v2, %v7677_v27  ;;  %v7421_v16 = vpop.f32.mrf.mxu0  ;;  %v9393_v27 = vld [vmem:[#allocation2 + $0x15c] sm:$0xff] }
 0x8b4   :  { %v7249_v36 = vpop.f32.mrf.mxu3 }
 0x8b5   :  { %v7873_v28 = vadd.f32 %v7809_v26, %v7745_v49  ;;  %v12792_v59 = vadd.f32 %v7418_v15, %v7249_v36  ;;  %v5473_v26 = vrot.slane %v12558_v22, 1  ;;  %v13938_v15 = vld [vmem:[#allocation58_spill] sm:$0xff] }
 0x8b6   :  { %v7537_v32 = vpop.f32.mrf.mxu1  ;;  %6929 = vmatmul.bf16.gmra.mxu2 %v13936_v14  ;;  %7460 = vmatmul.bf16.gmra.mxu0 %v13937_v24  ;;  %v5474_v31 = vrot.slane %v13938_v15, 1 }
 0x8b7   :  { %v7937_v55 = vmax.f32 %v7873_v28, 0.0  ;;  %v7538_v9 = vadd.f32 %v7537_v32, %v12582_v20 }
 0x8b9   :  { %8001 = vst [vmem:[#allocation6 + $0x60] sm:$0xff] %v7937_v55  ;;  %v7678_v11 = vadd.f32 %v7538_v9, %v12580_v40  ;;  %7291 = vmatmul.bf16.gmra.mxu3 %v9393_v27  ;;  %v6890_v58 = vpop.f32.mrf.mxu2  ;;  %v5475_v40 = vsel %vm939_vm1, %v5473_v26, %v5474_v31  ;;  %v13940_v27 = vld [vmem:[#allocation31_spill] sm:$0xff] }
 0x8ba   :  { %v12803_v20 = vadd.f32 %v6890_v58, %v13939_v37  ;;  %v13941_v37 = vld [vmem:[#allocation12_spill] sm:$0xff] }
 0x8bb   :  { %v7746_v49 = vadd.f32 %v12657_v2, %v7678_v11  ;;  %v7423_v24 = vpop.f32.mrf.mxu0  ;;  %v7811_v11 = vunpack.c.l.bf16 %v13940_v27 }
 0x8bc   :  { %v7252_v36 = vpop.f32.mrf.mxu3 }
 0x8bd   :  { %v7874_v28 = vadd.f32 %v7810_v35, %v7746_v49  ;;  %v12805_v32 = vadd.f32 %v7421_v16, %v7252_v36 }
 0x8be   :  { %v7540_v55 = vpop.f32.mrf.mxu1 }
 0x8bf   :  { %v7938_v30 = vmax.f32 %v7874_v28, 0.0  ;;  %v7541_v9 = vadd.f32 %v7540_v55, %v12593_v1  ;;  %v13942_v28 = vld [vmem:[#allocation121_spill] sm:$0xff] }
 0x8c1   :  { %8002 = vst [vmem:[#allocation6 + $0x68] sm:$0xff] %v7938_v30  ;;  %v7679_v22 = vadd.f32 %v7541_v9, %v12591_v41  ;;  %7579 = vmatmul.bf16.gmra.mxu1 %v5475_v40  ;;  %v6892_v58 = vpop.f32.mrf.mxu2  ;;  %v13943_v41 = vld [vmem:[#allocation125_spill] sm:$0xff]  ;;  %v7812_v40 = vunpack.c.h.bf16 %v13940_v27  ;;  %v9394_v30 = vld [vmem:[#allocation2 + $0x168] sm:$0xff]  ;;  %v13945_v27 = vld [vmem:[#allocation34_spill] sm:$0xff] }
 0x8c2   :  { %v12813_v35 = vadd.f32 %v6892_v58, %v13941_v37 }
 0x8c3   :  { %v7747_v15 = vadd.f32 %v12657_v2, %v7679_v22  ;;  %v7426_v9 = vpop.f32.mrf.mxu0 }
 0x8c4   :  { %v7254_v16 = vpop.f32.mrf.mxu3 }
 0x8c5   :  { %v7875_v49 = vadd.f32 %v7811_v11, %v7747_v15  ;;  %v12815_v36 = vadd.f32 %v7423_v24, %v7254_v16  ;;  %v13944_v11 = vld [vmem:[#allocation82_spill] sm:$0xff] }
 0x8c6   :  { %v7542_v26 = vpop.f32.mrf.mxu1  ;;  %6934 = vmatmul.bf16.gmra.mxu2 %v13942_v28  ;;  %7465 = vmatmul.bf16.gmra.mxu0 %v13943_v41 }
 0x8c7   :  { %v7939_v31 = vmax.f32 %v7875_v49, 0.0  ;;  %v7543_v1 = vadd.f32 %v7542_v26, %v12603_v18 }
 0x8c9   :  { %8003 = vst [vmem:[#allocation6 + $0x70] sm:$0xff] %v7939_v31  ;;  %v7680_v55 = vadd.f32 %v7543_v1, %v12601_v53  ;;  %7296 = vmatmul.bf16.gmra.mxu3 %v9394_v30  ;;  %v6895_v24 = vpop.f32.mrf.mxu2  ;;  %v7813_v31 = vunpack.c.l.bf16 %v13945_v27  ;;  %v13946_v30 = vld [vmem:[#allocation83_spill] sm:$0xff] }
 0x8ca   :  { %v12824_v15 = vadd.f32 %v6895_v24, %v13944_v11 }
 0x8cb   :  { %v7748_v22 = vadd.f32 %v12657_v2, %v7680_v55  ;;  %v7428_v55 = vpop.f32.mrf.mxu0 }
 0x8cc   :  { %v7257_v58 = vpop.f32.mrf.mxu3 }
 0x8cd   :  { %v7876_v18 = vadd.f32 %v7812_v40, %v7748_v22  ;;  %v12826_v37 = vadd.f32 %v7426_v9, %v7257_v58 }
 0x8ce   :  { %v7545_v16 = vpop.f32.mrf.mxu1 }
 0x8cf   :  { %v7940_v49 = vmax.f32 %v7876_v18, 0.0  ;;  %v7546_v26 = vadd.f32 %v7545_v16, %v12613_v42  ;;  %v13948_v18 = vld [vmem:[#allocation127_spill] sm:$0xff]  ;;  %v7814_v16 = vunpack.c.h.bf16 %v13945_v27 }
 0x8d1   :  { %8004 = vst [vmem:[#allocation6 + $0x78] sm:$0xff] %v7940_v49  ;;  %v7681_v53 = vadd.f32 %v7546_v26, %v12611_v39  ;;  %7584 = vmatmul.bf16.gmra.mxu1 %v13901_v34  ;;  %v6897_v41 = vpop.f32.mrf.mxu2  ;;  %v13947_v39 = vld [vmem:[#allocation124_spill] sm:$0xff]  ;;  %v9395_v49 = vld [vmem:[#allocation2 + $0x174] sm:$0xff] }
 0x8d2   :  { %v12834_v24 = vadd.f32 %v6897_v41, %v13946_v30 }
 0x8d3   :  { %v7749_v1 = vadd.f32 %v12657_v2, %v7681_v53 }
 0x8d4   :  { %v7259_v40 = vpop.f32.mrf.mxu3 }
 0x8d5   :  { %v7877_v9 = vadd.f32 %v7813_v31, %v7749_v1  ;;  %v12836_v22 = vadd.f32 %v7428_v55, %v7259_v40  ;;  %v13949_v31 = vld [vmem:[#allocation9_spill] sm:$0xff] }
 0x8d6   :  { %v7547_v11 = vpop.f32.mrf.mxu1  ;;  %6939 = vmatmul.bf16.gmra.mxu2 %v13947_v39  ;;  %7470 = vmatmul.bf16.gmra.mxu0 %v13948_v18  ;;  %v13950_v40 = vld [vmem:[#allocation81_spill] sm:$0xff] }
 0x8d7   :  { %v7941_v42 = vmax.f32 %v7877_v9, 0.0  ;;  %v7548_v58 = vadd.f32 %v7547_v11, %v12622_v44  ;;  %v13951_v11 = vld [vmem:[#allocation39_spill] sm:$0xff] }
 0x8d9   :  { %8005 = vst [vmem:[#allocation6 + $0x80] sm:$0xff] %v7941_v42  ;;  %v7682_v34 = vadd.f32 %v7548_v58, %v12620_v3  ;;  %7301 = vmatmul.bf16.gmra.mxu3 %v9395_v49  ;;  %v6900_v53 = vpop.f32.mrf.mxu2  ;;  %v7815_v3 = vunpack.c.l.bf16 %v13951_v11  ;;  %v13952_v58 = vld [vmem:[#allocation33_spill] sm:$0xff] }
 0x8da   :  { %v12845_v1 = vadd.f32 %v6900_v53, %v13949_v31  ;;  %v13954_v31 = vld [vmem:[#allocation126_spill] sm:$0xff] }
 0x8db   :  { %v7750_v26 = vadd.f32 %v12657_v2, %v7682_v34 }
 0x8dd   :  { %v7878_v41 = vadd.f32 %v7814_v16, %v7750_v26  ;;  %v13953_v26 = vld [vmem:[#allocation74_spill] sm:$0xff] }
 0x8de   :  { %v7550_v55 = vpop.f32.mrf.mxu1 }
 0x8df   :  { %v7942_v44 = vmax.f32 %v7878_v41, 0.0  ;;  %v7551_v30 = vadd.f32 %v7550_v55, %v12632_v60  ;;  %v13955_v60 = vld [vmem:[#allocation129_spill] sm:$0xff] }
 0x8e0   :  { %v13956_v41 = vld [vmem:[#allocation105_spill] sm:$0xff] }
 0x8e1   :  { %8006 = vst [vmem:[#allocation6 + $0x88] sm:$0xff] %v7942_v44  ;;  %v7683_v9 = vadd.f32 %v7551_v30, %v13950_v40  ;;  %7589 = vmatmul.bf16.gmra.mxu1 %v13907_v17  ;;  %v6902_v42 = vpop.f32.mrf.mxu2  ;;  %v7816_v17 = vunpack.c.h.bf16 %v13951_v11  ;;  %v9396_v44 = vld [vmem:[#allocation2 + $0x180] sm:$0xff] }
 0x8e2   :  { %v12853_v18 = vadd.f32 %v6902_v42, %v13952_v58  ;;  %v13958_v58 = vld [vmem:[#allocation66_spill] sm:$0xff] }
 0x8e3   :  { %v7751_v27 = vadd.f32 %v12657_v2, %v7683_v9 }
 0x8e5   :  { %v7879_v34 = vadd.f32 %v7815_v3, %v7751_v27  ;;  %v13957_v27 = vld [vmem:[#allocation106_spill] sm:$0xff] }
 0x8e6   :  { %v7552_v49 = vpop.f32.mrf.mxu1  ;;  %6944 = vmatmul.bf16.gmra.mxu2 %v13954_v31  ;;  %7475 = vmatmul.bf16.gmra.mxu0 %v13955_v60 }
 0x8e7   :  { %v7943_v16 = vmax.f32 %v7879_v34, 0.0  ;;  %v7553_v53 = vadd.f32 %v7552_v49, %v13953_v26  ;;  %v13959_v49 = vld [vmem:[#allocation44_spill] sm:$0xff] }
 0x8e8   :  { %v7817_v26 = vunpack.c.l.bf16 %v13959_v49 }
 0x8e9   :  { %8007 = vst [vmem:[#allocation6 + $0x90] sm:$0xff] %v7943_v16  ;;  %v7684_v55 = vadd.f32 %v7553_v53, %v13956_v41  ;;  %7306 = vmatmul.bf16.gmra.mxu3 %v9396_v44 }
 0x8eb   :  { %v7752_v30 = vadd.f32 %v12657_v2, %v7684_v55  ;;  %v13960_v55 = vld [vmem:[#allocation128_spill] sm:$0xff] }
 0x8ed   :  { %v7880_v40 = vadd.f32 %v7816_v17, %v7752_v30  ;;  %v13961_v17 = vld [vmem:[#allocation131_spill] sm:$0xff]  ;;  %v7818_v30 = vunpack.c.h.bf16 %v13959_v49 }
 0x8ee   :  { %v7555_v9 = vpop.f32.mrf.mxu1 }
 0x8ef   :  { %v7944_v3 = vmax.f32 %v7880_v40, 0.0  ;;  %v7556_v42 = vadd.f32 %v7555_v9, %v13957_v27  ;;  %v9397_v40 = vld [vmem:[#allocation2 + $0x18c] sm:$0xff] }
 0x8f1   :  { %8008 = vst [vmem:[#allocation6 + $0x98] sm:$0xff] %v7944_v3  ;;  %v7685_v34 = vadd.f32 %v7556_v42, %v13958_v58  ;;  %7594 = vmatmul.bf16.gmra.mxu1 %v13910_v57  ;;  %v13962_v58 = vld [vmem:[#allocation49_spill] sm:$0xff] }
 0x8f3   :  { %v7753_v16 = vadd.f32 %v12657_v2, %v7685_v34  ;;  %v7819_v34 = vunpack.c.l.bf16 %v13962_v58 }
 0x8f5   :  { %v7881_v53 = vadd.f32 %v7817_v26, %v7753_v16 }
 0x8f6   :  { %v7557_v11 = vpop.f32.mrf.mxu1  ;;  %6949 = vmatmul.bf16.gmra.mxu2 %v13960_v55  ;;  %7480 = vmatmul.bf16.gmra.mxu0 %v13961_v17 }
 0x8f7   :  { %v7945_v60 = vmax.f32 %v7881_v53, 0.0  ;;  %v7558_v41 = vadd.f32 %v7557_v11, %v12666_v29  ;;  %v13963_v11 = vld [vmem:[#allocation130_spill] sm:$0xff] }
 0x8f9   :  { %8009 = vst [vmem:[#allocation6 + $0xa0] sm:$0xff] %v7945_v60  ;;  %v7686_v44 = vadd.f32 %v7558_v41, %v12664_v19  ;;  %7311 = vmatmul.bf16.gmra.mxu3 %v9397_v40  ;;  %v13964_v60 = vld [vmem:[#allocation133_spill] sm:$0xff]  ;;  %v9398_v41 = vld [vmem:[#allocation2 + $0x198] sm:$0xff] }
 0x8fb   :  { %v7754_v57 = vadd.f32 %v12657_v2, %v7686_v44 }
 0x8fd   :  { %v7882_v9 = vadd.f32 %v7818_v30, %v7754_v57  ;;  %v13965_v57 = vld [vmem:[#allocation54_spill] sm:$0xff] }
 0x8fe   :  { %v7560_v3 = vpop.f32.mrf.mxu1 }
 0x8ff   :  { %v7946_v27 = vmax.f32 %v7882_v9, 0.0  ;;  %v7561_v42 = vadd.f32 %v7560_v3, %v12677_v45  ;;  %v7821_v9 = vunpack.c.l.bf16 %v13965_v57 }
 0x901   :  { %8010 = vst [vmem:[#allocation6 + $0xa8] sm:$0xff] %v7946_v27  ;;  %v7687_v29 = vadd.f32 %v7561_v42, %v12675_v23  ;;  %7599 = vmatmul.bf16.gmra.mxu1 %v13912_v46  ;;  %v7820_v23 = vunpack.c.h.bf16 %v13962_v58  ;;  %v13966_v58 = vld [vmem:[#allocation132_spill] sm:$0xff] }
 0x903   :  { %v7755_v19 = vadd.f32 %v12657_v2, %v7687_v29 }
 0x905   :  { %v7883_v26 = vadd.f32 %v7819_v34, %v7755_v19 }
 0x906   :  { %v7562_v49 = vpop.f32.mrf.mxu1  ;;  %6954 = vmatmul.bf16.gmra.mxu2 %v13963_v11  ;;  %7485 = vmatmul.bf16.gmra.mxu0 %v13964_v60 }
 0x907   :  { %v7947_v16 = vmax.f32 %v7883_v26, 0.0  ;;  %v7563_v53 = vadd.f32 %v7562_v49, %v12687_v25 }
 0x909   :  { %8011 = vst [vmem:[#allocation6 + $0xb0] sm:$0xff] %v7947_v16  ;;  %v7688_v45 = vadd.f32 %v7563_v53, %v12685_v13  ;;  %7316 = vmatmul.bf16.gmra.mxu3 %v9398_v41  ;;  %v13967_v53 = vld [vmem:[#allocation59_spill] sm:$0xff] }
 0x90a   :  { %v7823_v60 = vunpack.c.l.bf16 %v13967_v53 }
 0x90b   :  { %v7756_v46 = vadd.f32 %v12657_v2, %v7688_v45 }
 0x90d   :  { %v7884_v17 = vadd.f32 %v7820_v23, %v7756_v46 }
 0x90e   :  { %v7565_v44 = vpop.f32.mrf.mxu1 }
 0x90f   :  { %v7948_v30 = vmax.f32 %v7884_v17, 0.0  ;;  %v7566_v40 = vadd.f32 %v7565_v44, %v12698_v56  ;;  %v7822_v56 = vunpack.c.h.bf16 %v13965_v57  ;;  %v7824_v17 = vunpack.c.h.bf16 %v13967_v53  ;;  %v12918_v53 = vpop.f32.mrf.mxu0 }
 0x911   :  { %8012 = vst [vmem:[#allocation6 + $0xb8] sm:$0xff] %v7948_v30  ;;  %v7689_v25 = vadd.f32 %v7566_v40, %v12696_v63  ;;  %7604 = vmatmul.bf16.gmra.mxu1 %v13914_v54 }
 0x913   :  { %v7757_v13 = vadd.f32 %v12657_v2, %v7689_v25  ;;  %v13968_v25 = vld [vmem:[#allocation67_spill] sm:$0xff] }
 0x914   :  { %v7825_v57 = vunpack.c.l.bf16 %v13968_v25 }
 0x915   :  { %v7885_v3 = vadd.f32 %v7821_v9, %v7757_v13 }
 0x916   :  { %v7567_v27 = vpop.f32.mrf.mxu1  ;;  %6959 = vmatmul.bf16.gmra.mxu2 %v13966_v58 }
 0x917   :  { %v7949_v42 = vmax.f32 %v7885_v3, 0.0  ;;  %v7568_v29 = vadd.f32 %v7567_v27, %v12708_v51 }
 0x919   :  { %8013 = vst [vmem:[#allocation6 + $0xc0] sm:$0xff] %v7949_v42  ;;  %v7690_v34 = vadd.f32 %v7568_v29, %v12706_v5  ;;  %v7826_v42 = vunpack.c.h.bf16 %v13968_v25 }
 0x91b   :  { %v7758_v63 = vadd.f32 %v12657_v2, %v7690_v34 }
 0x91d   :  { %v7886_v19 = vadd.f32 %v7822_v56, %v7758_v63 }
 0x91e   :  { %v7570_v26 = vpop.f32.mrf.mxu1 }
 0x91f   :  { %v7950_v49 = vmax.f32 %v7886_v19, 0.0  ;;  %v7571_v54 = vadd.f32 %v7570_v26, %v12719_v62 }
 0x921   :  { %8014 = vst [vmem:[#allocation6 + $0xc8] sm:$0xff] %v7950_v49  ;;  %v7691_v16 = vadd.f32 %v7571_v54, %v12717_v21  ;;  %7609 = vmatmul.bf16.gmra.mxu1 %v13918_v52 }
 0x923   :  { %v7759_v51 = vadd.f32 %v12657_v2, %v7691_v16 }
 0x925   :  { %v7887_v45 = vadd.f32 %v7823_v60, %v7759_v51  ;;  %v12921_v60 = vpop.f32.mrf.mxu3 }
 0x926   :  { %v7572_v5 = vpop.f32.mrf.mxu1 }
 0x927   :  { %v7951_v23 = vmax.f32 %v7887_v45, 0.0  ;;  %v7573_v41 = vadd.f32 %v7572_v5, %v12729_v4 }
 0x929   :  { %8015 = vst [vmem:[#allocation6 + $0xd0] sm:$0xff] %v7951_v23  ;;  %v7692_v46 = vadd.f32 %v7573_v41, %v12727_v0  ;;  %v13970_v23 = vld [vmem:[#allocation11_spill] sm:$0xff] }
 0x92a   :  { %v7829_v41 = vunpack.c.l.bf16 %v13970_v23 }
 0x92b   :  { %v7760_v62 = vadd.f32 %v12657_v2, %v7692_v46  ;;  %v12928_v46 = vpop.f32.mrf.mxu0 }
 0x92d   :  { %v7888_v44 = vadd.f32 %v7824_v17, %v7760_v62  ;;  %v12931_v17 = vpop.f32.mrf.mxu3 }
 0x92e   :  { %v7575_v21 = vpop.f32.mrf.mxu1 }
 0x92f   :  { %v7952_v30 = vmax.f32 %v7888_v44, 0.0  ;;  %v7576_v40 = vadd.f32 %v7575_v21, %v12740_v8 }
 0x931   :  { %8016 = vst [vmem:[#allocation6 + $0xd8] sm:$0xff] %v7952_v30  ;;  %v7693_v52 = vadd.f32 %v7576_v40, %v12738_v12  ;;  %7614 = vmatmul.bf16.gmra.mxu1 %v13927_v7  ;;  %v13969_v7 = vld [vmem:[#allocation75_spill] sm:$0xff] }
 0x932   :  { %v7827_v63 = vunpack.c.l.bf16 %v13969_v7  ;;  %v7828_v16 = vunpack.c.h.bf16 %v13969_v7 }
 0x933   :  { %v7761_v4 = vadd.f32 %v12657_v2, %v7693_v52  ;;  %v12937_v52 = vpop.f32.mrf.mxu0 }
 0x935   :  { %v7889_v9 = vadd.f32 %v7825_v57, %v7761_v4  ;;  %v12941_v57 = vpop.f32.mrf.mxu3 }
 0x936   :  { %v7577_v0 = vpop.f32.mrf.mxu1 }
 0x937   :  { %v7953_v13 = vmax.f32 %v7889_v9, 0.0  ;;  %v7578_v3 = vadd.f32 %v7577_v0, %v12750_v38 }
 0x939   :  { %8017 = vst [vmem:[#allocation6 + $0xe0] sm:$0xff] %v7953_v13  ;;  %v7694_v27 = vadd.f32 %v7578_v3, %v12748_v33  ;;  %v13971_v13 = vld [vmem:[#allocation14_spill] sm:$0xff] }
 0x93a   :  { %v7831_v3 = vunpack.c.l.bf16 %v13971_v13 }
 0x93b   :  { %v7762_v8 = vadd.f32 %v12657_v2, %v7694_v27 }
 0x93d   :  { %v7890_v29 = vadd.f32 %v7826_v42, %v7762_v8  ;;  %v12948_v8 = vpop.f32.mrf.mxu0 }
 0x93e   :  { %v7580_v12 = vpop.f32.mrf.mxu1 }
 0x93f   :  { %v7954_v34 = vmax.f32 %v7890_v29, 0.0  ;;  %v7581_v56 = vadd.f32 %v7580_v12, %v12761_v43 }
 0x941   :  { %8018 = vst [vmem:[#allocation6 + $0xe8] sm:$0xff] %v7954_v34  ;;  %v7695_v19 = vadd.f32 %v7581_v56, %v12759_v50  ;;  %7619 = vmatmul.bf16.gmra.mxu1 %v13936_v14  ;;  %v12953_v56 = vpop.f32.mrf.mxu3 }
 0x943   :  { %v7763_v38 = vadd.f32 %v12657_v2, %v7695_v19 }
 0x945   :  { %v7891_v26 = vadd.f32 %v7827_v63, %v7763_v38 }
 0x946   :  { %v7582_v33 = vpop.f32.mrf.mxu1 }
 0x947   :  { %v7955_v49 = vmax.f32 %v7891_v26, 0.0  ;;  %v7583_v54 = vadd.f32 %v7582_v33, %v12771_v6  ;;  %v12959_v26 = vpop.f32.mrf.mxu0 }
 0x949   :  { %8019 = vst [vmem:[#allocation6 + $0xf0] sm:$0xff] %v7955_v49  ;;  %v7696_v43 = vadd.f32 %v7583_v54, %v12769_v61  ;;  %v13972_v49 = vld [vmem:[#allocation17_spill] sm:$0xff] }
 0x94a   :  { %v7833_v54 = vunpack.c.l.bf16 %v13972_v49 }
 0x94b   :  { %v7764_v50 = vadd.f32 %v12657_v2, %v7696_v43 }
 0x94d   :  { %v7892_v51 = vadd.f32 %v7828_v16, %v7764_v50 }
 0x94e   :  { %v7585_v14 = vpop.f32.mrf.mxu1 }
 0x94f   :  { %v7956_v45 = vmax.f32 %v7892_v51, 0.0  ;;  %v7586_v5 = vadd.f32 %v7585_v14, %v12782_v48  ;;  %v7830_v48 = vunpack.c.h.bf16 %v13970_v23 }
 0x951   :  { %8020 = vst [vmem:[#allocation6 + $0xf8] sm:$0xff] %v7956_v45  ;;  %v7697_v6 = vadd.f32 %v7586_v5, %v12780_v47  ;;  %7624 = vmatmul.bf16.gmra.mxu1 %v13942_v28  ;;  %v12939_v28 = vpop.f32.mrf.mxu2  ;;  %v7834_v45 = vunpack.c.h.bf16 %v13972_v49  ;;  %v12972_v5 = vpop.f32.mrf.mxu0  ;;  %v13976_v49 = vld [vmem:[#allocation87_spill] sm:$0xff] }
 0x953   :  { %v7765_v61 = vadd.f32 %v12657_v2, %v7697_v6 }
 0x955   :  { %v7893_v62 = vadd.f32 %v7829_v41, %v7765_v61  ;;  %v7432_v41 = vadd.f32 %v12918_v53, %v12921_v60 }
 0x956   :  { %v7587_v44 = vpop.f32.mrf.mxu1 }
 0x957   :  { %v7957_v21 = vmax.f32 %v7893_v62, 0.0  ;;  %v7588_v30 = vadd.f32 %v7587_v44, %v12792_v59  ;;  %v13973_v44 = vld [vmem:[#allocation20_spill] sm:$0xff] }
 0x959   :  { %8021 = vst [vmem:[#allocation6 + $0x100] sm:$0xff] %v7957_v21  ;;  %v7698_v40 = vadd.f32 %v7588_v30, %v12790_v10  ;;  %v12950_v29 = vpop.f32.mrf.mxu2  ;;  %v7835_v21 = vunpack.c.l.bf16 %v13973_v44 }
 0x95b   :  { %v7766_v47 = vadd.f32 %v12657_v2, %v7698_v40  ;;  %v12987_v40 = vpop.f32.mrf.mxu0 }
 0x95d   :  { %v7894_v25 = vadd.f32 %v7830_v48, %v7766_v47  ;;  %v7434_v48 = vadd.f32 %v12928_v46, %v12931_v17  ;;  %v7437_v46 = vadd.f32 %v12937_v52, %v12941_v57  ;;  %v4629_v57 = vld [vmem:[#allocation2 + $0x1ac] sm:$0x1] }
 0x95e   :  { %v7590_v4 = vpop.f32.mrf.mxu1 }
 0x95f   :  { %v7958_v9 = vmax.f32 %v7894_v25, 0.0  ;;  %v7591_v0 = vadd.f32 %v7590_v4, %v12805_v32  ;;  %v7832_v32 = vunpack.c.h.bf16 %v13971_v13  ;;  %v13974_v13 = vld [vmem:[#allocation86_spill] sm:$0xff] }
 0x961   :  { %8022 = vst [vmem:[#allocation6 + $0x108] sm:$0xff] %v7958_v9  ;;  %v7699_v59 = vadd.f32 %v7591_v0, %v12803_v20  ;;  %7629 = vmatmul.bf16.gmra.mxu1 %v13947_v39  ;;  %v12961_v33 = vpop.f32.mrf.mxu2 }
 0x963   :  { %v7767_v10 = vadd.f32 %v12657_v2, %v7699_v59 }
 0x965   :  { %v7895_v27 = vadd.f32 %v7831_v3, %v7767_v10  ;;  %v6906_v3 = vadd.f32 %v12939_v28, %v13974_v13  ;;  %v13000_v10 = vpop.f32.mrf.mxu0  ;;  %v4917_v28 = vunpack.c.l.b16 %v4629_v57 }
 0x966   :  { %v7592_v42 = vpop.f32.mrf.mxu1 }
 0x967   :  { %v7959_v12 = vmax.f32 %v7895_v27, 0.0  ;;  %v7593_v34 = vadd.f32 %v7592_v42, %v12815_v36 }
 0x969   :  { %8023 = vst [vmem:[#allocation6 + $0x110] sm:$0xff] %v7959_v12  ;;  %v7700_v20 = vadd.f32 %v7593_v34, %v12813_v35  ;;  %v12966_v35 = vpop.f32.mrf.mxu3 }
 0x96b   :  { %v7768_v39 = vadd.f32 %v12657_v2, %v7700_v20  ;;  %v13975_v20 = vld [vmem:[#allocation23_spill] sm:$0xff] }
 0x96d   :  { %v7896_v7 = vadd.f32 %v7832_v32, %v7768_v39  ;;  %v7837_v32 = vunpack.c.l.bf16 %v13975_v20  ;;  %v13009_v39 = vld [vmem:[#allocation2 + $0x1a4] sm:$0xff] }
 0x96e   :  { %v7595_v63 = vpop.f32.mrf.mxu1  ;;  %7321 = vmatmul.bf16.gmra.mxu3 %v13009_v39 }
 0x96f   :  { %v7960_v19 = vmax.f32 %v7896_v7, 0.0  ;;  %v7596_v38 = vadd.f32 %v7595_v63, %v12826_v37  ;;  %v7439_v7 = vadd.f32 %v12948_v8, %v12953_v56 }
 0x971   :  { %8024 = vst [vmem:[#allocation6 + $0x118] sm:$0xff] %v7960_v19  ;;  %v7701_v36 = vadd.f32 %v7596_v38, %v12824_v15  ;;  %7634 = vmatmul.bf16.gmra.mxu1 %v13954_v31  ;;  %v12974_v15 = vpop.f32.mrf.mxu2  ;;  %v12977_v23 = vpop.f32.mrf.mxu3  ;;  %v13014_v38 = vpack.c.b16 %v4917_v28, %v4917_v28 }
 0x973   :  { %v7769_v16 = vadd.f32 %v12657_v2, %v7701_v36  ;;  %v5377_v36 = vshll.u32 %v13009_v39, 16 }
 0x975   :  { %v7897_v43 = vadd.f32 %v7833_v54, %v7769_v16  ;;  %v5375_v16 = vshrl.u32 %v13009_v39, 16 }
 0x976   :  { %v7597_v50 = vpop.f32.mrf.mxu1 }
 0x977   :  { %v7961_v51 = vmax.f32 %v7897_v43, 0.0  ;;  %v7598_v37 = vadd.f32 %v7597_v50, %v12836_v22  ;;  %v5379_v43 = vrot.slane %v5377_v36, 1  ;;  %v5382_v50 = vshll.u32 %v13014_v38, 16 }
 0x979   :  { %8025 = vst [vmem:[#allocation6 + $0x120] sm:$0xff] %v7961_v51  ;;  %v7702_v14 = vadd.f32 %v7598_v37, %v12834_v24  ;;  %v12989_v47 = vpop.f32.mrf.mxu2  ;;  %v12991_v60 = vpop.f32.mrf.mxu3  ;;  %v7838_v37 = vunpack.c.h.bf16 %v13975_v20 }
 0x97a   :  { %v13021_v51 = vpop.f32.mrf.mxu0 }
 0x97b   :  { %v7770_v31 = vadd.f32 %v12657_v2, %v7702_v14 }
 0x97d   :  { %v7898_v6 = vadd.f32 %v7834_v45, %v7770_v31  ;;  %v5380_v45 = vor.u32 %v5379_v43, %v5375_v16  ;;  %v5384_v31 = vrot.slane %v5382_v50, 1 }
 0x97e   :  { %v7600_v61 = vpop.f32.mrf.mxu1 }
 0x97f   :  { %v7962_v62 = vmax.f32 %v7898_v6, 0.0  ;;  %v7601_v22 = vadd.f32 %v7600_v61, %v7432_v41  ;;  %v5385_v6 = vsel %vm470_vm0, %v5380_v45, %v5384_v31  ;;  %v7442_v61 = vadd.f32 %v12959_v26, %v12966_v35 }
 0x980   :  { %7490 = vmatmul.bf16.gmra.mxu0 %v5385_v6  ;;  %v7444_v26 = vadd.f32 %v12972_v5, %v12977_v23  ;;  %v5527_v45 = vrot.slane %v13009_v39, 1  ;;  %v5528_v31 = vrot.slane %v13014_v38, 1  ;;  %v13985_v39 = vld [vmem:[#allocation32_spill] sm:$0xff] }
 0x981   :  { %8026 = vst [vmem:[#allocation6 + $0x128] sm:$0xff] %v7962_v62  ;;  %v7703_v24 = vadd.f32 %v7601_v22, %v12845_v1  ;;  %7639 = vmatmul.bf16.gmra.mxu1 %v13960_v55  ;;  %v7836_v55 = vunpack.c.h.bf16 %v13973_v44  ;;  %v13002_v27 = vpop.f32.mrf.mxu2  ;;  %v13004_v34 = vpop.f32.mrf.mxu3 }
 0x983   :  { %v7771_v30 = vadd.f32 %v12657_v2, %v7703_v24  ;;  %v13977_v24 = vld [vmem:[#allocation24_spill] sm:$0xff] }
 0x984   :  { %v6911_v44 = vadd.f32 %v12961_v33, %v13977_v24 }
 0x985   :  { %v7899_v53 = vadd.f32 %v7835_v21, %v7771_v30 }
 0x986   :  { %v7602_v25 = vpop.f32.mrf.mxu1 }
 0x987   :  { %v7963_v4 = vmax.f32 %v7899_v53, 0.0  ;;  %v7603_v9 = vadd.f32 %v7602_v25, %v7434_v48  ;;  %v13978_v53 = vld [vmem:[#allocation26_spill] sm:$0xff] }
 0x988   :  { %v7839_v25 = vunpack.c.l.bf16 %v13978_v53 }
 0x989   :  { %8027 = vst [vmem:[#allocation6 + $0x130] sm:$0xff] %v7963_v4  ;;  %v7704_v1 = vadd.f32 %v7603_v9, %v12853_v18  ;;  %v13023_v8 = vpop.f32.mrf.mxu2  ;;  %v7282_v14 = vpop.f32.mrf.mxu3 }
 0x98a   :  { %v7453_v4 = vpop.f32.mrf.mxu0 }
 0x98b   :  { %v7772_v0 = vadd.f32 %v12657_v2, %v7704_v1 }
 0x98d   :  { %v7900_v17 = vadd.f32 %v7836_v55, %v7772_v0 }
 0x98e   :  { %v7605_v59 = vpop.f32.mrf.mxu1 }
 0x98f   :  { %v7964_v42 = vmax.f32 %v7900_v17, 0.0  ;;  %v7606_v12 = vadd.f32 %v7605_v59, %v7437_v46  ;;  %v13979_v46 = vld [vmem:[#allocation37_spill] sm:$0xff] }
 0x990   :  { %v6913_v33 = vadd.f32 %v12974_v15, %v13979_v46  ;;  %v7844_v46 = vunpack.c.h.bf16 %v13985_v39 }
 0x991   :  { %8028 = vst [vmem:[#allocation6 + $0x138] sm:$0xff] %v7964_v42  ;;  %v7705_v18 = vadd.f32 %v7606_v12, %v6906_v3  ;;  %7644 = vmatmul.bf16.gmra.mxu1 %v13963_v11  ;;  %v6908_v11 = vadd.f32 %v12950_v29, %v13976_v49  ;;  %v13029_v29 = vld [vmem:[%s13125_s4] ss:$0 sm:$0xff]  ;;  %v6922_v9 = vpop.f32.mrf.mxu2  ;;  %v7284_v55 = vpop.f32.mrf.mxu3  ;;  %v7840_v3 = vunpack.c.h.bf16 %v13978_v53  ;;  %v7447_v42 = vadd.f32 %v12987_v40, %v12991_v60  ;;  %s9456_s4 = smov [#allocation6]  }
 0x992   :  { %v7456_v12 = vpop.f32.mrf.mxu0  ;;  %v7449_v40 = vadd.f32 %v13000_v10, %v13004_v34  ;;  %v7452_v34 = vadd.f32 %v13021_v51, %v7282_v14  ;;  %v7454_v51 = vadd.f32 %v7453_v4, %v7284_v55  ;;  %s8057_s19 = sshll.u32 %s9456_s4, 4  ;;  %s8058_s19 = int_to_ptr.vmem [resolvable:$true] %s8057_s19 }
 0x993   :  { %v7773_v52 = vadd.f32 %v12657_v2, %v7705_v18 }
 0x995   :  { %v7901_v63 = vadd.f32 %v7837_v32, %v7773_v52  ;;  %v13980_v32 = vld [vmem:[#allocation90_spill] sm:$0xff] }
 0x996   :  { %v7607_v19 = vpop.f32.mrf.mxu1  ;;  %v6916_v52 = vadd.f32 %v12989_v47, %v13980_v32  ;;  %v13988_v32 = vld [vmem:[#allocation35_spill] sm:$0xff] }
 0x997   :  { %v7965_v54 = vmax.f32 %v7901_v63, 0.0  ;;  %v7608_v2 = vadd.f32 %v7607_v19, %v7439_v7  ;;  %v13981_v7 = vld [vmem:[#allocation29_spill] sm:$0xff]  ;;  %v13982_v19 = vld [vmem:[#allocation134_spill] sm:$0xff] }
 0x998   :  { %v7841_v63 = vunpack.c.l.bf16 %v13981_v7 }
 0x999   :  { %8029 = vst [vmem:[#allocation6 + $0x140] sm:$0xff] %v7965_v54  ;;  %v7706_v56 = vadd.f32 %v7608_v2, %v6908_v11  ;;  %v6925_v18 = vpop.f32.mrf.mxu2  ;;  %v7287_v5 = vpop.f32.mrf.mxu3  ;;  %v13983_v11 = vld [vmem:[#allocation91_spill] sm:$0xff] }
 0x99a   :  { %v6918_v54 = vadd.f32 %v13002_v27, %v13983_v11  ;;  %v7458_v2 = vpop.f32.mrf.mxu0  ;;  %v5529_v27 = vsel %vm939_vm1, %v5527_v45, %v5528_v31 }
 0x99b   :  { %v7774_v41 = vadd.f32 %v13029_v29, %v7706_v56 }
 0x99d   :  { %v7902_v62 = vadd.f32 %v7838_v37, %v7774_v41  ;;  %v7842_v37 = vunpack.c.h.bf16 %v13981_v7 }
 0x99e   :  { %v7610_v22 = vpop.f32.mrf.mxu1 }
 0x99f   :  { %v7966_v21 = vmax.f32 %v7902_v62, 0.0  ;;  %v7611_v30 = vadd.f32 %v7610_v22, %v7442_v61  ;;  %v13984_v61 = vld [vmem:[#allocation27_spill] sm:$0xff] }
 0x9a0   :  { %v6921_v62 = vadd.f32 %v13023_v8, %v13984_v61 }
 0x9a1   :  { %8030 = vst [vmem:[#allocation6 + $0x148] sm:$0xff] %v7966_v21  ;;  %v7707_v48 = vadd.f32 %v7611_v30, %v6911_v44  ;;  %7649 = vmatmul.bf16.gmra.mxu1 %v13966_v58  ;;  %v6927_v47 = vpop.f32.mrf.mxu2  ;;  %v7289_v50 = vpop.f32.mrf.mxu3 }
 0x9a2   :  { %v7461_v44 = vpop.f32.mrf.mxu0 }
 0x9a3   :  { %v7775_v1 = vadd.f32 %v13029_v29, %v7707_v48  ;;  %v7843_v48 = vunpack.c.l.bf16 %v13985_v39 }
 0x9a5   :  { %v7903_v35 = vadd.f32 %v7839_v25, %v7775_v1  ;;  %v13986_v1 = vld [vmem:[#allocation46_spill] sm:$0xff] }
 0x9a6   :  { %v7612_v0 = vpop.f32.mrf.mxu1 }
 0x9a7   :  { %v7967_v17 = vmax.f32 %v7903_v35, 0.0  ;;  %v7613_v59 = vadd.f32 %v7612_v0, %v7444_v26  ;;  %v6923_v26 = vadd.f32 %v6922_v9, %v13986_v1 }
 0x9a9   :  { %8031 = vst [vmem:[#allocation6 + $0x150] sm:$0xff] %v7967_v17  ;;  %v7708_v13 = vadd.f32 %v7613_v59, %v6913_v33  ;;  %v6930_v21 = vpop.f32.mrf.mxu2  ;;  %v7292_v38 = vpop.f32.mrf.mxu3 }
 0x9aa   :  { %v7463_v33 = vpop.f32.mrf.mxu0 }
 0x9ab   :  { %v7776_v58 = vadd.f32 %v13029_v29, %v7708_v13 }
 0x9ad   :  { %v7904_v20 = vadd.f32 %v7840_v3, %v7776_v58  ;;  %v7457_v3 = vadd.f32 %v7456_v12, %v7287_v5 }
 0x9ae   :  { %v7615_v23 = vpop.f32.mrf.mxu1 }
 0x9af   :  { %v7968_v15 = vmax.f32 %v7904_v20, 0.0  ;;  %v7616_v57 = vadd.f32 %v7615_v23, %v7447_v42  ;;  %v13987_v20 = vld [vmem:[#allocation92_spill] sm:$0xff] }
 0x9b0   :  { %v6926_v4 = vadd.f32 %v6925_v18, %v13987_v20 }
 0x9b1   :  { %8032 = vst [vmem:[#allocation6 + $0x158] sm:$0xff] %v7968_v15  ;;  %v7709_v28 = vadd.f32 %v7616_v57, %v6916_v52  ;;  %7654 = vmatmul.bf16.gmra.mxu1 %v13982_v19  ;;  %v6932_v17 = vpop.f32.mrf.mxu2  ;;  %v7294_v13 = vpop.f32.mrf.mxu3  ;;  %v7845_v52 = vunpack.c.l.bf16 %v13988_v32  ;;  %v7459_v57 = vadd.f32 %v7458_v2, %v7289_v50 }
 0x9b3   :  { %v7777_v36 = vadd.f32 %v13029_v29, %v7709_v28  ;;  %v7466_v28 = vpop.f32.mrf.mxu0 }
 0x9b5   :  { %v7905_v60 = vadd.f32 %v7841_v63, %v7777_v36 }
 0x9b6   :  { %v7617_v49 = vpop.f32.mrf.mxu1 }
 0x9b7   :  { %v7969_v16 = vmax.f32 %v7905_v60, 0.0  ;;  %v7618_v43 = vadd.f32 %v7617_v49, %v7449_v40  ;;  %v13989_v40 = vld [vmem:[#allocation94_spill] sm:$0xff]  ;;  %v7846_v49 = vunpack.c.h.bf16 %v13988_v32 }
 0x9b8   :  { %v6928_v12 = vadd.f32 %v6927_v47, %v13989_v40 }
 0x9b9   :  { %8033 = vst [vmem:[#allocation6 + $0x160] sm:$0xff] %v7969_v16  ;;  %v7710_v56 = vadd.f32 %v7618_v43, %v6918_v54  ;;  %v6935_v7 = vpop.f32.mrf.mxu2  ;;  %v7297_v19 = vpop.f32.mrf.mxu3  ;;  %v7462_v54 = vadd.f32 %v7461_v44, %v7292_v38 }
 0x9bb   :  { %v7778_v10 = vadd.f32 %v13029_v29, %v7710_v56  ;;  %v13990_v56 = vld [vmem:[#allocation36_spill] sm:$0xff]  ;;  %v7468_v50 = vpop.f32.mrf.mxu0 }
 0x9bc   :  { %v6931_v2 = vadd.f32 %v6930_v21, %v13990_v56 }
 0x9bd   :  { %v7906_v41 = vadd.f32 %v7842_v37, %v7778_v10 }
 0x9be   :  { %v7620_v6 = vpop.f32.mrf.mxu1 }
 0x9bf   :  { %v7970_v22 = vmax.f32 %v7906_v41, 0.0  ;;  %v7621_v24 = vadd.f32 %v7620_v6, %v7452_v34  ;;  %v13991_v34 = vld [vmem:[#allocation40_spill] sm:$0xff] }
 0x9c0   :  { %v7847_v41 = vunpack.c.l.bf16 %v13991_v34  ;;  %v7848_v38 = vunpack.c.h.bf16 %v13991_v34 }
 0x9c1   :  { %8034 = vst [vmem:[#allocation6 + $0x168] sm:$0xff] %v7970_v22  ;;  %v7711_v30 = vadd.f32 %v7621_v24, %v6921_v62  ;;  %7659 = vmatmul.bf16.gmra.mxu1 %v5529_v27  ;;  %v6937_v37 = vpop.f32.mrf.mxu2  ;;  %v7299_v10 = vpop.f32.mrf.mxu3  ;;  %v7464_v27 = vadd.f32 %v7463_v33, %v7294_v13  ;;  %v13992_v22 = vld [vmem:[#allocation48_spill] sm:$0xff]  ;;  %v13994_v33 = vld [vmem:[#allocation45_spill] sm:$0xff] }
 0x9c2   :  { %v6933_v24 = vadd.f32 %v6932_v17, %v13992_v22  ;;  %v7849_v17 = vunpack.c.l.bf16 %v13994_v33 }
 0x9c3   :  { %v7779_v53 = vadd.f32 %v13029_v29, %v7711_v30  ;;  %v7471_v39 = vpop.f32.mrf.mxu0 }
 0x9c5   :  { %v7907_v14 = vadd.f32 %v7843_v48, %v7779_v53 }
 0x9c6   :  { %v7622_v25 = vpop.f32.mrf.mxu1 }
 0x9c7   :  { %v7971_v35 = vmax.f32 %v7907_v14, 0.0  ;;  %v7623_v0 = vadd.f32 %v7622_v25, %v7454_v51  ;;  %v7467_v14 = vadd.f32 %v7466_v28, %v7297_v19 }
 0x9c9   :  { %8035 = vst [vmem:[#allocation6 + $0x170] sm:$0xff] %v7971_v35  ;;  %v7712_v8 = vadd.f32 %v7623_v0, %v6923_v26  ;;  %v6940_v21 = vpop.f32.mrf.mxu2  ;;  %v7302_v53 = vpop.f32.mrf.mxu3  ;;  %v13993_v26 = vld [vmem:[#allocation95_spill] sm:$0xff] }
 0x9ca   :  { %v6936_v35 = vadd.f32 %v6935_v7, %v13993_v26  ;;  %v7472_v28 = vadd.f32 %v7471_v39, %v7302_v53  ;;  %v14000_v53 = vld [vmem:[#allocation55_spill] sm:$0xff] }
 0x9cb   :  { %v7780_v59 = vadd.f32 %v13029_v29, %v7712_v8 }
 0x9cd   :  { %v7908_v58 = vadd.f32 %v7844_v46, %v7780_v59  ;;  %v7473_v59 = vpop.f32.mrf.mxu0 }
 0x9ce   :  { %v7625_v42 = vpop.f32.mrf.mxu1 }
 0x9cf   :  { %v7972_v55 = vmax.f32 %v7908_v58, 0.0  ;;  %v7626_v23 = vadd.f32 %v7625_v42, %v7457_v3  ;;  %v7469_v42 = vadd.f32 %v7468_v50, %v7299_v10  ;;  %v13998_v50 = vld [vmem:[#allocation100_spill] sm:$0xff] }
 0x9d1   :  { %8036 = vst [vmem:[#allocation6 + $0x178] sm:$0xff] %v7972_v55  ;;  %v7713_v9 = vadd.f32 %v7626_v23, %v6926_v4  ;;  %v6942_v13 = vpop.f32.mrf.mxu2  ;;  %v7304_v58 = vpop.f32.mrf.mxu3  ;;  %v13995_v55 = vld [vmem:[#allocation52_spill] sm:$0xff] }
 0x9d2   :  { %v6938_v23 = vadd.f32 %v6937_v37, %v13995_v55  ;;  %v6943_v37 = vadd.f32 %v6942_v13, %v13998_v50 }
 0x9d3   :  { %v7781_v15 = vadd.f32 %v13029_v29, %v7713_v9 }
 0x9d5   :  { %v7909_v63 = vadd.f32 %v7845_v52, %v7781_v15  ;;  %v7850_v15 = vunpack.c.h.bf16 %v13994_v33  ;;  %v7476_v7 = vpop.f32.mrf.mxu0 }
 0x9d6   :  { %v7627_v36 = vpop.f32.mrf.mxu1 }
 0x9d7   :  { %v7973_v5 = vmax.f32 %v7909_v63, 0.0  ;;  %v7628_v60 = vadd.f32 %v7627_v36, %v7459_v57 }
 0x9d9   :  { %8037 = vst [vmem:[#allocation6 + $0x180] sm:$0xff] %v7973_v5  ;;  %v7714_v18 = vadd.f32 %v7628_v60, %v6928_v12  ;;  %v6945_v63 = vpop.f32.mrf.mxu2  ;;  %v7307_v36 = vpop.f32.mrf.mxu3  ;;  %v13996_v12 = vld [vmem:[#allocation51_spill] sm:$0xff] }
 0x9da   :  { %v6941_v5 = vadd.f32 %v6940_v21, %v13996_v12 }
 0x9db   :  { %v7782_v11 = vadd.f32 %v13029_v29, %v7714_v18 }
 0x9dd   :  { %v7910_v16 = vadd.f32 %v7846_v49, %v7782_v11  ;;  %v13997_v11 = vld [vmem:[#allocation50_spill] sm:$0xff] }
 0x9de   :  { %v7630_v43 = vpop.f32.mrf.mxu1 }
 0x9df   :  { %v7974_v45 = vmax.f32 %v7910_v16, 0.0  ;;  %v7631_v31 = vadd.f32 %v7630_v43, %v7462_v54  ;;  %v7851_v54 = vunpack.c.l.bf16 %v13997_v11  ;;  %v7474_v43 = vadd.f32 %v7473_v59, %v7304_v58 }
 0x9e0   :  { %v7854_v59 = vunpack.c.h.bf16 %v14000_v53 }
 0x9e1   :  { %8038 = vst [vmem:[#allocation6 + $0x188] sm:$0xff] %v7974_v45  ;;  %v7715_v47 = vadd.f32 %v7631_v31, %v6931_v2  ;;  %v7478_v45 = vpop.f32.mrf.mxu0  ;;  %v6947_v31 = vpop.f32.mrf.mxu2 }
 0x9e2   :  { %v7309_v34 = vpop.f32.mrf.mxu3 }
 0x9e3   :  { %v7783_v6 = vadd.f32 %v13029_v29, %v7715_v47 }
 0x9e5   :  { %v7911_v61 = vadd.f32 %v7847_v41, %v7783_v6  ;;  %v7852_v6 = vunpack.c.h.bf16 %v13997_v11 }
 0x9e6   :  { %v7632_v62 = vpop.f32.mrf.mxu1 }
 0x9e7   :  { %v7975_v44 = vmax.f32 %v7911_v61, 0.0  ;;  %v7633_v30 = vadd.f32 %v7632_v62, %v7464_v27  ;;  %v7477_v61 = vadd.f32 %v7476_v7, %v7307_v36 }
 0x9e9   :  { %8039 = vst [vmem:[#allocation6 + $0x190] sm:$0xff] %v7975_v44  ;;  %v7716_v48 = vadd.f32 %v7633_v30, %v6933_v24  ;;  %v13999_v24 = vld [vmem:[#allocation104_spill] sm:$0xff]  ;;  %v7481_v21 = vpop.f32.mrf.mxu0 }
 0x9ea   :  { %v6946_v44 = vadd.f32 %v6945_v63, %v13999_v24 }
 0x9eb   :  { %v7784_v51 = vadd.f32 %v13029_v29, %v7716_v48  ;;  %v6950_v48 = vpop.f32.mrf.mxu2 }
 0x9ed   :  { %v7912_v25 = vadd.f32 %v7848_v38, %v7784_v51  ;;  %v7853_v51 = vunpack.c.l.bf16 %v14000_v53 }
 0x9ee   :  { %v7635_v1 = vpop.f32.mrf.mxu1 }
 0x9ef   :  { %v7976_v0 = vmax.f32 %v7912_v25, 0.0  ;;  %v7636_v8 = vadd.f32 %v7635_v1, %v7467_v14  ;;  %v7312_v14 = vpop.f32.mrf.mxu3  ;;  %v7479_v1 = vadd.f32 %v7478_v45, %v7309_v34 }
 0x9f1   :  { %8040 = vst [vmem:[#allocation6 + $0x198] sm:$0xff] %v7976_v0  ;;  %v7717_v46 = vadd.f32 %v7636_v8, %v6936_v35  ;;  %v14001_v0 = vld [vmem:[#allocation56_spill] sm:$0xff]  ;;  %v7483_v13 = vpop.f32.mrf.mxu0 }
 0x9f2   :  { %v6948_v8 = vadd.f32 %v6947_v31, %v14001_v0 }
 0x9f3   :  { %v7785_v3 = vadd.f32 %v13029_v29, %v7717_v46 }
 0x9f5   :  { %v7913_v20 = vadd.f32 %v7849_v17, %v7785_v3  ;;  %v6952_v3 = vpop.f32.mrf.mxu2 }
 0x9f6   :  { %v7637_v4 = vpop.f32.mrf.mxu1 }
 0x9f7   :  { %v7977_v9 = vmax.f32 %v7913_v20, 0.0  ;;  %v7638_v32 = vadd.f32 %v7637_v4, %v7469_v42  ;;  %v7314_v42 = vpop.f32.mrf.mxu3  ;;  %v7482_v20 = vadd.f32 %v7481_v21, %v7312_v14 }
 0x9f8   :  { %v7484_v63 = vadd.f32 %v7483_v13, %v7314_v42 }
 0x9f9   :  { %8041 = vst [vmem:[#allocation6 + $0x1a0] sm:$0xff] %v7977_v9  ;;  %v7718_v52 = vadd.f32 %v7638_v32, %v6938_v23  ;;  %v14002_v23 = vld [vmem:[#allocation62_spill] sm:$0xff] }
 0x9fa   :  { %v6951_v9 = vadd.f32 %v6950_v48, %v14002_v23 }
 0x9fb   :  { %v7786_v57 = vadd.f32 %v13029_v29, %v7718_v52 }
 0x9fd   :  { %v7914_v19 = vadd.f32 %v7850_v15, %v7786_v57  ;;  %v14003_v57 = vld [vmem:[#allocation60_spill] sm:$0xff]  ;;  %v6955_v36 = vpop.f32.mrf.mxu2 }
 0x9fe   :  { %v7640_v40 = vpop.f32.mrf.mxu1 }
 0x9ff   :  { %v7978_v60 = vmax.f32 %v7914_v19, 0.0  ;;  %v7641_v18 = vadd.f32 %v7640_v40, %v7472_v28  ;;  %v7855_v28 = vunpack.c.l.bf16 %v14003_v57  ;;  %v7486_v19 = vpop.f32.mrf.mxu0  ;;  %v7317_v12 = vpop.f32.mrf.mxu3 }
 0xa01   :  { %8042 = vst [vmem:[#allocation6 + $0x1a8] sm:$0xff] %v7978_v60  ;;  %v7719_v49 = vadd.f32 %v7641_v18, %v6941_v5  ;;  %v14004_v60 = vld [vmem:[#allocation102_spill] sm:$0xff] }
 0xa02   :  { %v6953_v18 = vadd.f32 %v6952_v3, %v14004_v60 }
 0xa03   :  { %v7787_v16 = vadd.f32 %v13029_v29, %v7719_v49 }
 0xa05   :  { %v7915_v56 = vadd.f32 %v7851_v54, %v7787_v16  ;;  %v7856_v16 = vunpack.c.h.bf16 %v14003_v57  ;;  %v6957_v34 = vpop.f32.mrf.mxu2 }
 0xa06   :  { %v7642_v2 = vpop.f32.mrf.mxu1 }
 0xa07   :  { %v7979_v10 = vmax.f32 %v7915_v56, 0.0  ;;  %v7643_v47 = vadd.f32 %v7642_v2, %v7474_v43  ;;  %v7487_v56 = vadd.f32 %v7486_v19, %v7317_v12  ;;  %v7488_v31 = vpop.f32.mrf.mxu0 }
 0xa09   :  { %8043 = vst [vmem:[#allocation6 + $0x1b0] sm:$0xff] %v7979_v10  ;;  %v7720_v41 = vadd.f32 %v7643_v47, %v6943_v37  ;;  %v14005_v37 = vld [vmem:[#allocation103_spill] sm:$0xff] }
 0xa0a   :  { %v6956_v45 = vadd.f32 %v6955_v36, %v14005_v37 }
 0xa0b   :  { %v7788_v27 = vadd.f32 %v13029_v29, %v7720_v41  ;;  %v7319_v41 = vpop.f32.mrf.mxu3 }
 0xa0d   :  { %v7916_v62 = vadd.f32 %v7852_v6, %v7788_v27  ;;  %v14006_v27 = vld [vmem:[#allocation68_spill] sm:$0xff] }
 0xa0e   :  { %v7645_v22 = vpop.f32.mrf.mxu1  ;;  %v7858_v14 = vunpack.c.h.bf16 %v14006_v27 }
 0xa0f   :  { %v7980_v30 = vmax.f32 %v7916_v62, 0.0  ;;  %v7646_v39 = vadd.f32 %v7645_v22, %v7477_v61  ;;  %v7857_v61 = vunpack.c.l.bf16 %v14006_v27  ;;  %v7489_v22 = vadd.f32 %v7488_v31, %v7319_v41  ;;  %v7491_v53 = vpop.f32.mrf.mxu0 }
 0xa11   :  { %8044 = vst [vmem:[#allocation6 + $0x1b8] sm:$0xff] %v7980_v30  ;;  %v7721_v38 = vadd.f32 %v7646_v39, %v6946_v44  ;;  %v14007_v30 = vld [vmem:[#allocation72_spill] sm:$0xff] }
 0xa12   :  { %v6958_v39 = vadd.f32 %v6957_v34, %v14007_v30 }
 0xa13   :  { %v7789_v25 = vadd.f32 %v13029_v29, %v7721_v38  ;;  %v7322_v38 = vpop.f32.mrf.mxu3 }
 0xa15   :  { %v7917_v26 = vadd.f32 %v7853_v51, %v7789_v25  ;;  %v6960_v25 = vpop.f32.mrf.mxu2 }
 0xa16   :  { %v7647_v35 = vpop.f32.mrf.mxu1 }
 0xa17   :  { %v7981_v46 = vmax.f32 %v7917_v26, 0.0  ;;  %v7648_v33 = vadd.f32 %v7647_v35, %v7479_v1  ;;  %v7492_v1 = vadd.f32 %v7491_v53, %v7322_v38  ;;  %v7493_v42 = vpop.f32.mrf.mxu0 }
 0xa19   :  { %8045 = vst [vmem:[#allocation6 + $0x1c0] sm:$0xff] %v7981_v46  ;;  %v7722_v17 = vadd.f32 %v7648_v33, %v6948_v8  ;;  %v14008_v8 = vld [vmem:[#allocation64_spill] sm:$0xff] }
 0xa1a   :  { %v6961_v46 = vadd.f32 %v6960_v25, %v14008_v8 }
 0xa1b   :  { %v7790_v58 = vadd.f32 %v13029_v29, %v7722_v17 }
 0xa1d   :  { %v7918_v4 = vadd.f32 %v7854_v59, %v7790_v58  ;;  %v14009_v59 = vld [vmem:[#allocation76_spill] sm:$0xff]  ;;  %v7324_v58 = vpop.f32.mrf.mxu3 }
 0xa1e   :  { %v7650_v55 = vpop.f32.mrf.mxu1  ;;  %v7859_v13 = vunpack.c.l.bf16 %v14009_v59 }
 0xa1f   :  { %v7982_v32 = vmax.f32 %v7918_v4, 0.0  ;;  %v7651_v52 = vadd.f32 %v7650_v55, %v7482_v20  ;;  %v6962_v4 = vpop.f32.mrf.mxu2  ;;  %v7494_v55 = vadd.f32 %v7493_v42, %v7324_v58 }
 0xa21   :  { %8046 = vst [vmem:[#allocation6 + $0x1c8] sm:$0xff] %v7982_v32  ;;  %v7723_v15 = vadd.f32 %v7651_v52, %v6951_v9  ;;  %v14010_v32 = vld [vmem:[#allocation84_spill] sm:$0xff] }
 0xa22   :  { %v6963_v52 = vadd.f32 %v6962_v4, %v14010_v32 }
 0xa23   :  { %v7791_v7 = vadd.f32 %v13029_v29, %v7723_v15 }
 0xa25   :  { %v7919_v40 = vadd.f32 %v7855_v28, %v7791_v7  ;;  %v7860_v28 = vunpack.c.h.bf16 %v14009_v59 }
 0xa26   :  { %v7652_v5 = vpop.f32.mrf.mxu1 }
 0xa27   :  { %v7983_v49 = vmax.f32 %v7919_v40, 0.0  ;;  %v7653_v11 = vadd.f32 %v7652_v5, %v7484_v63 }
 0xa29   :  { %8047 = vst [vmem:[#allocation6 + $0x1d0] sm:$0xff] %v7983_v49  ;;  %v7724_v54 = vadd.f32 %v7653_v11, %v6953_v18 }
 0xa2b   :  { %v7792_v43 = vadd.f32 %v13029_v29, %v7724_v54 }
 0xa2d   :  { %v7920_v2 = vadd.f32 %v7856_v16, %v7792_v43 }
 0xa2e   :  { %v7655_v50 = vpop.f32.mrf.mxu1 }
 0xa2f   :  { %v7984_v10 = vmax.f32 %v7920_v2, 0.0  ;;  %v7656_v47 = vadd.f32 %v7655_v50, %v7487_v56 }
 0xa31   :  { %8048 = vst [vmem:[#allocation6 + $0x1d8] sm:$0xff] %v7984_v10  ;;  %v7725_v6 = vadd.f32 %v7656_v47, %v6956_v45 }
 0xa33   :  { %v7793_v62 = vadd.f32 %v13029_v29, %v7725_v6 }
 0xa35   :  { %v7921_v24 = vadd.f32 %v7857_v61, %v7793_v62 }
 0xa36   :  { %v7657_v44 = vpop.f32.mrf.mxu1 }
 0xa37   :  { %v7985_v21 = vmax.f32 %v7921_v24, 0.0  ;;  %v7658_v48 = vadd.f32 %v7657_v44, %v7489_v22 }
 0xa39   :  { %8049 = vst [vmem:[#allocation6 + $0x1e0] sm:$0xff] %v7985_v21  ;;  %v7726_v51 = vadd.f32 %v7658_v48, %v6958_v39 }
 0xa3b   :  { %v7794_v26 = vadd.f32 %v13029_v29, %v7726_v51 }
 0xa3d   :  { %v7922_v35 = vadd.f32 %v7858_v14, %v7794_v26 }
 0xa3e   :  { %v7660_v0 = vpop.f32.mrf.mxu1 }
 0xa3f   :  { %v7986_v33 = vmax.f32 %v7922_v35, 0.0  ;;  %v7661_v17 = vadd.f32 %v7660_v0, %v7492_v1 }
 0xa41   :  { %8050 = vst [vmem:[#allocation6 + $0x1e8] sm:$0xff] %v7986_v33  ;;  %v7727_v3 = vadd.f32 %v7661_v17, %v6961_v46 }
 0xa43   :  { %v7795_v20 = vadd.f32 %v13029_v29, %v7727_v3 }
 0xa45   :  { %v7923_v23 = vadd.f32 %v7859_v13, %v7795_v20 }
 0xa46   :  { %v7662_v9 = vpop.f32.mrf.mxu1 }
 0xa47   :  { %v7987_v15 = vmax.f32 %v7923_v23, 0.0  ;;  %v7663_v57 = vadd.f32 %v7662_v9, %v7494_v55 }
 0xa49   :  { %8051 = vst [vmem:[#allocation6 + $0x1f0] sm:$0xff] %v7987_v15  ;;  %v7728_v7 = vadd.f32 %v7663_v57, %v6963_v52 }
 0xa4b   :  { %v7796_v63 = vadd.f32 %v13029_v29, %v7728_v7 }
 0xa4d   :  { %v7924_v19 = vadd.f32 %v7860_v28, %v7796_v63 }
 0xa4f   :  { %v7988_v36 = vmax.f32 %v7924_v19, 0.0 }
 0xa51   :  { %8052 = vst [vmem:[#allocation6 + $0x1f8] sm:$0xff] %v7988_v36 }
 0xa52   :  { %8065 = dma.vmem_to_hbm [thread:$0]  %s8058_s19, 8192, %s8060_s22, [#allocation5], %s9457_s23, %s9457_s23, %s9458_s24  }
 0xa53   :  { %9450 = dma.done.wait [#allocation5], 8192  }
 0xa54   :  { %9451 = vsyncadd [#allocation5], 4294959104 }
 0xa55   :  { %8070 = vsyncpa [#allocation4], 1 }
 0xa56   :  { %8071 = vsyncpa [#allocation5], 1 }

</bundles_post_ra>
